<compile_context>
chip_gen: v7x
topology: tpu7x:2x2x1
jax: 0.10.0
libtpu: 0.0.40
codegen_flags: <defaults>
</compile_context>

<pallas_src>
import jax
import jax.numpy as jnp
from jax.experimental import pallas as pl
from jax.experimental.pallas import tpu as pltpu

V_DIM = 512          # video_input_dim
A_DIM = 128          # audio_input_dim
H_DIM = 256          # hidden_dim
L_DIM = V_DIM // 4   # latent projection size = 128
LN_EPS = 1e-5        # torch.nn.LayerNorm default eps


def _agatt_kernel(vis_ref, aq1_ref, aq2_ref,
                  wqkv_ref, bqkv_ref, ln_g_ref, ln_b_ref,
                  wave_ref, bave_ref, wv31_ref, bv31_ref,
                  wavev_ref, bavev_ref, wbn_ref, bbn_ref,
                  wvc_ref, bvc_ref, wv2_ref, bv2_ref,
                  wvs_ref, bvs_ref, beta_ref, out_ref):
    f32 = jnp.float32
    bf16 = jnp.bfloat16
    CB, HW, Dv = vis_ref.shape
    M = CB * HW

    def relu(x):
        return jnp.maximum(x, 0.0)

    vis_bf = vis_ref[...]                         # (CB, HW, 512) bf16
    vis_f = vis_bf.astype(f32)                    # raw visual feature, f32
    vis2 = vis_bf.reshape(M, Dv)                  # flat M = CB*HW for big matmuls

    # ---- fused spatial self-attention projections: [Wq | Wk | Wv] ----
    qkv = jnp.dot(vis2, wqkv_ref[...], preferred_element_type=f32) + bqkv_ref[...]
    # bf16 operands for the small batched attention matmuls (single-pass MXU);
    # accumulation stays f32 via preferred_element_type.
    q3 = qkv[:, :L_DIM].astype(bf16).reshape(CB, HW, L_DIM)
    k3 = qkv[:, L_DIM:2 * L_DIM].astype(bf16).reshape(CB, HW, L_DIM)
    v3 = qkv[:, 2 * L_DIM:].astype(bf16).reshape(CB, HW, Dv)

    energy = jnp.einsum('cqe,cke->cqk', q3, k3, preferred_element_type=f32)
    attn = jax.nn.softmax(energy, axis=-1)
    o = jnp.einsum('cqk,ckd->cqd', attn.astype(bf16), v3, preferred_element_type=f32)

    # TODO(synk): nn.Dropout(0.2) implemented with eval-mode (identity) semantics.
    x = vis_f + o
    mu = jnp.mean(x, axis=-1, keepdims=True)
    var = jnp.mean(jnp.square(x - mu), axis=-1, keepdims=True)
    visual = (x - mu) * jax.lax.rsqrt(var + LN_EPS) * ln_g_ref[...] + ln_b_ref[...]

    # ---- fused [Wv3 | Wv1] projection of the LayerNorm'd visual feature ----
    proj = jnp.dot(visual.reshape(M, Dv).astype(bf16), wv31_ref[...],
                   preferred_element_type=f32) + bv31_ref[...]
    vq3 = relu(proj[:, :H_DIM]).reshape(CB, HW, H_DIM)      # affine_video_3 + relu
    vq1 = relu(proj[:, H_DIM:]).reshape(CB, HW, Dv)         # affine_video_1 + relu

    # ---- video-only spatial attention (self_att_feat) ----
    video_avg = jnp.mean(visual, axis=1)                                    # (CB, 512)
    video_avg = relu(jnp.dot(video_avg.astype(bf16), wave_ref[...],
                             preferred_element_type=f32) + bave_ref[...])   # (CB, 256)
    # Fold ave_v_att weight into the per-clip vector: sum(vq3*video_avg*w)
    # == sum(vq3 * (video_avg*w)); saves a full (CB,HW,256) intermediate.
    w_s = video_avg * wavev_ref[...]                                        # (CB, 256)
    s_scores = jnp.tanh(jnp.sum(vq3 * w_s[:, None, :], axis=-1,
                                keepdims=True) + bavev_ref[...])            # (CB, HW, 1)
    s_att = jax.nn.softmax(s_scores, axis=1)                                # softmax over HW
    self_att_feat = jnp.sum(s_att * visual, axis=1)                         # (CB, 512)

    # ---- audio-guided channel attention ----
    aq1 = aq1_ref[...]                                                      # (CB, 512), relu'd
    # mean(aq1[:,None,:] * vq1, axis=1) == aq1 * mean(vq1, axis=1)
    avq_raw = aq1 * jnp.mean(vq1, axis=1)                                   # (CB, 512)
    avq = relu(jnp.dot(avq_raw.astype(bf16), wbn_ref[...],
                       preferred_element_type=f32) + bbn_ref[...])          # (CB, 256)
    ch_att = jax.nn.sigmoid(jnp.dot(avq.astype(bf16), wvc_ref[...],
                                    preferred_element_type=f32) + bvc_ref[...])  # (CB, 512)
    c_att_vis = vis_f * (ch_att[:, None, :] + 1.0)                          # raw vis * (att+1)

    # ---- audio-guided spatial attention ----
    c_q = relu(jnp.dot(c_att_vis.reshape(M, Dv).astype(bf16), wv2_ref[...],
                       preferred_element_type=f32) + bv2_ref[...])
    c_q = c_q.reshape(CB, HW, H_DIM)
    aq2 = aq2_ref[...]                                                      # (CB, 256), relu'd
    w_sp = aq2 * wvs_ref[...]                                               # (CB, 256)
    sp_scores = jnp.tanh(jnp.sum(c_q * w_sp[:, None, :], axis=-1,
                                 keepdims=True) + bvs_ref[...])             # (CB, HW, 1)
    sp_att = jax.nn.softmax(sp_scores, axis=1)                              # softmax over HW
    c_s = jnp.sum(sp_att * c_att_vis, axis=1)                               # (CB, 512)

    beta = beta_ref[0]
    out = c_s + beta * jax.nn.sigmoid(self_att_feat) * c_s                  # (CB, 512)
    out_ref[...] = out.astype(out_ref.dtype)


def init_params(key):
    """Deterministic synthetic init, torch.nn.Linear-style U(-1/sqrt(in), 1/sqrt(in))."""
    def linear(k, fan_in, fan_out):
        kw, kb = jax.random.split(k)
        bound = 1.0 / (fan_in ** 0.5)
        w = jax.random.uniform(kw, (fan_in, fan_out), jnp.float32, -bound, bound)
        b = jax.random.uniform(kb, (1, fan_out), jnp.float32, -bound, bound)
        return w, b

    keys = jax.random.split(key, 13)
    p = {}
    p['wq'], p['bq'] = linear(keys[0], V_DIM, L_DIM)       # video_query
    p['wk'], p['bk'] = linear(keys[1], V_DIM, L_DIM)       # video_key
    p['wv'], p['bv'] = linear(keys[2], V_DIM, V_DIM)       # video_value
    p['ln_g'] = jnp.ones((1, V_DIM), jnp.float32)          # norm.weight
    p['ln_b'] = jnp.zeros((1, V_DIM), jnp.float32)         # norm.bias
    p['wave'], p['bave'] = linear(keys[3], V_DIM, H_DIM)   # affine_video_ave
    p['wv3'], p['bv3'] = linear(keys[4], V_DIM, H_DIM)     # affine_video_3
    w, b = linear(keys[5], H_DIM, 1)                       # ave_v_att
    p['wavev'], p['bavev'] = w.reshape(1, H_DIM), b.reshape(1, 1)
    p['wa1'], p['ba1'] = linear(keys[6], A_DIM, V_DIM)     # affine_audio_1
    p['wv1'], p['bv1'] = linear(keys[7], V_DIM, V_DIM)     # affine_video_1
    p['wbn'], p['bbn'] = linear(keys[8], V_DIM, H_DIM)     # affine_bottleneck
    p['wvc'], p['bvc'] = linear(keys[9], H_DIM, V_DIM)     # affine_v_c_att
    p['wv2'], p['bv2'] = linear(keys[10], V_DIM, H_DIM)    # affine_video_2
    p['wa2'], p['ba2'] = linear(keys[11], A_DIM, H_DIM)    # affine_audio_2
    w, b = linear(keys[12], H_DIM, 1)                      # affine_v_s_att
    p['wvs'], p['bvs'] = w.reshape(1, H_DIM), b.reshape(1, 1)
    # NOTE: ave_bottleneck from __init__ is unused in the reference forward.
    return p


_FUSED_ORDER = ('wqkv', 'bqkv', 'ln_g', 'ln_b', 'wave', 'bave', 'wv31', 'bv31',
                'wavev', 'bavev', 'wbn', 'bbn', 'wvc', 'bvc', 'wv2', 'bv2',
                'wvs', 'bvs')


def _prep_params(params):
    """Fuse shared-LHS projection weights; cast all matmul weights to bf16."""
    bf16, f32 = jnp.bfloat16, jnp.float32
    return {
        'wqkv': jnp.concatenate([params['wq'], params['wk'], params['wv']], axis=1).astype(bf16),
        'bqkv': jnp.concatenate([params['bq'], params['bk'], params['bv']], axis=1).astype(f32),
        'ln_g': params['ln_g'].astype(f32), 'ln_b': params['ln_b'].astype(f32),
        'wave': params['wave'].astype(bf16), 'bave': params['bave'].astype(f32),
        'wv31': jnp.concatenate([params['wv3'], params['wv1']], axis=1).astype(bf16),
        'bv31': jnp.concatenate([params['bv3'], params['bv1']], axis=1).astype(f32),
        'wavev': params['wavev'].astype(f32), 'bavev': params['bavev'].astype(f32),
        'wbn': params['wbn'].astype(bf16), 'bbn': params['bbn'].astype(f32),
        'wvc': params['wvc'].astype(bf16), 'bvc': params['bvc'].astype(f32),
        'wv2': params['wv2'].astype(bf16), 'bv2': params['bv2'].astype(f32),
        'wvs': params['wvs'].astype(f32), 'bvs': params['bvs'].astype(f32),
    }


def _round8(x):
    return ((x + 7) // 8) * 8


def _chip_tuning():
    """(target_m, vmem_limit_bytes, is_small_vmem_part)."""
    try:
        kind = jax.devices()[0].device_kind.lower()
    except Exception:
        kind = ""
    if ("v4" in kind) or ("v5" in kind) or ("v6" in kind):
        # 128 MiB VMEM parts: larger clip batch, more scoped VMEM.
        return 1024, 64 * 1024 * 1024, False
    # v7x (64 MiB VMEM / TC, 2 TCs) and unknown chips: conservative settings.
    return 512, 40 * 1024 * 1024, True


def new_audio_guided_attention(video, audio, params, beta):
    """video: (B, T, H, W, 512); audio: (T, B, 128); returns (B, T, 512)."""
    B, T, H, W, Dv = video.shape
    assert Dv == V_DIM
    HW = H * W
    BT = B * T

    # audio.transpose(1, 0) in the reference forward -> (B, T, 128) -> (BT, 128).
    aud = jnp.transpose(audio, (1, 0, 2)).reshape(BT, A_DIM).astype(jnp.float32)
    # Hoisted audio Linears: one batched matmul over all BT clips.
    aq1 = jax.nn.relu(aud @ params['wa1'] + params['ba1'])    # (BT, 512)
    aq2 = jax.nn.relu(aud @ params['wa2'] + params['ba2'])    # (BT, 256)

    vis = video.reshape(BT, HW, Dv).astype(jnp.bfloat16)

    # Clip batching: CB clips per grid step -> projection matmuls see M = CB*HW.
    target_m, vmem_limit, small_vmem = _chip_tuning()
    cb = _round8(-(-target_m // HW))              # cdiv then round up to multiple of 8
    if small_vmem:
        # Keep >= 2 grid steps so the "parallel" axis can use both v7x TensorCores.
        cap = max(8, _round8(-(-BT // 2)))
    else:
        # Single TC: just avoid over-padding tiny batches.
        cap = max(8, _round8(BT))
    cb = min(cb, cap)                             # cb stays a multiple of 8
    grid = -(-BT // cb)
    bt_pad = grid * cb
    if bt_pad != BT:                              # pad with zero clips; sliced off afterwards
        pad = bt_pad - BT
        vis = jnp.pad(vis, ((0, pad), (0, 0), (0, 0)))
        aq1 = jnp.pad(aq1, ((0, pad), (0, 0)))
        aq2 = jnp.pad(aq2, ((0, pad), (0, 0)))

    fused = _prep_params(params)
    param_list = [fused[k] for k in _FUSED_ORDER]
    beta_arr = jnp.asarray(beta, dtype=jnp.float32).reshape((1,))

    def const_spec(arr):
        nd = arr.ndim
        return pl.BlockSpec(arr.shape, lambda i, _nd=nd: (0,) * _nd)

    in_specs = [
        pl.BlockSpec((cb, HW, Dv), lambda i: (i, 0, 0)),   # visual clips (bf16)
        pl.BlockSpec((cb, V_DIM), lambda i: (i, 0)),       # relu(audio @ Wa1)
        pl.BlockSpec((cb, H_DIM), lambda i: (i, 0)),       # relu(audio @ Wa2)
    ] + [const_spec(a) for a in param_list] + [
        pl.BlockSpec(memory_space=pltpu.MemorySpace.SMEM),  # beta scalar
    ]

    # Advisory cost estimate (whole call) so XLA schedules surrounding ops well.
    m_total = bt_pad * HW
    flops = 2 * m_total * V_DIM * (3 * L_DIM + V_DIM + 2 * H_DIM + V_DIM)   # wqkv+wv31+wv2
    flops += 2 * bt_pad * HW * HW * (L_DIM + V_DIM)                         # attention bmm's
    flops += 2 * bt_pad * 3 * V_DIM * H_DIM                                 # wave/wbn/wvc
    transcendentals = bt_pad * (HW * HW + 4 * HW + 2 * V_DIM)               # softmax/tanh/sigmoid
    bytes_accessed = (vis.size * vis.dtype.itemsize
                      + aq1.size * 4 + aq2.size * 4
                      + sum(a.size * a.dtype.itemsize for a in param_list)
                      + bt_pad * V_DIM * 4)

    out = pl.pallas_call(
        _agatt_kernel,
        out_shape=jax.ShapeDtypeStruct((bt_pad, Dv), jnp.float32),
        grid_spec=pltpu.PrefetchScalarGridSpec(
            num_scalar_prefetch=0,
            grid=(grid,),
            in_specs=in_specs,
            out_specs=pl.BlockSpec((cb, Dv), lambda i: (i, 0)),
        ),
        compiler_params=pltpu.CompilerParams(
            dimension_semantics=("parallel",),
            vmem_limit_bytes=vmem_limit,
        ),
        cost_estimate=pl.CostEstimate(
            flops=int(flops),
            transcendentals=int(transcendentals),
            bytes_accessed=int(bytes_accessed),
        ),
    )(vis, aq1, aq2, *param_list, beta_arr)

    return out[:BT].reshape(B, T, Dv)


if __name__ == "__main__":
    key = jax.random.PRNGKey(0)
    kp, kv, ka = jax.random.split(key, 3)

    B, T, H, W = 2, 3, 4, 4          # small shapes; feature dims fixed by the module
    beta = 0.3

    params = init_params(kp)
    video = jax.random.normal(kv, (B, T, H, W, V_DIM), jnp.float32)
    audio = jax.random.normal(ka, (T, B, A_DIM), jnp.float32)

    fwd = jax.jit(new_audio_guided_attention)
    out = fwd(video, audio, params, beta)
    out = jax.block_until_ready(out)
    assert out.shape == (B, T, V_DIM)
    assert bool(jnp.all(jnp.isfinite(out)))
    print("KERNEL_OK")
</pallas_src>

<mosaic_0001>
module attributes {stable_mosaic.version = 11 : i64} {
  func.func @_agatt_kernel(%arg0: i32, %arg1: memref<8x16x512xbf16, #tpu.memory_space<vmem>>, %arg2: memref<8x512xf32, #tpu.memory_space<vmem>>, %arg3: memref<8x256xf32, #tpu.memory_space<vmem>>, %arg4: memref<512x768xbf16, #tpu.memory_space<vmem>>, %arg5: memref<1x768xf32, #tpu.memory_space<vmem>>, %arg6: memref<1x512xf32, #tpu.memory_space<vmem>>, %arg7: memref<1x512xf32, #tpu.memory_space<vmem>>, %arg8: memref<512x256xbf16, #tpu.memory_space<vmem>>, %arg9: memref<1x256xf32, #tpu.memory_space<vmem>>, %arg10: memref<512x768xbf16, #tpu.memory_space<vmem>>, %arg11: memref<1x768xf32, #tpu.memory_space<vmem>>, %arg12: memref<1x256xf32, #tpu.memory_space<vmem>>, %arg13: memref<1x1xf32, #tpu.memory_space<vmem>>, %arg14: memref<512x256xbf16, #tpu.memory_space<vmem>>, %arg15: memref<1x256xf32, #tpu.memory_space<vmem>>, %arg16: memref<256x512xbf16, #tpu.memory_space<vmem>>, %arg17: memref<1x512xf32, #tpu.memory_space<vmem>>, %arg18: memref<512x256xbf16, #tpu.memory_space<vmem>>, %arg19: memref<1x256xf32, #tpu.memory_space<vmem>>, %arg20: memref<1x256xf32, #tpu.memory_space<vmem>>, %arg21: memref<1x1xf32, #tpu.memory_space<vmem>>, %arg22: memref<1xf32, #tpu.memory_space<smem>>, %arg23: memref<8x512xf32, #tpu.memory_space<vmem>>) attributes {dimension_semantics = [#tpu.dimension_semantics<parallel>], iteration_bounds = array<i64: 1>, scalar_prefetch = 0 : i64, scratch_operands = 0 : i64, tpu.core_type = #tpu.core_type<tc>, window_params = [{transform_indices = @transform_0, window_bounds = array<i64: 8, 16, 512>}, {transform_indices = @transform_1, window_bounds = array<i64: 8, 512>}, {transform_indices = @transform_2, window_bounds = array<i64: 8, 256>}, {pipeline_mode = #tpu.pipeline_mode<synchronous>, transform_indices = @transform_3, window_bounds = array<i64: 512, 768>}, {pipeline_mode = #tpu.pipeline_mode<synchronous>, transform_indices = @transform_4, window_bounds = array<i64: 1, 768>}, {pipeline_mode = #tpu.pipeline_mode<synchronous>, transform_indices = @transform_5, window_bounds = array<i64: 1, 512>}, {pipeline_mode = #tpu.pipeline_mode<synchronous>, transform_indices = @transform_6, window_bounds = array<i64: 1, 512>}, {pipeline_mode = #tpu.pipeline_mode<synchronous>, transform_indices = @transform_7, window_bounds = array<i64: 512, 256>}, {pipeline_mode = #tpu.pipeline_mode<synchronous>, transform_indices = @transform_8, window_bounds = array<i64: 1, 256>}, {pipeline_mode = #tpu.pipeline_mode<synchronous>, transform_indices = @transform_9, window_bounds = array<i64: 512, 768>}, {pipeline_mode = #tpu.pipeline_mode<synchronous>, transform_indices = @transform_10, window_bounds = array<i64: 1, 768>}, {pipeline_mode = #tpu.pipeline_mode<synchronous>, transform_indices = @transform_11, window_bounds = array<i64: 1, 256>}, {pipeline_mode = #tpu.pipeline_mode<synchronous>, transform_indices = @transform_12, window_bounds = array<i64: 1, 1>}, {pipeline_mode = #tpu.pipeline_mode<synchronous>, transform_indices = @transform_13, window_bounds = array<i64: 512, 256>}, {pipeline_mode = #tpu.pipeline_mode<synchronous>, transform_indices = @transform_14, window_bounds = array<i64: 1, 256>}, {pipeline_mode = #tpu.pipeline_mode<synchronous>, transform_indices = @transform_15, window_bounds = array<i64: 256, 512>}, {pipeline_mode = #tpu.pipeline_mode<synchronous>, transform_indices = @transform_16, window_bounds = array<i64: 1, 512>}, {pipeline_mode = #tpu.pipeline_mode<synchronous>, transform_indices = @transform_17, window_bounds = array<i64: 512, 256>}, {pipeline_mode = #tpu.pipeline_mode<synchronous>, transform_indices = @transform_18, window_bounds = array<i64: 1, 256>}, {pipeline_mode = #tpu.pipeline_mode<synchronous>, transform_indices = @transform_19, window_bounds = array<i64: 1, 256>}, {pipeline_mode = #tpu.pipeline_mode<synchronous>, transform_indices = @transform_20, window_bounds = array<i64: 1, 1>}, {transform_indices = @transform_21, window_bounds = array<i64: 1>}, {transform_indices = @transform_22, window_bounds = array<i64: 8, 512>}]} {
    %c0 = arith.constant 0 : index
    %c0_0 = arith.constant 0 : index
    %c0_1 = arith.constant 0 : index
    %0 = vector.load %arg1[%c0, %c0_0, %c0_1] : memref<8x16x512xbf16, #tpu.memory_space<vmem>>, vector<8x16x512xbf16>
    %1 = arith.extf %0 : vector<8x16x512xbf16> to vector<8x16x512xf32>
    %2 = vector.shape_cast %0 : vector<8x16x512xbf16> to vector<128x512xbf16>
    %c0_2 = arith.constant 0 : index
    %c0_3 = arith.constant 0 : index
    %3 = vector.load %arg4[%c0_2, %c0_3] : memref<512x768xbf16, #tpu.memory_space<vmem>>, vector<512x768xbf16>
    %cst = arith.constant dense<0.000000e+00> : vector<128x768xf32>
    %4 = tpu.matmul %2, %3, %cst {dimension_numbers = #tpu.dot_dimension_numbers<[1], [0], [0], [1], [0, 0, 1, 1], [], []>} : vector<128x512xbf16>, vector<512x768xbf16>, vector<128x768xf32> -> vector<128x768xf32>
    %c0_4 = arith.constant 0 : index
    %c0_5 = arith.constant 0 : index
    %5 = vector.load %arg5[%c0_4, %c0_5] : memref<1x768xf32, #tpu.memory_space<vmem>>, vector<1x768xf32>
    %6 = vector.broadcast %5 : vector<1x768xf32> to vector<128x768xf32>
    %7 = arith.addf %4, %6 : vector<128x768xf32>
    %8 = vector.extract_strided_slice %7 {offsets = [0, 0], sizes = [128, 128], strides = [1, 1]} : vector<128x768xf32> to vector<128x128xf32>
    %9 = arith.truncf %8 : vector<128x128xf32> to vector<128x128xbf16>
    %10 = vector.shape_cast %9 : vector<128x128xbf16> to vector<8x16x128xbf16>
    %11 = vector.extract_strided_slice %7 {offsets = [0, 128], sizes = [128, 128], strides = [1, 1]} : vector<128x768xf32> to vector<128x128xf32>
    %12 = arith.truncf %11 : vector<128x128xf32> to vector<128x128xbf16>
    %13 = vector.shape_cast %12 : vector<128x128xbf16> to vector<8x16x128xbf16>
    %14 = vector.extract_strided_slice %7 {offsets = [0, 256], sizes = [128, 512], strides = [1, 1]} : vector<128x768xf32> to vector<128x512xf32>
    %15 = arith.truncf %14 : vector<128x512xf32> to vector<128x512xbf16>
    %16 = vector.shape_cast %15 : vector<128x512xbf16> to vector<8x16x512xbf16>
    "tpu.trace_start"() <{level = 10 : i32, message = "cqe,cke->cqk"}> : () -> ()
    %cst_6 = arith.constant dense<0.000000e+00> : vector<8x16x16xf32>
    %17 = tpu.matmul %10, %13, %cst_6 {dimension_numbers = #tpu.dot_dimension_numbers<[2], [2], [1], [1], [0, 0, 0, 1, 1, 1], [0], [0]>} : vector<8x16x128xbf16>, vector<8x16x128xbf16>, vector<8x16x16xf32> -> vector<8x16x16xf32>
    "tpu.trace_stop"() : () -> ()
    %cst_7 = arith.constant dense<0xFF800000> : vector<8x16xf32>
    %18 = vector.multi_reduction <maximumf>, %17, %cst_7 [2] : vector<8x16x16xf32> to vector<8x16xf32>
    %cst_8 = arith.constant 0xFF800000 : f32
    %19 = vector.broadcast %cst_8 : f32 to vector<8x16xf32>
    %20 = arith.maximumf %19, %18 : vector<8x16xf32>
    %21 = vector.shape_cast %20 : vector<8x16xf32> to vector<8x16x1xf32>
    %22 = vector.broadcast %21 : vector<8x16x1xf32> to vector<8x16x16xf32>
    %23 = arith.subf %17, %22 : vector<8x16x16xf32>
    %24 = math.exp %23 : vector<8x16x16xf32>
    %cst_9 = arith.constant dense<0.000000e+00> : vector<8x16xf32>
    %25 = vector.multi_reduction <add>, %24, %cst_9 [2] : vector<8x16x16xf32> to vector<8x16xf32>
    %26 = vector.shape_cast %25 : vector<8x16xf32> to vector<8x16x1xf32>
    %27 = vector.broadcast %26 : vector<8x16x1xf32> to vector<8x16x16xf32>
    %28 = arith.divf %24, %27 : vector<8x16x16xf32>
    %29 = arith.truncf %28 : vector<8x16x16xf32> to vector<8x16x16xbf16>
    "tpu.trace_start"() <{level = 10 : i32, message = "cqk,ckd->cqd"}> : () -> ()
    %cst_10 = arith.constant dense<0.000000e+00> : vector<8x16x512xf32>
    %30 = tpu.matmul %29, %16, %cst_10 {dimension_numbers = #tpu.dot_dimension_numbers<[2], [1], [1], [2], [0, 0, 0, 1, 1, 2], [0], [0]>} : vector<8x16x16xbf16>, vector<8x16x512xbf16>, vector<8x16x512xf32> -> vector<8x16x512xf32>
    "tpu.trace_stop"() : () -> ()
    %31 = arith.addf %1, %30 : vector<8x16x512xf32>
    %cst_11 = arith.constant dense<0.000000e+00> : vector<8x16xf32>
    %32 = vector.multi_reduction <add>, %31, %cst_11 [2] : vector<8x16x512xf32> to vector<8x16xf32>
    %33 = vector.shape_cast %32 : vector<8x16xf32> to vector<8x16x1xf32>
    %cst_12 = arith.constant 5.120000e+02 : f32
    %34 = vector.broadcast %cst_12 : f32 to vector<8x16x1xf32>
    %35 = arith.divf %33, %34 : vector<8x16x1xf32>
    %36 = vector.broadcast %35 : vector<8x16x1xf32> to vector<8x16x512xf32>
    %37 = arith.subf %31, %36 : vector<8x16x512xf32>
    %38 = arith.mulf %37, %37 : vector<8x16x512xf32>
    %cst_13 = arith.constant dense<0.000000e+00> : vector<8x16xf32>
    %39 = vector.multi_reduction <add>, %38, %cst_13 [2] : vector<8x16x512xf32> to vector<8x16xf32>
    %40 = vector.shape_cast %39 : vector<8x16xf32> to vector<8x16x1xf32>
    %cst_14 = arith.constant 5.120000e+02 : f32
    %41 = vector.broadcast %cst_14 : f32 to vector<8x16x1xf32>
    %42 = arith.divf %40, %41 : vector<8x16x1xf32>
    %43 = vector.broadcast %35 : vector<8x16x1xf32> to vector<8x16x512xf32>
    %44 = arith.subf %31, %43 : vector<8x16x512xf32>
    %cst_15 = arith.constant 9.99999974E-6 : f32
    %45 = vector.broadcast %cst_15 : f32 to vector<8x16x1xf32>
    %46 = arith.addf %42, %45 : vector<8x16x1xf32>
    %47 = math.rsqrt %46 : vector<8x16x1xf32>
    %48 = vector.broadcast %47 : vector<8x16x1xf32> to vector<8x16x512xf32>
    %49 = arith.mulf %44, %48 : vector<8x16x512xf32>
    %c0_16 = arith.constant 0 : index
    %c0_17 = arith.constant 0 : index
    %50 = vector.load %arg6[%c0_16, %c0_17] : memref<1x512xf32, #tpu.memory_space<vmem>>, vector<1x512xf32>
    %51 = vector.shape_cast %50 : vector<1x512xf32> to vector<1x1x512xf32>
    %52 = vector.broadcast %51 : vector<1x1x512xf32> to vector<8x16x512xf32>
    %53 = arith.mulf %49, %52 : vector<8x16x512xf32>
    %c0_18 = arith.constant 0 : index
    %c0_19 = arith.constant 0 : index
    %54 = vector.load %arg7[%c0_18, %c0_19] : memref<1x512xf32, #tpu.memory_space<vmem>>, vector<1x512xf32>
    %55 = vector.shape_cast %54 : vector<1x512xf32> to vector<1x1x512xf32>
    %56 = vector.broadcast %55 : vector<1x1x512xf32> to vector<8x16x512xf32>
    %57 = arith.addf %53, %56 : vector<8x16x512xf32>
    %58 = vector.shape_cast %57 : vector<8x16x512xf32> to vector<128x512xf32>
    %59 = arith.truncf %58 : vector<128x512xf32> to vector<128x512xbf16>
    %c0_20 = arith.constant 0 : index
    %c0_21 = arith.constant 0 : index
    %60 = vector.load %arg10[%c0_20, %c0_21] : memref<512x768xbf16, #tpu.memory_space<vmem>>, vector<512x768xbf16>
    %cst_22 = arith.constant dense<0.000000e+00> : vector<128x768xf32>
    %61 = tpu.matmul %59, %60, %cst_22 {dimension_numbers = #tpu.dot_dimension_numbers<[1], [0], [0], [1], [0, 0, 1, 1], [], []>} : vector<128x512xbf16>, vector<512x768xbf16>, vector<128x768xf32> -> vector<128x768xf32>
    %c0_23 = arith.constant 0 : index
    %c0_24 = arith.constant 0 : index
    %62 = vector.load %arg11[%c0_23, %c0_24] : memref<1x768xf32, #tpu.memory_space<vmem>>, vector<1x768xf32>
    %63 = vector.broadcast %62 : vector<1x768xf32> to vector<128x768xf32>
    %64 = arith.addf %61, %63 : vector<128x768xf32>
    %65 = vector.extract_strided_slice %64 {offsets = [0, 0], sizes = [128, 256], strides = [1, 1]} : vector<128x768xf32> to vector<128x256xf32>
    %cst_25 = arith.constant 0.000000e+00 : f32
    %66 = vector.broadcast %cst_25 : f32 to vector<128x256xf32>
    %67 = arith.maximumf %65, %66 : vector<128x256xf32>
    %68 = vector.shape_cast %67 : vector<128x256xf32> to vector<8x16x256xf32>
    %69 = vector.extract_strided_slice %64 {offsets = [0, 256], sizes = [128, 512], strides = [1, 1]} : vector<128x768xf32> to vector<128x512xf32>
    %cst_26 = arith.constant 0.000000e+00 : f32
    %70 = vector.broadcast %cst_26 : f32 to vector<128x512xf32>
    %71 = arith.maximumf %69, %70 : vector<128x512xf32>
    %72 = vector.shape_cast %71 : vector<128x512xf32> to vector<8x16x512xf32>
    %cst_27 = arith.constant dense<0.000000e+00> : vector<8x512xf32>
    %73 = vector.multi_reduction <add>, %57, %cst_27 [1] : vector<8x16x512xf32> to vector<8x512xf32>
    %cst_28 = arith.constant 1.600000e+01 : f32
    %74 = vector.broadcast %cst_28 : f32 to vector<8x512xf32>
    %75 = arith.divf %73, %74 : vector<8x512xf32>
    %76 = arith.truncf %75 : vector<8x512xf32> to vector<8x512xbf16>
    %c0_29 = arith.constant 0 : index
    %c0_30 = arith.constant 0 : index
    %77 = vector.load %arg8[%c0_29, %c0_30] : memref<512x256xbf16, #tpu.memory_space<vmem>>, vector<512x256xbf16>
    %cst_31 = arith.constant dense<0.000000e+00> : vector<8x256xf32>
    %78 = tpu.matmul %76, %77, %cst_31 {dimension_numbers = #tpu.dot_dimension_numbers<[1], [0], [0], [1], [0, 0, 1, 1], [], []>} : vector<8x512xbf16>, vector<512x256xbf16>, vector<8x256xf32> -> vector<8x256xf32>
    %c0_32 = arith.constant 0 : index
    %c0_33 = arith.constant 0 : index
    %79 = vector.load %arg9[%c0_32, %c0_33] : memref<1x256xf32, #tpu.memory_space<vmem>>, vector<1x256xf32>
    %80 = vector.broadcast %79 : vector<1x256xf32> to vector<8x256xf32>
    %81 = arith.addf %78, %80 : vector<8x256xf32>
    %cst_34 = arith.constant 0.000000e+00 : f32
    %82 = vector.broadcast %cst_34 : f32 to vector<8x256xf32>
    %83 = arith.maximumf %81, %82 : vector<8x256xf32>
    %c0_35 = arith.constant 0 : index
    %c0_36 = arith.constant 0 : index
    %84 = vector.load %arg12[%c0_35, %c0_36] : memref<1x256xf32, #tpu.memory_space<vmem>>, vector<1x256xf32>
    %85 = vector.broadcast %84 : vector<1x256xf32> to vector<8x256xf32>
    %86 = arith.mulf %83, %85 : vector<8x256xf32>
    %87 = vector.shape_cast %86 : vector<8x256xf32> to vector<8x1x256xf32>
    %88 = vector.broadcast %87 : vector<8x1x256xf32> to vector<8x16x256xf32>
    %89 = arith.mulf %68, %88 : vector<8x16x256xf32>
    %cst_37 = arith.constant dense<0.000000e+00> : vector<8x16xf32>
    %90 = vector.multi_reduction <add>, %89, %cst_37 [2] : vector<8x16x256xf32> to vector<8x16xf32>
    %91 = vector.shape_cast %90 : vector<8x16xf32> to vector<8x16x1xf32>
    %c0_38 = arith.constant 0 : index
    %c0_39 = arith.constant 0 : index
    %92 = vector.load %arg13[%c0_38, %c0_39] : memref<1x1xf32, #tpu.memory_space<vmem>>, vector<1x1xf32>
    %93 = vector.shape_cast %92 : vector<1x1xf32> to vector<1x1x1xf32>
    %94 = vector.broadcast %93 : vector<1x1x1xf32> to vector<8x16x1xf32>
    %95 = arith.addf %91, %94 : vector<8x16x1xf32>
    %96 = math.tanh %95 : vector<8x16x1xf32>
    %cst_40 = arith.constant dense<0xFF800000> : vector<8x1xf32>
    %97 = vector.multi_reduction <maximumf>, %96, %cst_40 [1] : vector<8x16x1xf32> to vector<8x1xf32>
    %cst_41 = arith.constant 0xFF800000 : f32
    %98 = vector.broadcast %cst_41 : f32 to vector<8x1xf32>
    %99 = arith.maximumf %98, %97 : vector<8x1xf32>
    %100 = vector.shape_cast %99 : vector<8x1xf32> to vector<8x1x1xf32>
    %101 = vector.broadcast %100 : vector<8x1x1xf32> to vector<8x16x1xf32>
    %102 = arith.subf %96, %101 : vector<8x16x1xf32>
    %103 = math.exp %102 : vector<8x16x1xf32>
    %cst_42 = arith.constant dense<0.000000e+00> : vector<8x1xf32>
    %104 = vector.multi_reduction <add>, %103, %cst_42 [1] : vector<8x16x1xf32> to vector<8x1xf32>
    %105 = vector.shape_cast %104 : vector<8x1xf32> to vector<8x1x1xf32>
    %106 = vector.broadcast %105 : vector<8x1x1xf32> to vector<8x16x1xf32>
    %107 = arith.divf %103, %106 : vector<8x16x1xf32>
    %108 = vector.broadcast %107 : vector<8x16x1xf32> to vector<8x16x512xf32>
    %109 = arith.mulf %108, %57 : vector<8x16x512xf32>
    %cst_43 = arith.constant dense<0.000000e+00> : vector<8x512xf32>
    %110 = vector.multi_reduction <add>, %109, %cst_43 [1] : vector<8x16x512xf32> to vector<8x512xf32>
    %c0_44 = arith.constant 0 : index
    %c0_45 = arith.constant 0 : index
    %111 = vector.load %arg2[%c0_44, %c0_45] : memref<8x512xf32, #tpu.memory_space<vmem>>, vector<8x512xf32>
    %cst_46 = arith.constant dense<0.000000e+00> : vector<8x512xf32>
    %112 = vector.multi_reduction <add>, %72, %cst_46 [1] : vector<8x16x512xf32> to vector<8x512xf32>
    %cst_47 = arith.constant 1.600000e+01 : f32
    %113 = vector.broadcast %cst_47 : f32 to vector<8x512xf32>
    %114 = arith.divf %112, %113 : vector<8x512xf32>
    %115 = arith.mulf %111, %114 : vector<8x512xf32>
    %116 = arith.truncf %115 : vector<8x512xf32> to vector<8x512xbf16>
    %c0_48 = arith.constant 0 : index
    %c0_49 = arith.constant 0 : index
    %117 = vector.load %arg14[%c0_48, %c0_49] : memref<512x256xbf16, #tpu.memory_space<vmem>>, vector<512x256xbf16>
    %cst_50 = arith.constant dense<0.000000e+00> : vector<8x256xf32>
    %118 = tpu.matmul %116, %117, %cst_50 {dimension_numbers = #tpu.dot_dimension_numbers<[1], [0], [0], [1], [0, 0, 1, 1], [], []>} : vector<8x512xbf16>, vector<512x256xbf16>, vector<8x256xf32> -> vector<8x256xf32>
    %c0_51 = arith.constant 0 : index
    %c0_52 = arith.constant 0 : index
    %119 = vector.load %arg15[%c0_51, %c0_52] : memref<1x256xf32, #tpu.memory_space<vmem>>, vector<1x256xf32>
    %120 = vector.broadcast %119 : vector<1x256xf32> to vector<8x256xf32>
    %121 = arith.addf %118, %120 : vector<8x256xf32>
    %cst_53 = arith.constant 0.000000e+00 : f32
    %122 = vector.broadcast %cst_53 : f32 to vector<8x256xf32>
    %123 = arith.maximumf %121, %122 : vector<8x256xf32>
    %124 = arith.truncf %123 : vector<8x256xf32> to vector<8x256xbf16>
    %c0_54 = arith.constant 0 : index
    %c0_55 = arith.constant 0 : index
    %125 = vector.load %arg16[%c0_54, %c0_55] : memref<256x512xbf16, #tpu.memory_space<vmem>>, vector<256x512xbf16>
    %cst_56 = arith.constant dense<0.000000e+00> : vector<8x512xf32>
    %126 = tpu.matmul %124, %125, %cst_56 {dimension_numbers = #tpu.dot_dimension_numbers<[1], [0], [0], [1], [0, 0, 1, 1], [], []>} : vector<8x256xbf16>, vector<256x512xbf16>, vector<8x512xf32> -> vector<8x512xf32>
    %c0_57 = arith.constant 0 : index
    %c0_58 = arith.constant 0 : index
    %127 = vector.load %arg17[%c0_57, %c0_58] : memref<1x512xf32, #tpu.memory_space<vmem>>, vector<1x512xf32>
    %128 = vector.broadcast %127 : vector<1x512xf32> to vector<8x512xf32>
    %129 = arith.addf %126, %128 : vector<8x512xf32>
    %130 = arith.negf %129 : vector<8x512xf32>
    %131 = math.exp %130 : vector<8x512xf32>
    %cst_59 = arith.constant 1.000000e+00 : f32
    %132 = vector.broadcast %cst_59 : f32 to vector<8x512xf32>
    %133 = arith.addf %132, %131 : vector<8x512xf32>
    %134 = arith.divf %132, %133 : vector<8x512xf32>
    %135 = vector.shape_cast %134 : vector<8x512xf32> to vector<8x1x512xf32>
    %cst_60 = arith.constant 1.000000e+00 : f32
    %136 = vector.broadcast %cst_60 : f32 to vector<8x1x512xf32>
    %137 = arith.addf %135, %136 : vector<8x1x512xf32>
    %138 = vector.broadcast %137 : vector<8x1x512xf32> to vector<8x16x512xf32>
    %139 = arith.mulf %1, %138 : vector<8x16x512xf32>
    %140 = vector.shape_cast %139 : vector<8x16x512xf32> to vector<128x512xf32>
    %141 = arith.truncf %140 : vector<128x512xf32> to vector<128x512xbf16>
    %c0_61 = arith.constant 0 : index
    %c0_62 = arith.constant 0 : index
    %142 = vector.load %arg18[%c0_61, %c0_62] : memref<512x256xbf16, #tpu.memory_space<vmem>>, vector<512x256xbf16>
    %cst_63 = arith.constant dense<0.000000e+00> : vector<128x256xf32>
    %143 = tpu.matmul %141, %142, %cst_63 {dimension_numbers = #tpu.dot_dimension_numbers<[1], [0], [0], [1], [0, 0, 1, 1], [], []>} : vector<128x512xbf16>, vector<512x256xbf16>, vector<128x256xf32> -> vector<128x256xf32>
    %c0_64 = arith.constant 0 : index
    %c0_65 = arith.constant 0 : index
    %144 = vector.load %arg19[%c0_64, %c0_65] : memref<1x256xf32, #tpu.memory_space<vmem>>, vector<1x256xf32>
    %145 = vector.broadcast %144 : vector<1x256xf32> to vector<128x256xf32>
    %146 = arith.addf %143, %145 : vector<128x256xf32>
    %cst_66 = arith.constant 0.000000e+00 : f32
    %147 = vector.broadcast %cst_66 : f32 to vector<128x256xf32>
    %148 = arith.maximumf %146, %147 : vector<128x256xf32>
    %149 = vector.shape_cast %148 : vector<128x256xf32> to vector<8x16x256xf32>
    %c0_67 = arith.constant 0 : index
    %c0_68 = arith.constant 0 : index
    %150 = vector.load %arg3[%c0_67, %c0_68] : memref<8x256xf32, #tpu.memory_space<vmem>>, vector<8x256xf32>
    %c0_69 = arith.constant 0 : index
    %c0_70 = arith.constant 0 : index
    %151 = vector.load %arg20[%c0_69, %c0_70] : memref<1x256xf32, #tpu.memory_space<vmem>>, vector<1x256xf32>
    %152 = vector.broadcast %151 : vector<1x256xf32> to vector<8x256xf32>
    %153 = arith.mulf %150, %152 : vector<8x256xf32>
    %154 = vector.shape_cast %153 : vector<8x256xf32> to vector<8x1x256xf32>
    %155 = vector.broadcast %154 : vector<8x1x256xf32> to vector<8x16x256xf32>
    %156 = arith.mulf %149, %155 : vector<8x16x256xf32>
    %cst_71 = arith.constant dense<0.000000e+00> : vector<8x16xf32>
    %157 = vector.multi_reduction <add>, %156, %cst_71 [2] : vector<8x16x256xf32> to vector<8x16xf32>
    %158 = vector.shape_cast %157 : vector<8x16xf32> to vector<8x16x1xf32>
    %c0_72 = arith.constant 0 : index
    %c0_73 = arith.constant 0 : index
    %159 = vector.load %arg21[%c0_72, %c0_73] : memref<1x1xf32, #tpu.memory_space<vmem>>, vector<1x1xf32>
    %160 = vector.shape_cast %159 : vector<1x1xf32> to vector<1x1x1xf32>
    %161 = vector.broadcast %160 : vector<1x1x1xf32> to vector<8x16x1xf32>
    %162 = arith.addf %158, %161 : vector<8x16x1xf32>
    %163 = math.tanh %162 : vector<8x16x1xf32>
    %cst_74 = arith.constant dense<0xFF800000> : vector<8x1xf32>
    %164 = vector.multi_reduction <maximumf>, %163, %cst_74 [1] : vector<8x16x1xf32> to vector<8x1xf32>
    %cst_75 = arith.constant 0xFF800000 : f32
    %165 = vector.broadcast %cst_75 : f32 to vector<8x1xf32>
    %166 = arith.maximumf %165, %164 : vector<8x1xf32>
    %167 = vector.shape_cast %166 : vector<8x1xf32> to vector<8x1x1xf32>
    %168 = vector.broadcast %167 : vector<8x1x1xf32> to vector<8x16x1xf32>
    %169 = arith.subf %163, %168 : vector<8x16x1xf32>
    %170 = math.exp %169 : vector<8x16x1xf32>
    %cst_76 = arith.constant dense<0.000000e+00> : vector<8x1xf32>
    %171 = vector.multi_reduction <add>, %170, %cst_76 [1] : vector<8x16x1xf32> to vector<8x1xf32>
    %172 = vector.shape_cast %171 : vector<8x1xf32> to vector<8x1x1xf32>
    %173 = vector.broadcast %172 : vector<8x1x1xf32> to vector<8x16x1xf32>
    %174 = arith.divf %170, %173 : vector<8x16x1xf32>
    %175 = vector.broadcast %174 : vector<8x16x1xf32> to vector<8x16x512xf32>
    %176 = arith.mulf %175, %139 : vector<8x16x512xf32>
    %cst_77 = arith.constant dense<0.000000e+00> : vector<8x512xf32>
    %177 = vector.multi_reduction <add>, %176, %cst_77 [1] : vector<8x16x512xf32> to vector<8x512xf32>
    %c0_78 = arith.constant 0 : index
    %178 = memref.load %arg22[%c0_78] : memref<1xf32, #tpu.memory_space<smem>>
    %179 = arith.negf %110 : vector<8x512xf32>
    %180 = math.exp %179 : vector<8x512xf32>
    %cst_79 = arith.constant 1.000000e+00 : f32
    %181 = vector.broadcast %cst_79 : f32 to vector<8x512xf32>
    %182 = arith.addf %181, %180 : vector<8x512xf32>
    %183 = arith.divf %181, %182 : vector<8x512xf32>
    %184 = vector.broadcast %178 : f32 to vector<8x512xf32>
    %185 = arith.mulf %184, %183 : vector<8x512xf32>
    %186 = arith.mulf %185, %177 : vector<8x512xf32>
    %187 = arith.addf %177, %186 : vector<8x512xf32>
    %c0_80 = arith.constant 0 : index
    %c0_81 = arith.constant 0 : index
    %188 = vector.load %arg23[%c0_80, %c0_81] : memref<8x512xf32, #tpu.memory_space<vmem>>, vector<8x512xf32>
    tpu.vector_store %arg23[%c0_80, %c0_81], %187 {strides = array<i32>} : memref<8x512xf32, #tpu.memory_space<vmem>>, vector<8x512xf32>,
    return
  }
  func.func @transform_0(%arg0: i32) -> (i32, i32, i32) {
    %c0_i32 = arith.constant 0 : i32
    %c0_i32_0 = arith.constant 0 : i32
    %c0_i32_1 = arith.constant 0 : i32
    return %arg0, %c0_i32, %c0_i32_0 : i32, i32, i32
  }
  func.func @transform_1(%arg0: i32) -> (i32, i32) {
    %c0_i32 = arith.constant 0 : i32
    %c0_i32_0 = arith.constant 0 : i32
    return %arg0, %c0_i32 : i32, i32
  }
  func.func @transform_2(%arg0: i32) -> (i32, i32) {
    %c0_i32 = arith.constant 0 : i32
    %c0_i32_0 = arith.constant 0 : i32
    return %arg0, %c0_i32 : i32, i32
  }
  func.func @transform_3(%arg0: i32) -> (i32, i32) {
    %c0_i32 = arith.constant 0 : i32
    %c0_i32_0 = arith.constant 0 : i32
    %c0_i32_1 = arith.constant 0 : i32
    return %c0_i32, %c0_i32_0 : i32, i32
  }
  func.func @transform_4(%arg0: i32) -> (i32, i32) {
    %c0_i32 = arith.constant 0 : i32
    %c0_i32_0 = arith.constant 0 : i32
    %c0_i32_1 = arith.constant 0 : i32
    return %c0_i32, %c0_i32_0 : i32, i32
  }
  func.func @transform_5(%arg0: i32) -> (i32, i32) {
    %c0_i32 = arith.constant 0 : i32
    %c0_i32_0 = arith.constant 0 : i32
    %c0_i32_1 = arith.constant 0 : i32
    return %c0_i32, %c0_i32_0 : i32, i32
  }
  func.func @transform_6(%arg0: i32) -> (i32, i32) {
    %c0_i32 = arith.constant 0 : i32
    %c0_i32_0 = arith.constant 0 : i32
    %c0_i32_1 = arith.constant 0 : i32
    return %c0_i32, %c0_i32_0 : i32, i32
  }
  func.func @transform_7(%arg0: i32) -> (i32, i32) {
    %c0_i32 = arith.constant 0 : i32
    %c0_i32_0 = arith.constant 0 : i32
    %c0_i32_1 = arith.constant 0 : i32
    return %c0_i32, %c0_i32_0 : i32, i32
  }
  func.func @transform_8(%arg0: i32) -> (i32, i32) {
    %c0_i32 = arith.constant 0 : i32
    %c0_i32_0 = arith.constant 0 : i32
    %c0_i32_1 = arith.constant 0 : i32
    return %c0_i32, %c0_i32_0 : i32, i32
  }
  func.func @transform_9(%arg0: i32) -> (i32, i32) {
    %c0_i32 = arith.constant 0 : i32
    %c0_i32_0 = arith.constant 0 : i32
    %c0_i32_1 = arith.constant 0 : i32
    return %c0_i32, %c0_i32_0 : i32, i32
  }
  func.func @transform_10(%arg0: i32) -> (i32, i32) {
    %c0_i32 = arith.constant 0 : i32
    %c0_i32_0 = arith.constant 0 : i32
    %c0_i32_1 = arith.constant 0 : i32
    return %c0_i32, %c0_i32_0 : i32, i32
  }
  func.func @transform_11(%arg0: i32) -> (i32, i32) {
    %c0_i32 = arith.constant 0 : i32
    %c0_i32_0 = arith.constant 0 : i32
    %c0_i32_1 = arith.constant 0 : i32
    return %c0_i32, %c0_i32_0 : i32, i32
  }
  func.func @transform_12(%arg0: i32) -> (i32, i32) {
    %c0_i32 = arith.constant 0 : i32
    %c0_i32_0 = arith.constant 0 : i32
    %c0_i32_1 = arith.constant 0 : i32
    return %c0_i32, %c0_i32_0 : i32, i32
  }
  func.func @transform_13(%arg0: i32) -> (i32, i32) {
    %c0_i32 = arith.constant 0 : i32
    %c0_i32_0 = arith.constant 0 : i32
    %c0_i32_1 = arith.constant 0 : i32
    return %c0_i32, %c0_i32_0 : i32, i32
  }
  func.func @transform_14(%arg0: i32) -> (i32, i32) {
    %c0_i32 = arith.constant 0 : i32
    %c0_i32_0 = arith.constant 0 : i32
    %c0_i32_1 = arith.constant 0 : i32
    return %c0_i32, %c0_i32_0 : i32, i32
  }
  func.func @transform_15(%arg0: i32) -> (i32, i32) {
    %c0_i32 = arith.constant 0 : i32
    %c0_i32_0 = arith.constant 0 : i32
    %c0_i32_1 = arith.constant 0 : i32
    return %c0_i32, %c0_i32_0 : i32, i32
  }
  func.func @transform_16(%arg0: i32) -> (i32, i32) {
    %c0_i32 = arith.constant 0 : i32
    %c0_i32_0 = arith.constant 0 : i32
    %c0_i32_1 = arith.constant 0 : i32
    return %c0_i32, %c0_i32_0 : i32, i32
  }
  func.func @transform_17(%arg0: i32) -> (i32, i32) {
    %c0_i32 = arith.constant 0 : i32
    %c0_i32_0 = arith.constant 0 : i32
    %c0_i32_1 = arith.constant 0 : i32
    return %c0_i32, %c0_i32_0 : i32, i32
  }
  func.func @transform_18(%arg0: i32) -> (i32, i32) {
    %c0_i32 = arith.constant 0 : i32
    %c0_i32_0 = arith.constant 0 : i32
    %c0_i32_1 = arith.constant 0 : i32
    return %c0_i32, %c0_i32_0 : i32, i32
  }
  func.func @transform_19(%arg0: i32) -> (i32, i32) {
    %c0_i32 = arith.constant 0 : i32
    %c0_i32_0 = arith.constant 0 : i32
    %c0_i32_1 = arith.constant 0 : i32
    return %c0_i32, %c0_i32_0 : i32, i32
  }
  func.func @transform_20(%arg0: i32) -> (i32, i32) {
    %c0_i32 = arith.constant 0 : i32
    %c0_i32_0 = arith.constant 0 : i32
    %c0_i32_1 = arith.constant 0 : i32
    return %c0_i32, %c0_i32_0 : i32, i32
  }
  func.func @transform_21(%arg0: i32) -> i32 {
    %c0_i32 = arith.constant 0 : i32
    %c0_i32_0 = arith.constant 0 : i32
    return %c0_i32 : i32
  }
  func.func @transform_22(%arg0: i32) -> (i32, i32) {
    %c0_i32 = arith.constant 0 : i32
    %c0_i32_0 = arith.constant 0 : i32
    return %arg0, %c0_i32 : i32, i32
  }
}

</mosaic_0001>

<bundles_post_ra>
// kernel: new_audio_guided_attention.1
= control target key start
LH: loop header
LB: loop body
LE: loop exit
PB: predicated region body
PF: predicated region fallthrough
CT: control target
= control target key end

     0   :  { %vm14095_vm0 = vmmov 0   ;;  %vm2571_vm1 = vcmask 130048   ;;  %vm6540_vm2 = vcmask 1041409   ;;  %vm6542_vm3 = vcmask 1042434   ;;  %s20771_s3 = inlined_call_operand.vmem [shape: bf16[512,768], index: 3, kind: input, shape index: {}]   ;;  %s20772_s0 = inlined_call_operand.vmem [shape: bf16[8,16,512], index: 0, kind: input, shape index: {}]   ;;  %s20773_s4 = inlined_call_operand.vmem [shape: f32[1,768], index: 4, kind: input, shape index: {}]   ;;  %s20774_s9 = inlined_call_operand.vmem [shape: bf16[512,768], index: 9, kind: input, shape index: {}]   ;;  %s20775_s7 = inlined_call_operand.vmem [shape: bf16[512,256], index: 7, kind: input, shape index: {}]   ;;  %s20776_s5 = inlined_call_operand.vmem [shape: f32[1,512], index: 5, kind: input, shape index: {}]   ;;  %s20777_s6 = inlined_call_operand.vmem [shape: f32[1,512], index: 6, kind: input, shape index: {}]   ;;  %s20778_s13 = inlined_call_operand.vmem [shape: bf16[512,256], index: 13, kind: input, shape index: {}]   ;;  %s20779_s10 = inlined_call_operand.vmem [shape: f32[1,768], index: 10, kind: input, shape index: {}]   ;;  %s20780_s1 = inlined_call_operand.vmem [shape: f32[8,512], index: 1, kind: input, shape index: {}]   ;;  %s20781_s12 = inlined_call_operand.<no memory space> [shape: f32[1,1], index: 12, kind: input, shape index: {}]   ;;  %s20782_s8 = inlined_call_operand.vmem [shape: f32[1,256], index: 8, kind: input, shape index: {}]   ;;  %s20783_s11 = inlined_call_operand.vmem [shape: f32[1,256], index: 11, kind: input, shape index: {}]   ;;  %s20784_s15 = inlined_call_operand.vmem [shape: bf16[256,512], index: 15, kind: input, shape index: {}]   ;;  %s20785_s14 = inlined_call_operand.vmem [shape: f32[1,256], index: 14, kind: input, shape index: {}]   ;;  %s20786_s17 = inlined_call_operand.vmem [shape: bf16[512,256], index: 17, kind: input, shape index: {}]   ;;  %s20787_s16 = inlined_call_operand.vmem [shape: f32[1,512], index: 16, kind: input, shape index: {}]   ;;  %s20788_s19 = inlined_call_operand.vmem [shape: f32[1,256], index: 19, kind: input, shape index: {}]   ;;  %s20789_s2 = inlined_call_operand.vmem [shape: f32[8,256], index: 2, kind: input, shape index: {}]   ;;  %s20790_s18 = inlined_call_operand.vmem [shape: f32[1,256], index: 18, kind: input, shape index: {}]   ;;  %s20791_s20 = inlined_call_operand.<no memory space> [shape: f32[1,1], index: 20, kind: input, shape index: {}]   ;;  %s20792_s21 = inlined_call_operand.<no memory space> [shape: f32[1], index: 21, kind: input, shape index: {}]   ;;  %s20793_s22 = inlined_call_operand.vmem [shape: f32[8,512], index: 22, kind: output, shape index: {}]  }
   0x1   :  { %21136 = sst [smem:[#allocation133_spill]] %s20771_s3  ;;  %vm6544_vm4 = vcmask 1043459   ;;  %vm6546_vm5 = vcmask 1044484   ;;  %vm6548_vm6 = vcmask 1045509   ;;  %vm6550_vm7 = vcmask 1046534  }
   0x2   :  { %21137 = sst [smem:[#allocation134_spill]] %s20772_s0  ;;  %s21143_s29 = sld [smem:[#allocation133_spill]]  ;;  %vm6552_vm8 = vcmask 1047559   ;;  %vm7252_vm9 = vcmask 7168  }
   0x3   :  { %21138 = sst [smem:[#allocation135_spill]] %s20773_s4 }
   0x4   :  { %21139 = sst [smem:[#allocation136_spill]] %s20774_s9  ;;  %s21144_s9 = sld [smem:[#allocation134_spill]] }
   0x5   :  { %21140 = sst [smem:[#allocation137_spill]] %s20775_s7  ;;  %s21147_s28 = sld [smem:[#allocation135_spill]] }
   0x6   :  { %21141 = sst [smem:[#allocation138_spill]] %s20776_s5  ;;  %s21295_s26 = sld [smem:[#allocation136_spill]] }
   0x7   :  { %21142 = sst [smem:[#allocation139_spill]] %s20777_s6  ;;  %s21336_s3 = sld [smem:[#allocation138_spill]] }
   0x8   :  { %v12670_v0 = vld [vmem:[%s21143_s29 + $0x4] ss:$24 sps:$4 sm:$0xff]   ;;  %v12674_v2 = vld [vmem:[%s21143_s29] ss:$24 sps:$4 sm:$0xff]   ;;  %v12676_v4 = vld [vmem:[%s21143_s29 + $0x34] ss:$24 sps:$4 sm:$0xff]  }
   0x9   :  { %v12672_v1 = vld [vmem:[%s21143_s29 + $0x304] ss:$24 sps:$4 sm:$0xff]   ;;  %1517 = vmatprep.subr.bf16.mxu1 %v12670_v0  ;;  %v12675_v3 = vld [vmem:[%s21143_s29 + $0x300] ss:$24 sps:$4 sm:$0xff]   ;;  %v12678_v5 = vld [vmem:[%s21143_s29 + $0x334] ss:$24 sps:$4 sm:$0xff]  }
   0xa   :  { %1630 = vmatprep.subr.bf16.mxu0 %v12672_v1  ;;  %1518 = vmatpush1.bf16.msra.mxu1 %v12674_v2  ;;  %v12680_v6 = vld [vmem:[%s21143_s29 + $0x30] ss:$24 sps:$4 sm:$0xff]   ;;  %v12682_v8 = vld [vmem:[%s21143_s29 + $0x64] ss:$24 sps:$4 sm:$0xff]   ;;  %v12686_v10 = vld [vmem:[%s21143_s29 + $0x60] ss:$24 sps:$4 sm:$0xff]  }
   0xb   :  { %1631 = vmatpush1.bf16.msra.mxu0 %v12675_v3  ;;  %1519 = vmatprep.subr.bf16.mxu1 %v12676_v4  ;;  %v12681_v7 = vld [vmem:[%s21143_s29 + $0x330] ss:$24 sps:$4 sm:$0xff]   ;;  %v12684_v9 = vld [vmem:[%s21143_s29 + $0x364] ss:$24 sps:$4 sm:$0xff]   ;;  %v12687_v11 = vld [vmem:[%s21143_s29 + $0x360] ss:$24 sps:$4 sm:$0xff]  }
   0xc   :  { %1632 = vmatprep.subr.bf16.mxu0 %v12678_v5  ;;  %v12688_v12 = vld [vmem:[%s21143_s29 + $0x94] ss:$24 sps:$4 sm:$0xff]   ;;  %v12692_v14 = vld [vmem:[%s21143_s29 + $0x90] ss:$24 sps:$4 sm:$0xff]   ;;  %v12694_v16 = vld [vmem:[%s21143_s29 + $0xc4] ss:$24 sps:$4 sm:$0xff]  }
   0xd   :  { %v12690_v13 = vld [vmem:[%s21143_s29 + $0x394] ss:$24 sps:$4 sm:$0xff]   ;;  %v12693_v15 = vld [vmem:[%s21143_s29 + $0x390] ss:$24 sps:$4 sm:$0xff]   ;;  %v12696_v17 = vld [vmem:[%s21143_s29 + $0x3c4] ss:$24 sps:$4 sm:$0xff]  }
   0xe   :  { %1520 = vmatpush1.bf16.msra.mxu1 %v12680_v6  ;;  %v12698_v18 = vld [vmem:[%s21143_s29 + $0xc0] ss:$24 sps:$4 sm:$0xff]   ;;  %v12700_v20 = vld [vmem:[%s21143_s29 + $0xf4] ss:$24 sps:$4 sm:$0xff]   ;;  %v12704_v22 = vld [vmem:[%s21143_s29 + $0xf0] ss:$24 sps:$4 sm:$0xff]  }
   0xf   :  { %1633 = vmatpush1.bf16.msra.mxu0 %v12681_v7  ;;  %1521 = vmatprep.subr.bf16.mxu1 %v12682_v8  ;;  %v12699_v19 = vld [vmem:[%s21143_s29 + $0x3c0] ss:$24 sps:$4 sm:$0xff]   ;;  %v12702_v21 = vld [vmem:[%s21143_s29 + $0x3f4] ss:$24 sps:$4 sm:$0xff]   ;;  %v12705_v23 = vld [vmem:[%s21143_s29 + $0x3f0] ss:$24 sps:$4 sm:$0xff]  }
  0x10   :  { %1634 = vmatprep.subr.bf16.mxu0 %v12684_v9  ;;  %v12706_v24 = vld [vmem:[%s21143_s29 + $0x124] ss:$24 sps:$4 sm:$0xff]   ;;  %v12710_v26 = vld [vmem:[%s21143_s29 + $0x120] ss:$24 sps:$4 sm:$0xff]   ;;  %v12712_v28 = vld [vmem:[%s21143_s29 + $0x154] ss:$24 sps:$4 sm:$0xff]  }
  0x11   :  { %v12708_v25 = vld [vmem:[%s21143_s29 + $0x424] ss:$24 sps:$4 sm:$0xff]   ;;  %v12711_v27 = vld [vmem:[%s21143_s29 + $0x420] ss:$24 sps:$4 sm:$0xff]   ;;  %v12714_v29 = vld [vmem:[%s21143_s29 + $0x454] ss:$24 sps:$4 sm:$0xff]  }
  0x12   :  { %1522 = vmatpush1.bf16.msra.mxu1 %v12686_v10  ;;  %v12716_v30 = vld [vmem:[%s21143_s29 + $0x150] ss:$24 sps:$4 sm:$0xff]   ;;  %v12718_v32 = vld [vmem:[%s21143_s29 + $0x184] ss:$24 sps:$4 sm:$0xff]   ;;  %v12722_v34 = vld [vmem:[%s21143_s29 + $0x180] ss:$24 sps:$4 sm:$0xff]  }
  0x13   :  { %1635 = vmatpush1.bf16.msra.mxu0 %v12687_v11  ;;  %1523 = vmatprep.subr.bf16.mxu1 %v12688_v12  ;;  %v12717_v31 = vld [vmem:[%s21143_s29 + $0x450] ss:$24 sps:$4 sm:$0xff]   ;;  %v12720_v33 = vld [vmem:[%s21143_s29 + $0x484] ss:$24 sps:$4 sm:$0xff]   ;;  %v12723_v35 = vld [vmem:[%s21143_s29 + $0x480] ss:$24 sps:$4 sm:$0xff]  }
  0x14   :  { %1636 = vmatprep.subr.bf16.mxu0 %v12690_v13  ;;  %v12724_v36 = vld [vmem:[%s21143_s29 + $0x1b4] ss:$24 sps:$4 sm:$0xff]   ;;  %v12728_v38 = vld [vmem:[%s21143_s29 + $0x1b0] ss:$24 sps:$4 sm:$0xff]   ;;  %v12730_v40 = vld [vmem:[%s21143_s29 + $0x1e4] ss:$24 sps:$4 sm:$0xff]  }
  0x15   :  { %v12726_v37 = vld [vmem:[%s21143_s29 + $0x4b4] ss:$24 sps:$4 sm:$0xff]   ;;  %v12729_v39 = vld [vmem:[%s21143_s29 + $0x4b0] ss:$24 sps:$4 sm:$0xff]   ;;  %v12732_v41 = vld [vmem:[%s21143_s29 + $0x4e4] ss:$24 sps:$4 sm:$0xff]  }
  0x16   :  { %1524 = vmatpush1.bf16.msra.mxu1 %v12692_v14  ;;  %v12734_v42 = vld [vmem:[%s21143_s29 + $0x1e0] ss:$24 sps:$4 sm:$0xff]   ;;  %v12736_v44 = vld [vmem:[%s21143_s29 + $0x214] ss:$24 sps:$4 sm:$0xff]   ;;  %v12740_v46 = vld [vmem:[%s21143_s29 + $0x210] ss:$24 sps:$4 sm:$0xff]  }
  0x17   :  { %1637 = vmatpush1.bf16.msra.mxu0 %v12693_v15  ;;  %1525 = vmatprep.subr.bf16.mxu1 %v12694_v16  ;;  %v12735_v43 = vld [vmem:[%s21143_s29 + $0x4e0] ss:$24 sps:$4 sm:$0xff]   ;;  %v12738_v45 = vld [vmem:[%s21143_s29 + $0x514] ss:$24 sps:$4 sm:$0xff]   ;;  %v12741_v47 = vld [vmem:[%s21143_s29 + $0x510] ss:$24 sps:$4 sm:$0xff]  }
  0x18   :  { %1638 = vmatprep.subr.bf16.mxu0 %v12696_v17  ;;  %v77_v48 = vld [vmem:[%s21144_s9] sm:$0xff]  ;;  %v79_v49 = vld [vmem:[%s21144_s9 + $0x10] sm:$0xff]  ;;  %v78_v50 = vld [vmem:[%s21144_s9 + $0x8] sm:$0xff]  ;;  %s21337_s5 = sld [smem:[#allocation139_spill]]  ;;  %s21392_s24 = sld [smem:[#allocation137_spill]] }
  0x19   :  { %v80_v51 = vld [vmem:[%s21144_s9 + $0x18] sm:$0xff]  ;;  %v14372_v53 = vcombine.high %v77_v48, %v79_v49  ;;  %v12748_v58 = vld [vmem:[%s21143_s29 + $0x274] ss:$24 sps:$4 sm:$0xff]   ;;  %v12752_v60 = vld [vmem:[%s21143_s29 + $0x270] ss:$24 sps:$4 sm:$0xff]   ;;  %v14438_v11 = vcombine.low %v77_v48, %v79_v49 }
  0x1a   :  { %1526 = vmatpush1.bf16.msra.mxu1 %v12698_v18  ;;  %v12742_v52 = vld [vmem:[%s21143_s29 + $0x244] ss:$24 sps:$4 sm:$0xff]   ;;  %v14374_v54 = vcombine.high %v78_v50, %v80_v51  ;;  %v12746_v56 = vld [vmem:[%s21143_s29 + $0x240] ss:$24 sps:$4 sm:$0xff]   ;;  %v12750_v59 = vld [vmem:[%s21143_s29 + $0x574] ss:$24 sps:$4 sm:$0xff]   ;;  %v14440_v12 = vcombine.low %v78_v50, %v80_v51 }
  0x1b   :  { %1639 = vmatpush1.bf16.msra.mxu0 %v12699_v19  ;;  %1527 = vmatprep.subr.bf16.mxu1 %v12700_v20  ;;  %v12744_v55 = vld [vmem:[%s21143_s29 + $0x544] ss:$24 sps:$4 sm:$0xff]   ;;  %v12747_v57 = vld [vmem:[%s21143_s29 + $0x540] ss:$24 sps:$4 sm:$0xff]   ;;  %v12753_v61 = vld [vmem:[%s21143_s29 + $0x570] ss:$24 sps:$4 sm:$0xff]  }
  0x1c   :  { %1640 = vmatprep.subr.bf16.mxu0 %v12702_v21  ;;  %1549 = vmatprep.mubr.bf16.mxu1 %v14372_v53  ;;  %v12754_v62 = vld [vmem:[%s21143_s29 + $0x2a4] ss:$24 sps:$4 sm:$0xff]   ;;  %v12758_v0 = vld [vmem:[%s21143_s29 + $0x2a0] ss:$24 sps:$4 sm:$0xff]   ;;  %v12760_v2 = vld [vmem:[%s21143_s29 + $0x2d4] ss:$24 sps:$4 sm:$0xff]  }
  0x1d   :  { %1662 = vmatprep.mubr.bf16.mxu0 %v14374_v54  ;;  %v12756_v63 = vld [vmem:[%s21143_s29 + $0x5a4] ss:$24 sps:$4 sm:$0xff]   ;;  %v12759_v1 = vld [vmem:[%s21143_s29 + $0x5a0] ss:$24 sps:$4 sm:$0xff]   ;;  %v12762_v3 = vld [vmem:[%s21143_s29 + $0x5d4] ss:$24 sps:$4 sm:$0xff]  }
  0x1e   :  { %1528 = vmatpush1.bf16.msra.mxu1 %v12704_v22  ;;  %v12764_v4 = vld [vmem:[%s21143_s29 + $0x2d0] ss:$24 sps:$4 sm:$0xff]   ;;  %v12772_v6 = vld [vmem:[%s21143_s29 + $0xc] ss:$24 sps:$4 sm:$0xff]   ;;  %v84_v10 = vld [vmem:[%s21144_s9 + $0x38] sm:$0xff] }
  0x1f   :  { %1641 = vmatpush1.bf16.msra.mxu0 %v12705_v23  ;;  %1529 = vmatprep.subr.bf16.mxu1 %v12706_v24  ;;  %v12765_v5 = vld [vmem:[%s21143_s29 + $0x5d0] ss:$24 sps:$4 sm:$0xff]   ;;  %v81_v7 = vld [vmem:[%s21144_s9 + $0x20] sm:$0xff]  ;;  %v12775_v15 = vld [vmem:[%s21143_s29 + $0x3c] ss:$24 sps:$4 sm:$0xff]  }
  0x20   :  { %1642 = vmatprep.subr.bf16.mxu0 %v12708_v25  ;;  %v83_v8 = vld [vmem:[%s21144_s9 + $0x30] sm:$0xff]  ;;  %v82_v9 = vld [vmem:[%s21144_s9 + $0x28] sm:$0xff]  ;;  %v85_v19 = vld [vmem:[%s21144_s9 + $0x40] sm:$0xff] }
  0x21   :  { %v12770_v13 = vld [vmem:[%s21143_s29 + $0x8] ss:$24 sps:$4 sm:$0xff]   ;;  %v14445_v14 = vcombine.high %v81_v7, %v83_v8  ;;  %v14450_v16 = vcombine.high %v82_v9, %v84_v10  ;;  %v12773_v17 = vld [vmem:[%s21143_s29 + $0x38] ss:$24 sps:$4 sm:$0xff]   ;;  %v12780_v18 = vld [vmem:[%s21143_s29 + $0x6c] ss:$24 sps:$4 sm:$0xff]   ;;  %v14474_v23 = vcombine.low %v81_v7, %v83_v8  ;;  %v14476_v24 = vcombine.low %v82_v9, %v84_v10 }
  0x22   :  { %1530 = vmatpush1.bf16.msra.mxu1 %v12710_v26  ;;  %v87_v20 = vld [vmem:[%s21144_s9 + $0x50] sm:$0xff]  ;;  %v86_v21 = vld [vmem:[%s21144_s9 + $0x48] sm:$0xff]  ;;  %v88_v22 = vld [vmem:[%s21144_s9 + $0x58] sm:$0xff] }
  0x23   :  { %1643 = vmatpush1.bf16.msra.mxu0 %v12711_v27  ;;  %1531 = vmatprep.subr.bf16.mxu1 %v12712_v28  ;;  %v12778_v25 = vld [vmem:[%s21143_s29 + $0x68] ss:$24 sps:$4 sm:$0xff]   ;;  %v14481_v26 = vcombine.high %v85_v19, %v87_v20  ;;  %v12785_v27 = vld [vmem:[%s21143_s29 + $0x9c] ss:$24 sps:$4 sm:$0xff]   ;;  %v14486_v28 = vcombine.high %v86_v21, %v88_v22  ;;  %v12820_v8 = vld [vmem:[%s21143_s29 + $0x1ec] ss:$24 sps:$4 sm:$0xff]  }
  0x24   :  { %1644 = vmatprep.subr.bf16.mxu0 %v12714_v29  ;;  %v12783_v29 = vld [vmem:[%s21143_s29 + $0x98] ss:$24 sps:$4 sm:$0xff]   ;;  %v12798_v49 = vld [vmem:[%s21143_s29 + $0x128] ss:$24 sps:$4 sm:$0xff]   ;;  %v12805_v51 = vld [vmem:[%s21143_s29 + $0x15c] ss:$24 sps:$4 sm:$0xff]  }
  0x25   :  { %v12891_v7 = vld [vmem:[%s21143_s29 + $0x40] ss:$24 sps:$4 sm:$0xff]   ;;  %v12899_v10 = vld [vmem:[%s21143_s29 + $0x74] ss:$24 sps:$4 sm:$0xff]  }
  0x26   :  { %1532 = vmatpush1.bf16.msra.mxu1 %v12716_v30  ;;  %v12790_v30 = vld [vmem:[%s21143_s29 + $0xcc] ss:$24 sps:$4 sm:$0xff]  }
  0x27   :  { %1645 = vmatpush1.bf16.msra.mxu0 %v12717_v31  ;;  %1533 = vmatprep.subr.bf16.mxu1 %v12718_v32  ;;  %v89_v31 = vld [vmem:[%s21144_s9 + $0x60] sm:$0xff]  ;;  %v91_v32 = vld [vmem:[%s21144_s9 + $0x70] sm:$0xff] }
  0x28   :  { %1646 = vmatprep.subr.bf16.mxu0 %v12720_v33  ;;  %v90_v33 = vld [vmem:[%s21144_s9 + $0x68] sm:$0xff]  ;;  %v101_v9 = vld [vmem:[%s21144_s9 + $0xc0] sm:$0xff] }
  0x2a   :  { %1534 = vmatpush1.bf16.msra.mxu1 %v12722_v34  ;;  %v92_v34 = vld [vmem:[%s21144_s9 + $0x78] sm:$0xff] }
  0x2b   :  { %1647 = vmatpush1.bf16.msra.mxu0 %v12723_v35  ;;  %1535 = vmatprep.subr.bf16.mxu1 %v12724_v36  ;;  %v14510_v35 = vcombine.low %v85_v19, %v87_v20  ;;  %v14512_v36 = vcombine.low %v86_v21, %v88_v22  ;;  %v14548_v48 = vcombine.low %v90_v33, %v92_v34  ;;  %v12818_v21 = vld [vmem:[%s21143_s29 + $0x1e8] ss:$24 sps:$4 sm:$0xff]  }
  0x2c   :  { %1648 = vmatprep.subr.bf16.mxu0 %v12726_v37  ;;  %v12788_v37 = vld [vmem:[%s21143_s29 + $0xc8] ss:$24 sps:$4 sm:$0xff]  }
  0x2e   :  { %1536 = vmatpush1.bf16.msra.mxu1 %v12728_v38  ;;  %v14517_v38 = vcombine.high %v89_v31, %v91_v32 }
  0x2f   :  { %1649 = vmatpush1.bf16.msra.mxu0 %v12729_v39  ;;  %1537 = vmatprep.subr.bf16.mxu1 %v12730_v40  ;;  %v12795_v39 = vld [vmem:[%s21143_s29 + $0xfc] ss:$24 sps:$4 sm:$0xff]   ;;  %v14522_v40 = vcombine.high %v90_v33, %v92_v34  ;;  %v12903_v33 = vld [vmem:[%s21143_s29 + $0xa0] ss:$24 sps:$4 sm:$0xff]  }
  0x30   :  { %1650 = vmatprep.subr.bf16.mxu0 %v12732_v41  ;;  %v12793_v41 = vld [vmem:[%s21143_s29 + $0xf8] ss:$24 sps:$4 sm:$0xff]   ;;  %v12908_v34 = vld [vmem:[%s21143_s29 + $0xd4] ss:$24 sps:$4 sm:$0xff]  }
  0x32   :  { %1538 = vmatpush1.bf16.msra.mxu1 %v12734_v42  ;;  %v12800_v42 = vld [vmem:[%s21143_s29 + $0x12c] ss:$24 sps:$4 sm:$0xff]  }
  0x33   :  { %1651 = vmatpush1.bf16.msra.mxu0 %v12735_v43  ;;  %1539 = vmatprep.subr.bf16.mxu1 %v12736_v44  ;;  %v93_v43 = vld [vmem:[%s21144_s9 + $0x80] sm:$0xff]  ;;  %v95_v44 = vld [vmem:[%s21144_s9 + $0x90] sm:$0xff] }
  0x34   :  { %1652 = vmatprep.subr.bf16.mxu0 %v12738_v45  ;;  %v94_v45 = vld [vmem:[%s21144_s9 + $0x88] sm:$0xff]  ;;  %v14553_v50 = vcombine.high %v93_v43, %v95_v44 }
  0x36   :  { %1540 = vmatpush1.bf16.msra.mxu1 %v12740_v46  ;;  %v96_v46 = vld [vmem:[%s21144_s9 + $0x98] sm:$0xff] }
  0x37   :  { %1653 = vmatpush1.bf16.msra.mxu0 %v12741_v47  ;;  %1541 = vmatprep.subr.bf16.mxu1 %v12742_v52  ;;  %v14546_v47 = vcombine.low %v89_v31, %v91_v32  ;;  %v14558_v52 = vcombine.high %v94_v45, %v96_v46  ;;  %v12830_v31 = vld [vmem:[%s21143_s29 + $0x24c] ss:$24 sps:$4 sm:$0xff]  }
  0x38   :  { %1654 = vmatprep.subr.bf16.mxu0 %v12744_v55  ;;  %v12803_v55 = vld [vmem:[%s21143_s29 + $0x158] ss:$24 sps:$4 sm:$0xff]   ;;  %v105_v32 = vld [vmem:[%s21144_s9 + $0xe0] sm:$0xff] }
  0x3a   :  { %1542 = vmatpush1.bf16.msra.mxu1 %v12746_v56  ;;  %v12810_v56 = vld [vmem:[%s21143_s29 + $0x18c] ss:$24 sps:$4 sm:$0xff]  }
  0x3b   :  { %1655 = vmatpush1.bf16.msra.mxu0 %v12747_v57  ;;  %1543 = vmatprep.subr.bf16.mxu1 %v12748_v58  ;;  %v97_v57 = vld [vmem:[%s21144_s9 + $0xa0] sm:$0xff]  ;;  %v99_v58 = vld [vmem:[%s21144_s9 + $0xb0] sm:$0xff] }
  0x3c   :  { %1656 = vmatprep.subr.bf16.mxu0 %v12750_v59  ;;  %v12885_v59 = vld [vmem:[%s21143_s29 + $0x10] ss:$24 sps:$4 sm:$0xff]   ;;  %v14636_v19 = vcombine.low %v97_v57, %v99_v58 }
  0x3e   :  { %1544 = vmatpush1.bf16.msra.mxu1 %v12752_v60  ;;  %v12887_v60 = vld [vmem:[%s21143_s29 + $0x14] ss:$24 sps:$4 sm:$0xff]  }
  0x3f   :  { %1657 = vmatpush1.bf16.msra.mxu0 %v12753_v61  ;;  %1545 = vmatprep.subr.bf16.mxu1 %v12754_v62  ;;  %v98_v61 = vld [vmem:[%s21144_s9 + $0xa8] sm:$0xff]  ;;  %v100_v62 = vld [vmem:[%s21144_s9 + $0xb8] sm:$0xff] }
  0x40   :  { %1658 = vmatprep.subr.bf16.mxu0 %v12756_v63  ;;  %v14588_v63 = vcombine.low %v93_v43, %v95_v44  ;;  %v14638_v20 = vcombine.low %v98_v61, %v100_v62  ;;  %v12828_v44 = vld [vmem:[%s21143_s29 + $0x248] ss:$24 sps:$4 sm:$0xff]  }
  0x42   :  { %1546 = vmatpush1.bf16.msra.mxu1 %v12758_v0  ;;  %v14590_v0 = vcombine.low %v94_v45, %v96_v46  ;;  %v12835_v46 = vld [vmem:[%s21143_s29 + $0x27c] ss:$24 sps:$4 sm:$0xff]  }
  0x43   :  { %1659 = vmatpush1.bf16.msra.mxu0 %v12759_v1  ;;  %1547 = vmatprep.subr.bf16.mxu1 %v12760_v2  ;;  %v12893_v1 = vld [vmem:[%s21143_s29 + $0x44] ss:$24 sps:$4 sm:$0xff]   ;;  %v12808_v2 = vld [vmem:[%s21143_s29 + $0x188] ss:$24 sps:$4 sm:$0xff]  }
  0x44   :  { %1660 = vmatprep.subr.bf16.mxu0 %v12762_v3  ;;  %v14598_v3 = vcombine.high %v97_v57, %v99_v58  ;;  %v12840_v57 = vld [vmem:[%s21143_s29 + $0x2ac] ss:$24 sps:$4 sm:$0xff]   ;;  %v12909_v58 = vld [vmem:[%s21143_s29 + $0x100] ss:$24 sps:$4 sm:$0xff]  }
  0x46   :  { %1548 = vmatpush1.bf16.msra.mxu1 %v12764_v4  ;;  %v12815_v4 = vld [vmem:[%s21143_s29 + $0x1bc] ss:$24 sps:$4 sm:$0xff]  }
  0x47   :  { %1661 = vmatpush1.bf16.msra.mxu0 %v12765_v5  ;;  %1743 = vmatprep.subr.bf16.mxu1 %v12772_v6  ;;  %v14603_v5 = vcombine.high %v98_v61, %v100_v62  ;;  %v12813_v6 = vld [vmem:[%s21143_s29 + $0x1b8] ss:$24 sps:$4 sm:$0xff]   ;;  %v12845_v62 = vld [vmem:[%s21143_s29 + $0x2dc] ss:$24 sps:$4 sm:$0xff]  }
  0x48   :  { %1969 = vmatprep.subr.bf16.mxu0 %v12887_v60  ;;  %v12838_v60 = vld [vmem:[%s21143_s29 + $0x2a8] ss:$24 sps:$4 sm:$0xff]  }
  0x49   :  { %1550 = vmatmul.mubr.bf16.vlgmr.msra.gmra.mrb[0].mxu1 %v14438_v11 }
  0x4a   :  { %1663 = vmatmul.mubr.bf16.vlgmr.msra.gmra.mrb[0].mxu0 %v14440_v12  ;;  %1744 = vmatpush1.bf16.msra.mxu1 %v12770_v13  ;;  %v103_v13 = vld [vmem:[%s21144_s9 + $0xd0] sm:$0xff] }
  0x4b   :  { %1559 = vmatprep.mubr.bf16.mxu1 %v14445_v14  ;;  %1745 = vmatprep.subr.bf16.mxu1 %v12775_v15  ;;  %v102_v15 = vld [vmem:[%s21144_s9 + $0xc8] sm:$0xff]  ;;  %v14643_v22 = vcombine.high %v101_v9, %v103_v13 }
  0x4c   :  { %1672 = vmatprep.mubr.bf16.mxu0 %v14450_v16  ;;  %1970 = vmatpush1.bf16.msra.mxu0 %v12885_v59 }
  0x4d   :  { %1971 = vmatprep.subr.bf16.mxu0 %v12893_v1  ;;  %v12914_v1 = vld [vmem:[%s21143_s29 + $0x134] ss:$24 sps:$4 sm:$0xff]  }
  0x4e   :  { %1746 = vmatpush1.bf16.msra.mxu1 %v12773_v17  ;;  %v104_v17 = vld [vmem:[%s21144_s9 + $0xd8] sm:$0xff] }
  0x4f   :  { %1747 = vmatprep.subr.bf16.mxu1 %v12780_v18  ;;  %v12897_v18 = vld [vmem:[%s21143_s29 + $0x70] ss:$24 sps:$4 sm:$0xff]   ;;  %v14683_v43 = vcombine.low %v102_v15, %v104_v17 }
  0x50   :  { %1972 = vmatpush1.bf16.msra.mxu0 %v12891_v7  ;;  %v12848_v7 = vld [vmem:[%s21143_s29 + $0x30c] ss:$24 sps:$4 sm:$0xff]  }
  0x51   :  { %1560 = vmatmul.mubr.bf16.gmra.mrb[4].mxu1 %v14474_v23  ;;  %1973 = vmatprep.subr.bf16.mxu0 %v12899_v10  ;;  %v12846_v10 = vld [vmem:[%s21143_s29 + $0x308] ss:$24 sps:$4 sm:$0xff]  }
  0x52   :  { %1673 = vmatmul.mubr.bf16.gmra.mrb[4].mxu0 %v14476_v24  ;;  %1748 = vmatpush1.bf16.msra.mxu1 %v12778_v25  ;;  %v12825_v25 = vld [vmem:[%s21143_s29 + $0x21c] ss:$24 sps:$4 sm:$0xff]  }
  0x53   :  { %1569 = vmatprep.mubr.bf16.mxu1 %v14481_v26  ;;  %1749 = vmatprep.subr.bf16.mxu1 %v12785_v27  ;;  %v14648_v27 = vcombine.high %v102_v15, %v104_v17  ;;  %v12929_v15 = vld [vmem:[%s21143_s29 + $0x1c4] ss:$24 sps:$4 sm:$0xff]   ;;  %v12849_v17 = vld [vmem:[%s21143_s29 + $0x338] ss:$24 sps:$4 sm:$0xff]  }
  0x54   :  { %1682 = vmatprep.mubr.bf16.mxu0 %v14486_v28  ;;  %1974 = vmatpush1.bf16.msra.mxu0 %v12897_v18  ;;  %v12854_v18 = vld [vmem:[%s21143_s29 + $0x36c] ss:$24 sps:$4 sm:$0xff]  }
  0x56   :  { %1750 = vmatpush1.bf16.msra.mxu1 %v12783_v29  ;;  %v12823_v29 = vld [vmem:[%s21143_s29 + $0x218] ss:$24 sps:$4 sm:$0xff]  }
  0x57   :  { %1751 = vmatprep.subr.bf16.mxu1 %v12790_v30  ;;  %v12905_v30 = vld [vmem:[%s21143_s29 + $0xa4] ss:$24 sps:$4 sm:$0xff]  }
  0x58   :  { %1975 = vmatprep.subr.bf16.mxu0 %v12905_v30  ;;  %v12857_v30 = vld [vmem:[%s21143_s29 + $0x39c] ss:$24 sps:$4 sm:$0xff]  }
  0x59   :  { %1570 = vmatmul.mubr.bf16.gmra.mrb[8].mxu1 %v14510_v35  ;;  %1976 = vmatpush1.bf16.msra.mxu0 %v12903_v33  ;;  %v12855_v33 = vld [vmem:[%s21143_s29 + $0x398] ss:$24 sps:$4 sm:$0xff]  }
  0x5a   :  { %1683 = vmatmul.mubr.bf16.gmra.mrb[8].mxu0 %v14512_v36  ;;  %1752 = vmatpush1.bf16.msra.mxu1 %v12788_v37  ;;  %v107_v37 = vld [vmem:[%s21144_s9 + $0xf0] sm:$0xff] }
  0x5b   :  { %1579 = vmatprep.mubr.bf16.mxu1 %v14517_v38  ;;  %1753 = vmatprep.subr.bf16.mxu1 %v12795_v39  ;;  %v106_v39 = vld [vmem:[%s21144_s9 + $0xe8] sm:$0xff]  ;;  %v14688_v45 = vcombine.high %v105_v32, %v107_v37  ;;  %v14714_v59 = vcombine.low %v105_v32, %v107_v37  ;;  %v12941_v32 = vld [vmem:[%s21143_s29 + $0x224] ss:$24 sps:$4 sm:$0xff]   ;;  %v12939_v37 = vld [vmem:[%s21143_s29 + $0x220] ss:$24 sps:$4 sm:$0xff]  }
  0x5c   :  { %1692 = vmatprep.mubr.bf16.mxu0 %v14522_v40  ;;  %1977 = vmatprep.subr.bf16.mxu0 %v12908_v34  ;;  %v12860_v34 = vld [vmem:[%s21143_s29 + $0x3cc] ss:$24 sps:$4 sm:$0xff]  }
  0x5e   :  { %1754 = vmatpush1.bf16.msra.mxu1 %v12793_v41  ;;  %v108_v41 = vld [vmem:[%s21144_s9 + $0xf8] sm:$0xff] }
  0x5f   :  { %1755 = vmatprep.subr.bf16.mxu1 %v12800_v42  ;;  %v14681_v42 = vcombine.low %v101_v9, %v103_v13  ;;  %v14719_v61 = vcombine.low %v106_v39, %v108_v41  ;;  %v12923_v9 = vld [vmem:[%s21143_s29 + $0x194] ss:$24 sps:$4 sm:$0xff]  }
  0x60   :  { %v12851_v13 = vld [vmem:[%s21143_s29 + $0x33c] ss:$24 sps:$4 sm:$0xff]  }
  0x61   :  { %1580 = vmatmul.mubr.bf16.gmra.mrb[12].mxu1 %v14546_v47 }
  0x62   :  { %1693 = vmatmul.mubr.bf16.gmra.mrb[12].mxu0 %v14548_v48  ;;  %1756 = vmatpush1.bf16.msra.mxu1 %v12798_v49  ;;  %v14693_v49 = vcombine.high %v106_v39, %v108_v41  ;;  %v12947_v39 = vld [vmem:[%s21143_s29 + $0x254] ss:$24 sps:$4 sm:$0xff]   ;;  %v12858_v41 = vld [vmem:[%s21143_s29 + $0x3c8] ss:$24 sps:$4 sm:$0xff]  }
  0x63   :  { %1589 = vmatprep.mubr.bf16.mxu1 %v14553_v50  ;;  %1757 = vmatprep.subr.bf16.mxu1 %v12805_v51  ;;  %v12906_v51 = vld [vmem:[%s21143_s29 + $0xd0] ss:$24 sps:$4 sm:$0xff]  }
  0x64   :  { %1702 = vmatprep.mubr.bf16.mxu0 %v14558_v52  ;;  %1978 = vmatpush1.bf16.msra.mxu0 %v12906_v51  ;;  %v12953_v51 = vld [vmem:[%s21143_s29 + $0x284] ss:$24 sps:$4 sm:$0xff]  }
  0x66   :  { %1758 = vmatpush1.bf16.msra.mxu1 %v12803_v55  ;;  %v12911_v55 = vld [vmem:[%s21143_s29 + $0x104] ss:$24 sps:$4 sm:$0xff]  }
  0x67   :  { %1759 = vmatprep.subr.bf16.mxu1 %v12810_v56  ;;  %v12833_v56 = vld [vmem:[%s21143_s29 + $0x278] ss:$24 sps:$4 sm:$0xff]   ;;  %1979 = vmatprep.subr.bf16.mxu0 %v12911_v55 }
  0x68   :  { %1980 = vmatpush1.bf16.msra.mxu0 %v12909_v58  ;;  %v12861_v55 = vld [vmem:[%s21143_s29 + $0x3f8] ss:$24 sps:$4 sm:$0xff]   ;;  %v12959_v58 = vld [vmem:[%s21143_s29 + $0x2b4] ss:$24 sps:$4 sm:$0xff]  }
  0x69   :  { %1590 = vmatmul.mubr.bf16.gmra.mrb[16].mxu1 %v14588_v63  ;;  %1981 = vmatprep.subr.bf16.mxu0 %v12914_v1  ;;  %v12957_v1 = vld [vmem:[%s21143_s29 + $0x2b0] ss:$24 sps:$4 sm:$0xff]  }
  0x6a   :  { %1703 = vmatmul.mubr.bf16.gmra.mrb[16].mxu0 %v14590_v0  ;;  %1760 = vmatpush1.bf16.msra.mxu1 %v12808_v2  ;;  %v12912_v2 = vld [vmem:[%s21143_s29 + $0x130] ss:$24 sps:$4 sm:$0xff]  }
  0x6b   :  { %1599 = vmatprep.mubr.bf16.mxu1 %v14598_v3  ;;  %1761 = vmatprep.subr.bf16.mxu1 %v12815_v4  ;;  %v12917_v4 = vld [vmem:[%s21143_s29 + $0x164] ss:$24 sps:$4 sm:$0xff]  }
  0x6c   :  { %1712 = vmatprep.mubr.bf16.mxu0 %v14603_v5  ;;  %1982 = vmatpush1.bf16.msra.mxu0 %v12912_v2  ;;  %v12965_v2 = vld [vmem:[%s21143_s29 + $0x2e4] ss:$24 sps:$4 sm:$0xff]  }
  0x6d   :  { %1983 = vmatprep.subr.bf16.mxu0 %v12917_v4  ;;  %v12867_v4 = vld [vmem:[%s21143_s29 + $0x458] ss:$24 sps:$4 sm:$0xff]  }
  0x6e   :  { %1762 = vmatpush1.bf16.msra.mxu1 %v12813_v6  ;;  %v12843_v6 = vld [vmem:[%s21143_s29 + $0x2d8] ss:$24 sps:$4 sm:$0xff]  }
  0x6f   :  { %1763 = vmatprep.subr.bf16.mxu1 %v12820_v8  ;;  %v12915_v8 = vld [vmem:[%s21143_s29 + $0x160] ss:$24 sps:$4 sm:$0xff]  }
  0x70   :  { %1984 = vmatpush1.bf16.msra.mxu0 %v12915_v8  ;;  %v12870_v8 = vld [vmem:[%s21143_s29 + $0x488] ss:$24 sps:$4 sm:$0xff]  }
  0x71   :  { %1600 = vmatmul.mubr.bf16.gmra.mrb[20].mxu1 %v14636_v19  ;;  %1985 = vmatprep.subr.bf16.mxu0 %v12923_v9  ;;  %v12875_v9 = vld [vmem:[%s21143_s29 + $0x4bc] ss:$24 sps:$4 sm:$0xff]  }
  0x72   :  { %1713 = vmatmul.mubr.bf16.gmra.mrb[20].mxu0 %v14638_v20  ;;  %1764 = vmatpush1.bf16.msra.mxu1 %v12818_v21  ;;  %v12927_v21 = vld [vmem:[%s21143_s29 + $0x1c0] ss:$24 sps:$4 sm:$0xff]  }
  0x73   :  { %1609 = vmatprep.mubr.bf16.mxu1 %v14643_v22  ;;  %1765 = vmatprep.subr.bf16.mxu1 %v12825_v25  ;;  %v12935_v25 = vld [vmem:[%s21143_s29 + $0x1f4] ss:$24 sps:$4 sm:$0xff]  }
  0x74   :  { %1722 = vmatprep.mubr.bf16.mxu0 %v14648_v27 }
  0x76   :  { %1766 = vmatpush1.bf16.msra.mxu1 %v12823_v29  ;;  %v12852_v29 = vld [vmem:[%s21143_s29 + $0x368] ss:$24 sps:$4 sm:$0xff]  }
  0x77   :  { %1767 = vmatprep.subr.bf16.mxu1 %v12830_v31  ;;  %v12933_v31 = vld [vmem:[%s21143_s29 + $0x1f0] ss:$24 sps:$4 sm:$0xff]  }
  0x79   :  { %1610 = vmatmul.mubr.bf16.gmra.mrb[24].mxu1 %v14681_v42 }
  0x7a   :  { %1723 = vmatmul.mubr.bf16.gmra.mrb[24].mxu0 %v14683_v43  ;;  %1768 = vmatpush1.bf16.msra.mxu1 %v12828_v44  ;;  %v12863_v44 = vld [vmem:[%s21143_s29 + $0x3fc] ss:$24 sps:$4 sm:$0xff]  }
  0x7b   :  { %1619 = vmatprep.mubr.bf16.mxu1 %v14688_v45  ;;  %1769 = vmatprep.subr.bf16.mxu1 %v12835_v46  ;;  %v12945_v46 = vld [vmem:[%s21143_s29 + $0x250] ss:$24 sps:$4 sm:$0xff]  }
  0x7c   :  { %1732 = vmatprep.mubr.bf16.mxu0 %v14693_v49 }
  0x7e   :  { %1770 = vmatpush1.bf16.msra.mxu1 %v12833_v56  ;;  %v12866_v56 = vld [vmem:[%s21143_s29 + $0x42c] ss:$24 sps:$4 sm:$0xff]  }
  0x7f   :  { %1771 = vmatprep.subr.bf16.mxu1 %v12840_v57  ;;  %v12951_v57 = vld [vmem:[%s21143_s29 + $0x280] ss:$24 sps:$4 sm:$0xff]  }
  0x81   :  { %1620 = vmatmul.mubr.bf16.gmra.mrb[28].mxu1 %v14714_v59 }
  0x82   :  { %1733 = vmatmul.mubr.bf16.gmra.mrb[28].mxu0 %v14719_v61  ;;  %1772 = vmatpush1.bf16.msra.mxu1 %v12838_v60  ;;  %v12864_v60 = vld [vmem:[%s21143_s29 + $0x428] ss:$24 sps:$4 sm:$0xff]  }
  0x83   :  { %1775 = vmatprep.mubr.bf16.mxu1 %v14372_v53  ;;  %1773 = vmatprep.subr.bf16.mxu1 %v12845_v62  ;;  %v12869_v62 = vld [vmem:[%s21143_s29 + $0x45c] ss:$24 sps:$4 sm:$0xff]  }
  0x84   :  { %2001 = vmatprep.mubr.bf16.mxu0 %v14372_v53  ;;  %v12921_v53 = vld [vmem:[%s21143_s29 + $0x190] ss:$24 sps:$4 sm:$0xff]  }
  0x85   :  { %1986 = vmatpush1.bf16.msra.mxu0 %v12921_v53  ;;  %v14870_v53 = vld [vmem:[%s21143_s29 + $0x310] ss:$24 sps:$4 sm:$0xff]  }
  0x86   :  { %1774 = vmatpush1.bf16.msra.mxu1 %v12843_v6  ;;  %1987 = vmatprep.subr.bf16.mxu0 %v12929_v15  ;;  %v12872_v6 = vld [vmem:[%s21143_s29 + $0x48c] ss:$24 sps:$4 sm:$0xff]  }
  0x87   :  { %1856 = vmatprep.subr.bf16.mxu1 %v12848_v7  ;;  %v12963_v7 = vld [vmem:[%s21143_s29 + $0x2e0] ss:$24 sps:$4 sm:$0xff]   ;;  %v12878_v15 = vld [vmem:[%s21143_s29 + $0x4ec] ss:$24 sps:$4 sm:$0xff]  }
  0x89   :  { %1776 = vmatmul.mubr.bf16.vlgmr.msra.gmra.mrb[32].mxu1 %v14438_v11  ;;  %1988 = vmatpush1.bf16.msra.mxu0 %v12927_v21  ;;  %v14890_v21 = vld [vmem:[%s21143_s29 + $0x340] ss:$24 sps:$4 sm:$0xff]  }
  0x8a   :  { %1857 = vmatpush1.bf16.msra.mxu1 %v12846_v10  ;;  %1785 = vmatprep.mubr.bf16.mxu1 %v14445_v14  ;;  %v14859_v10 = vld [vmem:[%s21143_s29 + $0x314] ss:$24 sps:$4 sm:$0xff]  }
  0x8b   :  { %1858 = vmatprep.subr.bf16.mxu1 %v12851_v13  ;;  %1989 = vmatprep.subr.bf16.mxu0 %v12935_v25  ;;  %v12873_v13 = vld [vmem:[%s21143_s29 + $0x4b8] ss:$24 sps:$4 sm:$0xff]  }
  0x8c   :  { %v12879_v25 = vld [vmem:[%s21143_s29 + $0x518] ss:$24 sps:$4 sm:$0xff]  }
  0x8d   :  { %1990 = vmatpush1.bf16.msra.mxu0 %v12933_v31  ;;  %v14918_v31 = vld [vmem:[%s21143_s29 + $0x3a4] ss:$24 sps:$4 sm:$0xff]  }
  0x8e   :  { %1859 = vmatpush1.bf16.msra.mxu1 %v12849_v17  ;;  %1991 = vmatprep.subr.bf16.mxu0 %v12941_v32  ;;  %v14878_v17 = vld [vmem:[%s21143_s29 + $0x344] ss:$24 sps:$4 sm:$0xff]   ;;  %v12882_v32 = vld [vmem:[%s21143_s29 + $0x548] ss:$24 sps:$4 sm:$0xff]  }
  0x8f   :  { %1860 = vmatprep.subr.bf16.mxu1 %v12854_v18  ;;  %v12876_v18 = vld [vmem:[%s21143_s29 + $0x4e8] ss:$24 sps:$4 sm:$0xff]  }
  0x91   :  { %1786 = vmatmul.mubr.bf16.gmra.mrb[36].mxu1 %v14474_v23  ;;  %1992 = vmatpush1.bf16.msra.mxu0 %v12939_v37  ;;  %v14950_v37 = vld [vmem:[%s21143_s29 + $0x3d0] ss:$24 sps:$4 sm:$0xff]  }
  0x92   :  { %1861 = vmatpush1.bf16.msra.mxu1 %v12852_v29  ;;  %1795 = vmatprep.mubr.bf16.mxu1 %v14481_v26  ;;  %v14910_v29 = vld [vmem:[%s21143_s29 + $0x370] ss:$24 sps:$4 sm:$0xff]  }
  0x93   :  { %1862 = vmatprep.subr.bf16.mxu1 %v12857_v30  ;;  %1993 = vmatprep.subr.bf16.mxu0 %v12947_v39  ;;  %v12884_v30 = vld [vmem:[%s21143_s29 + $0x54c] ss:$24 sps:$4 sm:$0xff]  }
  0x94   :  { %v12896_v39 = vld [vmem:[%s21143_s29 + $0x5ac] ss:$24 sps:$4 sm:$0xff]  }
  0x95   :  { %1994 = vmatpush1.bf16.msra.mxu0 %v12945_v46  ;;  %v14970_v46 = vld [vmem:[%s21143_s29 + $0x400] ss:$24 sps:$4 sm:$0xff]  }
  0x96   :  { %1863 = vmatpush1.bf16.msra.mxu1 %v12855_v33  ;;  %1995 = vmatprep.subr.bf16.mxu0 %v12953_v51  ;;  %v14930_v33 = vld [vmem:[%s21143_s29 + $0x3a0] ss:$24 sps:$4 sm:$0xff]  }
  0x97   :  { %1864 = vmatprep.subr.bf16.mxu1 %v12860_v34  ;;  %v12888_v34 = vld [vmem:[%s21143_s29 + $0x578] ss:$24 sps:$4 sm:$0xff]  }
  0x98   :  { %v12900_v51 = vld [vmem:[%s21143_s29 + $0x5d8] ss:$24 sps:$4 sm:$0xff]  }
  0x99   :  { %1796 = vmatmul.mubr.bf16.gmra.mrb[40].mxu1 %v14510_v35  ;;  %1996 = vmatpush1.bf16.msra.mxu0 %v12951_v57  ;;  %v12960_v57 = vld [vmem:[%s21143_s29 + $0x460] ss:$24 sps:$4 sm:$0xff]  }
  0x9a   :  { %1865 = vmatpush1.bf16.msra.mxu1 %v12858_v41  ;;  %1805 = vmatprep.mubr.bf16.mxu1 %v14517_v38  ;;  %v14958_v41 = vld [vmem:[%s21143_s29 + $0x404] ss:$24 sps:$4 sm:$0xff]  }
  0x9b   :  { %1866 = vmatprep.subr.bf16.mxu1 %v12863_v44  ;;  %1997 = vmatprep.subr.bf16.mxu0 %v12959_v58  ;;  %v12894_v44 = vld [vmem:[%s21143_s29 + $0x5a8] ss:$24 sps:$4 sm:$0xff]   ;;  %v12968_v58 = vld [vmem:[%s21143_s29 + $0x494] ss:$24 sps:$4 sm:$0xff]  }
  0x9d   :  { %1998 = vmatpush1.bf16.msra.mxu0 %v12957_v1  ;;  %v12975_v1 = vld [vmem:[%s21143_s29 + $0x520] ss:$24 sps:$4 sm:$0xff]  }
  0x9e   :  { %1867 = vmatpush1.bf16.msra.mxu1 %v12861_v55  ;;  %1999 = vmatprep.subr.bf16.mxu0 %v12965_v2  ;;  %v12954_v55 = vld [vmem:[%s21143_s29 + $0x430] ss:$24 sps:$4 sm:$0xff]   ;;  %v12980_v2 = vld [vmem:[%s21143_s29 + $0x554] ss:$24 sps:$4 sm:$0xff]  }
  0x9f   :  { %1868 = vmatprep.subr.bf16.mxu1 %v12866_v56  ;;  %v12962_v56 = vld [vmem:[%s21143_s29 + $0x464] ss:$24 sps:$4 sm:$0xff]  }
  0xa1   :  { %1806 = vmatmul.mubr.bf16.gmra.mrb[44].mxu1 %v14546_v47  ;;  %2000 = vmatpush1.bf16.msra.mxu0 %v12963_v7  ;;  %v12987_v7 = vld [vmem:[%s21143_s29 + $0x5e0] ss:$24 sps:$4 sm:$0xff]  }
  0xa2   :  { %1869 = vmatpush1.bf16.msra.mxu1 %v12864_v60  ;;  %1815 = vmatprep.mubr.bf16.mxu1 %v14553_v50  ;;  %v12969_v60 = vld [vmem:[%s21143_s29 + $0x4c0] ss:$24 sps:$4 sm:$0xff]  }
  0xa3   :  { %1870 = vmatprep.subr.bf16.mxu1 %v12869_v62  ;;  %2082 = vmatprep.subr.bf16.mxu0 %v14859_v10  ;;  %v12974_v62 = vld [vmem:[%s21143_s29 + $0x4f4] ss:$24 sps:$4 sm:$0xff]  }
  0xa4   :  { %2002 = vmatmul.mubr.bf16.vlgmr.msra.gmra.mrb[32].mxu0 %v14438_v11  ;;  %v12881_v11 = vld [vmem:[%s21143_s29 + $0x51c] ss:$24 sps:$4 sm:$0xff]  }
  0xa5   :  { %2011 = vmatprep.mubr.bf16.mxu0 %v14445_v14  ;;  %2083 = vmatpush1.bf16.msra.mxu0 %v14870_v53  ;;  %v14898_v14 = vld [vmem:[%s21143_s29 + $0x374] ss:$24 sps:$4 sm:$0xff]  }
  0xa6   :  { %1871 = vmatpush1.bf16.msra.mxu1 %v12867_v4  ;;  %2084 = vmatprep.subr.bf16.mxu0 %v14878_v17  ;;  %v12981_v4 = vld [vmem:[%s21143_s29 + $0x580] ss:$24 sps:$4 sm:$0xff]  }
  0xa7   :  { %1872 = vmatprep.subr.bf16.mxu1 %v12872_v6  ;;  %v12986_v6 = vld [vmem:[%s21143_s29 + $0x5b4] ss:$24 sps:$4 sm:$0xff]  }
  0xa9   :  { %1816 = vmatmul.mubr.bf16.gmra.mrb[48].mxu1 %v14588_v63  ;;  %2085 = vmatpush1.bf16.msra.mxu0 %v14890_v21 }
  0xaa   :  { %1873 = vmatpush1.bf16.msra.mxu1 %v12870_v8  ;;  %1825 = vmatprep.mubr.bf16.mxu1 %v14598_v3 }
  0xab   :  { %1874 = vmatprep.subr.bf16.mxu1 %v12875_v9  ;;  %2086 = vmatprep.subr.bf16.mxu0 %v14898_v14 }
  0xac   :  { %2012 = vmatmul.mubr.bf16.gmra.mrb[36].mxu0 %v14474_v23  ;;  %v12890_v23 = vld [vmem:[%s21143_s29 + $0x57c] ss:$24 sps:$4 sm:$0xff]  }
  0xad   :  { %2021 = vmatprep.mubr.bf16.mxu0 %v14481_v26  ;;  %2087 = vmatpush1.bf16.msra.mxu0 %v14910_v29  ;;  %v14938_v26 = vld [vmem:[%s21143_s29 + $0x3d4] ss:$24 sps:$4 sm:$0xff]  }
  0xae   :  { %1875 = vmatpush1.bf16.msra.mxu1 %v12873_v13  ;;  %2088 = vmatprep.subr.bf16.mxu0 %v14918_v31 }
  0xaf   :  { %1876 = vmatprep.subr.bf16.mxu1 %v12878_v15 }
  0xb1   :  { %1826 = vmatmul.mubr.bf16.gmra.mrb[52].mxu1 %v14636_v19  ;;  %2089 = vmatpush1.bf16.msra.mxu0 %v14930_v33 }
  0xb2   :  { %1877 = vmatpush1.bf16.msra.mxu1 %v12876_v18  ;;  %1835 = vmatprep.mubr.bf16.mxu1 %v14643_v22 }
  0xb3   :  { %1878 = vmatprep.subr.bf16.mxu1 %v12881_v11  ;;  %2090 = vmatprep.subr.bf16.mxu0 %v14938_v26 }
  0xb4   :  { %2022 = vmatmul.mubr.bf16.gmra.mrb[40].mxu0 %v14510_v35  ;;  %v12902_v35 = vld [vmem:[%s21143_s29 + $0x5dc] ss:$24 sps:$4 sm:$0xff]  }
  0xb5   :  { %2031 = vmatprep.mubr.bf16.mxu0 %v14517_v38  ;;  %2091 = vmatpush1.bf16.msra.mxu0 %v14950_v37  ;;  %v14978_v38 = vld [vmem:[%s21143_s29 + $0x434] ss:$24 sps:$4 sm:$0xff]  }
  0xb6   :  { %1879 = vmatpush1.bf16.msra.mxu1 %v12879_v25  ;;  %2092 = vmatprep.subr.bf16.mxu0 %v14958_v41 }
  0xb7   :  { %1880 = vmatprep.subr.bf16.mxu1 %v12884_v30 }
  0xb9   :  { %1836 = vmatmul.mubr.bf16.gmra.mrb[56].mxu1 %v14681_v42  ;;  %2093 = vmatpush1.bf16.msra.mxu0 %v14970_v46 }
  0xba   :  { %1881 = vmatpush1.bf16.msra.mxu1 %v12882_v32  ;;  %1845 = vmatprep.mubr.bf16.mxu1 %v14688_v45 }
  0xbb   :  { %1882 = vmatprep.subr.bf16.mxu1 %v12890_v23  ;;  %2094 = vmatprep.subr.bf16.mxu0 %v14978_v38 }
  0xbc   :  { %2032 = vmatmul.mubr.bf16.gmra.mrb[44].mxu0 %v14546_v47  ;;  %v12966_v47 = vld [vmem:[%s21143_s29 + $0x490] ss:$24 sps:$4 sm:$0xff]  }
  0xbd   :  { %2041 = vmatprep.mubr.bf16.mxu0 %v14553_v50  ;;  %2095 = vmatpush1.bf16.msra.mxu0 %v12954_v55  ;;  %v12971_v50 = vld [vmem:[%s21143_s29 + $0x4c4] ss:$24 sps:$4 sm:$0xff]  }
  0xbe   :  { %1883 = vmatpush1.bf16.msra.mxu1 %v12888_v34  ;;  %2096 = vmatprep.subr.bf16.mxu0 %v12962_v56 }
  0xbf   :  { %1884 = vmatprep.subr.bf16.mxu1 %v12896_v39 }
  0xc1   :  { %1846 = vmatmul.mubr.bf16.gmra.mrb[60].mxu1 %v14714_v59  ;;  %2097 = vmatpush1.bf16.msra.mxu0 %v12960_v57 }
  0xc2   :  { %1885 = vmatpush1.bf16.msra.mxu1 %v12894_v44  ;;  %1888 = vmatprep.mubr.bf16.mxu1 %v14374_v54 }
  0xc3   :  { %1886 = vmatprep.subr.bf16.mxu1 %v12902_v35  ;;  %2098 = vmatprep.subr.bf16.mxu0 %v12968_v58 }
  0xc4   :  { %2042 = vmatmul.mubr.bf16.gmra.mrb[48].mxu0 %v14588_v63  ;;  %v12972_v63 = vld [vmem:[%s21143_s29 + $0x4f0] ss:$24 sps:$4 sm:$0xff]  }
  0xc5   :  { %2051 = vmatprep.mubr.bf16.mxu0 %v14598_v3  ;;  %2099 = vmatpush1.bf16.msra.mxu0 %v12966_v47  ;;  %v12977_v3 = vld [vmem:[%s21143_s29 + $0x524] ss:$24 sps:$4 sm:$0xff]  }
  0xc6   :  { %1887 = vmatpush1.bf16.msra.mxu1 %v12900_v51  ;;  %2100 = vmatprep.subr.bf16.mxu0 %v12971_v50 }
  0xc7   :  { %12172 = vmatprep.subr.bf16.mxu1 %v14859_v10 }
  0xc9   :  { %1889 = vmatmul.mubr.bf16.vlgmr.msra.gmra.mrb[32].mxu1 %v14440_v12  ;;  %2101 = vmatpush1.bf16.msra.mxu0 %v12969_v60 }
  0xca   :  { %1898 = vmatprep.mubr.bf16.mxu1 %v14450_v16  ;;  %12188 = vmatpush1.bf16.msra.mxu1 %v14870_v53 }
  0xcb   :  { %12173 = vmatprep.subr.bf16.mxu1 %v14878_v17  ;;  %2102 = vmatprep.subr.bf16.mxu0 %v12974_v62 }
  0xcc   :  { %2052 = vmatmul.mubr.bf16.gmra.mrb[52].mxu0 %v14636_v19  ;;  %v12978_v19 = vld [vmem:[%s21143_s29 + $0x550] ss:$24 sps:$4 sm:$0xff]  }
  0xcd   :  { %2061 = vmatprep.mubr.bf16.mxu0 %v14643_v22  ;;  %2103 = vmatpush1.bf16.msra.mxu0 %v12972_v63  ;;  %v12983_v22 = vld [vmem:[%s21143_s29 + $0x584] ss:$24 sps:$4 sm:$0xff]  }
  0xce   :  { %12189 = vmatpush1.bf16.msra.mxu1 %v14890_v21  ;;  %2104 = vmatprep.subr.bf16.mxu0 %v12977_v3 }
  0xcf   :  { %12174 = vmatprep.subr.bf16.mxu1 %v14898_v14 }
  0xd1   :  { %1899 = vmatmul.mubr.bf16.gmra.mrb[36].mxu1 %v14476_v24  ;;  %2105 = vmatpush1.bf16.msra.mxu0 %v12975_v1 }
  0xd2   :  { %1908 = vmatprep.mubr.bf16.mxu1 %v14486_v28  ;;  %12190 = vmatpush1.bf16.msra.mxu1 %v14910_v29 }
  0xd3   :  { %12175 = vmatprep.subr.bf16.mxu1 %v14918_v31  ;;  %2106 = vmatprep.subr.bf16.mxu0 %v12980_v2 }
  0xd4   :  { %2062 = vmatmul.mubr.bf16.gmra.mrb[56].mxu0 %v14681_v42  ;;  %v12984_v42 = vld [vmem:[%s21143_s29 + $0x5b0] ss:$24 sps:$4 sm:$0xff]  }
  0xd5   :  { %2071 = vmatprep.mubr.bf16.mxu0 %v14688_v45  ;;  %2107 = vmatpush1.bf16.msra.mxu0 %v12978_v19  ;;  %v12989_v45 = vld [vmem:[%s21143_s29 + $0x5e4] ss:$24 sps:$4 sm:$0xff]  }
  0xd6   :  { %12191 = vmatpush1.bf16.msra.mxu1 %v14930_v33  ;;  %2108 = vmatprep.subr.bf16.mxu0 %v12983_v22 }
  0xd7   :  { %12176 = vmatprep.subr.bf16.mxu1 %v14938_v26 }
  0xd9   :  { %1909 = vmatmul.mubr.bf16.gmra.mrb[40].mxu1 %v14512_v36  ;;  %2109 = vmatpush1.bf16.msra.mxu0 %v12981_v4 }
  0xda   :  { %1918 = vmatprep.mubr.bf16.mxu1 %v14522_v40  ;;  %12192 = vmatpush1.bf16.msra.mxu1 %v14950_v37 }
  0xdb   :  { %12177 = vmatprep.subr.bf16.mxu1 %v14958_v41  ;;  %2110 = vmatprep.subr.bf16.mxu0 %v12986_v6 }
  0xdc   :  { %2072 = vmatmul.mubr.bf16.gmra.mrb[60].mxu0 %v14714_v59 }
  0xdd   :  { %2111 = vmatpush1.bf16.msra.mxu0 %v12984_v42  ;;  %2114 = vmatprep.mubr.bf16.mxu0 %v14374_v54  ;;  %v14094_v54 = vmov 0.0  }
  0xde   :  { %12193 = vmatpush1.bf16.msra.mxu1 %v14970_v46  ;;  %2112 = vmatprep.subr.bf16.mxu0 %v12989_v45 }
  0xdf   :  { %12178 = vmatprep.subr.bf16.mxu1 %v14978_v38 }
  0xe1   :  { %1919 = vmatmul.mubr.bf16.gmra.mrb[44].mxu1 %v14548_v48  ;;  %2113 = vmatpush1.bf16.msra.mxu0 %v12987_v7 }
  0xe2   :  { %1928 = vmatprep.mubr.bf16.mxu1 %v14558_v52  ;;  %12194 = vmatpush1.bf16.msra.mxu1 %v12954_v55 }
  0xe3   :  { %12179 = vmatprep.subr.bf16.mxu1 %v12962_v56 }
  0xe4   :  { %2115 = vmatmul.mubr.bf16.vlgmr.msra.gmra.mrb[32].mxu0 %v14440_v12  ;;  %v367_v12 = vlaneseq }
  0xe5   :  { %2124 = vmatprep.mubr.bf16.mxu0 %v14450_v16 }
  0xe6   :  { %12195 = vmatpush1.bf16.msra.mxu1 %v12960_v57  ;;  %v15095_v16 = vshrl.u32 %v367_v12, 7 }
  0xe7   :  { %12180 = vmatprep.subr.bf16.mxu1 %v12968_v58 }
  0xe8   :  { %21145 = vst [vmem:[#allocation5_spill] sm:$0xff] %v15095_v16 }
  0xe9   :  { %1929 = vmatmul.mubr.bf16.gmra.mrb[48].mxu1 %v14590_v0 }
  0xea   :  { %1938 = vmatprep.mubr.bf16.mxu1 %v14603_v5  ;;  %12196 = vmatpush1.bf16.msra.mxu1 %v12966_v47 }
  0xeb   :  { %12181 = vmatprep.subr.bf16.mxu1 %v12971_v50 }
  0xec   :  { %2125 = vmatmul.mubr.bf16.gmra.mrb[36].mxu0 %v14476_v24  ;;  %v15100_v24 = vsub.s32 0, %v15095_v16 }
  0xed   :  { %2134 = vmatprep.mubr.bf16.mxu0 %v14486_v28  ;;  %v15105_v28 = vld [vmem:[%s21147_s28] sm:$0x3f] }
  0xee   :  { %12197 = vmatpush1.bf16.msra.mxu1 %v12969_v60  ;;  %21146 = vst [vmem:[#allocation6_spill] sm:$0xff] %v15100_v24 }
  0xef   :  { %12182 = vmatprep.subr.bf16.mxu1 %v12974_v62 }
  0xf1   :  { %1939 = vmatmul.mubr.bf16.gmra.mrb[52].mxu1 %v14638_v20 }
  0xf2   :  { %1948 = vmatprep.mubr.bf16.mxu1 %v14648_v27  ;;  %12198 = vmatpush1.bf16.msra.mxu1 %v12972_v63 }
  0xf3   :  { %12183 = vmatprep.subr.bf16.mxu1 %v12977_v3 }
  0xf4   :  { %2135 = vmatmul.mubr.bf16.gmra.mrb[40].mxu0 %v14512_v36  ;;  %v15108_v36 = vsub.s32 1, %v15095_v16 }
  0xf5   :  { %2144 = vmatprep.mubr.bf16.mxu0 %v14522_v40  ;;  %v15112_v40 = vrot.slane %v15105_v28, %v15100_v24 }
  0xf6   :  { %12199 = vmatpush1.bf16.msra.mxu1 %v12975_v1  ;;  %21148 = vst [vmem:[#allocation7_spill] sm:$0xff] %v15108_v36 }
  0xf7   :  { %12184 = vmatprep.subr.bf16.mxu1 %v12980_v2 }
  0xf9   :  { %1949 = vmatmul.mubr.bf16.gmra.mrb[56].mxu1 %v14683_v43 }
  0xfa   :  { %1958 = vmatprep.mubr.bf16.mxu1 %v14693_v49  ;;  %12200 = vmatpush1.bf16.msra.mxu1 %v12978_v19 }
  0xfb   :  { %12185 = vmatprep.subr.bf16.mxu1 %v12983_v22 }
  0xfc   :  { %2145 = vmatmul.mubr.bf16.gmra.mrb[44].mxu0 %v14548_v48  ;;  %v15117_v48 = vrot.slane %v15105_v28, %v15108_v36 }
  0xfd   :  { %2154 = vmatprep.mubr.bf16.mxu0 %v14558_v52 }
  0xfe   :  { %12201 = vmatpush1.bf16.msra.mxu1 %v12981_v4 }
  0xff   :  { %12186 = vmatprep.subr.bf16.mxu1 %v12986_v6 }
 0x101   :  { %1959 = vmatmul.mubr.bf16.gmra.mrb[60].mxu1 %v14719_v61 }
 0x102   :  { %12202 = vmatpush1.bf16.msra.mxu1 %v12984_v42  ;;  %2164 = vmatprep.mubr.bf16.mxu1 %v14603_v5 }
 0x103   :  { %12187 = vmatprep.subr.bf16.mxu1 %v12989_v45 }
 0x104   :  { %2155 = vmatmul.mubr.bf16.gmra.mrb[48].mxu0 %v14590_v0 }
 0x106   :  { %12203 = vmatpush1.bf16.msra.mxu1 %v12987_v7 }
 0x107   :  { %12124 = vmatprep.subr.bf16.mxu1 %v14094_v54 }
 0x109   :  { %2165 = vmatmul.mubr.bf16.vlgmr.msra.gmra.mrb[64].mxu1 %v14638_v20 }
 0x10a   :  { %2174 = vmatprep.mubr.bf16.mxu1 %v14648_v27 }
 0x111   :  { %2175 = vmatmul.mubr.bf16.gmra.mrb[68].mxu1 %v14683_v43 }
 0x112   :  { %2184 = vmatprep.mubr.bf16.mxu1 %v14693_v49 }
 0x119   :  { %2185 = vmatmul.mubr.bf16.gmra.mrb[72].mxu1 %v14719_v61 }
 0x11a   :  { %12126 = vmatprep.mubr.msk.bf16.mxu1 %vm14095_vm0, %v14094_v54 }
 0x11c   :  { %v1551_v52 = vpop.f32.mrb[0].mxu1 }
 0x11d   :  { %v1664_v0 = vpop.f32.mrb[0].mxu0  ;;  %v1552_v5 = vadd.f32 %v1551_v52, %v15112_v40  ;;  %v1553_v20 = vpop.f32.mrb[1].mxu1 }
 0x11e   :  { %v1666_v27 = vpop.f32.mrb[1].mxu0  ;;  %v1554_v43 = vadd.f32 %v1553_v20, %v15117_v48  ;;  %v1555_v49 = vpop.f32.mrb[2].mxu1 }
 0x11f   :  { %v1668_v59 = vpop.f32.mrb[2].mxu0  ;;  %v1665_v8 = vadd.f32 %v1664_v0, %v1552_v5  ;;  %v1556_v61 = vadd.f32 %v1555_v49, %v15112_v40  ;;  %v1557_v9 = vpop.f32.mrb[3].mxu1 }
 0x120   :  { %v1670_v10 = vpop.f32.mrb[3].mxu0  ;;  %v1667_v13 = vadd.f32 %v1666_v27, %v1554_v43  ;;  %v1558_v53 = vadd.f32 %v1557_v9, %v15117_v48 }
 0x121   :  { %v1669_v15 = vadd.f32 %v1668_v59, %v1556_v61 }
 0x122   :  { %v1671_v17 = vadd.f32 %v1670_v10, %v1558_v53 }
 0x123   :  { %v2195_v18 = vpack.c.bf16 %v1669_v15, %v1665_v8 }
 0x124   :  { %v2203_v21 = vpack.c.bf16 %v1671_v17, %v1667_v13  ;;  %v1561_v11 = vpop.f32.mrb[4].mxu1 }
 0x125   :  { %v1674_v14 = vpop.f32.mrb[4].mxu0  ;;  %v1562_v25 = vadd.f32 %v1561_v11, %v15112_v40  ;;  %v1563_v29 = vpop.f32.mrb[5].mxu1 }
 0x126   :  { %v1676_v30 = vpop.f32.mrb[5].mxu0  ;;  %v1564_v31 = vadd.f32 %v1563_v29, %v15117_v48  ;;  %v1565_v32 = vpop.f32.mrb[6].mxu1  ;;  %12125 = vmatpush3.bf16.xpose.msra.mxu1 %v2203_v21 }
 0x127   :  { %v1678_v33 = vpop.f32.mrb[6].mxu0  ;;  %v1566_v23 = vadd.f32 %v1565_v32, %v15112_v40  ;;  %v1675_v26 = vadd.f32 %v1674_v14, %v1562_v25  ;;  %v1567_v34 = vpop.f32.mrb[7].mxu1  ;;  %12130 = vmatprep.subr.bf16.mxu1 %v14094_v54 }
 0x128   :  { %v1680_v37 = vpop.f32.mrb[7].mxu0  ;;  %v1568_v39 = vadd.f32 %v1567_v34, %v15117_v48  ;;  %v1677_v41 = vadd.f32 %v1676_v30, %v1564_v31 }
 0x129   :  { %v1679_v44 = vadd.f32 %v1678_v33, %v1566_v23 }
 0x12a   :  { %v1681_v46 = vadd.f32 %v1680_v37, %v1568_v39 }
 0x12b   :  { %v2196_v35 = vpack.c.bf16 %v1679_v44, %v1675_v26 }
 0x12c   :  { %v2204_v38 = vpack.c.bf16 %v1681_v46, %v1677_v41  ;;  %v1571_v51 = vpop.f32.mrb[8].mxu1 }
 0x12d   :  { %v1684_v55 = vpop.f32.mrb[8].mxu0  ;;  %v1572_v56 = vadd.f32 %v1571_v51, %v15112_v40  ;;  %v1573_v57 = vpop.f32.mrb[9].mxu1  ;;  %12127 = vmatmul.mubr.bf16.vlgmr.msra.gmra.mrb[76].mxu1 %v2195_v18 }
 0x12e   :  { %v1686_v58 = vpop.f32.mrb[9].mxu0  ;;  %v1574_v47 = vadd.f32 %v1573_v57, %v15117_v48  ;;  %v1575_v50 = vpop.f32.mrb[10].mxu1  ;;  %12131 = vmatpush3.bf16.xpose.msra.mxu1 %v2204_v38  ;;  %12132 = vmatprep.mubr.msk.bf16.mxu1 %vm14095_vm0, %v14094_v54 }
 0x12f   :  { %v1688_v60 = vpop.f32.mrb[10].mxu0  ;;  %v1576_v62 = vadd.f32 %v1575_v50, %v15112_v40  ;;  %v1685_v63 = vadd.f32 %v1684_v55, %v1572_v56  ;;  %v1577_v3 = vpop.f32.mrb[11].mxu1  ;;  %12136 = vmatprep.subr.bf16.mxu1 %v14094_v54 }
 0x130   :  { %v1690_v1 = vpop.f32.mrb[11].mxu0  ;;  %v1578_v2 = vadd.f32 %v1577_v3, %v15117_v48  ;;  %v1687_v19 = vadd.f32 %v1686_v58, %v1574_v47 }
 0x131   :  { %v1689_v22 = vadd.f32 %v1688_v60, %v1576_v62 }
 0x132   :  { %v1691_v4 = vadd.f32 %v1690_v1, %v1578_v2 }
 0x133   :  { %v2197_v6 = vpack.c.bf16 %v1689_v22, %v1685_v63 }
 0x134   :  { %v2205_v42 = vpack.c.bf16 %v1691_v4, %v1687_v19  ;;  %v1581_v45 = vpop.f32.mrb[12].mxu1 }
 0x135   :  { %v1694_v7 = vpop.f32.mrb[12].mxu0  ;;  %v1582_v12 = vadd.f32 %v1581_v45, %v15112_v40  ;;  %v1583_v52 = vpop.f32.mrb[13].mxu1  ;;  %12133 = vmatmul.mubr.bf16.vlgmr.msra.gmra.mrb[80].mxu1 %v2196_v35 }
 0x136   :  { %v1696_v0 = vpop.f32.mrb[13].mxu0  ;;  %v1584_v5 = vadd.f32 %v1583_v52, %v15117_v48  ;;  %v1585_v20 = vpop.f32.mrb[14].mxu1  ;;  %12137 = vmatpush3.bf16.xpose.msra.mxu1 %v2205_v42  ;;  %12138 = vmatprep.mubr.msk.bf16.mxu1 %vm14095_vm0, %v14094_v54 }
 0x137   :  { %v1698_v27 = vpop.f32.mrb[14].mxu0  ;;  %v1586_v43 = vadd.f32 %v1585_v20, %v15112_v40  ;;  %v1695_v49 = vadd.f32 %v1694_v7, %v1582_v12  ;;  %v1587_v59 = vpop.f32.mrb[15].mxu1  ;;  %12142 = vmatprep.subr.bf16.mxu1 %v14094_v54 }
 0x138   :  { %v1700_v8 = vpop.f32.mrb[15].mxu0  ;;  %v1588_v61 = vadd.f32 %v1587_v59, %v15117_v48  ;;  %v1697_v9 = vadd.f32 %v1696_v0, %v1584_v5 }
 0x139   :  { %v1699_v10 = vadd.f32 %v1698_v27, %v1586_v43 }
 0x13a   :  { %v1701_v13 = vadd.f32 %v1700_v8, %v1588_v61 }
 0x13b   :  { %v2198_v53 = vpack.c.bf16 %v1699_v10, %v1695_v49 }
 0x13c   :  { %v2206_v15 = vpack.c.bf16 %v1701_v13, %v1697_v9  ;;  %v1591_v17 = vpop.f32.mrb[16].mxu1 }
 0x13d   :  { %v1704_v18 = vpop.f32.mrb[16].mxu0  ;;  %v1592_v21 = vadd.f32 %v1591_v17, %v15112_v40  ;;  %v1593_v11 = vpop.f32.mrb[17].mxu1  ;;  %12139 = vmatmul.mubr.bf16.vlgmr.msra.gmra.mrb[84].mxu1 %v2197_v6 }
 0x13e   :  { %v1706_v14 = vpop.f32.mrb[17].mxu0  ;;  %v1594_v25 = vadd.f32 %v1593_v11, %v15117_v48  ;;  %v1595_v29 = vpop.f32.mrb[18].mxu1  ;;  %12143 = vmatpush3.bf16.xpose.msra.mxu1 %v2206_v15  ;;  %12144 = vmatprep.mubr.msk.bf16.mxu1 %vm14095_vm0, %v14094_v54 }
 0x13f   :  { %v1708_v30 = vpop.f32.mrb[18].mxu0  ;;  %v1596_v31 = vadd.f32 %v1595_v29, %v15112_v40  ;;  %v1705_v32 = vadd.f32 %v1704_v18, %v1592_v21  ;;  %v1597_v33 = vpop.f32.mrb[19].mxu1  ;;  %12148 = vmatprep.subr.bf16.mxu1 %v14094_v54 }
 0x140   :  { %v1710_v23 = vpop.f32.mrb[19].mxu0  ;;  %v1598_v26 = vadd.f32 %v1597_v33, %v15117_v48  ;;  %v1707_v34 = vadd.f32 %v1706_v14, %v1594_v25 }
 0x141   :  { %v1709_v37 = vadd.f32 %v1708_v30, %v1596_v31 }
 0x142   :  { %v1711_v39 = vadd.f32 %v1710_v23, %v1598_v26 }
 0x143   :  { %v2199_v41 = vpack.c.bf16 %v1709_v37, %v1705_v32 }
 0x144   :  { %v2207_v44 = vpack.c.bf16 %v1711_v39, %v1707_v34  ;;  %v1601_v46 = vpop.f32.mrb[20].mxu1  ;;  %v15178_v39 = vsub.s32 3, %v15095_v16 }
 0x145   :  { %v1714_v35 = vpop.f32.mrb[20].mxu0  ;;  %v1602_v38 = vadd.f32 %v1601_v46, %v15112_v40  ;;  %v1603_v51 = vpop.f32.mrb[21].mxu1  ;;  %12145 = vmatmul.mubr.bf16.vlgmr.msra.gmra.mrb[88].mxu1 %v2198_v53 }
 0x146   :  { %v1716_v55 = vpop.f32.mrb[21].mxu0  ;;  %v1604_v56 = vadd.f32 %v1603_v51, %v15117_v48  ;;  %v1605_v57 = vpop.f32.mrb[22].mxu1  ;;  %12149 = vmatpush3.bf16.xpose.msra.mxu1 %v2207_v44  ;;  %12150 = vmatprep.mubr.msk.bf16.mxu1 %vm14095_vm0, %v14094_v54  ;;  %21150 = vst [vmem:[#allocation9_spill] sm:$0xff] %v15178_v39  ;;  %v15186_v44 = vrot.slane %v15105_v28, %v15178_v39 }
 0x147   :  { %v1718_v58 = vpop.f32.mrb[22].mxu0  ;;  %v1606_v47 = vadd.f32 %v1605_v57, %v15112_v40  ;;  %v1715_v50 = vadd.f32 %v1714_v35, %v1602_v38  ;;  %v1607_v60 = vpop.f32.mrb[23].mxu1  ;;  %12154 = vmatprep.subr.bf16.mxu1 %v14094_v54 }
 0x148   :  { %v1720_v62 = vpop.f32.mrb[23].mxu0  ;;  %v1608_v63 = vadd.f32 %v1607_v60, %v15117_v48  ;;  %v1717_v3 = vadd.f32 %v1716_v55, %v1604_v56 }
 0x149   :  { %v1719_v1 = vadd.f32 %v1718_v58, %v1606_v47 }
 0x14a   :  { %v1721_v2 = vadd.f32 %v1720_v62, %v1608_v63 }
 0x14b   :  { %v2200_v19 = vpack.c.bf16 %v1719_v1, %v1715_v50 }
 0x14c   :  { %v2208_v22 = vpack.c.bf16 %v1721_v2, %v1717_v3  ;;  %v1611_v4 = vpop.f32.mrb[24].mxu1 }
 0x14d   :  { %v1724_v6 = vpop.f32.mrb[24].mxu0  ;;  %v1612_v42 = vadd.f32 %v1611_v4, %v15112_v40  ;;  %v1613_v45 = vpop.f32.mrb[25].mxu1  ;;  %12151 = vmatmul.mubr.bf16.vlgmr.msra.gmra.mrb[92].mxu1 %v2199_v41 }
 0x14e   :  { %v1726_v7 = vpop.f32.mrb[25].mxu0  ;;  %v1614_v12 = vadd.f32 %v1613_v45, %v15117_v48  ;;  %v1615_v52 = vpop.f32.mrb[26].mxu1  ;;  %12155 = vmatpush3.bf16.xpose.msra.mxu1 %v2208_v22  ;;  %12156 = vmatprep.mubr.msk.bf16.mxu1 %vm14095_vm0, %v14094_v54 }
 0x14f   :  { %v1728_v0 = vpop.f32.mrb[26].mxu0  ;;  %v1616_v5 = vadd.f32 %v1615_v52, %v15112_v40  ;;  %v1725_v20 = vadd.f32 %v1724_v6, %v1612_v42  ;;  %v1617_v27 = vpop.f32.mrb[27].mxu1  ;;  %12160 = vmatprep.subr.bf16.mxu1 %v14094_v54 }
 0x150   :  { %v1730_v43 = vpop.f32.mrb[27].mxu0  ;;  %v1618_v49 = vadd.f32 %v1617_v27, %v15117_v48  ;;  %v1727_v59 = vadd.f32 %v1726_v7, %v1614_v12 }
 0x151   :  { %v1729_v8 = vadd.f32 %v1728_v0, %v1616_v5 }
 0x152   :  { %v1731_v61 = vadd.f32 %v1730_v43, %v1618_v49 }
 0x153   :  { %v2201_v9 = vpack.c.bf16 %v1729_v8, %v1725_v20 }
 0x154   :  { %v2209_v10 = vpack.c.bf16 %v1731_v61, %v1727_v59  ;;  %v1621_v13 = vpop.f32.mrb[28].mxu1 }
 0x155   :  { %v1734_v53 = vpop.f32.mrb[28].mxu0  ;;  %v1622_v15 = vadd.f32 %v1621_v13, %v15112_v40  ;;  %v1623_v17 = vpop.f32.mrb[29].mxu1  ;;  %12157 = vmatmul.mubr.bf16.vlgmr.msra.gmra.mrb[96].mxu1 %v2200_v19 }
 0x156   :  { %v1736_v18 = vpop.f32.mrb[29].mxu0  ;;  %v1624_v21 = vadd.f32 %v1623_v17, %v15117_v48  ;;  %v1625_v11 = vpop.f32.mrb[30].mxu1  ;;  %12161 = vmatpush3.bf16.xpose.msra.mxu1 %v2209_v10  ;;  %12162 = vmatprep.mubr.msk.bf16.mxu1 %vm14095_vm0, %v14094_v54 }
 0x157   :  { %v1738_v14 = vpop.f32.mrb[30].mxu0  ;;  %v1626_v25 = vadd.f32 %v1625_v11, %v15112_v40  ;;  %v1735_v29 = vadd.f32 %v1734_v53, %v1622_v15  ;;  %v1627_v30 = vpop.f32.mrb[31].mxu1  ;;  %12166 = vmatprep.subr.bf16.mxu1 %v14094_v54  ;;  %v15175_v40 = vsub.s32 2, %v15095_v16 }
 0x158   :  { %v1740_v31 = vpop.f32.mrb[31].mxu0  ;;  %v1628_v32 = vadd.f32 %v1627_v30, %v15117_v48  ;;  %v1737_v33 = vadd.f32 %v1736_v18, %v1624_v21 }
 0x159   :  { %v1739_v23 = vadd.f32 %v1738_v14, %v1626_v25  ;;  %21149 = vst [vmem:[#allocation8_spill] sm:$0xff] %v15175_v40  ;;  %v15182_v48 = vrot.slane %v15105_v28, %v15175_v40 }
 0x15a   :  { %v1741_v26 = vadd.f32 %v1740_v31, %v1628_v32 }
 0x15b   :  { %v2202_v34 = vpack.c.bf16 %v1739_v23, %v1735_v29 }
 0x15c   :  { %v2210_v37 = vpack.c.bf16 %v1741_v26, %v1737_v33 }
 0x15d   :  { %12163 = vmatmul.mubr.bf16.vlgmr.msra.gmra.mrb[100].mxu1 %v2201_v9 }
 0x15e   :  { %12167 = vmatpush3.bf16.xpose.msra.mxu1 %v2210_v37  ;;  %12168 = vmatprep.mubr.msk.bf16.mxu1 %vm14095_vm0, %v14094_v54 }
 0x165   :  { %12169 = vmatmul.mubr.bf16.vlgmr.msra.gmra.mrb[104].mxu1 %v2202_v34 }
 0x19c   :  { %v1890_v41 = vpop.f32.mrb[32].mxu1 }
 0x19d   :  { %v1892_v46 = vpop.f32.mrb[33].mxu1  ;;  %v12268_v54 = vadd.f32 %v1890_v41, %v15182_v48 }
 0x19e   :  { %v1894_v35 = vpop.f32.mrb[34].mxu1  ;;  %v12269_v55 = vadd.f32 %v1892_v46, %v15186_v44 }
 0x19f   :  { %v12270_v38 = vadd.f32 %v1894_v35, %v15182_v48  ;;  %v1896_v51 = vpop.f32.mrb[35].mxu1  ;;  %v15198_v3 = vpop.f32.mrb[52].mxu0 }
 0x1a0   :  { %v12271_v56 = vadd.f32 %v1896_v51, %v15186_v44  ;;  %v15203_v19 = vpop.f32.mrb[53].mxu0 }
 0x1a1   :  { %v2211_v57 = vpack.c.bf16 %v12270_v38, %v12268_v54  ;;  %v15208_v4 = vpop.f32.mrb[54].mxu0 }
 0x1a2   :  { %v2212_v58 = vpack.c.bf16 %v12271_v56, %v12269_v55  ;;  %v15212_v42 = vpop.f32.mrb[55].mxu0 }
 0x1a4   :  { %v1900_v47 = vpop.f32.mrb[36].mxu1  ;;  %2759 = vmatprep.subr.bf16.mxu1 %v2212_v58 }
 0x1a5   :  { %v15193_v50 = vadd.f32 %v1900_v47, %v15182_v48  ;;  %v1902_v60 = vpop.f32.mrb[37].mxu1  ;;  %2760 = vmatpush1.bf16.msra.mxu1 %v2211_v57 }
 0x1a6   :  { %v15196_v62 = vadd.f32 %v1902_v60, %v15186_v44  ;;  %v1904_v63 = vpop.f32.mrb[38].mxu1 }
 0x1a7   :  { %v15201_v1 = vadd.f32 %v1904_v63, %v15182_v48  ;;  %v1906_v2 = vpop.f32.mrb[39].mxu1  ;;  %v15222_v20 = vpop.f32.mrb[56].mxu0 }
 0x1a8   :  { %v15206_v22 = vadd.f32 %v1906_v2, %v15186_v44  ;;  %v15227_v49 = vpop.f32.mrb[57].mxu0 }
 0x1a9   :  { %v15232_v8 = vpop.f32.mrb[58].mxu0 }
 0x1aa   :  { %v15236_v9 = vpop.f32.mrb[59].mxu0 }
 0x1ac   :  { %v1910_v7 = vpop.f32.mrb[40].mxu1 }
 0x1ad   :  { %v15217_v12 = vadd.f32 %v1910_v7, %v15182_v48  ;;  %v1912_v52 = vpop.f32.mrb[41].mxu1 }
 0x1ae   :  { %v15220_v0 = vadd.f32 %v1912_v52, %v15186_v44  ;;  %v1914_v5 = vpop.f32.mrb[42].mxu1 }
 0x1af   :  { %v15225_v27 = vadd.f32 %v1914_v5, %v15182_v48  ;;  %v1916_v43 = vpop.f32.mrb[43].mxu1  ;;  %v15246_v21 = vpop.f32.mrb[60].mxu0 }
 0x1b0   :  { %v15230_v59 = vadd.f32 %v1916_v43, %v15186_v44  ;;  %v15251_v25 = vpop.f32.mrb[61].mxu0 }
 0x1b1   :  { %v15256_v30 = vpop.f32.mrb[62].mxu0 }
 0x1b2   :  { %v15260_v32 = vpop.f32.mrb[63].mxu0 }
 0x1b4   :  { %v1920_v13 = vpop.f32.mrb[44].mxu1 }
 0x1b5   :  { %v15241_v53 = vadd.f32 %v1920_v13, %v15182_v48  ;;  %v1922_v15 = vpop.f32.mrb[45].mxu1 }
 0x1b6   :  { %v15244_v17 = vadd.f32 %v1922_v15, %v15186_v44  ;;  %v1924_v18 = vpop.f32.mrb[46].mxu1 }
 0x1b7   :  { %v15249_v11 = vadd.f32 %v1924_v18, %v15182_v48  ;;  %v1926_v14 = vpop.f32.mrb[47].mxu1  ;;  %v2116_v45 = vpop.f32.mrb[32].mxu0 }
 0x1b8   :  { %v15254_v29 = vadd.f32 %v1926_v14, %v15186_v44 }
 0x1bc   :  { %v1930_v23 = vpop.f32.mrb[48].mxu1 }
 0x1bd   :  { %v1932_v26 = vpop.f32.mrb[49].mxu1  ;;  %v12284_v37 = vadd.f32 %v1930_v23, %v15182_v48 }
 0x1be   :  { %v1934_v34 = vpop.f32.mrb[50].mxu1  ;;  %v12285_v35 = vadd.f32 %v1932_v26, %v15186_v44 }
 0x1bf   :  { %v12286_v41 = vadd.f32 %v1934_v34, %v15182_v48  ;;  %v1936_v46 = vpop.f32.mrb[51].mxu1 }
 0x1c0   :  { %v12287_v54 = vadd.f32 %v1936_v46, %v15186_v44  ;;  %v20798_v46 = vsub.s32 5, %v15095_v16 }
 0x1c1   :  { %v2227_v38 = vpack.c.bf16 %v12286_v41, %v12284_v37  ;;  %v20799_v37 = vsub.s32 4, %v15095_v16 }
 0x1c2   :  { %v2228_v51 = vpack.c.bf16 %v12287_v54, %v12285_v35 }
 0x1c4   :  { %v1940_v55 = vpop.f32.mrb[52].mxu1  ;;  %3115 = vmatprep.subr.bf16.mxu0 %v2228_v51  ;;  %v15302_v51 = vrot.slane %v15105_v28, %v20799_v37 }
 0x1c5   :  { %v15269_v56 = vadd.f32 %v1940_v55, %v15182_v48  ;;  %v1942_v57 = vpop.f32.mrb[53].mxu1  ;;  %3116 = vmatpush1.bf16.msra.mxu0 %v2227_v38 }
 0x1c6   :  { %v1944_v58 = vpop.f32.mrb[54].mxu1  ;;  %v12289_v63 = vadd.f32 %v1942_v57, %v15186_v44  ;;  %v15447_v16 = vadd.f32 %v2116_v45, %v15302_v51 }
 0x1c7   :  { %v15272_v47 = vadd.f32 %v1944_v58, %v15182_v48  ;;  %v1946_v60 = vpop.f32.mrb[55].mxu1  ;;  %v15310_v58 = vrot.slane %v15105_v28, %v20798_v46 }
 0x1c8   :  { %v12291_v2 = vadd.f32 %v1946_v60, %v15186_v44 }
 0x1c9   :  { %v2056_v28 = vadd.f32 %v15203_v19, %v15310_v58 }
 0x1ca   :  { %v2232_v52 = vpack.c.bf16 %v12291_v2, %v12289_v63 }
 0x1cc   :  { %v1950_v5 = vpop.f32.mrb[56].mxu1  ;;  %3204 = vmatprep.subr.bf16.mxu0 %v2232_v52 }
 0x1cd   :  { %v15279_v43 = vadd.f32 %v1950_v5, %v15182_v48  ;;  %v1952_v13 = vpop.f32.mrb[57].mxu1  ;;  %v2054_v5 = vadd.f32 %v15198_v3, %v15302_v51 }
 0x1ce   :  { %v15282_v15 = vadd.f32 %v1952_v13, %v15186_v44  ;;  %v1954_v18 = vpop.f32.mrb[58].mxu1 }
 0x1cf   :  { %v15285_v14 = vadd.f32 %v1954_v18, %v15182_v48  ;;  %v1956_v23 = vpop.f32.mrb[59].mxu1 }
 0x1d0   :  { %v15288_v26 = vadd.f32 %v1956_v23, %v15186_v44 }
 0x1d4   :  { %v1960_v35 = vpop.f32.mrb[60].mxu1 }
 0x1d5   :  { %v15297_v54 = vadd.f32 %v1960_v35, %v15182_v48  ;;  %v1962_v38 = vpop.f32.mrb[61].mxu1 }
 0x1d6   :  { %v15305_v55 = vadd.f32 %v1962_v38, %v15186_v44  ;;  %v1964_v57 = vpop.f32.mrb[62].mxu1 }
 0x1d7   :  { %21151 = vst [vmem:[#allocation10_spill] sm:$0xff] %v15297_v54  ;;  %v15313_v60 = vadd.f32 %v1964_v57, %v15182_v48  ;;  %v1966_v63 = vpop.f32.mrb[63].mxu1  ;;  %v2058_v48 = vadd.f32 %v15208_v4, %v15302_v51  ;;  %v2064_v4 = vadd.f32 %v15222_v20, %v15302_v51 }
 0x1d8   :  { %v15316_v2 = vadd.f32 %v1966_v63, %v15186_v44  ;;  %v2060_v44 = vadd.f32 %v15212_v42, %v15310_v58 }
 0x1d9   :  { %21152 = vst [vmem:[#allocation11_spill] sm:$0xff] %v15313_v60 }
 0x1dc   :  { %v2166_v18 = vpop.f32.mrb[64].mxu1 }
 0x1dd   :  { %v15330_v23 = vadd.f32 %v2166_v18, %v2054_v5  ;;  %v2168_v35 = vpop.f32.mrb[65].mxu1  ;;  %v2066_v5 = vadd.f32 %v15227_v49, %v15310_v58  ;;  %v2070_v18 = vadd.f32 %v15236_v9, %v15310_v58  ;;  %v2076_v9 = vadd.f32 %v15251_v25, %v15310_v58 }
 0x1de   :  { %v15332_v38 = vadd.f32 %v2168_v35, %v2056_v28  ;;  %v2170_v57 = vpop.f32.mrb[66].mxu1  ;;  %v2068_v28 = vadd.f32 %v15232_v8, %v15302_v51  ;;  %v2074_v8 = vadd.f32 %v15246_v21, %v15302_v51 }
 0x1df   :  { %21153 = vst [vmem:[#allocation12_spill] sm:$0xff] %v15330_v23  ;;  %v15334_v3 = vadd.f32 %v2170_v57, %v2058_v48  ;;  %v2172_v63 = vpop.f32.mrb[67].mxu1 }
 0x1e0   :  { %21154 = vst [vmem:[#allocation13_spill] sm:$0xff] %v15332_v38  ;;  %v15336_v46 = vadd.f32 %v2172_v63, %v2060_v44 }
 0x1e1   :  { %21155 = vst [vmem:[#allocation14_spill] sm:$0xff] %v15334_v3 }
 0x1e2   :  { %21156 = vst [vmem:[#allocation15_spill] sm:$0xff] %v15336_v46 }
 0x1e4   :  { %v2176_v48 = vpop.f32.mrb[68].mxu1 }
 0x1e5   :  { %v2178_v44 = vpop.f32.mrb[69].mxu1  ;;  %v15350_v35 = vadd.f32 %v2176_v48, %v2064_v4 }
 0x1e6   :  { %v2180_v57 = vpop.f32.mrb[70].mxu1  ;;  %v15352_v63 = vadd.f32 %v2178_v44, %v2066_v5  ;;  %v2078_v5 = vadd.f32 %v15256_v30, %v15302_v51 }
 0x1e7   :  { %21157 = vst [vmem:[#allocation16_spill] sm:$0xff] %v15350_v35  ;;  %v2182_v20 = vpop.f32.mrb[71].mxu1  ;;  %v15354_v37 = vadd.f32 %v2180_v57, %v2068_v28  ;;  %v2080_v28 = vadd.f32 %v15260_v32, %v15310_v58 }
 0x1e8   :  { %21158 = vst [vmem:[#allocation17_spill] sm:$0xff] %v15352_v63  ;;  %v15356_v19 = vadd.f32 %v2182_v20, %v2070_v18 }
 0x1e9   :  { %21159 = vst [vmem:[#allocation18_spill] sm:$0xff] %v15354_v37 }
 0x1ea   :  { %21160 = vst [vmem:[#allocation19_spill] sm:$0xff] %v15356_v19 }
 0x1ec   :  { %v2186_v48 = vpop.f32.mrb[72].mxu1 }
 0x1ed   :  { %v2188_v18 = vpop.f32.mrb[73].mxu1  ;;  %v15370_v44 = vadd.f32 %v2186_v48, %v2074_v8 }
 0x1ee   :  { %v2190_v57 = vpop.f32.mrb[74].mxu1  ;;  %v15372_v20 = vadd.f32 %v2188_v18, %v2076_v9 }
 0x1ef   :  { %21161 = vst [vmem:[#allocation20_spill] sm:$0xff] %v15370_v44  ;;  %v2192_v21 = vpop.f32.mrb[75].mxu1  ;;  %v15374_v49 = vadd.f32 %v2190_v57, %v2078_v5 }
 0x1f0   :  { %21162 = vst [vmem:[#allocation21_spill] sm:$0xff] %v15372_v20  ;;  %v15376_v25 = vadd.f32 %v2192_v21, %v2080_v28 }
 0x1f1   :  { %21163 = vst [vmem:[#allocation22_spill] sm:$0xff] %v15374_v49 }
 0x1f2   :  { %21164 = vst [vmem:[#allocation23_spill] sm:$0xff] %v15376_v25 }
 0x200   :  { %v15382_v42 = vpop.f32.mrb[76].mxu1 }
 0x201   :  { %v12128_v32 = vpop.f32.mrb[77].mxu1  ;;  %v2572_v8 = vsel %vm2571_vm1, %v15382_v42, -inf }
 0x202   :  { %2573 = vmax.xlane.f32.xlu0 %v2572_v8  ;;  %v15386_v9 = vpop.f32.mrb[78].mxu1 }
 0x203   :  { %v12129_v5 = vpop.f32.mrb[79].mxu1  ;;  %v2575_v48 = vsel %vm2571_vm1, %v15386_v9, -inf }
 0x206   :  { %2576 = vmax.xlane.f32.xlu0 %v2575_v48 }
 0x208   :  { %v15390_v28 = vpop.f32.mrb[80].mxu1 }
 0x209   :  { %v2578_v18 = vsel %vm2571_vm1, %v15390_v28, -inf  ;;  %v12134_v57 = vpop.f32.mrb[81].mxu1 }
 0x20a   :  { %2579 = vmax.xlane.f32.xlu1 %v2578_v18  ;;  %v15394_v21 = vpop.f32.mrb[82].mxu1 }
 0x20b   :  { %v12135_v32 = vpop.f32.mrb[83].mxu1  ;;  %v2581_v8 = vsel %vm2571_vm1, %v15394_v21, -inf }
 0x20e   :  { %2582 = vmax.xlane.f32.xlu1 %v2581_v8 }
 0x210   :  { %v15398_v4 = vpop.f32.mrb[84].mxu1 }
 0x211   :  { %v12140_v5 = vpop.f32.mrb[85].mxu1  ;;  %v2584_v48 = vsel %vm2571_vm1, %v15398_v4, -inf }
 0x212   :  { %2585 = vmax.xlane.f32.xlu0 %v2584_v48  ;;  %v15402_v30 = vpop.f32.mrb[86].mxu1 }
 0x213   :  { %v2587_v57 = vsel %vm2571_vm1, %v15402_v30, -inf  ;;  %v12141_v18 = vpop.f32.mrb[87].mxu1 }
 0x214   :  { %2588 = vmax.xlane.f32.xlu1 %v2587_v57 }
 0x218   :  { %v15406_v52 = vpop.f32.mrb[88].mxu1 }
 0x219   :  { %v12146_v32 = vpop.f32.mrb[89].mxu1  ;;  %v2590_v8 = vsel %vm2571_vm1, %v15406_v52, -inf }
 0x21a   :  { %2591 = vmax.xlane.f32.xlu0 %v2590_v8  ;;  %v15410_v31 = vpop.f32.mrb[90].mxu1 }
 0x21b   :  { %v2593_v5 = vsel %vm2571_vm1, %v15410_v31, -inf  ;;  %v12147_v48 = vpop.f32.mrb[91].mxu1 }
 0x21c   :  { %2594 = vmax.xlane.f32.xlu1 %v2593_v5 }
 0x220   :  { %v15414_v13 = vpop.f32.mrb[92].mxu1 }
 0x221   :  { %v12152_v34 = vpop.f32.mrb[93].mxu1  ;;  %v2596_v57 = vsel %vm2571_vm1, %v15414_v13, -inf }
 0x222   :  { %2597 = vmax.xlane.f32.xlu0 %v2596_v57  ;;  %v15418_v18 = vpop.f32.mrb[94].mxu1 }
 0x223   :  { %v2599_v32 = vsel %vm2571_vm1, %v15418_v18, -inf  ;;  %v12153_v8 = vpop.f32.mrb[95].mxu1 }
 0x224   :  { %2600 = vmax.xlane.f32.xlu1 %v2599_v32 }
 0x228   :  { %v15422_v33 = vpop.f32.mrb[96].mxu1 }
 0x229   :  { %v12158_v41 = vpop.f32.mrb[97].mxu1  ;;  %v2602_v5 = vsel %vm2571_vm1, %v15422_v33, -inf }
 0x22a   :  { %2603 = vmax.xlane.f32.xlu0 %v2602_v5  ;;  %v15426_v48 = vpop.f32.mrb[98].mxu1 }
 0x22b   :  { %v2605_v34 = vsel %vm2571_vm1, %v15426_v48, -inf  ;;  %v12159_v57 = vpop.f32.mrb[99].mxu1 }
 0x22c   :  { %2606 = vmax.xlane.f32.xlu1 %v2605_v34 }
 0x230   :  { %v15430_v7 = vpop.f32.mrb[100].mxu1 }
 0x231   :  { %v12164_v61 = vpop.f32.mrb[101].mxu1  ;;  %v2608_v32 = vsel %vm2571_vm1, %v15430_v7, -inf }
 0x232   :  { %2609 = vmax.xlane.f32.xlu0 %v2608_v32  ;;  %v15434_v8 = vpop.f32.mrb[102].mxu1 }
 0x233   :  { %v2611_v41 = vsel %vm2571_vm1, %v15434_v8, -inf  ;;  %v12165_v5 = vpop.f32.mrb[103].mxu1 }
 0x234   :  { %2612 = vmax.xlane.f32.xlu1 %v2611_v41  ;;  %v2118_v5 = vpop.f32.mrb[33].mxu0 }
 0x235   :  { %v12301_v41 = vadd.f32 %v2118_v5, %v15310_v58  ;;  %v2120_v40 = vpop.f32.mrb[34].mxu0 }
 0x236   :  { %v2122_v39 = vpop.f32.mrb[35].mxu0 }
 0x237   :  { %v2126_v24 = vpop.f32.mrb[36].mxu0 }
 0x238   :  { %v15438_v10 = vpop.f32.mrb[104].mxu1 }
 0x239   :  { %v12170_v6 = vpop.f32.mrb[105].mxu1  ;;  %v2614_v34 = vsel %vm2571_vm1, %v15438_v10, -inf }
 0x23a   :  { %2615 = vmax.xlane.f32.xlu0 %v2614_v34  ;;  %v15442_v57 = vpop.f32.mrb[106].mxu1  ;;  %v15451_v6 = vadd.f32 %v2120_v40, %v15302_v51  ;;  %v12303_v34 = vadd.f32 %v2122_v39, %v15310_v58 }
 0x23b   :  { %v2617_v61 = vsel %vm2571_vm1, %v15442_v57, -inf  ;;  %v12171_v32 = vpop.f32.mrb[107].mxu1 }
 0x23c   :  { %2618 = vmax.xlane.f32.xlu1 %v2617_v61  ;;  %v15457_v61 = vadd.f32 %v2126_v24, %v15302_v51  ;;  %v2128_v32 = vpop.f32.mrb[37].mxu0  ;;  %v2214_v45 = vpack.c.bf16 %v12303_v34, %v12301_v41 }
 0x23d   :  { %v15460_v44 = vadd.f32 %v2128_v32, %v15310_v58  ;;  %v2130_v5 = vpop.f32.mrb[38].mxu0 }
 0x23e   :  { %v15463_v49 = vadd.f32 %v2130_v5, %v15302_v51  ;;  %v2132_v40 = vpop.f32.mrb[39].mxu0  ;;  %2802 = vmatprep.subr.bf16.mxu1 %v2214_v45 }
 0x23f   :  { %v15466_v39 = vadd.f32 %v2132_v40, %v15310_v58  ;;  %v2136_v20 = vpop.f32.mrb[40].mxu0 }
 0x240   :  { %v15471_v24 = vadd.f32 %v2136_v20, %v15302_v51  ;;  %v2138_v41 = vpop.f32.mrb[41].mxu0 }
 0x241   :  { %v15476_v32 = vadd.f32 %v2138_v41, %v15310_v58  ;;  %v2140_v5 = vpop.f32.mrb[42].mxu0 }
 0x242   :  { %v15479_v45 = vadd.f32 %v2140_v5, %v15302_v51  ;;  %v2142_v40 = vpop.f32.mrb[43].mxu0 }
 0x243   :  { %v15482_v25 = vadd.f32 %v2142_v40, %v15310_v58  ;;  %v2146_v35 = vpop.f32.mrb[44].mxu0 }
 0x244   :  { %v15487_v36 = vadd.f32 %v2146_v35, %v15302_v51  ;;  %v2148_v37 = vpop.f32.mrb[45].mxu0 }
 0x245   :  { %v15492_v34 = vadd.f32 %v2148_v37, %v15310_v58  ;;  %v2150_v5 = vpop.f32.mrb[46].mxu0 }
 0x246   :  { %21165 = vst [vmem:[#allocation24_spill] sm:$0xff] %v15487_v36  ;;  %v15495_v63 = vadd.f32 %v2150_v5, %v15302_v51  ;;  %v2152_v40 = vpop.f32.mrb[47].mxu0 }
 0x247   :  { %v15498_v19 = vadd.f32 %v2152_v40, %v15310_v58  ;;  %v2156_v23 = vpop.f32.mrb[48].mxu0 }
 0x248   :  { %21166 = vst [vmem:[#allocation25_spill] sm:$0xff] %v15495_v63  ;;  %v15503_v20 = vadd.f32 %v2156_v23, %v15302_v51  ;;  %v2158_v3 = vpop.f32.mrb[49].mxu0 }
 0x249   :  { %v15508_v41 = vadd.f32 %v2158_v3, %v15310_v58  ;;  %v2160_v5 = vpop.f32.mrb[50].mxu0 }
 0x24a   :  { %21167 = vst [vmem:[#allocation26_spill] sm:$0xff] %v15503_v20  ;;  %v15511_v38 = vadd.f32 %v2160_v5, %v15302_v51  ;;  %v2162_v40 = vpop.f32.mrb[51].mxu0 }
 0x24b   :  { %v15514_v46 = vadd.f32 %v2162_v40, %v15310_v58 }
 0x24c   :  { %21168 = vst [vmem:[#allocation27_spill] sm:$0xff] %v15511_v38 }
 0x28f   :  { %v2574_v36 = vpop.xlane.xlu0 %2573 }
 0x290   :  { %v2620_v37 = vsub.f32 %v15382_v42, %v2574_v36 }
 0x292   :  { %v2636_v63 = vmul.f32 1.442695, %v2620_v37 }
 0x293   :  { %v2577_v3 = vpop.xlane.xlu0 %2576 }
 0x294   :  { %13662 = vpow2.f32 %v2636_v63  ;;  %v2621_v54 = vsub.f32 %v15386_v9, %v2577_v3 }
 0x296   :  { %v2638_v51 = vmul.f32 1.442695, %v2621_v54 }
 0x297   :  { %v2580_v5 = vpop.xlane.xlu1 %2579 }
 0x298   :  { %13664 = vpow2.f32 %v2638_v51  ;;  %v2622_v58 = vsub.f32 %v15390_v28, %v2580_v5 }
 0x29a   :  { %v2640_v40 = vmul.f32 1.442695, %v2622_v58 }
 0x29b   :  { %v2583_v60 = vpop.xlane.xlu1 %2582 }
 0x29c   :  { %13666 = vpow2.f32 %v2640_v40  ;;  %v2623_v35 = vsub.f32 %v15394_v21, %v2583_v60 }
 0x29e   :  { %v15524_v20 = vpop.eup %13662  ;;  %v2642_v23 = vmul.f32 1.442695, %v2623_v35 }
 0x29f   :  { %v2586_v38 = vpop.xlane.xlu0 %2585  ;;  %v2668_v36 = vsel %vm2571_vm1, %v15524_v20, 0.0 }
 0x2a0   :  { %13668 = vpow2.f32 %v2642_v23  ;;  %v2624_v42 = vsub.f32 %v15398_v4, %v2586_v38  ;;  %2669 = vadd.xlane.f32.xlu0 %v2668_v36 }
 0x2a1   :  { %v2589_v54 = vpop.xlane.xlu1 %2588 }
 0x2a2   :  { %v15529_v63 = vpop.eup %13664  ;;  %v2644_v9 = vmul.f32 1.442695, %v2624_v42  ;;  %v2625_v28 = vsub.f32 %v15402_v30, %v2589_v54 }
 0x2a3   :  { %v2671_v60 = vsel %vm2571_vm1, %v15529_v63, 0.0 }
 0x2a4   :  { %13670 = vpow2.f32 %v2644_v9  ;;  %v2646_v21 = vmul.f32 1.442695, %v2625_v28  ;;  %2672 = vadd.xlane.f32.xlu1 %v2671_v60 }
 0x2a6   :  { %v15534_v35 = vpop.eup %13666  ;;  %13672 = vpow2.f32 %v2646_v21 }
 0x2a7   :  { %v2592_v37 = vpop.xlane.xlu0 %2591  ;;  %v2674_v38 = vsel %vm2571_vm1, %v15534_v35, 0.0 }
 0x2a8   :  { %v2626_v4 = vsub.f32 %v15406_v52, %v2592_v37  ;;  %2675 = vadd.xlane.f32.xlu0 %v2674_v38 }
 0x2a9   :  { %v2595_v23 = vpop.xlane.xlu1 %2594 }
 0x2aa   :  { %v15539_v3 = vpop.eup %13668  ;;  %v2648_v30 = vmul.f32 1.442695, %v2626_v4  ;;  %v2627_v51 = vsub.f32 %v15410_v31, %v2595_v23 }
 0x2ab   :  { %v2677_v5 = vsel %vm2571_vm1, %v15539_v3, 0.0 }
 0x2ac   :  { %13674 = vpow2.f32 %v2648_v30  ;;  %v2650_v58 = vmul.f32 1.442695, %v2627_v51  ;;  %2678 = vadd.xlane.f32.xlu1 %v2677_v5 }
 0x2ae   :  { %v15544_v40 = vpop.eup %13670  ;;  %13676 = vpow2.f32 %v2650_v58 }
 0x2af   :  { %v2598_v36 = vpop.xlane.xlu0 %2597  ;;  %v2680_v52 = vsel %vm2571_vm1, %v15544_v40, 0.0 }
 0x2b0   :  { %v15548_v42 = vpop.eup %13672  ;;  %v2628_v54 = vsub.f32 %v15414_v13, %v2598_v36  ;;  %2681 = vadd.xlane.f32.xlu0 %v2680_v52 }
 0x2b1   :  { %v2601_v9 = vpop.xlane.xlu1 %2600  ;;  %v2683_v31 = vsel %vm2571_vm1, %v15548_v42, 0.0 }
 0x2b2   :  { %v2652_v28 = vmul.f32 1.442695, %v2628_v54  ;;  %v2629_v60 = vsub.f32 %v15418_v18, %v2601_v9  ;;  %2684 = vadd.xlane.f32.xlu1 %v2683_v31  ;;  %v14096_v31 = vmov 0  }
 0x2b3   :  { %2791 = vmatprep.mubr.bf16.mxu1 %v14096_v31  ;;  %3147 = vmatprep.mubr.bf16.mxu0 %v14096_v31 }
 0x2b4   :  { %13678 = vpow2.f32 %v2652_v28  ;;  %v2654_v21 = vmul.f32 1.442695, %v2629_v60  ;;  %12669 = vset.pattern.permute.xlu1 %v14096_v31  ;;  %12668 = vset.pattern.permute.xlu0 %v14096_v31 }
 0x2b6   :  { %v15554_v37 = vpop.eup %13674  ;;  %13680 = vpow2.f32 %v2654_v21 }
 0x2b7   :  { %v2604_v38 = vpop.xlane.xlu0 %2603  ;;  %v2686_v4 = vsel %vm2571_vm1, %v15554_v37, 0.0 }
 0x2b8   :  { %v15558_v23 = vpop.eup %13676  ;;  %v2630_v13 = vsub.f32 %v15422_v33, %v2604_v38  ;;  %2687 = vadd.xlane.f32.xlu0 %v2686_v4 }
 0x2b9   :  { %v2607_v30 = vpop.xlane.xlu1 %2606  ;;  %v2689_v51 = vsel %vm2571_vm1, %v15558_v23, 0.0 }
 0x2ba   :  { %v2656_v18 = vmul.f32 1.442695, %v2630_v13  ;;  %v2631_v5 = vsub.f32 %v15426_v48, %v2607_v30  ;;  %2690 = vadd.xlane.f32.xlu1 %v2689_v51 }
 0x2bc   :  { %13682 = vpow2.f32 %v2656_v18  ;;  %v2658_v58 = vmul.f32 1.442695, %v2631_v5 }
 0x2be   :  { %v15564_v36 = vpop.eup %13678  ;;  %13684 = vpow2.f32 %v2658_v58 }
 0x2bf   :  { %v2610_v52 = vpop.xlane.xlu0 %2609  ;;  %v2692_v54 = vsel %vm2571_vm1, %v15564_v36, 0.0 }
 0x2c0   :  { %v15568_v9 = vpop.eup %13680  ;;  %v2632_v33 = vsub.f32 %v15430_v7, %v2610_v52  ;;  %2693 = vadd.xlane.f32.xlu0 %v2692_v54 }
 0x2c1   :  { %v2613_v28 = vpop.xlane.xlu1 %2612  ;;  %v2695_v48 = vsel %vm2571_vm1, %v15568_v9, 0.0 }
 0x2c2   :  { %v2660_v60 = vmul.f32 1.442695, %v2632_v33  ;;  %v2633_v21 = vsub.f32 %v15434_v8, %v2613_v28  ;;  %2696 = vadd.xlane.f32.xlu1 %v2695_v48 }
 0x2c4   :  { %13686 = vpow2.f32 %v2660_v60  ;;  %v2662_v7 = vmul.f32 1.442695, %v2633_v21 }
 0x2c6   :  { %v15578_v38 = vpop.eup %13682  ;;  %13688 = vpow2.f32 %v2662_v7 }
 0x2c7   :  { %v2616_v4 = vpop.xlane.xlu0 %2615  ;;  %v2698_v13 = vsel %vm2571_vm1, %v15578_v38, 0.0 }
 0x2c8   :  { %v15582_v30 = vpop.eup %13684  ;;  %v2634_v51 = vsub.f32 %v15438_v10, %v2616_v4  ;;  %2699 = vadd.xlane.f32.xlu0 %v2698_v13 }
 0x2c9   :  { %v2619_v18 = vpop.xlane.xlu1 %2618  ;;  %v2701_v8 = vsel %vm2571_vm1, %v15582_v30, 0.0 }
 0x2ca   :  { %v2664_v5 = vmul.f32 1.442695, %v2634_v51  ;;  %v2635_v58 = vsub.f32 %v15442_v57, %v2619_v18  ;;  %2702 = vadd.xlane.f32.xlu1 %v2701_v8 }
 0x2cc   :  { %13690 = vpow2.f32 %v2664_v5  ;;  %v2666_v52 = vmul.f32 1.442695, %v2635_v58 }
 0x2ce   :  { %v15588_v54 = vpop.eup %13686  ;;  %13692 = vpow2.f32 %v2666_v52 }
 0x2cf   :  { %v2704_v33 = vsel %vm2571_vm1, %v15588_v54, 0.0 }
 0x2d0   :  { %v15592_v28 = vpop.eup %13688  ;;  %2705 = vadd.xlane.f32.xlu0 %v2704_v33  ;;  %v21169_v33 = vpack.c.bf16 %v15451_v6, %v15447_v16 }
 0x2d1   :  { %v2707_v10 = vsel %vm2571_vm1, %v15592_v28, 0.0 }
 0x2d2   :  { %2708 = vadd.xlane.f32.xlu1 %v2707_v10  ;;  %v21170_v10 = vpack.c.bf16 %v15206_v22, %v15196_v62  ;;  %v21172_v62 = vpack.c.bf16 %v15466_v39, %v15460_v44 }
 0x2d6   :  { %v15596_v48 = vpop.eup %13690 }
 0x2d7   :  { %v2710_v57 = vsel %vm2571_vm1, %v15596_v48, 0.0 }
 0x2d8   :  { %v15600_v60 = vpop.eup %13692  ;;  %2711 = vadd.xlane.f32.xlu0 %v2710_v57 }
 0x2d9   :  { %v2713_v21 = vsel %vm2571_vm1, %v15600_v60, 0.0 }
 0x2da   :  { %2714 = vadd.xlane.f32.xlu1 %v2713_v21 }
 0x32d   :  { %v2670_v7 = vpop.xlane.xlu0 %2669 }
 0x32e   :  { %13694 = vrcp.f32 %v2670_v7 }
 0x331   :  { %v2673_v4 = vpop.xlane.xlu1 %2672 }
 0x332   :  { %13696 = vrcp.f32 %v2673_v4  ;;  %v21171_v4 = vpack.c.bf16 %v15201_v1, %v15193_v50  ;;  %v21173_v50 = vpack.c.bf16 %v15463_v49, %v15457_v61  ;;  %v21174_v1 = vpack.c.bf16 %v15230_v59, %v15220_v0 }
 0x333   :  { %v21175_v49 = vpack.c.bf16 %v15225_v27, %v15217_v12 }
 0x335   :  { %v2676_v58 = vpop.xlane.xlu0 %2675 }
 0x338   :  { %v13695_v13 = vpop.eup %13694 }
 0x339   :  { %v2679_v51 = vpop.xlane.xlu1 %2678  ;;  %v2717_v8 = vmul.f32 %v13695_v13, %v15524_v20 }
 0x33a   :  { %13698 = vrcp.f32 %v2679_v51 }
 0x33b   :  { %13700 = vrcp.f32 %v2676_v58  ;;  %v21176_v58 = vpack.c.bf16 %v15482_v25, %v15476_v32  ;;  %v21178_v25 = vpack.c.bf16 %v15288_v26, %v15282_v15 }
 0x33c   :  { %v13697_v18 = vpop.eup %13696 }
 0x33d   :  { %v2719_v5 = vmul.f32 %v13697_v18, %v15529_v63  ;;  %v2682_v57 = vpop.xlane.xlu0 %2681 }
 0x33f   :  { %v2748_v52 = vpack.c.bf16 %v2719_v5, %v2717_v8  ;;  %v2685_v20 = vpop.xlane.xlu1 %2684 }
 0x340   :  { %13702 = vrcp.f32 %v2685_v20 }
 0x341   :  { %11606 = vmatmul.mubr.msk.bf16.vlgmr.msra.gmra.mrb[108].mxu1 %vm2571_vm1, %v2748_v52 }
 0x342   :  { %2803 = vmatpush1.bf16.msra.mxu1 %v21169_v33  ;;  %2834 = vmatprep.mubr.bf16.mxu1 %v14096_v31 }
 0x343   :  { %2848 = vmatprep.subr.bf16.mxu1 %v21170_v10 }
 0x344   :  { %v13699_v21 = vpop.eup %13698 }
 0x345   :  { %v2688_v63 = vpop.xlane.xlu0 %2687  ;;  %v13701_v7 = vpop.eup %13700  ;;  %v2723_v16 = vmul.f32 %v13699_v21, %v15539_v3 }
 0x346   :  { %v2721_v22 = vmul.f32 %v13701_v7, %v15534_v35 }
 0x347   :  { %v2691_v6 = vpop.xlane.xlu1 %2690 }
 0x348   :  { %v2749_v18 = vpack.c.bf16 %v2723_v16, %v2721_v22  ;;  %v21192_v22 = vld [vmem:[#allocation27_spill] sm:$0xff] }
 0x349   :  { %11607 = vmatmul.mubr.msk.bf16.vlgmr.msra.gmra.mrb[112].mxu1 %vm2571_vm1, %v2748_v52 }
 0x34a   :  { %2849 = vmatpush1.bf16.msra.mxu1 %v21171_v4  ;;  %2880 = vmatprep.mubr.bf16.mxu1 %v14096_v31  ;;  %v13703_v39 = vpop.eup %13702  ;;  %v21186_v4 = vld [vmem:[#allocation10_spill] sm:$0xff] }
 0x34b   :  { %2891 = vmatprep.subr.bf16.mxu1 %v21172_v62  ;;  %v2727_v61 = vmul.f32 %v13703_v39, %v15548_v42 }
 0x34d   :  { %v2694_v13 = vpop.xlane.xlu0 %2693 }
 0x34e   :  { %13704 = vrcp.f32 %v2694_v13  ;;  %v21193_v13 = vld [vmem:[#allocation26_spill] sm:$0xff] }
 0x34f   :  { %13706 = vrcp.f32 %v2682_v57  ;;  %v2697_v51 = vpop.xlane.xlu1 %2696 }
 0x350   :  { %13708 = vrcp.f32 %v2697_v51  ;;  %v21194_v51 = vpack.c.bf16 %v21192_v22, %v21193_v13 }
 0x351   :  { %11608 = vmatmul.mubr.msk.bf16.vlgmr.msra.gmra.mrb[116].mxu1 %vm2571_vm1, %v2749_v18 }
 0x352   :  { %2892 = vmatpush1.bf16.msra.mxu1 %v21173_v50  ;;  %2923 = vmatprep.mubr.bf16.mxu1 %v14096_v31  ;;  %v21196_v50 = vld [vmem:[#allocation13_spill] sm:$0xff] }
 0x353   :  { %2937 = vmatprep.subr.bf16.mxu1 %v21174_v1  ;;  %v21201_v1 = vld [vmem:[#allocation19_spill] sm:$0xff] }
 0x355   :  { %v2700_v44 = vpop.xlane.xlu0 %2699 }
 0x356   :  { %13710 = vrcp.f32 %v2700_v44  ;;  %v21202_v44 = vld [vmem:[#allocation17_spill] sm:$0xff] }
 0x357   :  { %v2703_v35 = vpop.xlane.xlu1 %2702  ;;  %v21203_v39 = vpack.c.bf16 %v21201_v1, %v21202_v44 }
 0x358   :  { %v13705_v3 = vpop.eup %13704  ;;  %13712 = vrcp.f32 %v2703_v35  ;;  %v21204_v35 = vld [vmem:[#allocation18_spill] sm:$0xff] }
 0x359   :  { %v13707_v8 = vpop.eup %13706  ;;  %11609 = vmatmul.mubr.msk.bf16.vlgmr.msra.gmra.mrb[120].mxu1 %vm2571_vm1, %v2749_v18  ;;  %v2733_v0 = vmul.f32 %v13705_v3, %v15564_v36  ;;  %13714 = vrcp.f32 %v2691_v6  ;;  %v21177_v36 = vpack.c.bf16 %v15272_v47, %v15269_v56  ;;  %v21180_v47 = vpack.c.bf16 %v15254_v29, %v15244_v17  ;;  %v21195_v18 = vld [vmem:[#allocation15_spill] sm:$0xff]  ;;  %v21205_v3 = vld [vmem:[#allocation16_spill] sm:$0xff] }
 0x35a   :  { %v13709_v5 = vpop.eup %13708  ;;  %2938 = vmatpush1.bf16.msra.mxu1 %v21175_v49  ;;  %2969 = vmatprep.mubr.bf16.mxu1 %v14096_v31  ;;  %v2725_v52 = vmul.f32 %v13707_v8, %v15544_v40  ;;  %v21179_v40 = vpack.c.bf16 %v15479_v45, %v15471_v24  ;;  %v21181_v24 = vpack.c.bf16 %v15285_v14, %v15279_v43  ;;  %v21208_v49 = vld [vmem:[#allocation21_spill] sm:$0xff] }
 0x35b   :  { %v2735_v59 = vmul.f32 %v13709_v5, %v15568_v9  ;;  %2980 = vmatprep.subr.bf16.mxu1 %v21176_v58  ;;  %v21182_v17 = vpack.c.bf16 %v15316_v2, %v15305_v55  ;;  %v21191_v6 = vpack.c.bf16 %v15514_v46, %v15508_v41  ;;  %v21199_v46 = vld [vmem:[#allocation12_spill] sm:$0xff]  ;;  %v21206_v8 = vpack.c.bf16 %v21204_v35, %v21205_v3  ;;  %v21207_v5 = vld [vmem:[#allocation23_spill] sm:$0xff] }
 0x35c   :  { %v2750_v27 = vpack.c.bf16 %v2727_v61, %v2725_v52  ;;  %v21209_v61 = vpack.c.bf16 %v21207_v5, %v21208_v49 }
 0x35d   :  { %v2752_v33 = vpack.c.bf16 %v2735_v59, %v2733_v0  ;;  %v2706_v10 = vpop.xlane.xlu0 %2705  ;;  %v21210_v0 = vld [vmem:[#allocation22_spill] sm:$0xff]  ;;  %v21211_v59 = vld [vmem:[#allocation20_spill] sm:$0xff] }
 0x35e   :  { %13716 = vrcp.f32 %v2706_v10  ;;  %v21212_v58 = vpack.c.bf16 %v21210_v0, %v21211_v59 }
 0x35f   :  { %13718 = vrcp.f32 %v2688_v63  ;;  %11614 = vmatmul.mubr.msk.bf16.vlgmr.msra.gmra.mrb[64].mxu0 %vm2571_vm1, %v2752_v33  ;;  %v2709_v12 = vpop.xlane.xlu1 %2708  ;;  %v21184_v63 = vpack.c.bf16 %v15498_v19, %v15492_v34 }
 0x360   :  { %v13711_v42 = vpop.eup %13710  ;;  %3205 = vmatpush1.bf16.msra.mxu0 %v21177_v36  ;;  %13720 = vrcp.f32 %v2709_v12  ;;  %3236 = vmatprep.mubr.bf16.mxu0 %v14096_v31  ;;  %v15738_v36 = vld [vmem:[%s21144_s9 + $0x10] sm:$0xff] }
 0x361   :  { %3293 = vmatprep.subr.bf16.mxu0 %v21178_v25  ;;  %11610 = vmatmul.mubr.msk.bf16.vlgmr.msra.gmra.mrb[124].mxu1 %vm2571_vm1, %v2750_v27  ;;  %v2737_v9 = vmul.f32 %v13711_v42, %v15578_v38  ;;  %v21183_v38 = vpack.c.bf16 %v15249_v11, %v15241_v53  ;;  %v21185_v11 = vld [vmem:[#allocation11_spill] sm:$0xff]  ;;  %21214 = vst [vmem:[#allocation10_spill] sm:$0xff] %v15738_v36  ;;  %v20850_v25 = vunpack.c.h.bf16 %v15738_v36 }
 0x362   :  { %v13713_v32 = vpop.eup %13712  ;;  %2981 = vmatpush1.bf16.msra.mxu1 %v21179_v40  ;;  %3012 = vmatprep.mubr.bf16.mxu1 %v14096_v31  ;;  %v21187_v16 = vpack.c.bf16 %v21185_v11, %v21186_v4 }
 0x363   :  { %v2739_v56 = vmul.f32 %v13713_v32, %v15582_v30  ;;  %3026 = vmatprep.subr.bf16.mxu1 %v21180_v47  ;;  %v13715_v26 = vpop.eup %13714 }
 0x364   :  { %v2731_v43 = vmul.f32 %v13715_v26, %v15558_v23 }
 0x365   :  { %v2712_v57 = vpop.xlane.xlu0 %2711  ;;  %v2753_v15 = vpack.c.bf16 %v2739_v56, %v2737_v9  ;;  %v15753_v56 = vld [vmem:[%s21144_s9 + $0x8] sm:$0xff] }
 0x366   :  { %13722 = vrcp.f32 %v2712_v57  ;;  %v20833_v47 = vunpack.c.l.bf16 %v15753_v56  ;;  %v20835_v57 = vunpack.c.h.bf16 %v15753_v56 }
 0x367   :  { %11616 = vmatmul.mubr.msk.bf16.vlgmr.msra.gmra.mrb[68].mxu0 %vm2571_vm1, %v2753_v15  ;;  %v2715_v20 = vpop.xlane.xlu1 %2714 }
 0x368   :  { %v13717_v21 = vpop.eup %13716  ;;  %3294 = vmatpush1.bf16.msra.mxu0 %v21181_v24  ;;  %13724 = vrcp.f32 %v2715_v20  ;;  %3325 = vmatprep.mubr.bf16.mxu0 %v14096_v31  ;;  %v15768_v20 = vld [vmem:[%s21144_s9 + $0x18] sm:$0xff] }
 0x369   :  { %v13719_v45 = vpop.eup %13718  ;;  %3382 = vmatprep.subr.bf16.mxu0 %v21182_v17  ;;  %11611 = vmatmul.mubr.msk.bf16.vlgmr.msra.gmra.mrb[128].mxu1 %vm2571_vm1, %v2750_v27  ;;  %v2741_v14 = vmul.f32 %v13717_v21, %v15588_v54  ;;  %v21188_v54 = vld [vmem:[#allocation25_spill] sm:$0xff]  ;;  %v20832_v21 = vunpack.c.l.bf16 %v15768_v20 }
 0x36a   :  { %v13721_v29 = vpop.eup %13720  ;;  %3027 = vmatpush1.bf16.msra.mxu1 %v21183_v38  ;;  %3058 = vmatprep.mubr.bf16.mxu1 %v14096_v31  ;;  %v2729_v55 = vmul.f32 %v13719_v45, %v15554_v37  ;;  %21215 = vst [vmem:[#allocation25_spill] sm:$0xff] %v15753_v56  ;;  %v20834_v45 = vunpack.c.h.bf16 %v15768_v20 }
 0x36b   :  { %v2743_v30 = vmul.f32 %v13721_v29, %v15592_v28  ;;  %3069 = vmatprep.subr.bf16.mxu1 %v21184_v63  ;;  %v21189_v28 = vld [vmem:[#allocation24_spill] sm:$0xff] }
 0x36c   :  { %v2751_v7 = vpack.c.bf16 %v2731_v43, %v2729_v55  ;;  %v21190_v19 = vpack.c.bf16 %v21188_v54, %v21189_v28  ;;  %21216 = vst [vmem:[#allocation24_spill] sm:$0xff] %v15768_v20 }
 0x36d   :  { %v2754_v2 = vpack.c.bf16 %v2743_v30, %v2741_v14 }
 0x36f   :  { %11618 = vmatmul.mubr.msk.bf16.vlgmr.msra.gmra.mrb[72].mxu0 %vm2571_vm1, %v2754_v2 }
 0x370   :  { %v13723_v53 = vpop.eup %13722  ;;  %3383 = vmatpush1.bf16.msra.mxu0 %v21187_v16  ;;  %3414 = vmatprep.mubr.bf16.mxu0 %v14096_v31 }
 0x371   :  { %11612 = vmatmul.mubr.msk.bf16.vlgmr.msra.gmra.mrb[132].mxu1 %vm2571_vm1, %v2751_v7  ;;  %v2745_v34 = vmul.f32 %v13723_v53, %v15596_v48  ;;  %v21197_v48 = vpack.c.bf16 %v21195_v18, %v21196_v50  ;;  %v15821_v18 = vld [vmem:[%s21144_s9 + $0x28] sm:$0xff] }
 0x372   :  { %v13725_v23 = vpop.eup %13724  ;;  %3070 = vmatpush1.bf16.msra.mxu1 %v21190_v19  ;;  %3101 = vmatprep.mubr.bf16.mxu1 %v14096_v31  ;;  %21219 = vst [vmem:[#allocation15_spill] sm:$0xff] %v15821_v18  ;;  %v20829_v50 = vunpack.c.l.bf16 %v15821_v18 }
 0x373   :  { %v2747_v37 = vmul.f32 %v13725_v23, %v15600_v60  ;;  %3158 = vmatprep.subr.bf16.mxu1 %v21191_v6  ;;  %v21198_v60 = vld [vmem:[#allocation14_spill] sm:$0xff]  ;;  %v15799_v23 = vld [vmem:[%s21144_s9 + $0x20] sm:$0xff] }
 0x374   :  { %v21200_v41 = vpack.c.bf16 %v21198_v60, %v21199_v46  ;;  %21217 = vst [vmem:[#allocation27_spill] sm:$0xff] %v15799_v23  ;;  %v20845_v54 = vunpack.c.l.bf16 %v15799_v23  ;;  %v20847_v28 = vunpack.c.h.bf16 %v15799_v23 }
 0x375   :  { %v2755_v62 = vpack.c.bf16 %v2747_v37, %v2745_v34  ;;  %v15806_v37 = vld [vmem:[%s21144_s9 + $0x30] sm:$0xff] }
 0x376   :  { %21218 = vst [vmem:[#allocation26_spill] sm:$0xff] %v15806_v37  ;;  %v20842_v6 = vunpack.c.l.bf16 %v15806_v37 }
 0x377   :  { %11620 = vmatmul.mubr.msk.bf16.vlgmr.msra.gmra.mrb[76].mxu0 %vm2571_vm1, %v2755_v62 }
 0x379   :  { %11613 = vmatmul.mubr.msk.bf16.vlgmr.msra.gmra.mrb[136].mxu1 %vm2571_vm1, %v2751_v7 }
 0x37a   :  { %3159 = vmatpush1.bf16.msra.mxu1 %v21194_v51  ;;  %3190 = vmatprep.mubr.bf16.mxu1 %v14096_v31 }
 0x37b   :  { %3247 = vmatprep.subr.bf16.mxu1 %v21197_v48  ;;  %v20831_v48 = vunpack.c.h.bf16 %v15821_v18 }
 0x381   :  { %11615 = vmatmul.mubr.msk.bf16.vlgmr.msra.gmra.mrb[140].mxu1 %vm2571_vm1, %v2752_v33  ;;  %v15731_v33 = vld [vmem:[%s21144_s9] sm:$0xff] }
 0x382   :  { %3248 = vmatpush1.bf16.msra.mxu1 %v21200_v41  ;;  %3279 = vmatprep.mubr.bf16.mxu1 %v14096_v31  ;;  %21213 = vst [vmem:[#allocation11_spill] sm:$0xff] %v15731_v33  ;;  %v20849_v10 = vunpack.c.l.bf16 %v15731_v33  ;;  %v20851_v12 = vunpack.c.h.bf16 %v15731_v33  ;;  %v15836_v41 = vld [vmem:[%s21144_s9 + $0x38] sm:$0xff] }
 0x383   :  { %3336 = vmatprep.subr.bf16.mxu1 %v21203_v39  ;;  %21220 = vst [vmem:[#allocation13_spill] sm:$0xff] %v15836_v41  ;;  %v20828_v1 = vunpack.c.l.bf16 %v15836_v41  ;;  %v20830_v39 = vunpack.c.h.bf16 %v15836_v41 }
 0x389   :  { %11617 = vmatmul.mubr.msk.bf16.vlgmr.msra.gmra.mrb[144].mxu1 %vm2571_vm1, %v2753_v15 }
 0x38a   :  { %3337 = vmatpush1.bf16.msra.mxu1 %v21206_v8  ;;  %3368 = vmatprep.mubr.bf16.mxu1 %v14096_v31 }
 0x38b   :  { %3425 = vmatprep.subr.bf16.mxu1 %v21209_v61 }
 0x391   :  { %11619 = vmatmul.mubr.msk.bf16.vlgmr.msra.gmra.mrb[148].mxu1 %vm2571_vm1, %v2754_v2 }
 0x392   :  { %3426 = vmatpush1.bf16.msra.mxu1 %v21212_v58  ;;  %3457 = vmatprep.mubr.bf16.mxu1 %v14096_v31  ;;  %v20848_v31 = vunpack.c.l.bf16 %v15738_v36 }
 0x399   :  { %11621 = vmatmul.mubr.msk.bf16.vlgmr.msra.gmra.mrb[152].mxu1 %vm2571_vm1, %v2755_v62  ;;  %v20846_v62 = vunpack.c.h.bf16 %v15806_v37 }
 0x414   :  { %v2793_v52 = vpop.f32.mrb[108].mxu1 }
 0x415   :  { %v2795_v27 = vpop.f32.mrb[109].mxu1  ;;  %v15744_v40 = vadd.f32 %v2793_v52, %v20849_v10 }
 0x416   :  { %v2797_v42 = vpop.f32.mrb[110].mxu1  ;;  %v15748_v9 = vadd.f32 %v2795_v27, %v20851_v12  ;;  %v16024_v12 = vld [vmem:[%s21144_s9 + $0x90] sm:$0xff] }
 0x417   :  { %v2799_v32 = vpop.f32.mrb[111].mxu1  ;;  %v15759_v15 = vadd.f32 %v2797_v42, %v20848_v31  ;;  %v15981_v31 = vld [vmem:[%s21144_s9 + $0x68] sm:$0xff]  ;;  %21232 = vst [vmem:[#allocation20_spill] sm:$0xff] %v16024_v12  ;;  %v21242_v36 = vunpack.c.h.bf16 %v16024_v12 }
 0x418   :  { %v15763_v26 = vadd.f32 %v2799_v32, %v20850_v25  ;;  %v3532_v17 = vadd.f32 %v15748_v9, %v15744_v40  ;;  %21227 = vst [vmem:[#allocation23_spill] sm:$0xff] %v15981_v31  ;;  %v21231_v41 = vunpack.c.l.bf16 %v15981_v31 }
 0x41a   :  { %v3537_v30 = vadd.f32 %v15763_v26, %v15759_v15 }
 0x41c   :  { %v2836_v24 = vpop.f32.mrb[112].mxu1 }
 0x41d   :  { %v15776_v29 = vadd.f32 %v2836_v24, %v20833_v47  ;;  %v2838_v38 = vpop.f32.mrb[113].mxu1 }
 0x41e   :  { %v15780_v43 = vadd.f32 %v2838_v38, %v20835_v57  ;;  %v2840_v14 = vpop.f32.mrb[114].mxu1 }
 0x41f   :  { %v3533_v63 = vadd.f32 %v3532_v17, %v15776_v29  ;;  %v15787_v55 = vadd.f32 %v2840_v14, %v20832_v21  ;;  %v2842_v2 = vpop.f32.mrb[115].mxu1 }
 0x420   :  { %v15791_v7 = vadd.f32 %v2842_v2, %v20834_v45 }
 0x421   :  { %v3538_v53 = vadd.f32 %v3537_v30, %v15787_v55  ;;  %v3534_v11 = vadd.f32 %v3533_v63, %v15780_v43  ;;  %v15873_v30 = vld [vmem:[%s21144_s9 + $0x40] sm:$0xff] }
 0x422   :  { %21221 = vst [vmem:[#allocation14_spill] sm:$0xff] %v15873_v30  ;;  %v20837_v63 = vunpack.c.l.bf16 %v15873_v30 }
 0x423   :  { %3535 = vadd.xlane.f32.xlu0 %v3534_v11  ;;  %v3539_v4 = vadd.f32 %v3538_v53, %v15791_v7  ;;  %v20841_v53 = vunpack.c.h.bf16 %v15873_v30 }
 0x424   :  { %v2882_v16 = vpop.f32.mrb[116].mxu1 }
 0x425   :  { %3540 = vadd.xlane.f32.xlu1 %v3539_v4  ;;  %v2884_v19 = vpop.f32.mrb[117].mxu1  ;;  %v15812_v13 = vadd.f32 %v2882_v16, %v20845_v54  ;;  %v15882_v16 = vld [vmem:[%s21144_s9 + $0x50] sm:$0xff] }
 0x426   :  { %v2886_v34 = vpop.f32.mrb[118].mxu1  ;;  %v15816_v51 = vadd.f32 %v2884_v19, %v20847_v28  ;;  %21222 = vst [vmem:[#allocation12_spill] sm:$0xff] %v15882_v16  ;;  %v20836_v19 = vunpack.c.l.bf16 %v15882_v16 }
 0x427   :  { %v2888_v22 = vpop.f32.mrb[119].mxu1  ;;  %v15827_v60 = vadd.f32 %v2886_v34, %v20842_v6  ;;  %v20840_v34 = vunpack.c.h.bf16 %v15882_v16 }
 0x428   :  { %v15831_v46 = vadd.f32 %v2888_v22, %v20846_v62  ;;  %v3542_v35 = vadd.f32 %v15816_v51, %v15812_v13 }
 0x42a   :  { %v3547_v61 = vadd.f32 %v15831_v46, %v15827_v60 }
 0x42c   :  { %v2925_v44 = vpop.f32.mrb[120].mxu1 }
 0x42d   :  { %v15844_v3 = vadd.f32 %v2925_v44, %v20829_v50  ;;  %v2927_v8 = vpop.f32.mrb[121].mxu1 }
 0x42e   :  { %v15848_v5 = vadd.f32 %v2927_v8, %v20831_v48  ;;  %v2929_v49 = vpop.f32.mrb[122].mxu1  ;;  %v15897_v8 = vld [vmem:[%s21144_s9 + $0x48] sm:$0xff] }
 0x42f   :  { %v3543_v0 = vadd.f32 %v3542_v35, %v15844_v3  ;;  %v15855_v59 = vadd.f32 %v2929_v49, %v20828_v1  ;;  %v2931_v58 = vpop.f32.mrb[123].mxu1  ;;  %21223 = vst [vmem:[#allocation19_spill] sm:$0xff] %v15897_v8  ;;  %v20838_v49 = vunpack.c.l.bf16 %v15897_v8 }
 0x430   :  { %v15859_v52 = vadd.f32 %v2931_v58, %v20830_v39 }
 0x431   :  { %v3548_v27 = vadd.f32 %v3547_v61, %v15855_v59  ;;  %v3544_v42 = vadd.f32 %v3543_v0, %v15848_v5  ;;  %v20839_v0 = vunpack.c.h.bf16 %v15897_v8 }
 0x432   :  { %v15863_v32 = vpop.f32.mrb[64].mxu0 }
 0x433   :  { %v15865_v24 = vpop.f32.mrb[65].mxu0  ;;  %3545 = vadd.xlane.f32.xlu0 %v3544_v42  ;;  %v3549_v17 = vadd.f32 %v3548_v27, %v15859_v52 }
 0x434   :  { %v2971_v38 = vpop.f32.mrb[124].mxu1  ;;  %v15868_v14 = vpop.f32.mrb[66].mxu0 }
 0x435   :  { %v15876_v2 = vpop.f32.mrb[67].mxu0  ;;  %3550 = vadd.xlane.f32.xlu1 %v3549_v17  ;;  %v2973_v11 = vpop.f32.mrb[125].mxu1  ;;  %v15888_v44 = vadd.f32 %v2971_v38, %v20837_v63  ;;  %v15916_v17 = vld [vmem:[%s21144_s9 + $0x58] sm:$0xff] }
 0x436   :  { %v2975_v4 = vpop.f32.mrb[126].mxu1  ;;  %v15892_v35 = vadd.f32 %v2973_v11, %v20841_v53  ;;  %21224 = vst [vmem:[#allocation17_spill] sm:$0xff] %v15916_v17  ;;  %v20843_v38 = vunpack.c.l.bf16 %v15916_v17  ;;  %v20844_v50 = vunpack.c.h.bf16 %v15916_v17 }
 0x437   :  { %v2977_v22 = vpop.f32.mrb[127].mxu1  ;;  %v15905_v58 = vadd.f32 %v2975_v4, %v20836_v19 }
 0x438   :  { %v15909_v27 = vadd.f32 %v2977_v22, %v20840_v34  ;;  %v3552_v4 = vadd.f32 %v15892_v35, %v15888_v44 }
 0x43a   :  { %v15900_v61 = vpop.f32.mrb[68].mxu0  ;;  %v3557_v45 = vadd.f32 %v15909_v27, %v15905_v58 }
 0x43b   :  { %v15911_v42 = vpop.f32.mrb[69].mxu0 }
 0x43c   :  { %v3014_v11 = vpop.f32.mrb[128].mxu1  ;;  %v15919_v1 = vpop.f32.mrb[70].mxu0 }
 0x43d   :  { %v15926_v22 = vadd.f32 %v3014_v11, %v20838_v49  ;;  %v3016_v39 = vpop.f32.mrb[129].mxu1  ;;  %v15928_v48 = vpop.f32.mrb[71].mxu0 }
 0x43e   :  { %v15932_v21 = vadd.f32 %v3016_v39, %v20839_v0  ;;  %v3018_v47 = vpop.f32.mrb[130].mxu1 }
 0x43f   :  { %v3553_v57 = vadd.f32 %v3552_v4, %v15926_v22  ;;  %v15939_v19 = vadd.f32 %v3018_v47, %v20843_v38  ;;  %v3020_v63 = vpop.f32.mrb[131].mxu1  ;;  %v15957_v47 = vld [vmem:[%s21144_s9 + $0x60] sm:$0xff] }
 0x440   :  { %v15943_v11 = vadd.f32 %v3020_v63, %v20844_v50  ;;  %21225 = vst [vmem:[#allocation18_spill] sm:$0xff] %v15957_v47  ;;  %v20852_v63 = vunpack.c.l.bf16 %v15957_v47 }
 0x441   :  { %v3558_v49 = vadd.f32 %v3557_v45, %v15939_v19  ;;  %v3554_v39 = vadd.f32 %v3553_v57, %v15932_v21  ;;  %v20853_v57 = vunpack.c.h.bf16 %v15957_v47 }
 0x442   :  { %v15947_v0 = vpop.f32.mrb[72].mxu0 }
 0x443   :  { %v15949_v34 = vpop.f32.mrb[73].mxu0  ;;  %3555 = vadd.xlane.f32.xlu0 %v3554_v39  ;;  %v3559_v4 = vadd.f32 %v3558_v49, %v15943_v11  ;;  %v15966_v49 = vld [vmem:[%s21144_s9 + $0x70] sm:$0xff] }
 0x444   :  { %v3060_v53 = vpop.f32.mrb[132].mxu1  ;;  %v15952_v6 = vpop.f32.mrb[74].mxu0  ;;  %21226 = vst [vmem:[#allocation16_spill] sm:$0xff] %v15966_v49  ;;  %v20858_v39 = vunpack.c.l.bf16 %v15966_v49 }
 0x445   :  { %v15960_v45 = vpop.f32.mrb[75].mxu0  ;;  %3560 = vadd.xlane.f32.xlu1 %v3559_v4  ;;  %v3062_v38 = vpop.f32.mrb[133].mxu1  ;;  %v15972_v28 = vadd.f32 %v3060_v53, %v20852_v63  ;;  %v21228_v53 = vunpack.c.h.bf16 %v15966_v49 }
 0x446   :  { %v3064_v50 = vpop.f32.mrb[134].mxu1  ;;  %v15976_v4 = vadd.f32 %v3062_v38, %v20853_v57  ;;  %v16000_v57 = vld [vmem:[%s21144_s9 + $0x78] sm:$0xff] }
 0x447   :  { %v3066_v62 = vpop.f32.mrb[135].mxu1  ;;  %v15989_v54 = vadd.f32 %v3064_v50, %v20858_v39  ;;  %21229 = vst [vmem:[#allocation21_spill] sm:$0xff] %v16000_v57  ;;  %v16009_v50 = vld [vmem:[%s21144_s9 + $0x80] sm:$0xff]  ;;  %v21234_v16 = vunpack.c.l.bf16 %v16000_v57  ;;  %v21235_v23 = vunpack.c.h.bf16 %v16000_v57 }
 0x448   :  { %v15993_v63 = vadd.f32 %v3066_v62, %v21228_v53  ;;  %21230 = vst [vmem:[#allocation22_spill] sm:$0xff] %v16009_v50  ;;  %v3562_v39 = vadd.f32 %v15976_v4, %v15972_v28  ;;  %v21233_v62 = vunpack.c.h.bf16 %v15981_v31  ;;  %v21237_v47 = vunpack.c.l.bf16 %v16009_v50 }
 0x449   :  { %v21241_v31 = vunpack.c.l.bf16 %v16024_v12 }
 0x44a   :  { %v15984_v25 = vpop.f32.mrb[76].mxu0 }
 0x44b   :  { %v15995_v38 = vpop.f32.mrb[77].mxu0 }
 0x44c   :  { %v3103_v17 = vpop.f32.mrb[136].mxu1  ;;  %v16003_v8 = vpop.f32.mrb[78].mxu0 }
 0x44d   :  { %v16017_v10 = vadd.f32 %v3103_v17, %v21231_v41  ;;  %v3105_v18 = vpop.f32.mrb[137].mxu1  ;;  %v16019_v20 = vpop.f32.mrb[79].mxu0  ;;  %v3567_v41 = vadd.f32 %v15993_v63, %v15989_v54 }
 0x44e   :  { %v16029_v53 = vadd.f32 %v3105_v18, %v21233_v62  ;;  %v3107_v49 = vpop.f32.mrb[138].mxu1  ;;  %v16046_v18 = vld [vmem:[%s21144_s9 + $0x88] sm:$0xff]  ;;  %v16065_v62 = vadd.f32 %v15868_v14, %v21241_v31 }
 0x44f   :  { %v3563_v17 = vadd.f32 %v3562_v39, %v16017_v10  ;;  %v16037_v30 = vadd.f32 %v3107_v49, %v21234_v16  ;;  %v3109_v37 = vpop.f32.mrb[139].mxu1  ;;  %21236 = vst [vmem:[#allocation28_spill] sm:$0xff] %v16046_v18  ;;  %v16052_v39 = vadd.f32 %v15863_v32, %v21237_v47  ;;  %v21239_v16 = vunpack.c.h.bf16 %v16009_v50  ;;  %v16076_v47 = vld [vmem:[%s21144_s9 + $0x98] sm:$0xff] }
 0x450   :  { %v16041_v56 = vadd.f32 %v3109_v37, %v21235_v23  ;;  %v16070_v32 = vadd.f32 %v15876_v2, %v21242_v36  ;;  %21244 = vst [vmem:[#allocation32_spill] sm:$0xff] %v16076_v47  ;;  %v16085_v36 = vld [vmem:[%s21144_s9 + $0xa0] sm:$0xff]  ;;  %v21248_v12 = vunpack.c.h.bf16 %v16046_v18 }
 0x451   :  { %21238 = vst [vmem:[#allocation29_spill] sm:$0xff] %v16052_v39  ;;  %v16057_v49 = vadd.f32 %v15865_v24, %v21239_v16  ;;  %v3568_v23 = vadd.f32 %v3567_v41, %v16037_v30  ;;  %v3564_v37 = vadd.f32 %v3563_v17, %v16029_v53  ;;  %21245 = vst [vmem:[#allocation33_spill] sm:$0xff] %v16085_v36  ;;  %v16096_v16 = vld [vmem:[%s21144_s9 + $0xb0] sm:$0xff] }
 0x452   :  { %21243 = vst [vmem:[#allocation31_spill] sm:$0xff] %v16070_v32  ;;  %21247 = vst [vmem:[#allocation34_spill] sm:$0xff] %v16096_v16  ;;  %v3577_v2 = vadd.f32 %v16070_v32, %v16065_v62  ;;  %v21258_v32 = vunpack.c.h.bf16 %v16096_v16 }
 0x453   :  { %21240 = vst [vmem:[#allocation30_spill] sm:$0xff] %v16057_v49  ;;  %3565 = vadd.xlane.f32.xlu0 %v3564_v37  ;;  %v3569_v24 = vadd.f32 %v3568_v23, %v16041_v56  ;;  %v3572_v31 = vadd.f32 %v16057_v49, %v16052_v39  ;;  %v21246_v23 = vunpack.c.l.bf16 %v16046_v18  ;;  %v21250_v39 = vunpack.c.h.bf16 %v16076_v47 }
 0x454   :  { %v3192_v17 = vpop.f32.mrb[140].mxu1  ;;  %v21257_v18 = vunpack.c.l.bf16 %v16096_v16 }
 0x455   :  { %v16091_v37 = vadd.f32 %v3192_v17, %v21246_v23  ;;  %3570 = vadd.xlane.f32.xlu1 %v3569_v24  ;;  %v3194_v41 = vpop.f32.mrb[141].mxu1  ;;  %v21249_v23 = vunpack.c.l.bf16 %v16076_v47  ;;  %v21253_v17 = vunpack.c.l.bf16 %v16085_v36 }
 0x456   :  { %v16101_v50 = vadd.f32 %v3194_v41, %v21248_v12  ;;  %v3196_v14 = vpop.f32.mrb[142].mxu1  ;;  %v16118_v12 = vld [vmem:[%s21144_s9 + $0xa8] sm:$0xff]  ;;  %v16137_v41 = vadd.f32 %v15919_v1, %v21257_v18 }
 0x457   :  { %v3573_v24 = vadd.f32 %v3572_v31, %v16091_v37  ;;  %v16109_v33 = vadd.f32 %v3196_v14, %v21249_v23  ;;  %v3198_v49 = vpop.f32.mrb[143].mxu1  ;;  %21252 = vst [vmem:[#allocation36_spill] sm:$0xff] %v16118_v12  ;;  %v16124_v31 = vadd.f32 %v15900_v61, %v21253_v17  ;;  %v21255_v14 = vunpack.c.h.bf16 %v16085_v36 }
 0x458   :  { %v16113_v57 = vadd.f32 %v3198_v49, %v21250_v39  ;;  %v16142_v61 = vadd.f32 %v15928_v48, %v21258_v32  ;;  %v16157_v48 = vld [vmem:[%s21144_s9 + $0xc0] sm:$0xff]  ;;  %v21264_v16 = vunpack.c.h.bf16 %v16118_v12 }
 0x459   :  { %21254 = vst [vmem:[#allocation37_spill] sm:$0xff] %v16124_v31  ;;  %v16129_v23 = vadd.f32 %v15911_v42, %v21255_v14  ;;  %v3578_v39 = vadd.f32 %v3577_v2, %v16109_v33  ;;  %v3574_v49 = vadd.f32 %v3573_v24, %v16101_v50  ;;  %v16148_v2 = vld [vmem:[%s21144_s9 + $0xb8] sm:$0xff]  ;;  %21261 = vst [vmem:[#allocation41_spill] sm:$0xff] %v16157_v48  ;;  %v16168_v14 = vld [vmem:[%s21144_s9 + $0xd0] sm:$0xff] }
 0x45a   :  { %21251 = vst [vmem:[#allocation35_spill] sm:$0xff] %v16113_v57  ;;  %21259 = vst [vmem:[#allocation39_spill] sm:$0xff] %v16142_v61  ;;  %v3587_v32 = vadd.f32 %v16142_v61, %v16137_v41  ;;  %v21274_v61 = vunpack.c.h.bf16 %v16168_v14 }
 0x45b   :  { %21256 = vst [vmem:[#allocation38_spill] sm:$0xff] %v16129_v23  ;;  %3575 = vadd.xlane.f32.xlu0 %v3574_v49  ;;  %v3579_v42 = vadd.f32 %v3578_v39, %v16113_v57  ;;  %21260 = vst [vmem:[#allocation40_spill] sm:$0xff] %v16148_v2  ;;  %v3582_v1 = vadd.f32 %v16129_v23, %v16124_v31  ;;  %v21262_v39 = vunpack.c.l.bf16 %v16118_v12  ;;  %v21266_v57 = vunpack.c.h.bf16 %v16148_v2 }
 0x45c   :  { %v3281_v24 = vpop.f32.mrb[144].mxu1  ;;  %21263 = vst [vmem:[#allocation42_spill] sm:$0xff] %v16168_v14  ;;  %v21273_v12 = vunpack.c.l.bf16 %v16168_v14 }
 0x45d   :  { %v16163_v49 = vadd.f32 %v3281_v24, %v21262_v39  ;;  %3580 = vadd.xlane.f32.xlu1 %v3579_v42  ;;  %v3283_v17 = vpop.f32.mrb[145].mxu1  ;;  %v21265_v39 = vunpack.c.l.bf16 %v16148_v2  ;;  %v21269_v24 = vunpack.c.l.bf16 %v16157_v48 }
 0x45e   :  { %v16173_v36 = vadd.f32 %v3283_v17, %v21264_v16  ;;  %v3285_v18 = vpop.f32.mrb[146].mxu1  ;;  %v16190_v16 = vld [vmem:[%s21144_s9 + $0xc8] sm:$0xff]  ;;  %v16209_v17 = vadd.f32 %v15952_v6, %v21273_v12 }
 0x45f   :  { %v3583_v42 = vadd.f32 %v3582_v1, %v16163_v49  ;;  %v16181_v23 = vadd.f32 %v3285_v18, %v21265_v39  ;;  %v3287_v31 = vpop.f32.mrb[147].mxu1  ;;  %21268 = vst [vmem:[#allocation44_spill] sm:$0xff] %v16190_v16  ;;  %v16196_v1 = vadd.f32 %v15947_v0, %v21269_v24  ;;  %v21271_v18 = vunpack.c.h.bf16 %v16157_v48 }
 0x460   :  { %v16185_v47 = vadd.f32 %v3287_v31, %v21266_v57  ;;  %v16214_v0 = vadd.f32 %v15960_v45, %v21274_v61  ;;  %v16229_v45 = vld [vmem:[%s21144_s9 + $0xe0] sm:$0xff]  ;;  %v21280_v14 = vunpack.c.h.bf16 %v16190_v16 }
 0x461   :  { %21270 = vst [vmem:[#allocation45_spill] sm:$0xff] %v16196_v1  ;;  %v16201_v39 = vadd.f32 %v15949_v34, %v21271_v18  ;;  %v3588_v57 = vadd.f32 %v3587_v32, %v16181_v23  ;;  %v3584_v31 = vadd.f32 %v3583_v42, %v16173_v36  ;;  %v16220_v32 = vld [vmem:[%s21144_s9 + $0xd8] sm:$0xff]  ;;  %21277 = vst [vmem:[#allocation49_spill] sm:$0xff] %v16229_v45  ;;  %v16240_v18 = vld [vmem:[%s21144_s9 + $0xf0] sm:$0xff] }
 0x462   :  { %21267 = vst [vmem:[#allocation43_spill] sm:$0xff] %v16185_v47  ;;  %21275 = vst [vmem:[#allocation47_spill] sm:$0xff] %v16214_v0  ;;  %v3597_v61 = vadd.f32 %v16214_v0, %v16209_v17  ;;  %v21288_v0 = vunpack.c.h.bf16 %v16240_v18 }
 0x463   :  { %21272 = vst [vmem:[#allocation46_spill] sm:$0xff] %v16201_v39  ;;  %3585 = vadd.xlane.f32.xlu0 %v3584_v31  ;;  %v3589_v34 = vadd.f32 %v3588_v57, %v16185_v47  ;;  %21276 = vst [vmem:[#allocation48_spill] sm:$0xff] %v16220_v32  ;;  %v3592_v6 = vadd.f32 %v16201_v39, %v16196_v1  ;;  %v21278_v57 = vunpack.c.l.bf16 %v16190_v16  ;;  %v21282_v47 = vunpack.c.h.bf16 %v16220_v32 }
 0x464   :  { %v3370_v42 = vpop.f32.mrb[148].mxu1  ;;  %21279 = vst [vmem:[#allocation50_spill] sm:$0xff] %v16240_v18  ;;  %v21287_v16 = vunpack.c.l.bf16 %v16240_v18 }
 0x465   :  { %v16235_v31 = vadd.f32 %v3370_v42, %v21278_v57  ;;  %3590 = vadd.xlane.f32.xlu1 %v3589_v34  ;;  %v3372_v24 = vpop.f32.mrb[149].mxu1  ;;  %v21281_v57 = vunpack.c.l.bf16 %v16220_v32  ;;  %v21284_v42 = vunpack.c.l.bf16 %v16229_v45 }
 0x466   :  { %v16245_v48 = vadd.f32 %v3372_v24, %v21280_v14  ;;  %v3374_v12 = vpop.f32.mrb[150].mxu1  ;;  %v16262_v14 = vld [vmem:[%s21144_s9 + $0xe8] sm:$0xff]  ;;  %v16281_v24 = vadd.f32 %v16003_v8, %v21287_v16 }
 0x467   :  { %v3593_v34 = vadd.f32 %v3592_v6, %v16235_v31  ;;  %v16253_v39 = vadd.f32 %v3374_v12, %v21281_v57  ;;  %v3376_v1 = vpop.f32.mrb[151].mxu1  ;;  %21283 = vst [vmem:[#allocation51_spill] sm:$0xff] %v16262_v14  ;;  %v16268_v6 = vadd.f32 %v15984_v25, %v21284_v42  ;;  %v21285_v12 = vunpack.c.h.bf16 %v16229_v45 }
 0x468   :  { %v16257_v2 = vadd.f32 %v3376_v1, %v21282_v47  ;;  %v20927_v32 = vunpack.c.h.bf16 %v16262_v14  ;;  %v16286_v25 = vadd.f32 %v16019_v20, %v21288_v0  ;;  %v21290_v16 = vunpack.c.l.bf16 %v16262_v14 }
 0x469   :  { %v16273_v57 = vadd.f32 %v15995_v38, %v21285_v12  ;;  %v3598_v47 = vadd.f32 %v3597_v61, %v16253_v39  ;;  %v3594_v1 = vadd.f32 %v3593_v34, %v16245_v48  ;;  %v16292_v61 = vld [vmem:[%s21144_s9 + $0xf8] sm:$0xff] }
 0x46a   :  { %21289 = vst [vmem:[#allocation53_spill] sm:$0xff] %v16292_v61  ;;  %v3607_v42 = vadd.f32 %v16286_v25, %v16281_v24  ;;  %v21291_v12 = vunpack.c.l.bf16 %v16292_v61 }
 0x46b   :  { %21286 = vst [vmem:[#allocation52_spill] sm:$0xff] %v16273_v57  ;;  %3595 = vadd.xlane.f32.xlu0 %v3594_v1  ;;  %v3599_v38 = vadd.f32 %v3598_v47, %v16257_v2  ;;  %v3602_v8 = vadd.f32 %v16273_v57, %v16268_v6 }
 0x46c   :  { %v3459_v34 = vpop.f32.mrb[152].mxu1 }
 0x46d   :  { %v16300_v20 = vadd.f32 %v3459_v34, %v21290_v16  ;;  %3600 = vadd.xlane.f32.xlu1 %v3599_v38  ;;  %v3461_v0 = vpop.f32.mrb[153].mxu1  ;;  %v21293_v34 = vunpack.c.h.bf16 %v16292_v61 }
 0x46e   :  { %v16304_v47 = vadd.f32 %v3461_v0, %v20927_v32  ;;  %v3463_v1 = vpop.f32.mrb[154].mxu1 }
 0x46f   :  { %v3603_v18 = vadd.f32 %v3602_v8, %v16300_v20  ;;  %v16311_v45 = vadd.f32 %v3463_v1, %v21291_v12  ;;  %v3465_v57 = vpop.f32.mrb[155].mxu1  ;;  %v12990_v8 = vld [vmem:[%s21295_s26] ss:$24 sps:$4 sm:$0xff]   ;;  %v12992_v12 = vld [vmem:[%s21295_s26 + $0x4] ss:$24 sps:$4 sm:$0xff]  }
 0x470   :  { %v16315_v16 = vadd.f32 %v3465_v57, %v21293_v34  ;;  %v12993_v57 = vld [vmem:[%s21295_s26 + $0x8] ss:$24 sps:$4 sm:$0xff]   ;;  %5337 = vmatprep.subr.bf16.mxu0 %v12992_v12  ;;  %v12999_v1 = vld [vmem:[%s21295_s26 + $0x38] ss:$24 sps:$4 sm:$0xff]   ;;  %v13001_v34 = vld [vmem:[%s21295_s26 + $0x3c] ss:$24 sps:$4 sm:$0xff]  }
 0x471   :  { %21292 = vst [vmem:[#allocation54_spill] sm:$0xff] %v16311_v45  ;;  %v3608_v38 = vadd.f32 %v3607_v42, %v16311_v45  ;;  %v3604_v0 = vadd.f32 %v3603_v18, %v16304_v47  ;;  %v12995_v18 = vld [vmem:[%s21295_s26 + $0xc] ss:$24 sps:$4 sm:$0xff]   ;;  %5338 = vmatpush1.bf16.msra.mxu0 %v12990_v8  ;;  %v13005_v12 = vld [vmem:[%s21295_s26 + $0x68] ss:$24 sps:$4 sm:$0xff]  }
 0x472   :  { %21294 = vst [vmem:[#allocation55_spill] sm:$0xff] %v16315_v16  ;;  %v12998_v42 = vld [vmem:[%s21295_s26 + $0x34] ss:$24 sps:$4 sm:$0xff]   ;;  %5563 = vmatprep.subr.bf16.mxu1 %v12995_v18 }
 0x473   :  { %3605 = vadd.xlane.f32.xlu0 %v3604_v0  ;;  %v3609_v32 = vadd.f32 %v3608_v38, %v16315_v16  ;;  %5564 = vmatpush1.bf16.msra.mxu1 %v12993_v57  ;;  %v13004_v38 = vld [vmem:[%s21295_s26 + $0x64] ss:$24 sps:$4 sm:$0xff]   ;;  %v13002_v0 = vld [vmem:[%s21295_s26 + $0x60] ss:$24 sps:$4 sm:$0xff]   ;;  %v13010_v57 = vld [vmem:[%s21295_s26 + $0x94] ss:$24 sps:$4 sm:$0xff]  }
 0x474   :  { %5339 = vmatprep.subr.bf16.mxu0 %v12998_v42  ;;  %5565 = vmatprep.subr.bf16.mxu1 %v13001_v34  ;;  %v13007_v8 = vld [vmem:[%s21295_s26 + $0x6c] ss:$24 sps:$4 sm:$0xff]   ;;  %v13013_v18 = vld [vmem:[%s21295_s26 + $0x9c] ss:$24 sps:$4 sm:$0xff]   ;;  %v13008_v42 = vld [vmem:[%s21295_s26 + $0x90] ss:$24 sps:$4 sm:$0xff]  }
 0x475   :  { %3610 = vadd.xlane.f32.xlu1 %v3609_v32  ;;  %v12996_v32 = vld [vmem:[%s21295_s26 + $0x30] ss:$24 sps:$4 sm:$0xff]   ;;  %v13019_v34 = vld [vmem:[%s21295_s26 + $0xcc] ss:$24 sps:$4 sm:$0xff]  }
 0x476   :  { %5340 = vmatpush1.bf16.msra.mxu0 %v12996_v32  ;;  %v13011_v32 = vld [vmem:[%s21295_s26 + $0x98] ss:$24 sps:$4 sm:$0xff]  }
 0x477   :  { %5566 = vmatpush1.bf16.msra.mxu1 %v12999_v1  ;;  %5341 = vmatprep.subr.bf16.mxu0 %v13004_v38  ;;  %v13016_v1 = vld [vmem:[%s21295_s26 + $0xc4] ss:$24 sps:$4 sm:$0xff]   ;;  %v13014_v38 = vld [vmem:[%s21295_s26 + $0xc0] ss:$24 sps:$4 sm:$0xff]  }
 0x478   :  { %5567 = vmatprep.subr.bf16.mxu1 %v13007_v8  ;;  %v13022_v8 = vld [vmem:[%s21295_s26 + $0xf4] ss:$24 sps:$4 sm:$0xff]  }
 0x47a   :  { %5342 = vmatpush1.bf16.msra.mxu0 %v13002_v0  ;;  %v13017_v0 = vld [vmem:[%s21295_s26 + $0xc8] ss:$24 sps:$4 sm:$0xff]  }
 0x47b   :  { %5568 = vmatpush1.bf16.msra.mxu1 %v13005_v12  ;;  %5343 = vmatprep.subr.bf16.mxu0 %v13010_v57  ;;  %v13025_v12 = vld [vmem:[%s21295_s26 + $0xfc] ss:$24 sps:$4 sm:$0xff]   ;;  %v13020_v57 = vld [vmem:[%s21295_s26 + $0xf0] ss:$24 sps:$4 sm:$0xff]  }
 0x47c   :  { %5569 = vmatprep.subr.bf16.mxu1 %v13013_v18  ;;  %v13023_v18 = vld [vmem:[%s21295_s26 + $0xf8] ss:$24 sps:$4 sm:$0xff]  }
 0x47e   :  { %5344 = vmatpush1.bf16.msra.mxu0 %v13008_v42  ;;  %v13028_v42 = vld [vmem:[%s21295_s26 + $0x124] ss:$24 sps:$4 sm:$0xff]  }
 0x47f   :  { %5570 = vmatpush1.bf16.msra.mxu1 %v13011_v32  ;;  %5345 = vmatprep.subr.bf16.mxu0 %v13016_v1  ;;  %v13031_v32 = vld [vmem:[%s21295_s26 + $0x12c] ss:$24 sps:$4 sm:$0xff]   ;;  %v13026_v1 = vld [vmem:[%s21295_s26 + $0x120] ss:$24 sps:$4 sm:$0xff]  }
 0x480   :  { %5571 = vmatprep.subr.bf16.mxu1 %v13019_v34  ;;  %v13029_v34 = vld [vmem:[%s21295_s26 + $0x128] ss:$24 sps:$4 sm:$0xff]  }
 0x482   :  { %5346 = vmatpush1.bf16.msra.mxu0 %v13014_v38  ;;  %v13034_v38 = vld [vmem:[%s21295_s26 + $0x154] ss:$24 sps:$4 sm:$0xff]  }
 0x483   :  { %5572 = vmatpush1.bf16.msra.mxu1 %v13017_v0  ;;  %5347 = vmatprep.subr.bf16.mxu0 %v13022_v8  ;;  %v13032_v0 = vld [vmem:[%s21295_s26 + $0x150] ss:$24 sps:$4 sm:$0xff]   ;;  %v13037_v8 = vld [vmem:[%s21295_s26 + $0x15c] ss:$24 sps:$4 sm:$0xff]  }
 0x484   :  { %5573 = vmatprep.subr.bf16.mxu1 %v13025_v12  ;;  %v13035_v12 = vld [vmem:[%s21295_s26 + $0x158] ss:$24 sps:$4 sm:$0xff]  }
 0x486   :  { %5348 = vmatpush1.bf16.msra.mxu0 %v13020_v57  ;;  %v13040_v57 = vld [vmem:[%s21295_s26 + $0x184] ss:$24 sps:$4 sm:$0xff]  }
 0x487   :  { %5574 = vmatpush1.bf16.msra.mxu1 %v13023_v18  ;;  %5349 = vmatprep.subr.bf16.mxu0 %v13028_v42  ;;  %v13043_v18 = vld [vmem:[%s21295_s26 + $0x18c] ss:$24 sps:$4 sm:$0xff]   ;;  %v13038_v42 = vld [vmem:[%s21295_s26 + $0x180] ss:$24 sps:$4 sm:$0xff]  }
 0x488   :  { %5575 = vmatprep.subr.bf16.mxu1 %v13031_v32  ;;  %v13041_v32 = vld [vmem:[%s21295_s26 + $0x188] ss:$24 sps:$4 sm:$0xff]  }
 0x48a   :  { %5350 = vmatpush1.bf16.msra.mxu0 %v13026_v1  ;;  %v13046_v1 = vld [vmem:[%s21295_s26 + $0x1b4] ss:$24 sps:$4 sm:$0xff]  }
 0x48b   :  { %5576 = vmatpush1.bf16.msra.mxu1 %v13029_v34  ;;  %5351 = vmatprep.subr.bf16.mxu0 %v13034_v38  ;;  %v13049_v34 = vld [vmem:[%s21295_s26 + $0x1bc] ss:$24 sps:$4 sm:$0xff]  }
 0x48c   :  { %5577 = vmatprep.subr.bf16.mxu1 %v13037_v8  ;;  %v13044_v8 = vld [vmem:[%s21295_s26 + $0x1b0] ss:$24 sps:$4 sm:$0xff]  }
 0x48e   :  { %5352 = vmatpush1.bf16.msra.mxu0 %v13032_v0 }
 0x48f   :  { %5578 = vmatpush1.bf16.msra.mxu1 %v13035_v12  ;;  %5353 = vmatprep.subr.bf16.mxu0 %v13040_v57  ;;  %v13047_v12 = vld [vmem:[%s21295_s26 + $0x1b8] ss:$24 sps:$4 sm:$0xff]  }
 0x490   :  { %5579 = vmatprep.subr.bf16.mxu1 %v13043_v18 }
 0x492   :  { %5354 = vmatpush1.bf16.msra.mxu0 %v13038_v42 }
 0x493   :  { %5580 = vmatpush1.bf16.msra.mxu1 %v13041_v32  ;;  %5355 = vmatprep.subr.bf16.mxu0 %v13046_v1 }
 0x494   :  { %5581 = vmatprep.subr.bf16.mxu1 %v13049_v34 }
 0x496   :  { %5356 = vmatpush1.bf16.msra.mxu0 %v13044_v8 }
 0x497   :  { %5582 = vmatpush1.bf16.msra.mxu1 %v13047_v12 }
 0x4b0   :  { %v3536_v61 = vpop.xlane.xlu0 %3535 }
 0x4b1   :  { %v3613_v14 = vmul.f32 0.001953125, %v3536_v61 }
 0x4b2   :  { %v3541_v38 = vpop.xlane.xlu1 %3540 }
 0x4b3   :  { %v16438_v16 = vsub.f32 %v15744_v40, %v3613_v14  ;;  %v16441_v0 = vsub.f32 %v15748_v9, %v3613_v14  ;;  %v3614_v45 = vmul.f32 0.001953125, %v3541_v38  ;;  %v16444_v61 = vsub.f32 %v15776_v29, %v3613_v14 }
 0x4b4   :  { %v16450_v57 = vsub.f32 %v15780_v43, %v3613_v14 }
 0x4b5   :  { %21296 = vst [vmem:[#allocation56_spill] sm:$0xff] %v16438_v16  ;;  %v3693_v18 = vmul.f32 %v16438_v16, %v16438_v16  ;;  %v3694_v40 = vmul.f32 %v16441_v0, %v16441_v0  ;;  %v16457_v9 = vsub.f32 %v15759_v15, %v3614_v45  ;;  %v16460_v29 = vsub.f32 %v15763_v26, %v3614_v45 }
 0x4b6   :  { %v16463_v38 = vsub.f32 %v15787_v55, %v3614_v45  ;;  %v3695_v43 = vmul.f32 %v16444_v61, %v16444_v61  ;;  %v16470_v16 = vsub.f32 %v15791_v7, %v3614_v45  ;;  %v3696_v26 = vmul.f32 %v16450_v57, %v16450_v57 }
 0x4b7   :  { %21297 = vst [vmem:[#allocation57_spill] sm:$0xff] %v16457_v9  ;;  %21298 = vst [vmem:[#allocation58_spill] sm:$0xff] %v16460_v29  ;;  %v3757_v14 = vadd.f32 %v3694_v40, %v3693_v18  ;;  %v3697_v42 = vmul.f32 %v16457_v9, %v16457_v9  ;;  %v3698_v15 = vmul.f32 %v16460_v29, %v16460_v29 }
 0x4b8   :  { %v3699_v32 = vmul.f32 %v16463_v38, %v16463_v38  ;;  %v3700_v34 = vmul.f32 %v16470_v16, %v16470_v16 }
 0x4b9   :  { %v3758_v55 = vadd.f32 %v3757_v14, %v3695_v43  ;;  %v3762_v1 = vadd.f32 %v3698_v15, %v3697_v42 }
 0x4bb   :  { %v3759_v18 = vadd.f32 %v3758_v55, %v3696_v26  ;;  %v3763_v40 = vadd.f32 %v3762_v1, %v3699_v32 }
 0x4bd   :  { %3760 = vadd.xlane.f32.xlu0 %v3759_v18  ;;  %v3764_v7 = vadd.f32 %v3763_v40, %v3700_v34 }
 0x4bf   :  { %3765 = vadd.xlane.f32.xlu1 %v3764_v7 }
 0x4c0   :  { %v3546_v45 = vpop.xlane.xlu0 %3545 }
 0x4c1   :  { %v3615_v9 = vmul.f32 0.001953125, %v3546_v45  ;;  %v13055_v45 = vld [vmem:[%s21295_s26 + $0x1ec] ss:$24 sps:$4 sm:$0xff]  }
 0x4c2   :  { %v3551_v8 = vpop.xlane.xlu1 %3550  ;;  %5583 = vmatprep.subr.bf16.mxu1 %v13055_v45 }
 0x4c3   :  { %v16481_v29 = vsub.f32 %v15812_v13, %v3615_v9  ;;  %v16484_v12 = vsub.f32 %v15816_v51, %v3615_v9  ;;  %v3616_v43 = vmul.f32 0.001953125, %v3551_v8  ;;  %v16487_v14 = vsub.f32 %v15844_v3, %v3615_v9 }
 0x4c4   :  { %v16490_v42 = vsub.f32 %v15848_v5, %v3615_v9 }
 0x4c5   :  { %v3701_v15 = vmul.f32 %v16481_v29, %v16481_v29  ;;  %v3702_v26 = vmul.f32 %v16484_v12, %v16484_v12  ;;  %v16497_v55 = vsub.f32 %v15827_v60, %v3616_v43  ;;  %v16500_v13 = vsub.f32 %v15831_v46, %v3616_v43 }
 0x4c6   :  { %v16503_v51 = vsub.f32 %v15855_v59, %v3616_v43  ;;  %v3703_v3 = vmul.f32 %v16487_v14, %v16487_v14  ;;  %v16510_v32 = vsub.f32 %v15859_v52, %v3616_v43  ;;  %v3704_v46 = vmul.f32 %v16490_v42, %v16490_v42  ;;  %v13052_v52 = vld [vmem:[%s21295_s26 + $0x1e4] ss:$24 sps:$4 sm:$0xff]   ;;  %v13050_v43 = vld [vmem:[%s21295_s26 + $0x1e0] ss:$24 sps:$4 sm:$0xff]  }
 0x4c7   :  { %v3767_v5 = vadd.f32 %v3702_v26, %v3701_v15  ;;  %v3705_v9 = vmul.f32 %v16497_v55, %v16497_v55  ;;  %v3706_v60 = vmul.f32 %v16500_v13, %v16500_v13  ;;  %v13053_v15 = vld [vmem:[%s21295_s26 + $0x1e8] ss:$24 sps:$4 sm:$0xff]   ;;  %5357 = vmatprep.subr.bf16.mxu0 %v13052_v52 }
 0x4c8   :  { %v3707_v59 = vmul.f32 %v16503_v51, %v16503_v51  ;;  %v3708_v40 = vmul.f32 %v16510_v32, %v16510_v32  ;;  %5358 = vmatpush1.bf16.msra.mxu0 %v13050_v43  ;;  %5584 = vmatpush1.bf16.msra.mxu1 %v13053_v15  ;;  %v13070_v15 = vld [vmem:[%s21295_s26 + $0x274] ss:$24 sps:$4 sm:$0xff]  }
 0x4c9   :  { %v3768_v1 = vadd.f32 %v3767_v5, %v3703_v3  ;;  %v3772_v18 = vadd.f32 %v3706_v60, %v3705_v9  ;;  %v13058_v5 = vld [vmem:[%s21295_s26 + $0x214] ss:$24 sps:$4 sm:$0xff]  }
 0x4ca   :  { %v13061_v9 = vld [vmem:[%s21295_s26 + $0x21c] ss:$24 sps:$4 sm:$0xff]   ;;  %5359 = vmatprep.subr.bf16.mxu0 %v13058_v5 }
 0x4cb   :  { %v3769_v34 = vadd.f32 %v3768_v1, %v3704_v46  ;;  %v3773_v7 = vadd.f32 %v3772_v18, %v3707_v59  ;;  %v13056_v46 = vld [vmem:[%s21295_s26 + $0x210] ss:$24 sps:$4 sm:$0xff]   ;;  %5585 = vmatprep.subr.bf16.mxu1 %v13061_v9 }
 0x4cc   :  { %v13059_v1 = vld [vmem:[%s21295_s26 + $0x218] ss:$24 sps:$4 sm:$0xff]   ;;  %5360 = vmatpush1.bf16.msra.mxu0 %v13056_v46 }
 0x4cd   :  { %3770 = vadd.xlane.f32.xlu0 %v3769_v34  ;;  %v3774_v8 = vadd.f32 %v3773_v7, %v3708_v40  ;;  %v13064_v7 = vld [vmem:[%s21295_s26 + $0x244] ss:$24 sps:$4 sm:$0xff]   ;;  %5586 = vmatpush1.bf16.msra.mxu1 %v13059_v1 }
 0x4ce   :  { %5361 = vmatprep.subr.bf16.mxu0 %v13064_v7 }
 0x4cf   :  { %3775 = vadd.xlane.f32.xlu1 %v3774_v8 }
 0x4d0   :  { %v3556_v26 = vpop.xlane.xlu0 %3555 }
 0x4d1   :  { %v3617_v3 = vmul.f32 0.001953125, %v3556_v26  ;;  %v13073_v26 = vld [vmem:[%s21295_s26 + $0x27c] ss:$24 sps:$4 sm:$0xff]  }
 0x4d2   :  { %v3561_v60 = vpop.xlane.xlu1 %3560 }
 0x4d3   :  { %v16545_v59 = vsub.f32 %v15888_v44, %v3617_v3  ;;  %v16548_v18 = vsub.f32 %v15892_v35, %v3617_v3  ;;  %v3618_v34 = vmul.f32 0.001953125, %v3561_v60  ;;  %v16551_v40 = vsub.f32 %v15926_v22, %v3617_v3  ;;  %v13062_v44 = vld [vmem:[%s21295_s26 + $0x240] ss:$24 sps:$4 sm:$0xff]   ;;  %v13067_v22 = vld [vmem:[%s21295_s26 + $0x24c] ss:$24 sps:$4 sm:$0xff]  }
 0x4d4   :  { %v16557_v52 = vsub.f32 %v15932_v21, %v3617_v3  ;;  %v13065_v35 = vld [vmem:[%s21295_s26 + $0x248] ss:$24 sps:$4 sm:$0xff]   ;;  %5587 = vmatprep.subr.bf16.mxu1 %v13067_v22  ;;  %5362 = vmatpush1.bf16.msra.mxu0 %v13062_v44  ;;  %v13076_v44 = vld [vmem:[%s21295_s26 + $0x2a4] ss:$24 sps:$4 sm:$0xff]  }
 0x4d5   :  { %21299 = vst [vmem:[#allocation59_spill] sm:$0xff] %v16551_v40  ;;  %v16569_v45 = vsub.f32 %v15905_v58, %v3618_v34  ;;  %v16572_v8 = vsub.f32 %v15909_v27, %v3618_v34  ;;  %v3709_v21 = vmul.f32 %v16545_v59, %v16545_v59  ;;  %v3710_v43 = vmul.f32 %v16548_v18, %v16548_v18  ;;  %v13068_v3 = vld [vmem:[%s21295_s26 + $0x270] ss:$24 sps:$4 sm:$0xff]  }
 0x4d6   :  { %v3711_v58 = vmul.f32 %v16551_v40, %v16551_v40  ;;  %v16587_v27 = vsub.f32 %v15939_v19, %v3618_v34  ;;  %v16593_v9 = vsub.f32 %v15943_v11, %v3618_v34  ;;  %v13071_v19 = vld [vmem:[%s21295_s26 + $0x278] ss:$24 sps:$4 sm:$0xff]   ;;  %v3712_v1 = vmul.f32 %v16557_v52, %v16557_v52  ;;  %5588 = vmatpush1.bf16.msra.mxu1 %v13065_v35 }
 0x4d7   :  { %v3777_v5 = vadd.f32 %v3710_v43, %v3709_v21  ;;  %v3713_v60 = vmul.f32 %v16569_v45, %v16569_v45  ;;  %v3714_v46 = vmul.f32 %v16572_v8, %v16572_v8  ;;  %5363 = vmatprep.subr.bf16.mxu0 %v13070_v15  ;;  %5589 = vmatprep.subr.bf16.mxu1 %v13073_v26  ;;  %v13074_v35 = vld [vmem:[%s21295_s26 + $0x2a0] ss:$24 sps:$4 sm:$0xff]  }
 0x4d8   :  { %21300 = vst [vmem:[#allocation60_spill] sm:$0xff] %v16587_v27  ;;  %v3715_v11 = vmul.f32 %v16587_v27, %v16587_v27  ;;  %v3716_v22 = vmul.f32 %v16593_v9, %v16593_v9  ;;  %5364 = vmatpush1.bf16.msra.mxu0 %v13068_v3  ;;  %v13077_v15 = vld [vmem:[%s21295_s26 + $0x2a8] ss:$24 sps:$4 sm:$0xff]  }
 0x4d9   :  { %v3778_v7 = vadd.f32 %v3777_v5, %v3711_v58  ;;  %v3782_v34 = vadd.f32 %v3714_v46, %v3713_v60  ;;  %v13079_v58 = vld [vmem:[%s21295_s26 + $0x2ac] ss:$24 sps:$4 sm:$0xff]   ;;  %5365 = vmatprep.subr.bf16.mxu0 %v13076_v44  ;;  %v13085_v60 = vld [vmem:[%s21295_s26 + $0x2dc] ss:$24 sps:$4 sm:$0xff]  }
 0x4da   :  { %5590 = vmatpush1.bf16.msra.mxu1 %v13071_v19  ;;  %v13082_v5 = vld [vmem:[%s21295_s26 + $0x2d4] ss:$24 sps:$4 sm:$0xff]   ;;  %v13080_v19 = vld [vmem:[%s21295_s26 + $0x2d0] ss:$24 sps:$4 sm:$0xff]  }
 0x4db   :  { %v3779_v21 = vadd.f32 %v3778_v7, %v3712_v1  ;;  %v3783_v43 = vadd.f32 %v3782_v34, %v3715_v11  ;;  %5591 = vmatprep.subr.bf16.mxu1 %v13079_v58 }
 0x4dc   :  { %5366 = vmatpush1.bf16.msra.mxu0 %v13074_v35 }
 0x4dd   :  { %3780 = vadd.xlane.f32.xlu0 %v3779_v21  ;;  %v3784_v40 = vadd.f32 %v3783_v43, %v3716_v22  ;;  %5367 = vmatprep.subr.bf16.mxu0 %v13082_v5 }
 0x4de   :  { %5592 = vmatpush1.bf16.msra.mxu1 %v13077_v15 }
 0x4df   :  { %3785 = vadd.xlane.f32.xlu1 %v3784_v40  ;;  %v13083_v40 = vld [vmem:[%s21295_s26 + $0x2d8] ss:$24 sps:$4 sm:$0xff]   ;;  %5593 = vmatprep.subr.bf16.mxu1 %v13085_v60 }
 0x4e0   :  { %v3566_v26 = vpop.xlane.xlu0 %3565  ;;  %5368 = vmatpush1.bf16.msra.mxu0 %v13080_v19 }
 0x4e1   :  { %v3619_v3 = vmul.f32 0.001953125, %v3566_v26 }
 0x4e2   :  { %v3571_v46 = vpop.xlane.xlu1 %3570  ;;  %5594 = vmatpush1.bf16.msra.mxu1 %v13083_v40  ;;  %v21306_v40 = vld [vmem:[#allocation30_spill] sm:$0xff] }
 0x4e3   :  { %v16633_v1 = vsub.f32 %v15972_v28, %v3619_v3  ;;  %v16636_v7 = vsub.f32 %v15976_v4, %v3619_v3  ;;  %v3620_v11 = vmul.f32 0.001953125, %v3571_v46  ;;  %v16639_v34 = vsub.f32 %v16017_v10, %v3619_v3  ;;  %v21305_v46 = vld [vmem:[#allocation29_spill] sm:$0xff] }
 0x4e4   :  { %v16642_v21 = vsub.f32 %v16029_v53, %v3619_v3 }
 0x4e5   :  { %21301 = vst [vmem:[#allocation61_spill] sm:$0xff] %v16639_v34  ;;  %v16645_v22 = vsub.f32 %v15989_v54, %v3620_v11  ;;  %v16648_v43 = vsub.f32 %v15993_v63, %v3620_v11  ;;  %v3717_v28 = vmul.f32 %v16633_v1, %v16633_v1  ;;  %v3718_v4 = vmul.f32 %v16636_v7, %v16636_v7 }
 0x4e6   :  { %21302 = vst [vmem:[#allocation62_spill] sm:$0xff] %v16642_v21  ;;  %v16655_v10 = vsub.f32 %v16037_v30, %v3620_v11  ;;  %v3719_v53 = vmul.f32 %v16639_v34, %v16639_v34  ;;  %v16664_v35 = vsub.f32 %v16041_v56, %v3620_v11  ;;  %v3720_v26 = vmul.f32 %v16642_v21, %v16642_v21 }
 0x4e7   :  { %v3787_v44 = vadd.f32 %v3718_v4, %v3717_v28  ;;  %v3721_v54 = vmul.f32 %v16645_v22, %v16645_v22  ;;  %v3722_v63 = vmul.f32 %v16648_v43, %v16648_v43 }
 0x4e8   :  { %21303 = vst [vmem:[#allocation63_spill] sm:$0xff] %v16655_v10  ;;  %v3576_v58 = vpop.xlane.xlu0 %3575  ;;  %21304 = vst [vmem:[#allocation64_spill] sm:$0xff] %v16664_v35  ;;  %v3723_v60 = vmul.f32 %v16655_v10, %v16655_v10  ;;  %v3724_v56 = vmul.f32 %v16664_v35, %v16664_v35  ;;  %v21314_v10 = vld [vmem:[#allocation38_spill] sm:$0xff] }
 0x4e9   :  { %v3621_v15 = vmul.f32 0.001953125, %v3576_v58  ;;  %v3788_v30 = vadd.f32 %v3787_v44, %v3719_v53  ;;  %v3792_v3 = vadd.f32 %v3722_v63, %v3721_v54  ;;  %v21309_v54 = vld [vmem:[#allocation31_spill] sm:$0xff] }
 0x4ea   :  { %v3581_v5 = vpop.xlane.xlu1 %3580 }
 0x4eb   :  { %v16671_v19 = vsub.f32 %v21305_v46, %v3621_v15  ;;  %v16674_v28 = vsub.f32 %v21306_v40, %v3621_v15  ;;  %v3622_v4 = vmul.f32 0.001953125, %v3581_v5  ;;  %v3789_v34 = vadd.f32 %v3788_v30, %v3720_v26 }
 0x4ec   :  { %v3793_v11 = vadd.f32 %v3792_v3, %v3723_v60  ;;  %v16679_v58 = vsub.f32 %v16091_v37, %v3621_v15  ;;  %v16682_v53 = vsub.f32 %v16101_v50, %v3621_v15  ;;  %v21311_v60 = vld [vmem:[#allocation35_spill] sm:$0xff] }
 0x4ed   :  { %v16685_v44 = vsub.f32 %v16065_v62, %v3622_v4  ;;  %v16688_v63 = vsub.f32 %v21309_v54, %v3622_v4  ;;  %3790 = vadd.xlane.f32.xlu0 %v3789_v34  ;;  %v3725_v26 = vmul.f32 %v16671_v19, %v16671_v19  ;;  %v3726_v30 = vmul.f32 %v16674_v28, %v16674_v28 }
 0x4ee   :  { %21307 = vst [vmem:[#allocation29_spill] sm:$0xff] %v16679_v58  ;;  %21308 = vst [vmem:[#allocation30_spill] sm:$0xff] %v16682_v53  ;;  %v3794_v3 = vadd.f32 %v3793_v11, %v3724_v56  ;;  %v16695_v37 = vsub.f32 %v16109_v33, %v3622_v4  ;;  %v3727_v50 = vmul.f32 %v16679_v58, %v16679_v58 }
 0x4ef   :  { %v3797_v15 = vadd.f32 %v3726_v30, %v3725_v26  ;;  %v3729_v62 = vmul.f32 %v16685_v44, %v16685_v44  ;;  %v3730_v34 = vmul.f32 %v16688_v63, %v16688_v63  ;;  %v16704_v46 = vsub.f32 %v21311_v60, %v3622_v4  ;;  %v21313_v30 = vld [vmem:[#allocation37_spill] sm:$0xff] }
 0x4f0   :  { %21310 = vst [vmem:[#allocation31_spill] sm:$0xff] %v16695_v37  ;;  %3795 = vadd.xlane.f32.xlu1 %v3794_v3  ;;  %v3586_v5 = vpop.xlane.xlu0 %3585  ;;  %v3728_v33 = vmul.f32 %v16682_v53, %v16682_v53  ;;  %v3731_v26 = vmul.f32 %v16695_v37, %v16695_v37  ;;  %v21322_v37 = vld [vmem:[#allocation46_spill] sm:$0xff] }
 0x4f1   :  { %21312 = vst [vmem:[#allocation35_spill] sm:$0xff] %v16704_v46  ;;  %v3623_v40 = vmul.f32 0.001953125, %v3586_v5  ;;  %v3798_v56 = vadd.f32 %v3797_v15, %v3727_v50  ;;  %v3802_v11 = vadd.f32 %v3730_v34, %v3729_v62  ;;  %v3732_v4 = vmul.f32 %v16704_v46, %v16704_v46  ;;  %v21317_v62 = vld [vmem:[#allocation39_spill] sm:$0xff] }
 0x4f2   :  { %v3591_v54 = vpop.xlane.xlu1 %3590 }
 0x4f3   :  { %v16711_v58 = vsub.f32 %v21313_v30, %v3623_v40  ;;  %v16714_v35 = vsub.f32 %v21314_v10, %v3623_v40  ;;  %v3624_v3 = vmul.f32 0.001953125, %v3591_v54  ;;  %v3799_v21 = vadd.f32 %v3798_v56, %v3728_v33  ;;  %v21319_v54 = vld [vmem:[#allocation43_spill] sm:$0xff] }
 0x4f4   :  { %v3803_v5 = vadd.f32 %v3802_v11, %v3731_v26  ;;  %v16719_v60 = vsub.f32 %v16163_v49, %v3623_v40  ;;  %v16722_v50 = vsub.f32 %v16173_v36, %v3623_v40 }
 0x4f5   :  { %v16725_v15 = vsub.f32 %v16137_v41, %v3624_v3  ;;  %v16728_v34 = vsub.f32 %v21317_v62, %v3624_v3  ;;  %3800 = vadd.xlane.f32.xlu0 %v3799_v21  ;;  %v3733_v10 = vmul.f32 %v16711_v58, %v16711_v58  ;;  %v3734_v33 = vmul.f32 %v16714_v35, %v16714_v35 }
 0x4f6   :  { %21315 = vst [vmem:[#allocation37_spill] sm:$0xff] %v16719_v60  ;;  %21316 = vst [vmem:[#allocation38_spill] sm:$0xff] %v16722_v50  ;;  %v3804_v56 = vadd.f32 %v3803_v5, %v3732_v4  ;;  %v16735_v49 = vsub.f32 %v16181_v23, %v3624_v3  ;;  %v3735_v36 = vmul.f32 %v16719_v60, %v16719_v60 }
 0x4f7   :  { %v3807_v40 = vadd.f32 %v3734_v33, %v3733_v10  ;;  %v3737_v41 = vmul.f32 %v16725_v15, %v16725_v15  ;;  %v3738_v21 = vmul.f32 %v16728_v34, %v16728_v34  ;;  %v16744_v26 = vsub.f32 %v21319_v54, %v3624_v3  ;;  %v21321_v33 = vld [vmem:[#allocation45_spill] sm:$0xff] }
 0x4f8   :  { %21318 = vst [vmem:[#allocation39_spill] sm:$0xff] %v16735_v49  ;;  %3805 = vadd.xlane.f32.xlu1 %v3804_v56  ;;  %v3596_v11 = vpop.xlane.xlu0 %3595  ;;  %v3736_v23 = vmul.f32 %v16722_v50, %v16722_v50  ;;  %v3739_v10 = vmul.f32 %v16735_v49, %v16735_v49 }
 0x4f9   :  { %21320 = vst [vmem:[#allocation43_spill] sm:$0xff] %v16744_v26  ;;  %v3625_v30 = vmul.f32 0.001953125, %v3596_v11  ;;  %v3808_v4 = vadd.f32 %v3807_v40, %v3735_v36  ;;  %v3812_v5 = vadd.f32 %v3738_v21, %v3737_v41  ;;  %v3740_v3 = vmul.f32 %v16744_v26, %v16744_v26  ;;  %v13088_v40 = vld [vmem:[%s21295_s26 + $0x30c] ss:$24 sps:$4 sm:$0xff]  }
 0x4fa   :  { %v3601_v62 = vpop.xlane.xlu1 %3600  ;;  %5676 = vmatprep.subr.bf16.mxu1 %v13088_v40  ;;  %v21346_v26 = vld [vmem:[#allocation57_spill] sm:$0xff] }
 0x4fb   :  { %v16751_v60 = vsub.f32 %v21321_v33, %v3625_v30  ;;  %v16754_v46 = vsub.f32 %v21322_v37, %v3625_v30  ;;  %v3626_v56 = vmul.f32 0.001953125, %v3601_v62  ;;  %v3809_v53 = vadd.f32 %v3808_v4, %v3736_v23  ;;  %v21325_v37 = vld [vmem:[#allocation47_spill] sm:$0xff] }
 0x4fc   :  { %v3813_v11 = vadd.f32 %v3812_v5, %v3739_v10  ;;  %v16759_v54 = vsub.f32 %v16235_v31, %v3625_v30  ;;  %v16762_v36 = vsub.f32 %v16245_v48, %v3625_v30  ;;  %v13091_v48 = vld [vmem:[%s21295_s26 + $0x304] ss:$24 sps:$4 sm:$0xff]  }
 0x4fd   :  { %v16768_v41 = vsub.f32 %v16209_v17, %v3626_v56  ;;  %v16771_v21 = vsub.f32 %v21325_v37, %v3626_v56  ;;  %3810 = vadd.xlane.f32.xlu0 %v3809_v53  ;;  %v3741_v23 = vmul.f32 %v16751_v60, %v16751_v60  ;;  %v3742_v31 = vmul.f32 %v16754_v46, %v16754_v46 }
 0x4fe   :  { %21323 = vst [vmem:[#allocation45_spill] sm:$0xff] %v16759_v54  ;;  %21324 = vst [vmem:[#allocation46_spill] sm:$0xff] %v16762_v36  ;;  %v3814_v30 = vadd.f32 %v3813_v11, %v3740_v3  ;;  %v16781_v4 = vsub.f32 %v16253_v39, %v3626_v56  ;;  %v3743_v17 = vmul.f32 %v16759_v54, %v16759_v54  ;;  %5450 = vmatprep.subr.bf16.mxu0 %v13091_v48  ;;  %v21328_v54 = vld [vmem:[#allocation52_spill] sm:$0xff] }
 0x4ff   :  { %v3817_v5 = vadd.f32 %v3742_v31, %v3741_v23  ;;  %v3745_v53 = vmul.f32 %v16768_v41, %v16768_v41  ;;  %v3746_v62 = vmul.f32 %v16771_v21, %v16771_v21  ;;  %v16790_v33 = vsub.f32 %v16257_v2, %v3626_v56 }
 0x500   :  { %21326 = vst [vmem:[#allocation47_spill] sm:$0xff] %v16781_v4  ;;  %3815 = vadd.xlane.f32.xlu1 %v3814_v30  ;;  %v3606_v10 = vpop.xlane.xlu0 %3605  ;;  %v3744_v39 = vmul.f32 %v16762_v36, %v16762_v36  ;;  %v3747_v23 = vmul.f32 %v16781_v4, %v16781_v4 }
 0x501   :  { %21327 = vst [vmem:[#allocation65_spill] sm:$0xff] %v16790_v33  ;;  %v3627_v3 = vmul.f32 0.001953125, %v3606_v10  ;;  %v3818_v11 = vadd.f32 %v3817_v5, %v3743_v17  ;;  %v3822_v40 = vadd.f32 %v3746_v62, %v3745_v53  ;;  %v3748_v2 = vmul.f32 %v16790_v33, %v16790_v33 }
 0x502   :  { %v3611_v37 = vpop.xlane.xlu1 %3610 }
 0x503   :  { %v16797_v31 = vsub.f32 %v16268_v6, %v3627_v3  ;;  %v16800_v48 = vsub.f32 %v21328_v54, %v3627_v3  ;;  %v3628_v30 = vmul.f32 0.001953125, %v3611_v37  ;;  %v3819_v49 = vadd.f32 %v3818_v11, %v3744_v39  ;;  %v21332_v39 = vld [vmem:[#allocation54_spill] sm:$0xff] }
 0x504   :  { %v3823_v56 = vadd.f32 %v3822_v40, %v3747_v23  ;;  %v16805_v10 = vsub.f32 %v16300_v20, %v3627_v3  ;;  %v16808_v17 = vsub.f32 %v16304_v47, %v3627_v3 }
 0x505   :  { %v16811_v5 = vsub.f32 %v16281_v24, %v3628_v30  ;;  %v16814_v6 = vsub.f32 %v16286_v25, %v3628_v30  ;;  %3820 = vadd.xlane.f32.xlu0 %v3819_v49  ;;  %v3749_v54 = vmul.f32 %v16797_v31, %v16797_v31  ;;  %v3750_v53 = vmul.f32 %v16800_v48, %v16800_v48  ;;  %v21334_v24 = vld [vmem:[#allocation55_spill] sm:$0xff] }
 0x506   :  { %21329 = vst [vmem:[#allocation52_spill] sm:$0xff] %v16805_v10  ;;  %21330 = vst [vmem:[#allocation66_spill] sm:$0xff] %v16808_v17  ;;  %v3824_v62 = vadd.f32 %v3823_v56, %v3748_v2  ;;  %v3751_v20 = vmul.f32 %v16805_v10, %v16805_v10  ;;  %v16823_v47 = vsub.f32 %v21332_v39, %v3628_v30 }
 0x507   :  { %21331 = vst [vmem:[#allocation67_spill] sm:$0xff] %v16811_v5  ;;  %v3827_v3 = vadd.f32 %v3750_v53, %v3749_v54  ;;  %v16826_v11 = vsub.f32 %v21334_v24, %v3628_v30  ;;  %v3753_v25 = vmul.f32 %v16811_v5, %v16811_v5  ;;  %v3754_v49 = vmul.f32 %v16814_v6, %v16814_v6 }
 0x508   :  { %21333 = vst [vmem:[#allocation54_spill] sm:$0xff] %v16823_v47  ;;  %3825 = vadd.xlane.f32.xlu1 %v3824_v62  ;;  %v3752_v40 = vmul.f32 %v16808_v17, %v16808_v17  ;;  %v3755_v23 = vmul.f32 %v16823_v47, %v16823_v47 }
 0x509   :  { %21335 = vst [vmem:[#allocation55_spill] sm:$0xff] %v16826_v11  ;;  %v3828_v37 = vadd.f32 %v3827_v3, %v3751_v20  ;;  %v3832_v2 = vadd.f32 %v3754_v49, %v3753_v25  ;;  %v3756_v30 = vmul.f32 %v16826_v11, %v16826_v11  ;;  %v3949_v20 = vld [vmem:[%s21336_s3] sm:$0xf]  ;;  %v21338_v25 = vld [vmem:[#allocation7_spill] sm:$0xff] }
 0x50a   :  { %v4035_v3 = vld [vmem:[%s21337_s5] sm:$0xf]  ;;  %v16845_v49 = vrot.slane %v3949_v20, %v21338_v25 }
 0x50b   :  { %v3829_v56 = vadd.f32 %v3828_v37, %v3752_v40  ;;  %v3833_v54 = vadd.f32 %v3832_v2, %v3755_v23  ;;  %v21339_v40 = vld [vmem:[#allocation6_spill] sm:$0xff]  ;;  %v21340_v23 = vld [vmem:[#allocation9_spill] sm:$0xff]  ;;  %v16864_v11 = vrot.slane %v4035_v3, %v21338_v25 }
 0x50c   :  { %v16848_v37 = vrot.slane %v3949_v20, %v21339_v40  ;;  %v16851_v2 = vrot.slane %v3949_v20, %v21340_v23 }
 0x50d   :  { %3830 = vadd.xlane.f32.xlu0 %v3829_v56  ;;  %v3834_v53 = vadd.f32 %v3833_v54, %v3756_v30  ;;  %v16857_v56 = vrot.slane %v4035_v3, %v21340_v23 }
 0x50e   :  { %21341 = vst [vmem:[#allocation68_spill] sm:$0xff] %v16851_v2 }
 0x50f   :  { %3835 = vadd.xlane.f32.xlu1 %v3834_v53  ;;  %v21343_v53 = vld [vmem:[#allocation56_spill] sm:$0xff] }
 0x54a   :  { %v3761_v39 = vpop.xlane.xlu0 %3760 }
 0x54b   :  { %v3837_v24 = vmul.f32 0.001953125, %v3761_v39 }
 0x54c   :  { %v3766_v62 = vpop.xlane.xlu1 %3765 }
 0x54d   :  { %v3853_v10 = vadd.f32 1e-05, %v3837_v24  ;;  %v3838_v4 = vmul.f32 0.001953125, %v3766_v62 }
 0x54f   :  { %13726 = vrsqrt.f32 %v3853_v10  ;;  %v3854_v17 = vadd.f32 1e-05, %v3838_v4  ;;  %v21342_v10 = vld [vmem:[#allocation8_spill] sm:$0xff] }
 0x550   :  { %v16854_v4 = vrot.slane %v3949_v20, %v21342_v10  ;;  %v16867_v20 = vrot.slane %v4035_v3, %v21339_v40  ;;  %v16870_v33 = vrot.slane %v4035_v3, %v21342_v10 }
 0x551   :  { %13728 = vrsqrt.f32 %v3854_v17 }
 0x552   :  { %21344 = vst [vmem:[#allocation56_spill] sm:$0xff] %v16870_v33 }
 0x559   :  { %v13727_v17 = vpop.eup %13726 }
 0x55a   :  { %v3771_v30 = vpop.xlane.xlu0 %3770  ;;  %v3886_v54 = vmul.f32 %v13727_v17, %v16441_v0  ;;  %v3885_v39 = vmul.f32 %v13727_v17, %v21343_v53  ;;  %v3888_v24 = vmul.f32 %v13727_v17, %v16450_v57  ;;  %v3887_v62 = vmul.f32 %v13727_v17, %v16444_v61 }
 0x55b   :  { %v3839_v47 = vmul.f32 0.001953125, %v3771_v30  ;;  %v13729_v23 = vpop.eup %13728  ;;  %v21345_v30 = vld [vmem:[#allocation58_spill] sm:$0xff] }
 0x55c   :  { %v3972_v36 = vmul.f32 %v16845_v49, %v3886_v54  ;;  %v3971_v0 = vmul.f32 %v16848_v37, %v3885_v39  ;;  %v3974_v53 = vmul.f32 %v16851_v2, %v3888_v24  ;;  %v3973_v57 = vmul.f32 %v16854_v4, %v3887_v62  ;;  %v3776_v17 = vpop.xlane.xlu1 %3775 }
 0x55d   :  { %v3855_v61 = vadd.f32 1e-05, %v3839_v47  ;;  %v3890_v25 = vmul.f32 %v13729_v23, %v21345_v30  ;;  %v3889_v50 = vmul.f32 %v13729_v23, %v21346_v26  ;;  %v3892_v40 = vmul.f32 %v13729_v23, %v16470_v16 }
 0x55e   :  { %v3840_v27 = vmul.f32 0.001953125, %v3776_v17  ;;  %v16880_v3 = vadd.f32 %v16857_v56, %v3974_v53  ;;  %v16886_v47 = vadd.f32 %v16864_v11, %v3972_v36  ;;  %v3891_v30 = vmul.f32 %v13729_v23, %v16463_v38  ;;  %v13089_v23 = vld [vmem:[%s21295_s26 + $0x300] ss:$24 sps:$4 sm:$0xff]  }
 0x55f   :  { %13730 = vrsqrt.f32 %v3855_v61  ;;  %v3976_v54 = vmul.f32 %v16845_v49, %v3890_v25  ;;  %v3975_v39 = vmul.f32 %v16848_v37, %v3889_v50  ;;  %v3978_v24 = vmul.f32 %v16851_v2, %v3892_v40  ;;  %v13086_v40 = vld [vmem:[%s21295_s26 + $0x308] ss:$24 sps:$4 sm:$0xff]   ;;  %v13092_v17 = vld [vmem:[%s21295_s26 + $0x338] ss:$24 sps:$4 sm:$0xff]  }
 0x560   :  { %21347 = vst [vmem:[#allocation58_spill] sm:$0xff] %v16880_v3  ;;  %v3856_v62 = vadd.f32 1e-05, %v3840_v27  ;;  %21348 = vst [vmem:[#allocation57_spill] sm:$0xff] %v16886_v47  ;;  %v16890_v26 = vadd.f32 %v16870_v33, %v3973_v57  ;;  %v16896_v53 = vadd.f32 %v16867_v20, %v3971_v0  ;;  %v3977_v27 = vmul.f32 %v16854_v4, %v3891_v30  ;;  %v13094_v0 = vld [vmem:[%s21295_s26 + $0x33c] ss:$24 sps:$4 sm:$0xff]  }
 0x561   :  { %v16893_v16 = vadd.f32 %v16864_v11, %v3976_v54  ;;  %v16899_v25 = vadd.f32 %v16867_v20, %v3975_v39  ;;  %v16902_v50 = vadd.f32 %v16857_v56, %v3978_v24  ;;  %v13097_v57 = vld [vmem:[%s21295_s26 + $0x334] ss:$24 sps:$4 sm:$0xff]   ;;  %v13095_v54 = vld [vmem:[%s21295_s26 + $0x330] ss:$24 sps:$4 sm:$0xff]   ;;  %v13103_v24 = vld [vmem:[%s21295_s26 + $0x364] ss:$24 sps:$4 sm:$0xff]  }
 0x562   :  { %21349 = vst [vmem:[#allocation69_spill] sm:$0xff] %v16890_v26  ;;  %21351 = vst [vmem:[#allocation71_spill] sm:$0xff] %v16896_v53  ;;  %13732 = vrsqrt.f32 %v3856_v62  ;;  %v16926_v61 = vadd.f32 %v16870_v33, %v3977_v27  ;;  %v13100_v39 = vld [vmem:[%s21295_s26 + $0x36c] ss:$24 sps:$4 sm:$0xff]  }
 0x563   :  { %21350 = vst [vmem:[#allocation70_spill] sm:$0xff] %v16893_v16  ;;  %21352 = vst [vmem:[#allocation72_spill] sm:$0xff] %v16899_v25  ;;  %v16907_v38 = vpack.c.bf16 %v16893_v16, %v16886_v47  ;;  %v16911_v36 = vpack.c.bf16 %v16899_v25, %v16896_v53 }
 0x564   :  { %21353 = vst [vmem:[#allocation73_spill] sm:$0xff] %v16902_v50  ;;  %21356 = vst [vmem:[#allocation76_spill] sm:$0xff] %v16926_v61 }
 0x565   :  { %21354 = vst [vmem:[#allocation74_spill] sm:$0xff] %v16907_v38  ;;  %21355 = vst [vmem:[#allocation75_spill] sm:$0xff] %v16911_v36  ;;  %5369 = vmatprep.mubr.bf16.mxu0 %v16907_v38  ;;  %5595 = vmatprep.mubr.bf16.mxu1 %v16907_v38 }
 0x566   :  { %5370 = vmatmul.mubr.bf16.vlgmr.msra.gmra.mrb[80].mxu0 %v16911_v36  ;;  %5596 = vmatmul.mubr.bf16.vlgmr.msra.gmra.mrb[156].mxu1 %v16911_v36 }
 0x567   :  { %5677 = vmatpush1.bf16.msra.mxu1 %v13086_v40  ;;  %5451 = vmatpush1.bf16.msra.mxu0 %v13089_v23 }
 0x568   :  { %5678 = vmatprep.subr.bf16.mxu1 %v13094_v0  ;;  %5452 = vmatprep.subr.bf16.mxu0 %v13097_v57  ;;  %v13098_v0 = vld [vmem:[%s21295_s26 + $0x368] ss:$24 sps:$4 sm:$0xff]  }
 0x569   :  { %v13731_v62 = vpop.eup %13730  ;;  %v13101_v57 = vld [vmem:[%s21295_s26 + $0x360] ss:$24 sps:$4 sm:$0xff]  }
 0x56a   :  { %v3781_v30 = vpop.xlane.xlu0 %3780  ;;  %v3894_v27 = vmul.f32 %v13731_v62, %v16484_v12  ;;  %v3893_v40 = vmul.f32 %v13731_v62, %v16481_v29  ;;  %v13106_v12 = vld [vmem:[%s21295_s26 + $0x39c] ss:$24 sps:$4 sm:$0xff]  }
 0x56b   :  { %v3841_v23 = vmul.f32 0.001953125, %v3781_v30  ;;  %5679 = vmatpush1.bf16.msra.mxu1 %v13092_v17  ;;  %5453 = vmatpush1.bf16.msra.mxu0 %v13095_v54  ;;  %v13109_v29 = vld [vmem:[%s21295_s26 + $0x394] ss:$24 sps:$4 sm:$0xff]  }
 0x56c   :  { %v13733_v10 = vpop.eup %13732  ;;  %v3786_v36 = vpop.xlane.xlu1 %3785  ;;  %5680 = vmatprep.subr.bf16.mxu1 %v13100_v39  ;;  %5454 = vmatprep.subr.bf16.mxu0 %v13103_v24  ;;  %v3980_v30 = vmul.f32 %v16845_v49, %v3894_v27  ;;  %v3979_v61 = vmul.f32 %v16848_v37, %v3893_v40  ;;  %v13104_v24 = vld [vmem:[%s21295_s26 + $0x398] ss:$24 sps:$4 sm:$0xff]   ;;  %v3896_v27 = vmul.f32 %v13731_v62, %v16490_v42  ;;  %v13112_v40 = vld [vmem:[%s21295_s26 + $0x3cc] ss:$24 sps:$4 sm:$0xff]  }
 0x56d   :  { %v3857_v17 = vadd.f32 1e-05, %v3841_v23  ;;  %v3842_v54 = vmul.f32 0.001953125, %v3786_v36  ;;  %v3898_v38 = vmul.f32 %v13733_v10, %v16500_v13  ;;  %v3897_v5 = vmul.f32 %v13733_v10, %v16497_v55  ;;  %v13107_v36 = vld [vmem:[%s21295_s26 + $0x390] ss:$24 sps:$4 sm:$0xff]  }
 0x56e   :  { %v16975_v23 = vadd.f32 %v16864_v11, %v3980_v30  ;;  %v13121_v30 = vld [vmem:[%s21295_s26 + $0x3f4] ss:$24 sps:$4 sm:$0xff]  }
 0x56f   :  { %13734 = vrsqrt.f32 %v3857_v17  ;;  %v3858_v39 = vadd.f32 1e-05, %v3842_v54  ;;  %5681 = vmatpush1.bf16.msra.mxu1 %v13098_v0  ;;  %5455 = vmatpush1.bf16.msra.mxu0 %v13101_v57  ;;  %v3984_v13 = vmul.f32 %v16845_v49, %v3898_v38  ;;  %v3983_v55 = vmul.f32 %v16848_v37, %v3897_v5  ;;  %v13115_v0 = vld [vmem:[%s21295_s26 + $0x3c4] ss:$24 sps:$4 sm:$0xff]  }
 0x570   :  { %5682 = vmatprep.subr.bf16.mxu1 %v13106_v12  ;;  %5456 = vmatprep.subr.bf16.mxu0 %v13109_v29  ;;  %21357 = vst [vmem:[#allocation77_spill] sm:$0xff] %v16975_v23  ;;  %v16984_v38 = vadd.f32 %v16867_v20, %v3979_v61  ;;  %v3900_v57 = vmul.f32 %v13733_v10, %v16510_v32  ;;  %v13110_v61 = vld [vmem:[%s21295_s26 + $0x3c8] ss:$24 sps:$4 sm:$0xff]   ;;  %v13118_v54 = vld [vmem:[%s21295_s26 + $0x3fc] ss:$24 sps:$4 sm:$0xff]  }
 0x571   :  { %13736 = vrsqrt.f32 %v3858_v39  ;;  %v16981_v42 = vadd.f32 %v16864_v11, %v3984_v13  ;;  %v16987_v5 = vadd.f32 %v16867_v20, %v3983_v55  ;;  %v3982_v12 = vmul.f32 %v16851_v2, %v3896_v27  ;;  %v13113_v32 = vld [vmem:[%s21295_s26 + $0x3c0] ss:$24 sps:$4 sm:$0xff]  }
 0x572   :  { %21359 = vst [vmem:[#allocation79_spill] sm:$0xff] %v16984_v38  ;;  %v3986_v39 = vmul.f32 %v16851_v2, %v3900_v57  ;;  %v3899_v27 = vmul.f32 %v13733_v10, %v16503_v51  ;;  %v13116_v13 = vld [vmem:[%s21295_s26 + $0x3f8] ss:$24 sps:$4 sm:$0xff]  }
 0x573   :  { %21358 = vst [vmem:[#allocation78_spill] sm:$0xff] %v16981_v42  ;;  %21360 = vst [vmem:[#allocation80_spill] sm:$0xff] %v16987_v5  ;;  %5683 = vmatpush1.bf16.msra.mxu1 %v13104_v24  ;;  %5457 = vmatpush1.bf16.msra.mxu0 %v13107_v36  ;;  %v16993_v29 = vpack.c.bf16 %v16981_v42, %v16975_v23  ;;  %v16997_v17 = vpack.c.bf16 %v16987_v5, %v16984_v38 }
 0x574   :  { %5684 = vmatprep.subr.bf16.mxu1 %v13112_v40  ;;  %5458 = vmatprep.subr.bf16.mxu0 %v13115_v0  ;;  %v17015_v24 = vadd.f32 %v16857_v56, %v3982_v12  ;;  %v3895_v36 = vmul.f32 %v13731_v62, %v16487_v14  ;;  %v17025_v55 = vadd.f32 %v16857_v56, %v3986_v39  ;;  %v13119_v0 = vld [vmem:[%s21295_s26 + $0x3f0] ss:$24 sps:$4 sm:$0xff]   ;;  %v13124_v14 = vld [vmem:[%s21295_s26 + $0x42c] ss:$24 sps:$4 sm:$0xff]  }
 0x575   :  { %21361 = vst [vmem:[#allocation81_spill] sm:$0xff] %v16993_v29  ;;  %21362 = vst [vmem:[#allocation82_spill] sm:$0xff] %v16997_v17  ;;  %5379 = vmatprep.mubr.bf16.mxu0 %v16993_v29  ;;  %5605 = vmatprep.mubr.bf16.mxu1 %v16993_v29  ;;  %v3985_v10 = vmul.f32 %v16854_v4, %v3899_v27 }
 0x576   :  { %21363 = vst [vmem:[#allocation83_spill] sm:$0xff] %v17015_v24  ;;  %5380 = vmatmul.mubr.bf16.gmra.mrb[84].mxu0 %v16997_v17  ;;  %5606 = vmatmul.mubr.bf16.gmra.mrb[160].mxu1 %v16997_v17  ;;  %21364 = vst [vmem:[#allocation84_spill] sm:$0xff] %v17025_v55  ;;  %v3981_v51 = vmul.f32 %v16854_v4, %v3895_v36 }
 0x577   :  { %5685 = vmatpush1.bf16.msra.mxu1 %v13110_v61  ;;  %5459 = vmatpush1.bf16.msra.mxu0 %v13113_v32  ;;  %v13127_v61 = vld [vmem:[%s21295_s26 + $0x424] ss:$24 sps:$4 sm:$0xff]  }
 0x578   :  { %5686 = vmatprep.subr.bf16.mxu1 %v13118_v54  ;;  %5460 = vmatprep.subr.bf16.mxu0 %v13121_v30  ;;  %v17047_v30 = vadd.f32 %v16870_v33, %v3981_v51 }
 0x579   :  { %v17027_v40 = vpop.eup %13734 }
 0x57a   :  { %v3791_v62 = vpop.xlane.xlu0 %3790  ;;  %v3902_v57 = vmul.f32 %v17027_v40, %v16548_v18  ;;  %v3901_v12 = vmul.f32 %v17027_v40, %v16545_v59  ;;  %21365 = vst [vmem:[#allocation85_spill] sm:$0xff] %v17047_v30  ;;  %v13122_v59 = vld [vmem:[%s21295_s26 + $0x428] ss:$24 sps:$4 sm:$0xff]  }
 0x57b   :  { %v17044_v32 = vpop.eup %13736  ;;  %v3843_v54 = vmul.f32 0.001953125, %v3791_v62  ;;  %5687 = vmatpush1.bf16.msra.mxu1 %v13116_v13  ;;  %5461 = vmatpush1.bf16.msra.mxu0 %v13119_v0  ;;  %v13130_v13 = vld [vmem:[%s21295_s26 + $0x45c] ss:$24 sps:$4 sm:$0xff]  }
 0x57c   :  { %v3906_v39 = vmul.f32 %v17044_v32, %v16572_v8  ;;  %v3988_v36 = vmul.f32 %v16845_v49, %v3902_v57  ;;  %v3905_v17 = vmul.f32 %v17044_v32, %v16569_v45  ;;  %v3987_v62 = vmul.f32 %v16848_v37, %v3901_v12  ;;  %5688 = vmatprep.subr.bf16.mxu1 %v13124_v14  ;;  %v13125_v8 = vld [vmem:[%s21295_s26 + $0x420] ss:$24 sps:$4 sm:$0xff]   ;;  %v13133_v45 = vld [vmem:[%s21295_s26 + $0x454] ss:$24 sps:$4 sm:$0xff]  }
 0x57d   :  { %v3859_v18 = vadd.f32 1e-05, %v3843_v54  ;;  %v3796_v27 = vpop.xlane.xlu1 %3795  ;;  %5462 = vmatprep.subr.bf16.mxu0 %v13127_v61 }
 0x57e   :  { %v3844_v51 = vmul.f32 0.001953125, %v3796_v27  ;;  %v3992_v57 = vmul.f32 %v16845_v49, %v3906_v39  ;;  %v3991_v0 = vmul.f32 %v16848_v37, %v3905_v17  ;;  %v17070_v12 = vadd.f32 %v16864_v11, %v3988_v36 }
 0x57f   :  { %13738 = vrsqrt.f32 %v3859_v18  ;;  %5689 = vmatpush1.bf16.msra.mxu1 %v13122_v59  ;;  %v17076_v27 = vadd.f32 %v16867_v20, %v3987_v62  ;;  %5463 = vmatpush1.bf16.msra.mxu0 %v13125_v8  ;;  %v17082_v39 = vadd.f32 %v16870_v33, %v3985_v10  ;;  %v13128_v59 = vld [vmem:[%s21295_s26 + $0x458] ss:$24 sps:$4 sm:$0xff]   ;;  %v13136_v8 = vld [vmem:[%s21295_s26 + $0x48c] ss:$24 sps:$4 sm:$0xff]   ;;  %v6139_v33 = vadd.f32 %v16987_v5, %v16984_v38 }
 0x580   :  { %v3860_v14 = vadd.f32 1e-05, %v3844_v51  ;;  %21366 = vst [vmem:[#allocation86_spill] sm:$0xff] %v17070_v12  ;;  %v17073_v54 = vadd.f32 %v16864_v11, %v3992_v57  ;;  %v17079_v61 = vadd.f32 %v16867_v20, %v3991_v0  ;;  %5690 = vmatprep.subr.bf16.mxu1 %v13130_v13  ;;  %v13131_v18 = vld [vmem:[%s21295_s26 + $0x450] ss:$24 sps:$4 sm:$0xff]   ;;  %5464 = vmatprep.subr.bf16.mxu0 %v13133_v45 }
 0x581   :  { %21368 = vst [vmem:[#allocation88_spill] sm:$0xff] %v17076_v27  ;;  %21370 = vst [vmem:[#allocation90_spill] sm:$0xff] %v17082_v39  ;;  %v13139_v13 = vld [vmem:[%s21295_s26 + $0x484] ss:$24 sps:$4 sm:$0xff]   ;;  %v13134_v0 = vld [vmem:[%s21295_s26 + $0x488] ss:$24 sps:$4 sm:$0xff]   ;;  %v3908_v39 = vmul.f32 %v17044_v32, %v16593_v9 }
 0x582   :  { %21367 = vst [vmem:[#allocation87_spill] sm:$0xff] %v17073_v54  ;;  %21369 = vst [vmem:[#allocation89_spill] sm:$0xff] %v17079_v61  ;;  %13740 = vrsqrt.f32 %v3860_v14  ;;  %v3801_v17 = vpop.xlane.xlu0 %3800  ;;  %v17086_v36 = vpack.c.bf16 %v17073_v54, %v17070_v12  ;;  %v17096_v10 = vpack.c.bf16 %v17079_v61, %v17076_v27  ;;  %v13137_v14 = vld [vmem:[%s21295_s26 + $0x480] ss:$24 sps:$4 sm:$0xff]   ;;  %v13154_v9 = vld [vmem:[%s21295_s26 + $0x51c] ss:$24 sps:$4 sm:$0xff]  }
 0x583   :  { %v3845_v62 = vmul.f32 0.001953125, %v3801_v17  ;;  %5691 = vmatpush1.bf16.msra.mxu1 %v13128_v59  ;;  %5465 = vmatpush1.bf16.msra.mxu0 %v13131_v18  ;;  %v13142_v17 = vld [vmem:[%s21295_s26 + $0x4bc] ss:$24 sps:$4 sm:$0xff]  }
 0x584   :  { %21371 = vst [vmem:[#allocation91_spill] sm:$0xff] %v17086_v36  ;;  %21372 = vst [vmem:[#allocation92_spill] sm:$0xff] %v17096_v10  ;;  %5389 = vmatprep.mubr.bf16.mxu0 %v17086_v36  ;;  %5615 = vmatprep.mubr.bf16.mxu1 %v17086_v36  ;;  %v13145_v59 = vld [vmem:[%s21295_s26 + $0x4b4] ss:$24 sps:$4 sm:$0xff]  }
 0x585   :  { %v3861_v51 = vadd.f32 1e-05, %v3845_v62  ;;  %v3806_v57 = vpop.xlane.xlu1 %3805  ;;  %5390 = vmatmul.mubr.bf16.gmra.mrb[88].mxu0 %v17096_v10  ;;  %5616 = vmatmul.mubr.bf16.gmra.mrb[164].mxu1 %v17096_v10  ;;  %v3904_v62 = vmul.f32 %v17027_v40, %v16557_v52  ;;  %v13143_v52 = vld [vmem:[%s21295_s26 + $0x4b0] ss:$24 sps:$4 sm:$0xff]  }
 0x586   :  { %v3846_v45 = vmul.f32 0.001953125, %v3806_v57  ;;  %5692 = vmatprep.subr.bf16.mxu1 %v13136_v8  ;;  %5466 = vmatprep.subr.bf16.mxu0 %v13139_v13 }
 0x587   :  { %13742 = vrsqrt.f32 %v3861_v51  ;;  %5693 = vmatpush1.bf16.msra.mxu1 %v13134_v0  ;;  %5467 = vmatpush1.bf16.msra.mxu0 %v13137_v14  ;;  %v13140_v51 = vld [vmem:[%s21295_s26 + $0x4b8] ss:$24 sps:$4 sm:$0xff]   ;;  %v6118_v14 = vadd.f32 %v16893_v16, %v16886_v47 }
 0x588   :  { %v3862_v18 = vadd.f32 1e-05, %v3846_v45  ;;  %5694 = vmatprep.subr.bf16.mxu1 %v13142_v17  ;;  %5468 = vmatprep.subr.bf16.mxu0 %v13145_v59 }
 0x589   :  { %v17122_v57 = vpop.eup %13738 }
 0x58a   :  { %13744 = vrsqrt.f32 %v3862_v18  ;;  %v3811_v10 = vpop.xlane.xlu0 %3810  ;;  %v3910_v8 = vmul.f32 %v17122_v57, %v16636_v7  ;;  %v3909_v13 = vmul.f32 %v17122_v57, %v16633_v1  ;;  %v13148_v7 = vld [vmem:[%s21295_s26 + $0x4ec] ss:$24 sps:$4 sm:$0xff]   ;;  %v6111_v18 = vadd.f32 %v16899_v25, %v16896_v53 }
 0x58b   :  { %v3847_v45 = vmul.f32 0.001953125, %v3811_v10  ;;  %v13151_v1 = vld [vmem:[%s21295_s26 + $0x4e4] ss:$24 sps:$4 sm:$0xff]   ;;  %v17147_v10 = vmul.f32 %v16851_v2, %v3904_v62  ;;  %5695 = vmatpush1.bf16.msra.mxu1 %v13140_v51  ;;  %5469 = vmatpush1.bf16.msra.mxu0 %v13143_v52  ;;  %v13146_v62 = vld [vmem:[%s21295_s26 + $0x4e8] ss:$24 sps:$4 sm:$0xff]  }
 0x58c   :  { %v17140_v0 = vpop.eup %13740  ;;  %v3996_v29 = vmul.f32 %v16845_v49, %v3910_v8  ;;  %v3995_v47 = vmul.f32 %v16848_v37, %v3909_v13  ;;  %5696 = vmatprep.subr.bf16.mxu1 %v13148_v7  ;;  %5470 = vmatprep.subr.bf16.mxu0 %v13151_v1  ;;  %v6119_v13 = vrot.slane %v6118_v14, 4 }
 0x58d   :  { %v3863_v17 = vadd.f32 1e-05, %v3847_v45  ;;  %v3816_v59 = vpop.xlane.xlu1 %3815  ;;  %v3914_v36 = vmul.f32 %v17140_v0, %v16648_v43  ;;  %v3913_v16 = vmul.f32 %v17140_v0, %v16645_v22  ;;  %v13149_v43 = vld [vmem:[%s21295_s26 + $0x4e0] ss:$24 sps:$4 sm:$0xff]   ;;  %v13157_v22 = vld [vmem:[%s21295_s26 + $0x514] ss:$24 sps:$4 sm:$0xff]   ;;  %v6132_v45 = vadd.f32 %v16902_v50, %v16880_v3 }
 0x58e   :  { %v3848_v30 = vmul.f32 0.001953125, %v3816_v59  ;;  %v17176_v7 = vadd.f32 %v16864_v11, %v3996_v29  ;;  %v17182_v59 = vmul.f32 %v16851_v2, %v3908_v39 }
 0x58f   :  { %13746 = vrsqrt.f32 %v3863_v17  ;;  %v4000_v8 = vmul.f32 %v16845_v49, %v3914_v36  ;;  %v3999_v52 = vmul.f32 %v16848_v37, %v3913_v16  ;;  %v6112_v36 = vrot.slane %v6111_v18, 4  ;;  %5697 = vmatpush1.bf16.msra.mxu1 %v13146_v62  ;;  %5471 = vmatpush1.bf16.msra.mxu0 %v13149_v43 }
 0x590   :  { %v3864_v51 = vadd.f32 1e-05, %v3848_v30  ;;  %21374 = vst [vmem:[#allocation94_spill] sm:$0xff] %v17176_v7  ;;  %v17185_v30 = vadd.f32 %v16867_v20, %v3995_v47  ;;  %v13152_v47 = vld [vmem:[%s21295_s26 + $0x518] ss:$24 sps:$4 sm:$0xff]   ;;  %5698 = vmatprep.subr.bf16.mxu1 %v13154_v9  ;;  %5472 = vmatprep.subr.bf16.mxu0 %v13157_v22  ;;  %v6146_v62 = vadd.f32 %v16981_v42, %v16975_v23 }
 0x591   :  { %v17173_v17 = vpop.eup %13742  ;;  %v17179_v1 = vadd.f32 %v16864_v11, %v4000_v8  ;;  %v17188_v16 = vadd.f32 %v16867_v20, %v3999_v52  ;;  %v13163_v9 = vld [vmem:[%s21295_s26 + $0x544] ss:$24 sps:$4 sm:$0xff]   ;;  %v6133_v52 = vrot.slane %v6132_v45, 4  ;;  %v6113_v23 = vadd.f32 %v6112_v36, %v6111_v18 }
 0x592   :  { %21373 = vst [vmem:[#allocation93_spill] sm:$0xff] %v17173_v17  ;;  %13748 = vrsqrt.f32 %v3864_v51  ;;  %v3821_v25 = vpop.xlane.xlu0 %3820  ;;  %21376 = vst [vmem:[#allocation96_spill] sm:$0xff] %v17185_v30  ;;  %v3918_v53 = vmul.f32 %v17173_v17, %v16674_v28  ;;  %v3917_v39 = vmul.f32 %v17173_v17, %v16671_v19  ;;  %v13155_v51 = vld [vmem:[%s21295_s26 + $0x510] ss:$24 sps:$4 sm:$0xff]   ;;  %v13160_v19 = vld [vmem:[%s21295_s26 + $0x54c] ss:$24 sps:$4 sm:$0xff]  }
 0x593   :  { %21375 = vst [vmem:[#allocation95_spill] sm:$0xff] %v17179_v1  ;;  %21377 = vst [vmem:[#allocation97_spill] sm:$0xff] %v17188_v16  ;;  %v3849_v29 = vmul.f32 0.001953125, %v3821_v25  ;;  %v17194_v8 = vpack.c.bf16 %v17179_v1, %v17176_v7  ;;  %v6120_v25 = vadd.f32 %v6119_v13, %v6118_v14  ;;  %v17210_v43 = vpack.c.bf16 %v17188_v16, %v17185_v30 }
 0x594   :  { %v17204_v28 = vpop.eup %13744  ;;  %v4004_v13 = vmul.f32 %v16845_v49, %v3918_v53  ;;  %5699 = vmatpush1.bf16.msra.mxu1 %v13152_v47  ;;  %5473 = vmatpush1.bf16.msra.mxu0 %v13155_v51  ;;  %v13161_v53 = vld [vmem:[%s21295_s26 + $0x540] ss:$24 sps:$4 sm:$0xff]  }
 0x595   :  { %21378 = vst [vmem:[#allocation98_spill] sm:$0xff] %v17194_v8  ;;  %21379 = vst [vmem:[#allocation99_spill] sm:$0xff] %v17204_v28  ;;  %v3865_v22 = vadd.f32 1e-05, %v3849_v29  ;;  %v3826_v17 = vpop.xlane.xlu1 %3825  ;;  %5399 = vmatprep.mubr.bf16.mxu0 %v17194_v8  ;;  %5625 = vmatprep.mubr.bf16.mxu1 %v17194_v8  ;;  %v3922_v14 = vmul.f32 %v17204_v28, %v16688_v63  ;;  %v3921_v42 = vmul.f32 %v17204_v28, %v16685_v44  ;;  %v13158_v44 = vld [vmem:[%s21295_s26 + $0x548] ss:$24 sps:$4 sm:$0xff]  }
 0x596   :  { %21380 = vst [vmem:[#allocation100_spill] sm:$0xff] %v17210_v43  ;;  %v3850_v2 = vmul.f32 0.001953125, %v3826_v17  ;;  %5400 = vmatmul.mubr.bf16.gmra.mrb[92].mxu0 %v17210_v43  ;;  %5626 = vmatmul.mubr.bf16.gmra.mrb[168].mxu1 %v17210_v43  ;;  %v4003_v8 = vmul.f32 %v16848_v37, %v3917_v39  ;;  %v6121_v18 = vrot.slane %v6120_v25, 2  ;;  %v6147_v17 = vrot.slane %v6146_v62, 4  ;;  %v13166_v39 = vld [vmem:[%s21295_s26 + $0x57c] ss:$24 sps:$4 sm:$0xff]  }
 0x597   :  { %13750 = vrsqrt.f32 %v3865_v22  ;;  %v4008_v29 = vmul.f32 %v16845_v49, %v3922_v14  ;;  %v4007_v63 = vmul.f32 %v16848_v37, %v3921_v42  ;;  %5700 = vmatprep.subr.bf16.mxu1 %v13160_v19  ;;  %5474 = vmatprep.subr.bf16.mxu0 %v13163_v9  ;;  %v6134_v42 = vadd.f32 %v6133_v52, %v6132_v45  ;;  %v13167_v43 = vld [vmem:[%s21295_s26 + $0x570] ss:$24 sps:$4 sm:$0xff]  }
 0x598   :  { %v3866_v36 = vadd.f32 1e-05, %v3850_v2  ;;  %v17244_v51 = vadd.f32 %v16864_v11, %v4004_v13  ;;  %v17250_v14 = vadd.f32 %v16867_v20, %v4003_v8  ;;  %v6140_v19 = vrot.slane %v6139_v33, 4  ;;  %5701 = vmatpush1.bf16.msra.mxu1 %v13158_v44  ;;  %5475 = vmatpush1.bf16.msra.mxu0 %v13161_v53  ;;  %v13164_v8 = vld [vmem:[%s21295_s26 + $0x578] ss:$24 sps:$4 sm:$0xff]  }
 0x599   :  { %v17241_v47 = vpop.eup %13746  ;;  %v17247_v22 = vadd.f32 %v16864_v11, %v4008_v29  ;;  %v17253_v2 = vadd.f32 %v16867_v20, %v4007_v63  ;;  %v6114_v52 = vrot.slane %v6113_v23, 2  ;;  %5702 = vmatprep.subr.bf16.mxu1 %v13166_v39  ;;  %v13172_v44 = vld [vmem:[%s21295_s26 + $0x5ac] ss:$24 sps:$4 sm:$0xff]   ;;  %v6135_v53 = vrot.slane %v6134_v42, 2 }
 0x59a   :  { %21381 = vst [vmem:[#allocation101_spill] sm:$0xff] %v17244_v51  ;;  %21383 = vst [vmem:[#allocation103_spill] sm:$0xff] %v17250_v14  ;;  %13752 = vrsqrt.f32 %v3866_v36  ;;  %v3831_v9 = vpop.xlane.xlu0 %3830  ;;  %v3926_v45 = vmul.f32 %v17241_v47, %v16714_v35  ;;  %v13169_v35 = vld [vmem:[%s21295_s26 + $0x574] ss:$24 sps:$4 sm:$0xff]   ;;  %v6122_v36 = vadd.f32 %v6121_v18, %v6120_v25  ;;  %v13175_v18 = vld [vmem:[%s21295_s26 + $0x5a4] ss:$24 sps:$4 sm:$0xff]  }
 0x59b   :  { %21382 = vst [vmem:[#allocation102_spill] sm:$0xff] %v17247_v22  ;;  %21384 = vst [vmem:[#allocation104_spill] sm:$0xff] %v17253_v2  ;;  %v3851_v5 = vmul.f32 0.001953125, %v3831_v9  ;;  %v17259_v13 = vpack.c.bf16 %v17247_v22, %v17244_v51  ;;  %v17263_v29 = vpack.c.bf16 %v17253_v2, %v17250_v14  ;;  %v6148_v9 = vadd.f32 %v6147_v17, %v6146_v62 }
 0x59c   :  { %v17271_v63 = vpop.eup %13748  ;;  %v3836_v38 = vpop.xlane.xlu1 %3835  ;;  %v4012_v62 = vmul.f32 %v16845_v49, %v3926_v45  ;;  %v6141_v17 = vadd.f32 %v6140_v19, %v6139_v33  ;;  %5476 = vmatprep.subr.bf16.mxu0 %v13169_v35  ;;  %5703 = vmatpush1.bf16.msra.mxu1 %v13164_v8  ;;  %v6123_v45 = vrot.slane %v6122_v36, 1  ;;  %v3925_v33 = vmul.f32 %v17241_v47, %v16711_v58  ;;  %v13178_v35 = vld [vmem:[%s21295_s26 + $0x5dc] ss:$24 sps:$4 sm:$0xff]  }
 0x59d   :  { %21385 = vst [vmem:[#allocation105_spill] sm:$0xff] %v17259_v13  ;;  %21386 = vst [vmem:[#allocation106_spill] sm:$0xff] %v17263_v29  ;;  %v3867_v28 = vadd.f32 1e-05, %v3851_v5  ;;  %v3852_v22 = vmul.f32 0.001953125, %v3836_v38  ;;  %5409 = vmatprep.mubr.bf16.mxu0 %v17259_v13  ;;  %5635 = vmatprep.mubr.bf16.mxu1 %v17259_v13  ;;  %v3930_v25 = vmul.f32 %v17271_v63, %v16728_v34  ;;  %v6149_v13 = vrot.slane %v6148_v9, 2 }
 0x59e   :  { %21387 = vst [vmem:[#allocation107_spill] sm:$0xff] %v17271_v63  ;;  %5410 = vmatmul.mubr.bf16.gmra.mrb[96].mxu0 %v17263_v29  ;;  %5636 = vmatmul.mubr.bf16.gmra.mrb[172].mxu1 %v17263_v29  ;;  %v6115_v5 = vadd.f32 %v6114_v52, %v6113_v23  ;;  %v13170_v34 = vld [vmem:[%s21295_s26 + $0x5a8] ss:$24 sps:$4 sm:$0xff]   ;;  %v17301_v19 = vadd.f32 %v16864_v11, %v4012_v62  ;;  %v6142_v58 = vrot.slane %v6141_v17, 2 }
 0x59f   :  { %13754 = vrsqrt.f32 %v3867_v28  ;;  %v3868_v38 = vadd.f32 1e-05, %v3852_v22  ;;  %v4016_v39 = vmul.f32 %v16845_v49, %v3930_v25  ;;  %5477 = vmatpush1.bf16.msra.mxu0 %v13167_v43  ;;  %v13173_v23 = vld [vmem:[%s21295_s26 + $0x5a0] ss:$24 sps:$4 sm:$0xff]   ;;  %v6136_v28 = vadd.f32 %v6135_v53, %v6134_v42  ;;  %5704 = vmatprep.subr.bf16.mxu1 %v13172_v44  ;;  %v13181_v53 = vld [vmem:[%s21295_s26 + $0x5d4] ss:$24 sps:$4 sm:$0xff]  }
 0x5a0   :  { %21388 = vst [vmem:[#allocation108_spill] sm:$0xff] %v17301_v19  ;;  %v3929_v8 = vmul.f32 %v17271_v63, %v16725_v15  ;;  %5478 = vmatprep.subr.bf16.mxu0 %v13175_v18  ;;  %v4011_v43 = vmul.f32 %v16848_v37, %v3925_v33  ;;  %v6160_v25 = vadd.f32 %v17025_v55, %v17015_v24  ;;  %v6116_v15 = vrot.slane %v6115_v5, 1  ;;  %v13179_v63 = vld [vmem:[%s21295_s26 + $0x5d0] ss:$24 sps:$4 sm:$0xff]  }
 0x5a1   :  { %v17298_v22 = vpop.eup %13750  ;;  %13756 = vrsqrt.f32 %v3868_v38  ;;  %v17304_v52 = vadd.f32 %v16864_v11, %v4016_v39  ;;  %5705 = vmatpush1.bf16.msra.mxu1 %v13170_v34  ;;  %v6124_v38 = vadd.f32 %v6123_v45, %v6122_v36  ;;  %v6150_v39 = vadd.f32 %v6149_v13, %v6148_v9  ;;  %v13184_v34 = vld [vmem:[%s21392_s24 + $0x4] ss:$8 sps:$4 sm:$0xff]  }
 0x5a2   :  { %v3934_v42 = vmul.f32 %v17298_v22, %v16754_v46  ;;  %v4015_v62 = vmul.f32 %v16848_v37, %v3929_v8  ;;  %v13176_v46 = vld [vmem:[%s21295_s26 + $0x5d8] ss:$24 sps:$4 sm:$0xff]   ;;  %v17330_v33 = vadd.f32 %v16867_v20, %v4011_v43  ;;  %v3933_v9 = vmul.f32 %v17298_v22, %v16751_v60  ;;  %5706 = vmatprep.subr.bf16.mxu1 %v13178_v35 }
 0x5a3   :  { %21389 = vst [vmem:[#allocation109_spill] sm:$0xff] %v17304_v52  ;;  %v17321_v44 = vpack.c.bf16 %v17304_v52, %v17301_v19  ;;  %5479 = vmatpush1.bf16.msra.mxu0 %v13173_v23  ;;  %v6137_v45 = vrot.slane %v6136_v28, 1  ;;  %v6143_v23 = vadd.f32 %v6142_v58, %v6141_v17  ;;  %v17352_v43 = vpack.c.bf16 %v16902_v50, %v16880_v3 }
 0x5a4   :  { %v17327_v18 = vpop.eup %13752  ;;  %21391 = vst [vmem:[#allocation111_spill] sm:$0xff] %v17330_v33  ;;  %v4020_v29 = vmul.f32 %v16845_v49, %v3934_v42  ;;  %v17342_v13 = vadd.f32 %v16867_v20, %v4015_v62  ;;  %5480 = vmatprep.subr.bf16.mxu0 %v13181_v53  ;;  %v13187_v42 = vld [vmem:[%s21295_s26 + $0x14] ss:$24 sps:$4 sm:$0xff]   ;;  %v6161_v62 = vrot.slane %v6160_v25, 4  ;;  %v6174_v60 = vadd.f32 %v17073_v54, %v17070_v12 }
 0x5a5   :  { %21390 = vst [vmem:[#allocation110_spill] sm:$0xff] %v17321_v44  ;;  %5419 = vmatprep.mubr.bf16.mxu0 %v17321_v44  ;;  %5645 = vmatprep.mubr.bf16.mxu1 %v17321_v44  ;;  %v3938_v36 = vmul.f32 %v17327_v18, %v16771_v21  ;;  %v3937_v8 = vmul.f32 %v17327_v18, %v16768_v41  ;;  %21394 = vst [vmem:[#allocation113_spill] sm:$0xff] %v17352_v43  ;;  %v17364_v58 = vmul.f32 0.0625, %v6124_v38 }
 0x5a6   :  { %21393 = vst [vmem:[#allocation112_spill] sm:$0xff] %v17342_v13  ;;  %v6117_v21 = vadd.f32 %v6116_v15, %v6115_v5  ;;  %v17361_v17 = vpack.c.bf16 %v17342_v13, %v17330_v33  ;;  %5707 = vmatpush1.bf16.msra.mxu1 %v13176_v46  ;;  %v6167_v35 = vadd.f32 %v17079_v61, %v17076_v27  ;;  %v6151_v15 = vrot.slane %v6150_v39, 1 }
 0x5a7   :  { %v4024_v41 = vmul.f32 %v16845_v49, %v3938_v36  ;;  %v4019_v53 = vmul.f32 %v16848_v37, %v3933_v9  ;;  %v4023_v50 = vmul.f32 %v16848_v37, %v3937_v8  ;;  %5481 = vmatpush1.bf16.msra.mxu0 %v13179_v63  ;;  %6903 = vmatprep.subr.bf16.mxu1 %v13184_v34  ;;  %v6144_v12 = vrot.slane %v6143_v23, 1 }
 0x5a8   :  { %21395 = vst [vmem:[#allocation114_spill] sm:$0xff] %v17361_v17  ;;  %5420 = vmatmul.mubr.bf16.gmra.mrb[100].mxu0 %v17361_v17  ;;  %5646 = vmatmul.mubr.bf16.gmra.mrb[176].mxu1 %v17361_v17  ;;  %v17375_v46 = vadd.f32 %v16864_v11, %v4020_v29  ;;  %v6138_v36 = vadd.f32 %v6137_v45, %v6136_v28  ;;  %v6175_v54 = vrot.slane %v6174_v60, 4  ;;  %v6168_v45 = vrot.slane %v6167_v35, 4 }
 0x5a9   :  { %v17370_v5 = vpop.eup %13754  ;;  %v17378_v38 = vadd.f32 %v16864_v11, %v4024_v41  ;;  %v17381_v9 = vadd.f32 %v16867_v20, %v4023_v50  ;;  %5789 = vmatprep.subr.bf16.mxu0 %v13187_v42  ;;  %v6162_v34 = vadd.f32 %v6161_v62, %v6160_v25  ;;  %v17392_v41 = vadd.f32 %v16867_v20, %v4019_v53  ;;  %v21402_v25 = vld [vmem:[#allocation76_spill] sm:$0xff]  ;;  %v21405_v50 = vld [vmem:[#allocation67_spill] sm:$0xff] }
 0x5aa   :  { %21396 = vst [vmem:[#allocation115_spill] sm:$0xff] %v17370_v5  ;;  %21397 = vst [vmem:[#allocation116_spill] sm:$0xff] %v17375_v46  ;;  %v3942_v63 = vmul.f32 %v17370_v5, %v16800_v48  ;;  %v3941_v28 = vmul.f32 %v17370_v5, %v16797_v31  ;;  %v17402_v42 = vpack.c.bf16 %v21402_v25, %v16890_v26  ;;  %v6336_v62 = vmul.f32 0.0625, %v6117_v21 }
 0x5ab   :  { %21398 = vst [vmem:[#allocation117_spill] sm:$0xff] %v17378_v38  ;;  %21399 = vst [vmem:[#allocation118_spill] sm:$0xff] %v17381_v9  ;;  %v17385_v8 = vpop.eup %13756  ;;  %v17389_v29 = vpack.c.bf16 %v17378_v38, %v17375_v46  ;;  %v17408_v53 = vpack.c.bf16 %v17381_v9, %v17392_v41  ;;  %v6152_v61 = vadd.f32 %v6151_v15, %v6150_v39  ;;  %v17414_v17 = vmul.f32 0.0625, %v6138_v36 }
 0x5ac   :  { %21401 = vst [vmem:[#allocation120_spill] sm:$0xff] %v17392_v41  ;;  %v3946_v48 = vmul.f32 %v17385_v8, %v16814_v6  ;;  %21403 = vst [vmem:[#allocation121_spill] sm:$0xff] %v17402_v42  ;;  %v4028_v31 = vmul.f32 %v16845_v49, %v3942_v63  ;;  %v3945_v27 = vmul.f32 %v17385_v8, %v21405_v50  ;;  %v6163_v25 = vrot.slane %v6162_v34, 2 }
 0x5ad   :  { %21400 = vst [vmem:[#allocation119_spill] sm:$0xff] %v17389_v29  ;;  %5429 = vmatprep.mubr.bf16.mxu0 %v17389_v29  ;;  %5655 = vmatprep.mubr.bf16.mxu1 %v17389_v29  ;;  %21404 = vst [vmem:[#allocation122_spill] sm:$0xff] %v17408_v53  ;;  %v6145_v6 = vadd.f32 %v6144_v12, %v6143_v23  ;;  %v6176_v21 = vadd.f32 %v6175_v54, %v6174_v60 }
 0x5ae   :  { %v4032_v3 = vmul.f32 %v16845_v49, %v3946_v48  ;;  %v4027_v44 = vmul.f32 %v16848_v37, %v3941_v28  ;;  %v4031_v29 = vmul.f32 %v16848_v37, %v3945_v27  ;;  %v6169_v26 = vadd.f32 %v6168_v45, %v6167_v35  ;;  %v21416_v28 = vld [vmem:[#allocation60_spill] sm:$0xff] }
 0x5af   :  { %v6202_v5 = vadd.f32 %v17179_v1, %v17176_v7  ;;  %v17421_v63 = vadd.f32 %v16864_v11, %v4028_v31  ;;  %v17433_v37 = vadd.f32 %v16857_v56, %v17147_v10  ;;  %v17437_v12 = vadd.f32 %v16857_v56, %v17182_v59  ;;  %v21418_v31 = vld [vmem:[#allocation64_spill] sm:$0xff] }
 0x5b0   :  { %v17424_v39 = vadd.f32 %v16864_v11, %v4032_v3  ;;  %5430 = vmatmul.mubr.bf16.gmra.mrb[104].mxu0 %v17408_v53  ;;  %5656 = vmatmul.mubr.bf16.gmra.mrb[180].mxu1 %v17408_v53  ;;  %v17429_v49 = vadd.f32 %v16867_v20, %v4031_v29  ;;  %v6368_v54 = vpack.c.bf16 %v6336_v62, %v6336_v62  ;;  %v17439_v27 = vmul.f32 0.0625, %v6152_v61 }
 0x5b1   :  { %21406 = vst [vmem:[#allocation67_spill] sm:$0xff] %v17421_v63  ;;  %21409 = vst [vmem:[#allocation125_spill] sm:$0xff] %v17433_v37  ;;  %v6195_v11 = vadd.f32 %v17188_v16, %v17185_v30  ;;  %v6340_v23 = vmul.f32 0.0625, %v6145_v6  ;;  %v17448_v60 = vadd.f32 %v16867_v20, %v4027_v44  ;;  %v6164_v35 = vadd.f32 %v6163_v25, %v6162_v34  ;;  %v21415_v44 = vld [vmem:[#allocation59_spill] sm:$0xff]  ;;  %v21417_v25 = vld [vmem:[#allocation62_spill] sm:$0xff] }
 0x5b2   :  { %21407 = vst [vmem:[#allocation123_spill] sm:$0xff] %v17424_v39  ;;  %21408 = vst [vmem:[#allocation124_spill] sm:$0xff] %v17429_v49  ;;  %v17445_v3 = vpack.c.bf16 %v17424_v39, %v17421_v63  ;;  %v6177_v59 = vrot.slane %v6176_v21, 2  ;;  %v6170_v15 = vrot.slane %v6169_v26, 2  ;;  %v6203_v36 = vrot.slane %v6202_v5, 4  ;;  %v21419_v30 = vld [vmem:[#allocation68_spill] sm:$0xff] }
 0x5b3   :  { %21410 = vst [vmem:[#allocation126_spill] sm:$0xff] %v17437_v12  ;;  %21412 = vst [vmem:[#allocation128_spill] sm:$0xff] %v17448_v60  ;;  %v17456_v61 = vpack.c.bf16 %v17025_v55, %v17015_v24  ;;  %v6223_v29 = vadd.f32 %v17253_v2, %v17250_v14  ;;  %v17462_v20 = vpack.c.bf16 %v17429_v49, %v17448_v60  ;;  %v6196_v48 = vrot.slane %v6195_v11, 4  ;;  %v21430_v2 = vld [vmem:[#allocation63_spill] sm:$0xff]  ;;  %v21431_v55 = vld [vmem:[#allocation30_spill] sm:$0xff] }
 0x5b4   :  { %21411 = vst [vmem:[#allocation127_spill] sm:$0xff] %v17445_v3  ;;  %5439 = vmatprep.mubr.bf16.mxu0 %v17445_v3  ;;  %5665 = vmatprep.mubr.bf16.mxu1 %v17445_v3  ;;  %v3903_v34 = vmul.f32 %v17027_v40, %v21415_v44  ;;  %v3907_v50 = vmul.f32 %v17044_v32, %v21416_v28  ;;  %v6165_v14 = vrot.slane %v6164_v35, 1 }
 0x5b5   :  { %21413 = vst [vmem:[#allocation129_spill] sm:$0xff] %v17456_v61  ;;  %21414 = vst [vmem:[#allocation130_spill] sm:$0xff] %v17462_v20  ;;  %v3912_v62 = vmul.f32 %v17122_v57, %v21417_v25  ;;  %v3916_v6 = vmul.f32 %v17140_v0, %v21418_v31  ;;  %v6372_v10 = vpack.c.bf16 %v6340_v23, %v6340_v23  ;;  %v6224_v16 = vrot.slane %v6223_v29, 4  ;;  %v21420_v25 = vld [vmem:[#allocation56_spill] sm:$0xff] }
 0x5b6   :  { %v3989_v7 = vmul.f32 %v16854_v4, %v3903_v34  ;;  %v3993_v1 = vmul.f32 %v16854_v4, %v3907_v50  ;;  %v6178_v40 = vadd.f32 %v6177_v59, %v6176_v21  ;;  %v6171_v44 = vadd.f32 %v6170_v15, %v6169_v26  ;;  %v21425_v15 = vld [vmem:[#allocation102_spill] sm:$0xff] }
 0x5b7   :  { %v3998_v32 = vmul.f32 %v21419_v30, %v3912_v62  ;;  %v4002_v28 = vmul.f32 %v21419_v30, %v3916_v6  ;;  %v6204_v45 = vadd.f32 %v6203_v36, %v6202_v5  ;;  %v6508_v50 = vunpack.c.l.b16 %v6368_v54  ;;  %v21426_v36 = vld [vmem:[#allocation85_spill] sm:$0xff]  ;;  %v21427_v62 = vld [vmem:[#allocation90_spill] sm:$0xff] }
 0x5b8   :  { %5440 = vmatmul.mubr.bf16.gmra.mrb[108].mxu0 %v17462_v20  ;;  %5666 = vmatmul.mubr.bf16.gmra.mrb[184].mxu1 %v17462_v20  ;;  %v17481_v23 = vadd.f32 %v21420_v25, %v3989_v7  ;;  %v17484_v34 = vadd.f32 %v21420_v25, %v3993_v1  ;;  %v6197_v21 = vadd.f32 %v6196_v48, %v6195_v11  ;;  %v6512_v59 = vunpack.c.l.b16 %v6372_v10  ;;  %v21429_v54 = vld [vmem:[#allocation61_spill] sm:$0xff] }
 0x5b9   :  { %5482 = vmatprep.mubr.bf16.mxu0 %v17352_v43  ;;  %5708 = vmatprep.mubr.bf16.mxu1 %v17352_v43  ;;  %v17489_v26 = vadd.f32 %v16857_v56, %v3998_v32  ;;  %v17492_v5 = vadd.f32 %v16857_v56, %v4002_v28  ;;  %v6230_v7 = vadd.f32 %v21425_v15, %v17244_v51  ;;  %v6179_v48 = vrot.slane %v6178_v40, 1  ;;  %v21432_v43 = vld [vmem:[#allocation93_spill] sm:$0xff] }
 0x5ba   :  { %21421 = vst [vmem:[#allocation59_spill] sm:$0xff] %v17481_v23  ;;  %21422 = vst [vmem:[#allocation60_spill] sm:$0xff] %v17484_v34  ;;  %v17498_v1 = vpack.c.bf16 %v21427_v62, %v21426_v36  ;;  %v3911_v11 = vmul.f32 %v17122_v57, %v21429_v54  ;;  %v6172_v31 = vrot.slane %v6171_v44, 1  ;;  %v6166_v6 = vadd.f32 %v6165_v14, %v6164_v35  ;;  %v13182_v57 = vld [vmem:[%s21392_s24] ss:$8 sps:$4 sm:$0xff]   ;;  %v21433_v35 = vld [vmem:[#allocation35_spill] sm:$0xff] }
 0x5bb   :  { %21423 = vst [vmem:[#allocation62_spill] sm:$0xff] %v17489_v26  ;;  %21424 = vst [vmem:[#allocation64_spill] sm:$0xff] %v17492_v5  ;;  %v3915_v32 = vmul.f32 %v17140_v0, %v21430_v2  ;;  %v6205_v24 = vrot.slane %v6204_v45, 2  ;;  %v6225_v28 = vadd.f32 %v6224_v16, %v6223_v29  ;;  %v3920_v51 = vmul.f32 %v21432_v43, %v21431_v55  ;;  %v21434_v54 = vld [vmem:[#allocation99_spill] sm:$0xff] }
 0x5bc   :  { %21428 = vst [vmem:[#allocation68_spill] sm:$0xff] %v17498_v1  ;;  %v3997_v10 = vmul.f32 %v16854_v4, %v3911_v11  ;;  %v6198_v15 = vrot.slane %v6197_v21, 2  ;;  %v6251_v20 = vadd.f32 %v17342_v13, %v17330_v33  ;;  %v3924_v0 = vmul.f32 %v21434_v54, %v21433_v35  ;;  %v13185_v16 = vld [vmem:[%s21295_s26 + $0x10] ss:$24 sps:$4 sm:$0xff]   ;;  %v13193_v35 = vld [vmem:[%s21295_s26 + $0x44] ss:$24 sps:$4 sm:$0xff]  }
 0x5bd   :  { %v4001_v14 = vmul.f32 %v16854_v4, %v3915_v32  ;;  %v6231_v2 = vrot.slane %v6230_v7, 4  ;;  %v4006_v29 = vmul.f32 %v21419_v30, %v3920_v51  ;;  %v21436_v11 = vld [vmem:[#allocation29_spill] sm:$0xff]  ;;  %v6180_v13 = vadd.f32 %v6179_v48, %v6178_v40  ;;  %v13190_v32 = vld [vmem:[%s21392_s24 + $0x14] ss:$8 sps:$4 sm:$0xff]  }
 0x5be   :  { %v17519_v55 = vadd.f32 %v21420_v25, %v3997_v10  ;;  %v3919_v33 = vmul.f32 %v21432_v43, %v21436_v11  ;;  %v17524_v3 = vmul.f32 0.0625, %v6166_v6  ;;  %v4010_v10 = vmul.f32 %v21419_v30, %v3924_v0  ;;  %v21439_v40 = vld [vmem:[#allocation31_spill] sm:$0xff] }
 0x5bf   :  { %v17533_v53 = vadd.f32 %v21420_v25, %v4001_v14  ;;  %v6226_v51 = vrot.slane %v6225_v28, 2  ;;  %v17539_v43 = vadd.f32 %v16857_v56, %v4006_v29  ;;  %v3923_v48 = vmul.f32 %v21434_v54, %v21439_v40  ;;  %v13188_v0 = vld [vmem:[%s21392_s24 + $0x10] ss:$8 sps:$4 sm:$0xff]   ;;  %v13194_v29 = vld [vmem:[%s21392_s24 + $0x20] ss:$8 sps:$4 sm:$0xff]  }
 0x5c0   :  { %21435 = vst [vmem:[#allocation56_spill] sm:$0xff] %v17519_v55  ;;  %5483 = vmatmul.mubr.bf16.vlgmr.msra.gmra.mrb[80].mxu0 %v17402_v42  ;;  %5709 = vmatmul.mubr.bf16.vlgmr.msra.gmra.mrb[156].mxu1 %v17402_v42  ;;  %v4005_v6 = vmul.f32 %v16854_v4, %v3919_v33  ;;  %v6173_v11 = vadd.f32 %v6172_v31, %v6171_v44  ;;  %v6252_v14 = vrot.slane %v6251_v20, 4  ;;  %v13191_v54 = vld [vmem:[%s21295_s26 + $0x40] ss:$24 sps:$4 sm:$0xff]   ;;  %v17570_v31 = vmul.f32 0.0625, %v6180_v13 }
 0x5c1   :  { %21437 = vst [vmem:[#allocation61_spill] sm:$0xff] %v17533_v53  ;;  %21438 = vst [vmem:[#allocation63_spill] sm:$0xff] %v17539_v43  ;;  %v6206_v62 = vadd.f32 %v6205_v24, %v6204_v45  ;;  %v6199_v36 = vadd.f32 %v6198_v15, %v6197_v21  ;;  %6904 = vmatpush1.bf16.msra.mxu1 %v13182_v57  ;;  %5492 = vmatprep.mubr.bf16.mxu0 %v17456_v61  ;;  %v13196_v24 = vld [vmem:[%s21392_s24 + $0x24] ss:$8 sps:$4 sm:$0xff]  }
 0x5c2   :  { %v6232_v42 = vadd.f32 %v6231_v2, %v6230_v7  ;;  %5718 = vmatprep.mubr.bf16.mxu1 %v17456_v61  ;;  %5790 = vmatpush1.bf16.msra.mxu0 %v13185_v16  ;;  %v17556_v33 = vadd.f32 %v16857_v56, %v4010_v10  ;;  %v4009_v45 = vmul.f32 %v16854_v4, %v3923_v48  ;;  %v13199_v15 = vld [vmem:[%s21295_s26 + $0x74] ss:$24 sps:$4 sm:$0xff]   ;;  %v21447_v21 = vld [vmem:[#allocation37_spill] sm:$0xff] }
 0x5c3   :  { %v17560_v44 = vsel %vm6540_vm2, %v6512_v59, %v6508_v50  ;;  %6905 = vmatprep.subr.bf16.mxu1 %v13190_v32  ;;  %5791 = vmatprep.subr.bf16.mxu0 %v13193_v35  ;;  %v17568_v7 = vadd.f32 %v21420_v25, %v4005_v6  ;;  %v6227_v57 = vadd.f32 %v6226_v51, %v6225_v28  ;;  %v21443_v32 = vld [vmem:[#allocation38_spill] sm:$0xff]  ;;  %v21444_v35 = vld [vmem:[#allocation43_spill] sm:$0xff]  ;;  %v17586_v51 = vmul.f32 0.0625, %v6173_v11 }
 0x5c4   :  { %21440 = vst [vmem:[#allocation30_spill] sm:$0xff] %v17556_v33  ;;  %v6258_v2 = vadd.f32 %v17304_v52, %v17301_v19  ;;  %v17575_v50 = vadd.f32 %v21420_v25, %v4009_v45  ;;  %v6253_v59 = vadd.f32 %v6252_v14, %v6251_v20  ;;  %v6286_v16 = vadd.f32 %v17378_v38, %v17375_v46  ;;  %v21445_v28 = vld [vmem:[#allocation107_spill] sm:$0xff] }
 0x5c5   :  { %21441 = vst [vmem:[#allocation93_spill] sm:$0xff] %v17568_v7  ;;  %6906 = vmatpush1.bf16.msra.mxu1 %v13188_v0  ;;  %v3928_v13 = vmul.f32 %v17241_v47, %v21443_v32  ;;  %v3932_v10 = vmul.f32 %v21445_v28, %v21444_v35  ;;  %v6207_v40 = vrot.slane %v6206_v62, 1  ;;  %v6200_v48 = vrot.slane %v6199_v36, 1  ;;  %v13197_v20 = vld [vmem:[%s21295_s26 + $0x70] ss:$24 sps:$4 sm:$0xff]  }
 0x5c6   :  { %21442 = vst [vmem:[#allocation35_spill] sm:$0xff] %v17575_v50  ;;  %v6233_v6 = vrot.slane %v6232_v42, 2  ;;  %5792 = vmatpush1.bf16.msra.mxu0 %v13191_v54  ;;  %6907 = vmatprep.subr.bf16.mxu1 %v13196_v24  ;;  %v6279_v14 = vadd.f32 %v17381_v9, %v17392_v41  ;;  %v17595_v0 = vpack.c.bf16 %v17437_v12, %v17433_v37  ;;  %v13202_v11 = vld [vmem:[%s21392_s24 + $0x34] ss:$8 sps:$4 sm:$0xff]   ;;  %v6259_v35 = vrot.slane %v6258_v2, 4 }
 0x5c7   :  { %5793 = vmatprep.subr.bf16.mxu0 %v13199_v15  ;;  %v13205_v54 = vld [vmem:[%s21295_s26 + $0xa4] ss:$24 sps:$4 sm:$0xff]   ;;  %v4014_v24 = vmul.f32 %v21419_v30, %v3928_v13  ;;  %v4018_v45 = vmul.f32 %v21419_v30, %v3932_v10  ;;  %v6228_v15 = vrot.slane %v6227_v57, 1  ;;  %v3927_v46 = vmul.f32 %v17241_v47, %v21447_v21  ;;  %v13200_v13 = vld [vmem:[%s21392_s24 + $0x30] ss:$8 sps:$4 sm:$0xff]  }
 0x5c8   :  { %21446 = vst [vmem:[#allocation99_spill] sm:$0xff] %v17595_v0  ;;  %5493 = vmatmul.mubr.bf16.gmra.mrb[84].mxu0 %v17498_v1  ;;  %5719 = vmatmul.mubr.bf16.gmra.mrb[160].mxu1 %v17498_v1  ;;  %v6254_v41 = vrot.slane %v6253_v59, 2  ;;  %v6287_v19 = vrot.slane %v6286_v16, 4  ;;  %v6376_v38 = vpack.c.bf16 %v17586_v51, %v17586_v51  ;;  %v17623_v9 = vadd.f32 %v6207_v40, %v6206_v62  ;;  %v13203_v47 = vld [vmem:[%s21295_s26 + $0xa0] ss:$24 sps:$4 sm:$0xff]  }
 0x5c9   :  { %6908 = vmatpush1.bf16.msra.mxu1 %v13194_v29  ;;  %5502 = vmatprep.mubr.bf16.mxu0 %v17595_v0  ;;  %v17616_v10 = vadd.f32 %v16857_v56, %v4014_v24  ;;  %v17619_v32 = vadd.f32 %v16857_v56, %v4018_v45  ;;  %v13208_v21 = vld [vmem:[%s21392_s24 + $0x44] ss:$8 sps:$4 sm:$0xff]   ;;  %v21450_v29 = vld [vmem:[#allocation39_spill] sm:$0xff]  ;;  %v17634_v45 = vadd.f32 %v6200_v48, %v6199_v36  ;;  %v6280_v62 = vrot.slane %v6279_v14, 4 }
 0x5ca   :  { %5728 = vmatprep.mubr.bf16.mxu1 %v17595_v0  ;;  %5794 = vmatpush1.bf16.msra.mxu0 %v13197_v20  ;;  %v3931_v24 = vmul.f32 %v21445_v28, %v21450_v29  ;;  %v17636_v52 = vadd.f32 %v6233_v6, %v6232_v42  ;;  %v13211_v51 = vld [vmem:[%s21295_s26 + $0xd4] ss:$24 sps:$4 sm:$0xff]   ;;  %v4013_v40 = vmul.f32 %v16854_v4, %v3927_v46  ;;  %v13206_v6 = vld [vmem:[%s21392_s24 + $0x40] ss:$8 sps:$4 sm:$0xff]  }
 0x5cb   :  { %21448 = vst [vmem:[#allocation29_spill] sm:$0xff] %v17616_v10  ;;  %21449 = vst [vmem:[#allocation31_spill] sm:$0xff] %v17619_v32  ;;  %6909 = vmatprep.subr.bf16.mxu1 %v13202_v11  ;;  %5795 = vmatprep.subr.bf16.mxu0 %v13205_v54  ;;  %v17642_v20 = vadd.f32 %v6228_v15, %v6227_v57  ;;  %v17644_v0 = vadd.f32 %v6259_v35, %v6258_v2  ;;  %v21452_v57 = vld [vmem:[#allocation46_spill] sm:$0xff]  ;;  %v21458_v29 = vld [vmem:[#allocation45_spill] sm:$0xff] }
 0x5cc   :  { %v6188_v28 = vadd.f32 %v17437_v12, %v17433_v37  ;;  %v4017_v36 = vmul.f32 %v16854_v4, %v3931_v24  ;;  %v17649_v42 = vadd.f32 %v6254_v41, %v6253_v59  ;;  %v17651_v48 = vadd.f32 %v6287_v19, %v6286_v16  ;;  %v13209_v41 = vld [vmem:[%s21295_s26 + $0xd0] ss:$24 sps:$4 sm:$0xff]  }
 0x5cd   :  { %6910 = vmatpush1.bf16.msra.mxu1 %v13200_v13  ;;  %v17657_v46 = vadd.f32 %v21420_v25, %v4013_v40  ;;  %v3936_v2 = vmul.f32 %v17298_v22, %v21452_v57  ;;  %v21453_v11 = vpack.c.bf16 %v17364_v58, %v17364_v58  ;;  %v17668_v19 = vpack.c.bf16 %v17484_v34, %v17481_v23  ;;  %v21456_v16 = vld [vmem:[#allocation65_spill] sm:$0xff]  ;;  %v13214_v13 = vld [vmem:[%s21392_s24 + $0x54] ss:$8 sps:$4 sm:$0xff]   ;;  %v21471_v12 = vld [vmem:[#allocation54_spill] sm:$0xff] }
 0x5ce   :  { %5796 = vmatpush1.bf16.msra.mxu0 %v13203_v47  ;;  %6911 = vmatprep.subr.bf16.mxu1 %v13208_v21  ;;  %v17674_v59 = vadd.f32 %v21420_v25, %v4017_v36  ;;  %v3940_v15 = vmul.f32 %v17327_v18, %v21456_v16  ;;  %v17678_v35 = vadd.f32 %v6280_v62, %v6279_v14  ;;  %v13217_v47 = vld [vmem:[%s21295_s26 + $0x104] ss:$24 sps:$4 sm:$0xff]   ;;  %v6189_v62 = vrot.slane %v6188_v28, 4  ;;  %v21461_v16 = vld [vmem:[#allocation47_spill] sm:$0xff] }
 0x5cf   :  { %21451 = vst [vmem:[#allocation38_spill] sm:$0xff] %v17657_v46  ;;  %v17664_v54 = vunpack.c.l.b16 %v21453_v11  ;;  %21454 = vst [vmem:[#allocation43_spill] sm:$0xff] %v17668_v19  ;;  %5797 = vmatprep.subr.bf16.mxu0 %v13211_v51  ;;  %v17682_v58 = vpack.c.bf16 %v17492_v5, %v17489_v26  ;;  %v4022_v21 = vmul.f32 %v21419_v30, %v3936_v2  ;;  %v13212_v2 = vld [vmem:[%s21392_s24 + $0x50] ss:$8 sps:$4 sm:$0xff]  }
 0x5d0   :  { %21455 = vst [vmem:[#allocation107_spill] sm:$0xff] %v17674_v59  ;;  %v3935_v24 = vmul.f32 %v17298_v22, %v21458_v29  ;;  %v6307_v14 = vadd.f32 %v17429_v49, %v17448_v60  ;;  %5503 = vmatmul.mubr.bf16.gmra.mrb[88].mxu0 %v17668_v19  ;;  %5729 = vmatmul.mubr.bf16.gmra.mrb[164].mxu1 %v17668_v19  ;;  %v21465_v60 = vld [vmem:[#allocation115_spill] sm:$0xff] }
 0x5d1   :  { %21457 = vst [vmem:[#allocation37_spill] sm:$0xff] %v17682_v58  ;;  %v6216_v51 = vadd.f32 %v17492_v5, %v17489_v26  ;;  %v4026_v40 = vmul.f32 %v21419_v30, %v3940_v15  ;;  %v17702_v36 = vadd.f32 %v17424_v39, %v17421_v63  ;;  %v21459_v22 = vpack.c.bf16 %v17414_v17, %v17414_v17  ;;  %v13215_v17 = vld [vmem:[%s21295_s26 + $0x100] ss:$24 sps:$4 sm:$0xff]  }
 0x5d2   :  { %6912 = vmatpush1.bf16.msra.mxu1 %v13206_v6  ;;  %5512 = vmatprep.mubr.bf16.mxu0 %v17682_v58  ;;  %v17714_v11 = vadd.f32 %v16857_v56, %v4022_v21  ;;  %v3939_v15 = vmul.f32 %v17327_v18, %v21461_v16  ;;  %v21462_v29 = vpack.c.bf16 %v17439_v27, %v17439_v27  ;;  %v13220_v6 = vld [vmem:[%s21392_s24 + $0x64] ss:$8 sps:$4 sm:$0xff]   ;;  %v21466_v49 = vld [vmem:[#allocation55_spill] sm:$0xff] }
 0x5d3   :  { %v17707_v57 = vunpack.c.l.b16 %v21459_v22  ;;  %5738 = vmatprep.mubr.bf16.mxu1 %v17682_v58  ;;  %5798 = vmatpush1.bf16.msra.mxu0 %v13209_v41  ;;  %v6244_v21 = vadd.f32 %v17556_v33, %v17539_v43  ;;  %v17733_v18 = vadd.f32 %v16857_v56, %v4026_v40  ;;  %v4021_v27 = vmul.f32 %v16854_v4, %v3935_v24  ;;  %v13223_v41 = vld [vmem:[%s21295_s26 + $0x134] ss:$24 sps:$4 sm:$0xff]  }
 0x5d4   :  { %21460 = vst [vmem:[#allocation39_spill] sm:$0xff] %v17714_v11  ;;  %v17721_v63 = vunpack.c.l.b16 %v21462_v29  ;;  %v17736_v22 = vunpack.c.l.b16 %v6376_v38  ;;  %6913 = vmatprep.subr.bf16.mxu1 %v13214_v13  ;;  %5799 = vmatprep.subr.bf16.mxu0 %v13217_v47  ;;  %v4025_v16 = vmul.f32 %v16854_v4, %v3939_v15  ;;  %v21464_v29 = vld [vmem:[#allocation66_spill] sm:$0xff]  ;;  %v3948_v26 = vmul.f32 %v17385_v8, %v21466_v49 }
 0x5d5   :  { %21463 = vst [vmem:[#allocation46_spill] sm:$0xff] %v17733_v18  ;;  %v3944_v39 = vmul.f32 %v21465_v60, %v21464_v29  ;;  %v6308_v40 = vrot.slane %v6307_v14, 4  ;;  %v6190_v5 = vadd.f32 %v6189_v62, %v6188_v28  ;;  %v6217_v37 = vrot.slane %v6216_v51, 4  ;;  %v13218_v13 = vld [vmem:[%s21392_s24 + $0x60] ss:$8 sps:$4 sm:$0xff]  }
 0x5d6   :  { %v17748_v38 = vpack.c.bf16 %v17533_v53, %v17519_v55  ;;  %6914 = vmatpush1.bf16.msra.mxu1 %v13212_v2  ;;  %v17754_v47 = vadd.f32 %v21420_v25, %v4021_v27  ;;  %v17757_v24 = vadd.f32 %v21420_v25, %v4025_v16  ;;  %v4034_v28 = vmul.f32 %v21419_v30, %v3948_v26  ;;  %v13221_v62 = vld [vmem:[%s21295_s26 + $0x130] ss:$24 sps:$4 sm:$0xff]   ;;  %v21470_v29 = vld [vmem:[#allocation52_spill] sm:$0xff] }
 0x5d7   :  { %v4030_v49 = vmul.f32 %v21419_v30, %v3944_v39  ;;  %5800 = vmatpush1.bf16.msra.mxu0 %v13215_v17  ;;  %6915 = vmatprep.subr.bf16.mxu1 %v13220_v6  ;;  %v6245_v2 = vrot.slane %v6244_v21, 4  ;;  %v6272_v15 = vadd.f32 %v17619_v32, %v17616_v10  ;;  %v3943_v27 = vmul.f32 %v21465_v60, %v21470_v29  ;;  %v13226_v26 = vld [vmem:[%s21392_s24 + $0x74] ss:$8 sps:$4 sm:$0xff]  }
 0x5d8   :  { %21467 = vst [vmem:[#allocation65_spill] sm:$0xff] %v17748_v38  ;;  %21468 = vst [vmem:[#allocation45_spill] sm:$0xff] %v17754_v47  ;;  %v3947_v16 = vmul.f32 %v17385_v8, %v21471_v12  ;;  %v6261_v39 = vrot.slane %v17644_v0, 2  ;;  %5801 = vmatprep.subr.bf16.mxu0 %v13223_v41  ;;  %v17773_v30 = vpack.c.bf16 %v17556_v33, %v17539_v43  ;;  %v13229_v17 = vld [vmem:[%s21295_s26 + $0x164] ss:$24 sps:$4 sm:$0xff]   ;;  %v6282_v12 = vrot.slane %v17678_v35, 2 }
 0x5d9   :  { %21469 = vst [vmem:[#allocation47_spill] sm:$0xff] %v17757_v24  ;;  %v17782_v60 = vadd.f32 %v16857_v56, %v4030_v49  ;;  %v17785_v8 = vadd.f32 %v16857_v56, %v4034_v28  ;;  %v6315_v6 = vrot.slane %v17702_v36, 4  ;;  %5513 = vmatmul.mubr.bf16.gmra.mrb[92].mxu0 %v17748_v38  ;;  %5739 = vmatmul.mubr.bf16.gmra.mrb[168].mxu1 %v17748_v38  ;;  %v6289_v29 = vrot.slane %v17651_v48, 2  ;;  %v13224_v56 = vld [vmem:[%s21392_s24 + $0x70] ss:$8 sps:$4 sm:$0xff]  }
 0x5da   :  { %21472 = vst [vmem:[#allocation66_spill] sm:$0xff] %v17773_v30  ;;  %v4029_v41 = vmul.f32 %v16854_v4, %v3943_v27  ;;  %v6256_v43 = vrot.slane %v17649_v42, 1  ;;  %v6309_v33 = vadd.f32 %v6308_v40, %v6307_v14  ;;  %v6191_v49 = vrot.slane %v6190_v5, 2  ;;  %6916 = vmatpush1.bf16.msra.mxu1 %v13218_v13  ;;  %5522 = vmatprep.mubr.bf16.mxu0 %v17773_v30  ;;  %v13227_v27 = vld [vmem:[%s21295_s26 + $0x160] ss:$24 sps:$4 sm:$0xff]  }
 0x5db   :  { %21473 = vst [vmem:[#allocation115_spill] sm:$0xff] %v17782_v60  ;;  %21474 = vst [vmem:[#allocation55_spill] sm:$0xff] %v17785_v8  ;;  %v4033_v28 = vmul.f32 %v16854_v4, %v3947_v16  ;;  %v6218_v58 = vadd.f32 %v6217_v37, %v6216_v51  ;;  %v6246_v19 = vadd.f32 %v6245_v2, %v6244_v21  ;;  %5748 = vmatprep.mubr.bf16.mxu1 %v17773_v30  ;;  %v13232_v14 = vld [vmem:[%s21392_s24 + $0x84] ss:$8 sps:$4 sm:$0xff]  }
 0x5dc   :  { %5802 = vmatpush1.bf16.msra.mxu0 %v13221_v62  ;;  %v6273_v40 = vrot.slane %v6272_v15, 4  ;;  %v17807_v13 = vadd.f32 %v21420_v25, %v4029_v41  ;;  %v17810_v38 = vmul.f32 0.0625, %v17634_v45  ;;  %6917 = vmatprep.subr.bf16.mxu1 %v13226_v26  ;;  %v13235_v4 = vld [vmem:[%s21295_s26 + $0x194] ss:$24 sps:$4 sm:$0xff]   ;;  %v6300_v37 = vadd.f32 %v17733_v18, %v17714_v11 }
 0x5dd   :  { %5803 = vmatprep.subr.bf16.mxu0 %v13229_v17  ;;  %v17818_v51 = vadd.f32 %v21420_v25, %v4033_v28  ;;  %v6262_v21 = vadd.f32 %v6261_v39, %v17644_v0  ;;  %v6283_v62 = vadd.f32 %v6282_v12, %v17678_v35  ;;  %v6235_v2 = vrot.slane %v17636_v52, 1  ;;  %v13230_v25 = vld [vmem:[%s21392_s24 + $0x80] ss:$8 sps:$4 sm:$0xff]   ;;  %v13241_v39 = vld [vmem:[%s21295_s26 + $0x1c4] ss:$24 sps:$4 sm:$0xff]  }
 0x5de   :  { %21475 = vst [vmem:[#allocation52_spill] sm:$0xff] %v17807_v13  ;;  %v6290_v45 = vadd.f32 %v6289_v29, %v17651_v48  ;;  %v6316_v16 = vadd.f32 %v6315_v6, %v17702_v36  ;;  %v17826_v26 = vmul.f32 0.0625, %v17642_v20  ;;  %v6257_v17 = vadd.f32 %v6256_v43, %v17649_v42  ;;  %6918 = vmatpush1.bf16.msra.mxu1 %v13224_v56  ;;  %v13233_v20 = vld [vmem:[%s21295_s26 + $0x190] ss:$24 sps:$4 sm:$0xff]  }
 0x5df   :  { %21476 = vst [vmem:[#allocation54_spill] sm:$0xff] %v17818_v51  ;;  %v6310_v41 = vrot.slane %v6309_v33, 2  ;;  %v6192_v30 = vadd.f32 %v6191_v49, %v6190_v5  ;;  %v6219_v0 = vrot.slane %v6218_v58, 2  ;;  %6919 = vmatprep.subr.bf16.mxu1 %v13232_v14  ;;  %v17834_v48 = vpack.c.bf16 %v17575_v50, %v17568_v7  ;;  %v13238_v5 = vld [vmem:[%s21392_s24 + $0x94] ss:$8 sps:$4 sm:$0xff]  }
 0x5e0   :  { %5804 = vmatpush1.bf16.msra.mxu0 %v13227_v27  ;;  %v6274_v35 = vadd.f32 %v6273_v40, %v6272_v15  ;;  %v6317_v43 = vrot.slane %v6316_v16, 2  ;;  %v6247_v42 = vrot.slane %v6246_v19, 2  ;;  %v17844_v36 = vpack.c.bf16 %v17619_v32, %v17616_v10 }
 0x5e1   :  { %21477 = vst [vmem:[#allocation131_spill] sm:$0xff] %v17834_v48  ;;  %5805 = vmatprep.subr.bf16.mxu0 %v13235_v4  ;;  %v6301_v12 = vrot.slane %v6300_v37, 4  ;;  %v6263_v6 = vrot.slane %v6262_v21, 1  ;;  %v6284_v29 = vrot.slane %v6283_v62, 1  ;;  %5523 = vmatmul.mubr.bf16.gmra.mrb[96].mxu0 %v17834_v48  ;;  %v6328_v15 = vadd.f32 %v17785_v8, %v17782_v60  ;;  %v13236_v4 = vld [vmem:[%s21392_s24 + $0x90] ss:$8 sps:$4 sm:$0xff]  }
 0x5e2   :  { %21478 = vst [vmem:[#allocation132_spill] sm:$0xff] %v17844_v36  ;;  %5749 = vmatmul.mubr.bf16.gmra.mrb[172].mxu1 %v17834_v48  ;;  %v6291_v49 = vrot.slane %v6290_v45, 1  ;;  %v6318_v56 = vadd.f32 %v6317_v43, %v6316_v16  ;;  %v17857_v14 = vadd.f32 %v6310_v41, %v6309_v33  ;;  %v6193_v40 = vrot.slane %v6192_v30, 1  ;;  %5532 = vmatprep.mubr.bf16.mxu0 %v17844_v36  ;;  %v13239_v16 = vld [vmem:[%s21295_s26 + $0x1c0] ss:$24 sps:$4 sm:$0xff]  }
 0x5e3   :  { %6920 = vmatpush1.bf16.msra.mxu1 %v13230_v25  ;;  %v6220_v10 = vadd.f32 %v6219_v0, %v6218_v58  ;;  %v6275_v32 = vrot.slane %v6274_v35, 2  ;;  %5758 = vmatprep.mubr.bf16.mxu1 %v17844_v36  ;;  %v13244_v33 = vld [vmem:[%s21392_s24 + $0xa4] ss:$8 sps:$4 sm:$0xff]   ;;  %v6236_v41 = vadd.f32 %v6235_v2, %v17636_v52  ;;  %v21479_v43 = vpack.c.bf16 %v17524_v3, %v17524_v3  ;;  %v13242_v3 = vld [vmem:[%s21392_s24 + $0xa0] ss:$8 sps:$4 sm:$0xff]  }
 0x5e4   :  { %5806 = vmatpush1.bf16.msra.mxu0 %v13233_v20  ;;  %v6319_v25 = vrot.slane %v6318_v56, 1  ;;  %v6248_v58 = vadd.f32 %v6247_v42, %v6246_v19  ;;  %6921 = vmatprep.subr.bf16.mxu1 %v13238_v5  ;;  %v13247_v0 = vld [vmem:[%s21295_s26 + $0x1f4] ss:$24 sps:$4 sm:$0xff]   ;;  %v6302_v20 = vadd.f32 %v6301_v12, %v6300_v37  ;;  %v6264_v28 = vadd.f32 %v6263_v6, %v6262_v21 }
 0x5e5   :  { %v17874_v27 = vunpack.c.l.b16 %v21479_v43  ;;  %5807 = vmatprep.subr.bf16.mxu0 %v13241_v39  ;;  %v17879_v36 = vmul.f32 0.0625, %v6257_v17  ;;  %v6285_v48 = vadd.f32 %v6284_v29, %v6283_v62  ;;  %v6329_v1 = vrot.slane %v6328_v15, 4  ;;  %v13250_v21 = vld [vmem:[%s21392_s24 + $0xb4] ss:$8 sps:$4 sm:$0xff]  }
 0x5e6   :  { %v6292_v52 = vadd.f32 %v6291_v49, %v6290_v45  ;;  %v6312_v2 = vrot.slane %v17857_v14, 1  ;;  %v6194_v61 = vadd.f32 %v6193_v40, %v6192_v30  ;;  %v6320_v19 = vadd.f32 %v6319_v25, %v6318_v56  ;;  %v13245_v30 = vld [vmem:[%s21295_s26 + $0x1f0] ss:$24 sps:$4 sm:$0xff]   ;;  %v13253_v17 = vld [vmem:[%s21295_s26 + $0x224] ss:$24 sps:$4 sm:$0xff]  }
 0x5e7   :  { %6922 = vmatpush1.bf16.msra.mxu1 %v13236_v4  ;;  %v6349_v5 = vmul.f32 0.0625, %v17623_v9  ;;  %v6221_v42 = vrot.slane %v6220_v10, 1  ;;  %v17888_v37 = vpack.c.bf16 %v17674_v59, %v17657_v46  ;;  %v6353_v62 = vmul.f32 0.0625, %v6236_v41 }
 0x5e8   :  { %5808 = vmatpush1.bf16.msra.mxu0 %v13239_v16  ;;  %6923 = vmatprep.subr.bf16.mxu1 %v13244_v33  ;;  %v6276_v45 = vadd.f32 %v6275_v32, %v6274_v35  ;;  %v17898_v9 = vpack.c.bf16 %v17733_v18, %v17714_v11  ;;  %v6357_v39 = vmul.f32 0.0625, %v6264_v28  ;;  %v6249_v12 = vrot.slane %v6248_v58, 1  ;;  %v13248_v28 = vld [vmem:[%s21392_s24 + $0xb0] ss:$8 sps:$4 sm:$0xff]  }
 0x5e9   :  { %5809 = vmatprep.subr.bf16.mxu0 %v13247_v0  ;;  %v6303_v6 = vrot.slane %v6302_v20, 2  ;;  %v6388_v29 = vpack.c.bf16 %v17879_v36, %v17879_v36  ;;  %5533 = vmatmul.mubr.bf16.gmra.mrb[100].mxu0 %v17888_v37  ;;  %v6361_v32 = vmul.f32 0.0625, %v6292_v52  ;;  %v6330_v49 = vadd.f32 %v6329_v1, %v6328_v15  ;;  %v13251_v1 = vld [vmem:[%s21295_s26 + $0x220] ss:$24 sps:$4 sm:$0xff]   ;;  %v13269_v36 = vld [vmem:[%s21295_s26 + $0x2b0] ss:$24 sps:$4 sm:$0xff]  }
 0x5ea   :  { %5759 = vmatmul.mubr.bf16.gmra.mrb[176].mxu1 %v17888_v37  ;;  %v6277_v35 = vrot.slane %v6276_v45, 1  ;;  %v17907_v56 = vmul.f32 0.0625, %v6285_v48  ;;  %5542 = vmatprep.mubr.bf16.mxu0 %v17898_v9  ;;  %v6365_v40 = vmul.f32 0.0625, %v6320_v19  ;;  %v6381_v4 = vpack.c.bf16 %v6349_v5, %v6349_v5  ;;  %v13256_v48 = vld [vmem:[%s21392_s24 + $0xc4] ss:$8 sps:$4 sm:$0xff]  }
 0x5eb   :  { %6924 = vmatpush1.bf16.msra.mxu1 %v13242_v3  ;;  %v6304_v16 = vadd.f32 %v6303_v6, %v6302_v20  ;;  %v17913_v33 = vmul.f32 0.0625, %v6194_v61  ;;  %v6222_v41 = vadd.f32 %v6221_v42, %v6220_v10  ;;  %5768 = vmatprep.mubr.bf16.mxu1 %v17898_v9  ;;  %v6385_v15 = vpack.c.bf16 %v6353_v62, %v6353_v62  ;;  %v13259_v61 = vld [vmem:[%s21295_s26 + $0x254] ss:$24 sps:$4 sm:$0xff]   ;;  %v13265_v6 = vld [vmem:[%s21295_s26 + $0x284] ss:$24 sps:$4 sm:$0xff]  }
 0x5ec   :  { %5810 = vmatpush1.bf16.msra.mxu0 %v13245_v30  ;;  %v6331_v25 = vrot.slane %v6330_v49, 2  ;;  %6925 = vmatprep.subr.bf16.mxu1 %v13250_v21  ;;  %v6389_v10 = vpack.c.bf16 %v6357_v39, %v6357_v39  ;;  %v6313_v43 = vadd.f32 %v6312_v2, %v17857_v14  ;;  %v6250_v0 = vadd.f32 %v6249_v12, %v6248_v58  ;;  %v13254_v30 = vld [vmem:[%s21392_s24 + $0xc0] ss:$8 sps:$4 sm:$0xff]   ;;  %v13262_v12 = vld [vmem:[%s21392_s24 + $0xd4] ss:$8 sps:$4 sm:$0xff]  }
 0x5ed   :  { %5811 = vmatprep.subr.bf16.mxu0 %v13253_v17  ;;  %v6305_v20 = vrot.slane %v6304_v16, 1  ;;  %v6393_v52 = vpack.c.bf16 %v6361_v32, %v6361_v32  ;;  %v21480_v3 = vpack.c.bf16 %v17570_v31, %v17570_v31  ;;  %v6278_v5 = vadd.f32 %v6277_v35, %v6276_v45  ;;  %v13257_v31 = vld [vmem:[%s21295_s26 + $0x250] ss:$24 sps:$4 sm:$0xff]  }
 0x5ee   :  { %v6332_v42 = vadd.f32 %v6331_v25, %v6330_v49  ;;  %v17934_v21 = vpack.c.bf16 %v17757_v24, %v17754_v47  ;;  %v6397_v62 = vpack.c.bf16 %v6365_v40, %v6365_v40  ;;  %v6521_v14 = vunpack.c.l.b16 %v6381_v4  ;;  %v13263_v25 = vld [vmem:[%s21295_s26 + $0x280] ss:$24 sps:$4 sm:$0xff]  }
 0x5ef   :  { %v6517_v19 = vunpack.c.l.b16 %v21480_v3  ;;  %6926 = vmatpush1.bf16.msra.mxu1 %v13248_v28  ;;  %v6306_v58 = vadd.f32 %v6305_v20, %v6304_v16  ;;  %v17941_v2 = vpack.c.bf16 %v17785_v8, %v17782_v60  ;;  %v6525_v45 = vunpack.c.l.b16 %v6385_v15  ;;  %v13271_v3 = vld [vmem:[%s21295_s26 + $0x2b4] ss:$24 sps:$4 sm:$0xff]  }
 0x5f0   :  { %5812 = vmatpush1.bf16.msra.mxu0 %v13251_v1  ;;  %6927 = vmatprep.subr.bf16.mxu1 %v13256_v48  ;;  %v6333_v17 = vrot.slane %v6332_v42, 1  ;;  %v6351_v39 = vmul.f32 0.0625, %v6222_v41  ;;  %v6529_v32 = vunpack.c.l.b16 %v6389_v10  ;;  %v6554_v35 = vsel %vm6540_vm2, %v17721_v63, %v17664_v54  ;;  %v13260_v63 = vld [vmem:[%s21392_s24 + $0xd0] ss:$8 sps:$4 sm:$0xff]  }
 0x5f1   :  { %5813 = vmatprep.subr.bf16.mxu0 %v13259_v61  ;;  %v6364_v49 = vmul.f32 0.0625, %v6313_v43  ;;  %v6355_v28 = vmul.f32 0.0625, %v6250_v0  ;;  %5543 = vmatmul.mubr.bf16.gmra.mrb[104].mxu0 %v17934_v21  ;;  %v6533_v40 = vunpack.c.l.b16 %v6393_v52  ;;  %v6555_v4 = vsel %vm6542_vm3, %v6517_v19, %v6554_v35  ;;  %v13277_v35 = vld [vmem:[%s21295_s26 + $0x2e4] ss:$24 sps:$4 sm:$0xff]  }
 0x5f2   :  { %5769 = vmatmul.mubr.bf16.gmra.mrb[180].mxu1 %v17934_v21  ;;  %v6334_v16 = vadd.f32 %v6333_v17, %v6332_v42  ;;  %v6359_v41 = vmul.f32 0.0625, %v6278_v5  ;;  %v6379_v1 = vpack.c.bf16 %v17913_v33, %v17913_v33  ;;  %5552 = vmatprep.mubr.bf16.mxu0 %v17941_v2  ;;  %v6537_v54 = vunpack.c.l.b16 %v6397_v62  ;;  %v13268_v33 = vld [vmem:[%s21392_s24 + $0xe4] ss:$8 sps:$4 sm:$0xff]  }
 0x5f3   :  { %6928 = vmatpush1.bf16.msra.mxu1 %v13254_v30  ;;  %v6556_v48 = vsel %vm6544_vm4, %v6521_v14, %v6555_v4  ;;  %v6363_v15 = vmul.f32 0.0625, %v6306_v58  ;;  %5778 = vmatprep.mubr.bf16.mxu1 %v17941_v2  ;;  %v6392_v10 = vpack.c.bf16 %v17907_v56, %v17907_v56  ;;  %v6383_v0 = vpack.c.bf16 %v6351_v39, %v6351_v39  ;;  %v13266_v58 = vld [vmem:[%s21392_s24 + $0xe0] ss:$8 sps:$4 sm:$0xff]  }
 0x5f4   :  { %5814 = vmatpush1.bf16.msra.mxu0 %v13257_v31  ;;  %v6557_v61 = vsel %vm6546_vm5, %v6525_v45, %v6556_v48  ;;  %v6367_v43 = vmul.f32 0.0625, %v6334_v16  ;;  %v21481_v20 = vpack.c.bf16 %v17810_v38, %v17810_v38  ;;  %6929 = vmatprep.subr.bf16.mxu1 %v13262_v12  ;;  %v6396_v5 = vpack.c.bf16 %v6364_v49, %v6364_v49 }
 0x5f5   :  { %5815 = vmatprep.subr.bf16.mxu0 %v13265_v6  ;;  %v6558_v19 = vsel %vm6548_vm6, %v6529_v32, %v6557_v61  ;;  %v6387_v42 = vpack.c.bf16 %v6355_v28, %v6355_v28  ;;  %v21482_v30 = vpack.c.bf16 %v17826_v26, %v17826_v26  ;;  %v6528_v62 = vunpack.c.l.b16 %v6388_v29  ;;  %v13274_v32 = vld [vmem:[%s21392_s24 + $0xf4] ss:$8 sps:$4 sm:$0xff]  }
 0x5f6   :  { %v6520_v52 = vunpack.c.l.b16 %v21481_v20  ;;  %v6559_v38 = vsel %vm6550_vm7, %v6533_v40, %v6558_v19  ;;  %v6391_v14 = vpack.c.bf16 %v6359_v41, %v6359_v41  ;;  %v17991_v31 = vpack.c.bf16 %v17818_v51, %v17807_v13  ;;  %v21483_v41 = vld [vmem:[#allocation74_spill] sm:$0xff] }
 0x5f7   :  { %v6524_v56 = vunpack.c.l.b16 %v21482_v30  ;;  %6930 = vmatpush1.bf16.msra.mxu1 %v13260_v63  ;;  %v6560_v45 = vsel %vm6552_vm8, %v6537_v54, %v6559_v38  ;;  %v6395_v26 = vpack.c.bf16 %v6363_v15, %v6363_v15  ;;  %v6519_v17 = vunpack.c.l.b16 %v6379_v1  ;;  %v13272_v1 = vld [vmem:[%s21392_s24 + $0xf0] ss:$8 sps:$4 sm:$0xff]   ;;  %v13283_v61 = vld [vmem:[%s21295_s26 + $0x314] ss:$24 sps:$4 sm:$0xff]   ;;  %v13278_v20 = vld [vmem:[%s21392_s24 + $0x100] ss:$8 sps:$4 sm:$0xff]  }
 0x5f8   :  { %5816 = vmatpush1.bf16.msra.mxu0 %v13263_v25  ;;  %6931 = vmatprep.subr.bf16.mxu1 %v13268_v33  ;;  %v6532_v29 = vunpack.c.l.b16 %v6392_v10  ;;  %v6543_v39 = vsel %vm6542_vm3, %v17736_v22, %v17560_v44  ;;  %v6399_v12 = vpack.c.bf16 %v6367_v43, %v6367_v43  ;;  %v6523_v6 = vunpack.c.l.b16 %v6383_v0  ;;  %v13275_v15 = vld [vmem:[%s21295_s26 + $0x2e0] ss:$24 sps:$4 sm:$0xff]   ;;  %v13289_v30 = vld [vmem:[%s21295_s26 + $0x344] ss:$24 sps:$4 sm:$0xff]  }
 0x5f9   :  { %5817 = vmatprep.subr.bf16.mxu0 %v13271_v3  ;;  %v6536_v49 = vunpack.c.l.b16 %v6396_v5  ;;  %v6545_v28 = vsel %vm6544_vm4, %v6520_v52, %v6543_v39  ;;  %v6527_v40 = vunpack.c.l.b16 %v6387_v42  ;;  %5553 = vmatmul.mubr.bf16.gmra.mrb[108].mxu0 %v17991_v31  ;;  %v6576_v44 = vpack.c.b16 %v6560_v45, %v6560_v45  ;;  %v13281_v3 = vld [vmem:[%s21295_s26 + $0x310] ss:$24 sps:$4 sm:$0xff]   ;;  %v13286_v42 = vld [vmem:[%s21392_s24 + $0x114] ss:$8 sps:$4 sm:$0xff]   ;;  %v13292_v45 = vld [vmem:[%s21392_s24 + $0x124] ss:$8 sps:$4 sm:$0xff]  }
 0x5fa   :  { %5779 = vmatmul.mubr.bf16.gmra.mrb[184].mxu1 %v17991_v31  ;;  %v6547_v22 = vsel %vm6546_vm5, %v6524_v56, %v6545_v28  ;;  %v6531_v4 = vunpack.c.l.b16 %v6391_v14  ;;  %v6568_v16 = vsel %vm6540_vm2, %v17874_v27, %v17707_v57  ;;  %5821 = vmatprep.mubr.bf16.mxu0 %v21483_v41  ;;  %v6535_v54 = vunpack.c.l.b16 %v6395_v26  ;;  %v13280_v57 = vld [vmem:[%s21392_s24 + $0x104] ss:$8 sps:$4 sm:$0xff]   ;;  %v21484_v56 = vld [vmem:[#allocation75_spill] sm:$0xff] }
 0x5fb   :  { %6932 = vmatpush1.bf16.msra.mxu1 %v13266_v58  ;;  %v6549_v63 = vsel %vm6548_vm6, %v6528_v62, %v6547_v22  ;;  %v6569_v48 = vsel %vm6542_vm3, %v6519_v17, %v6568_v16  ;;  %6935 = vmatprep.mubr.bf16.mxu1 %v6576_v44  ;;  %v6539_v25 = vunpack.c.l.b16 %v6399_v12  ;;  %v13284_v38 = vld [vmem:[%s21392_s24 + $0x110] ss:$8 sps:$4 sm:$0xff]   ;;  %v21485_v14 = vld [vmem:[#allocation81_spill] sm:$0xff]  ;;  %v13295_v26 = vld [vmem:[%s21295_s26 + $0x374] ss:$24 sps:$4 sm:$0xff]   ;;  %v6181_v16 = vadd.f32 %v17484_v34, %v17481_v23 }
 0x5fc   :  { %5818 = vmatpush1.bf16.msra.mxu0 %v13269_v36  ;;  %v6551_v27 = vsel %vm6550_vm7, %v6532_v29, %v6549_v63  ;;  %v6570_v33 = vsel %vm6544_vm4, %v6523_v6, %v6569_v48  ;;  %6933 = vmatprep.subr.bf16.mxu1 %v13274_v32  ;;  %v13287_v58 = vld [vmem:[%s21295_s26 + $0x340] ss:$24 sps:$4 sm:$0xff]   ;;  %v13293_v36 = vld [vmem:[%s21295_s26 + $0x370] ss:$24 sps:$4 sm:$0xff]   ;;  %v13298_v29 = vld [vmem:[%s21392_s24 + $0x134] ss:$8 sps:$4 sm:$0xff]   ;;  %v6209_v48 = vadd.f32 %v17533_v53, %v17519_v55 }
 0x5fd   :  { %5819 = vmatprep.subr.bf16.mxu0 %v13277_v35  ;;  %v6553_v10 = vsel %vm6552_vm8, %v6536_v49, %v6551_v27  ;;  %v6571_v43 = vsel %vm6546_vm5, %v6527_v40, %v6570_v33  ;;  %v13290_v17 = vld [vmem:[%s21392_s24 + $0x120] ss:$8 sps:$4 sm:$0xff]   ;;  %v13301_v39 = vld [vmem:[%s21295_s26 + $0x3a4] ss:$24 sps:$4 sm:$0xff]   ;;  %v13296_v6 = vld [vmem:[%s21392_s24 + $0x130] ss:$8 sps:$4 sm:$0xff]   ;;  %v6237_v27 = vadd.f32 %v17575_v50, %v17568_v7  ;;  %v6265_v33 = vadd.f32 %v17674_v59, %v17657_v46 }
 0x5fe   :  { %v6572_v0 = vsel %vm6548_vm6, %v6531_v4, %v6571_v43  ;;  %v6575_v19 = vpack.c.b16 %v6553_v10, %v6553_v10  ;;  %v21486_v12 = vld [vmem:[#allocation82_spill] sm:$0xff]  ;;  %v21487_v32 = vld [vmem:[#allocation91_spill] sm:$0xff]  ;;  %v21488_v40 = vld [vmem:[#allocation85_spill] sm:$0xff]  ;;  %v6182_v43 = vrot.slane %v6181_v16, 4 }
 0x5ff   :  { %6934 = vmatpush1.bf16.msra.mxu1 %v13272_v1  ;;  %v6573_v52 = vsel %vm6550_vm7, %v6535_v54, %v6572_v0  ;;  %v13299_v35 = vld [vmem:[%s21295_s26 + $0x3a0] ss:$24 sps:$4 sm:$0xff]   ;;  %v13304_v49 = vld [vmem:[%s21392_s24 + $0x144] ss:$8 sps:$4 sm:$0xff]   ;;  %v13305_v41 = vld [vmem:[%s21295_s26 + $0x3d0] ss:$24 sps:$4 sm:$0xff]   ;;  %v6293_v0 = vadd.f32 %v17757_v24, %v17754_v47 }
 0x600   :  { %5820 = vmatpush1.bf16.msra.mxu0 %v13275_v15  ;;  %6944 = vmatprep.subr.bf16.mxu1 %v13280_v57  ;;  %v6574_v5 = vsel %vm6552_vm8, %v6539_v25, %v6573_v52  ;;  %v13307_v28 = vld [vmem:[%s21295_s26 + $0x3d4] ss:$24 sps:$4 sm:$0xff]   ;;  %v13302_v4 = vld [vmem:[%s21392_s24 + $0x140] ss:$8 sps:$4 sm:$0xff]   ;;  %v13313_v57 = vld [vmem:[%s21295_s26 + $0x404] ss:$24 sps:$4 sm:$0xff]  }
 0x601   :  { %5902 = vmatprep.subr.bf16.mxu0 %v13283_v61  ;;  %v6578_v62 = vpack.c.b16 %v6574_v5, %v6574_v5  ;;  %v21489_v44 = vld [vmem:[#allocation90_spill] sm:$0xff]  ;;  %v21490_v1 = vld [vmem:[#allocation69_spill] sm:$0xff]  ;;  %v21491_v63 = vld [vmem:[#allocation76_spill] sm:$0xff]  ;;  %v6210_v5 = vrot.slane %v6209_v48, 4 }
 0x602   :  { %6936 = vmatmul.mubr.bf16.vlgmr.msra.gmra.mrb[188].mxu1 %v6575_v19  ;;  %v6153_v22 = vadd.f32 %v21489_v44, %v21488_v40  ;;  %v6125_v54 = vadd.f32 %v21491_v63, %v21490_v1  ;;  %v13310_v15 = vld [vmem:[%s21392_s24 + $0x154] ss:$8 sps:$4 sm:$0xff]   ;;  %v13308_v10 = vld [vmem:[%s21392_s24 + $0x150] ss:$8 sps:$4 sm:$0xff]  }
 0x603   :  { %5822 = vmatmul.mubr.bf16.vlgmr.msra.gmra.mrb[112].mxu0 %v21484_v56  ;;  %6945 = vmatpush1.bf16.msra.mxu1 %v13278_v20  ;;  %v21492_v61 = vld [vmem:[#allocation92_spill] sm:$0xff]  ;;  %v21493_v20 = vld [vmem:[#allocation98_spill] sm:$0xff]  ;;  %v6238_v56 = vrot.slane %v6237_v27, 4 }
 0x604   :  { %5831 = vmatprep.mubr.bf16.mxu0 %v21485_v14  ;;  %5903 = vmatpush1.bf16.msra.mxu0 %v13281_v3  ;;  %v6154_v25 = vrot.slane %v6153_v22, 4  ;;  %v13311_v52 = vld [vmem:[%s21295_s26 + $0x400] ss:$24 sps:$4 sm:$0xff]   ;;  %v13316_v3 = vld [vmem:[%s21392_s24 + $0x164] ss:$8 sps:$4 sm:$0xff]   ;;  %v6126_v19 = vrot.slane %v6125_v54, 4 }
 0x605   :  { %6976 = vmatprep.mubr.bf16.mxu1 %v6578_v62  ;;  %6946 = vmatprep.subr.bf16.mxu1 %v13286_v42  ;;  %v6321_v42 = vadd.f32 %v17818_v51, %v17807_v13  ;;  %v13314_v14 = vld [vmem:[%s21392_s24 + $0x160] ss:$8 sps:$4 sm:$0xff]  }
 0x606   :  { %5904 = vmatprep.subr.bf16.mxu0 %v13289_v30  ;;  %v13319_v30 = vld [vmem:[%s21295_s26 + $0x434] ss:$24 sps:$4 sm:$0xff]   ;;  %v6155_v62 = vadd.f32 %v6154_v25, %v6153_v22 }
 0x607   :  { %6947 = vmatpush1.bf16.msra.mxu1 %v13284_v38  ;;  %v6266_v38 = vrot.slane %v6265_v33, 4 }
 0x608   :  { %5905 = vmatpush1.bf16.msra.mxu0 %v13287_v58  ;;  %6948 = vmatprep.subr.bf16.mxu1 %v13292_v45  ;;  %v6183_v58 = vadd.f32 %v6182_v43, %v6181_v16  ;;  %v6294_v45 = vrot.slane %v6293_v0, 4  ;;  %v21495_v16 = vld [vmem:[#allocation105_spill] sm:$0xff] }
 0x609   :  { %5906 = vmatprep.subr.bf16.mxu0 %v13295_v26  ;;  %v13317_v26 = vld [vmem:[%s21295_s26 + $0x430] ss:$24 sps:$4 sm:$0xff]  }
 0x60a   :  { %v6184_v22 = vrot.slane %v6183_v58, 2 }
 0x60b   :  { %5832 = vmatmul.mubr.bf16.gmra.mrb[116].mxu0 %v21486_v12  ;;  %6949 = vmatpush1.bf16.msra.mxu1 %v13290_v17  ;;  %v6127_v17 = vadd.f32 %v6126_v19, %v6125_v54  ;;  %v13325_v12 = vld [vmem:[%s21295_s26 + $0x464] ss:$24 sps:$4 sm:$0xff]  }
 0x60c   :  { %5841 = vmatprep.mubr.bf16.mxu0 %v21487_v32  ;;  %5907 = vmatpush1.bf16.msra.mxu0 %v13293_v36  ;;  %v6211_v36 = vadd.f32 %v6210_v5, %v6209_v48  ;;  %v6156_v32 = vrot.slane %v6155_v62, 2  ;;  %v13328_v54 = vld [vmem:[%s21392_s24 + $0x184] ss:$8 sps:$4 sm:$0xff]   ;;  %v6185_v43 = vadd.f32 %v6184_v22, %v6183_v58  ;;  %v13334_v5 = vld [vmem:[%s21392_s24 + $0x194] ss:$8 sps:$4 sm:$0xff]  }
 0x60d   :  { %6950 = vmatprep.subr.bf16.mxu1 %v13298_v29  ;;  %5908 = vmatprep.subr.bf16.mxu0 %v13301_v39  ;;  %v6322_v29 = vrot.slane %v6321_v42, 4  ;;  %v13322_v39 = vld [vmem:[%s21392_s24 + $0x174] ss:$8 sps:$4 sm:$0xff]   ;;  %v6128_v48 = vrot.slane %v6127_v17, 2 }
 0x60e   :  { %v6186_v58 = vrot.slane %v6185_v43, 1 }
 0x60f   :  { %6951 = vmatpush1.bf16.msra.mxu1 %v13296_v6  ;;  %v6239_v6 = vadd.f32 %v6238_v56, %v6237_v27  ;;  %v13331_v27 = vld [vmem:[%s21295_s26 + $0x494] ss:$24 sps:$4 sm:$0xff]  }
 0x610   :  { %5909 = vmatpush1.bf16.msra.mxu0 %v13299_v35  ;;  %6952 = vmatprep.subr.bf16.mxu1 %v13304_v49  ;;  %v6267_v35 = vadd.f32 %v6266_v38, %v6265_v33  ;;  %v21494_v49 = vld [vmem:[#allocation100_spill] sm:$0xff]  ;;  %v6157_v33 = vadd.f32 %v6156_v32, %v6155_v62  ;;  %v21496_v38 = vld [vmem:[#allocation106_spill] sm:$0xff]  ;;  %v6187_v22 = vadd.f32 %v6186_v58, %v6185_v43 }
 0x611   :  { %5910 = vmatprep.subr.bf16.mxu0 %v13307_v28  ;;  %v13320_v28 = vld [vmem:[%s21392_s24 + $0x170] ss:$8 sps:$4 sm:$0xff]   ;;  %v6240_v25 = vrot.slane %v6239_v6, 2 }
 0x612   :  { %v6158_v56 = vrot.slane %v6157_v33, 1  ;;  %v6346_v43 = vmul.f32 0.0625, %v6187_v22 }
 0x613   :  { %5842 = vmatmul.mubr.bf16.gmra.mrb[120].mxu0 %v21492_v61  ;;  %6953 = vmatpush1.bf16.msra.mxu1 %v13302_v4  ;;  %v6295_v4 = vadd.f32 %v6294_v45, %v6293_v0  ;;  %v6268_v61 = vrot.slane %v6267_v35, 2 }
 0x614   :  { %5851 = vmatprep.mubr.bf16.mxu0 %v21493_v20  ;;  %5911 = vmatpush1.bf16.msra.mxu0 %v13305_v41  ;;  %v13323_v41 = vld [vmem:[%s21295_s26 + $0x460] ss:$24 sps:$4 sm:$0xff]   ;;  %v13329_v20 = vld [vmem:[%s21295_s26 + $0x490] ss:$24 sps:$4 sm:$0xff]   ;;  %v6378_v58 = vpack.c.bf16 %v6346_v43, %v6346_v43 }
 0x615   :  { %6954 = vmatprep.subr.bf16.mxu1 %v13310_v15  ;;  %5912 = vmatprep.subr.bf16.mxu0 %v13313_v57  ;;  %v6212_v15 = vrot.slane %v6211_v36, 2  ;;  %v6323_v57 = vadd.f32 %v6322_v29, %v6321_v42  ;;  %v6296_v0 = vrot.slane %v6295_v4, 2  ;;  %v13337_v42 = vld [vmem:[%s21295_s26 + $0x4c4] ss:$24 sps:$4 sm:$0xff]   ;;  %v6269_v62 = vadd.f32 %v6268_v61, %v6267_v35  ;;  %v13344_v61 = vld [vmem:[%s21392_s24 + $0x1b0] ss:$8 sps:$4 sm:$0xff]  }
 0x616   :  { %v6159_v35 = vadd.f32 %v6158_v56, %v6157_v33  ;;  %v21498_v33 = vld [vmem:[#allocation114_spill] sm:$0xff]  ;;  %v6518_v22 = vunpack.c.l.b16 %v6378_v58 }
 0x617   :  { %6955 = vmatpush1.bf16.msra.mxu1 %v13308_v10  ;;  %v13326_v10 = vld [vmem:[%s21392_s24 + $0x180] ss:$8 sps:$4 sm:$0xff]   ;;  %v6324_v19 = vrot.slane %v6323_v57, 2  ;;  %v6297_v45 = vadd.f32 %v6296_v0, %v6295_v4  ;;  %v21499_v0 = vld [vmem:[#allocation119_spill] sm:$0xff] }
 0x618   :  { %5913 = vmatpush1.bf16.msra.mxu0 %v13311_v52  ;;  %6956 = vmatprep.subr.bf16.mxu1 %v13316_v3  ;;  %v6129_v52 = vadd.f32 %v6128_v48, %v6127_v17  ;;  %v6213_v3 = vadd.f32 %v6212_v15, %v6211_v36  ;;  %v13335_v17 = vld [vmem:[%s21295_s26 + $0x4c0] ss:$24 sps:$4 sm:$0xff]   ;;  %v13340_v36 = vld [vmem:[%s21392_s24 + $0x1a4] ss:$8 sps:$4 sm:$0xff]   ;;  %v13341_v4 = vld [vmem:[%s21295_s26 + $0x4f0] ss:$24 sps:$4 sm:$0xff]  }
 0x619   :  { %5914 = vmatprep.subr.bf16.mxu0 %v13319_v30  ;;  %v6241_v30 = vadd.f32 %v6240_v25, %v6239_v6  ;;  %v6325_v6 = vadd.f32 %v6324_v19, %v6323_v57  ;;  %v13346_v48 = vld [vmem:[%s21392_s24 + $0x1b4] ss:$8 sps:$4 sm:$0xff]   ;;  %v6342_v25 = vmul.f32 0.0625, %v6159_v35  ;;  %v21500_v35 = vld [vmem:[#allocation122_spill] sm:$0xff] }
 0x61a   :  { %v6130_v29 = vrot.slane %v6129_v52, 1  ;;  %v13349_v15 = vld [vmem:[%s21295_s26 + $0x524] ss:$24 sps:$4 sm:$0xff]   ;;  %v13365_v43 = vld [vmem:[%s21295_s26 + $0x5b0] ss:$24 sps:$4 sm:$0xff]  }
 0x61b   :  { %5852 = vmatmul.mubr.bf16.gmra.mrb[124].mxu0 %v21494_v49  ;;  %6957 = vmatpush1.bf16.msra.mxu1 %v13314_v14  ;;  %v13332_v14 = vld [vmem:[%s21392_s24 + $0x190] ss:$8 sps:$4 sm:$0xff]   ;;  %v6242_v32 = vrot.slane %v6241_v30, 1  ;;  %v6270_v49 = vrot.slane %v6269_v62, 1  ;;  %v6326_v57 = vrot.slane %v6325_v6, 1 }
 0x61c   :  { %5861 = vmatprep.mubr.bf16.mxu0 %v21495_v16  ;;  %5915 = vmatpush1.bf16.msra.mxu0 %v13317_v26  ;;  %v21497_v26 = vld [vmem:[#allocation110_spill] sm:$0xff]  ;;  %v6298_v16 = vrot.slane %v6297_v45, 1 }
 0x61d   :  { %6958 = vmatprep.subr.bf16.mxu1 %v13322_v39  ;;  %5916 = vmatprep.subr.bf16.mxu0 %v13325_v12  ;;  %v6214_v39 = vrot.slane %v6213_v3, 1  ;;  %v13343_v12 = vld [vmem:[%s21295_s26 + $0x4f4] ss:$24 sps:$4 sm:$0xff]  }
 0x61f   :  { %6959 = vmatpush1.bf16.msra.mxu1 %v13320_v28  ;;  %v13338_v28 = vld [vmem:[%s21392_s24 + $0x1a0] ss:$8 sps:$4 sm:$0xff]  }
 0x620   :  { %5917 = vmatpush1.bf16.msra.mxu0 %v13323_v41  ;;  %6960 = vmatprep.subr.bf16.mxu1 %v13328_v54  ;;  %v6131_v41 = vadd.f32 %v6130_v29, %v6129_v52  ;;  %v6215_v54 = vadd.f32 %v6214_v39, %v6213_v3  ;;  %v13352_v52 = vld [vmem:[%s21392_s24 + $0x1c4] ss:$8 sps:$4 sm:$0xff]   ;;  %v6299_v3 = vadd.f32 %v6298_v16, %v6297_v45  ;;  %v13353_v45 = vld [vmem:[%s21295_s26 + $0x550] ss:$24 sps:$4 sm:$0xff]   ;;  %v13359_v16 = vld [vmem:[%s21295_s26 + $0x580] ss:$24 sps:$4 sm:$0xff]  }
 0x621   :  { %5918 = vmatprep.subr.bf16.mxu0 %v13331_v27  ;;  %v6243_v27 = vadd.f32 %v6242_v32, %v6241_v30  ;;  %v13361_v29 = vld [vmem:[%s21295_s26 + $0x584] ss:$24 sps:$4 sm:$0xff]  }
 0x622   :  { %v6350_v19 = vmul.f32 0.0625, %v6215_v54  ;;  %v6338_v30 = vmul.f32 0.0625, %v6131_v41  ;;  %v13364_v41 = vld [vmem:[%s21392_s24 + $0x1e4] ss:$8 sps:$4 sm:$0xff]  }
 0x623   :  { %5862 = vmatmul.mubr.bf16.gmra.mrb[128].mxu0 %v21496_v38  ;;  %6961 = vmatpush1.bf16.msra.mxu1 %v13326_v10  ;;  %v6271_v10 = vadd.f32 %v6270_v49, %v6269_v62  ;;  %v6354_v56 = vmul.f32 0.0625, %v6243_v27  ;;  %v6374_v62 = vpack.c.bf16 %v6342_v25, %v6342_v25  ;;  %v13350_v38 = vld [vmem:[%s21392_s24 + $0x1c0] ss:$8 sps:$4 sm:$0xff]   ;;  %v13356_v49 = vld [vmem:[%s21392_s24 + $0x1d0] ss:$8 sps:$4 sm:$0xff]  }
 0x624   :  { %5871 = vmatprep.mubr.bf16.mxu0 %v21497_v26  ;;  %5919 = vmatpush1.bf16.msra.mxu0 %v13329_v20  ;;  %v13347_v20 = vld [vmem:[%s21295_s26 + $0x520] ss:$24 sps:$4 sm:$0xff]   ;;  %v6362_v26 = vmul.f32 0.0625, %v6299_v3  ;;  %v13373_v3 = vld [vmem:[%s21295_s26 + $0x5e4] ss:$24 sps:$4 sm:$0xff]  }
 0x625   :  { %6962 = vmatprep.subr.bf16.mxu1 %v13334_v5  ;;  %5920 = vmatprep.subr.bf16.mxu0 %v13337_v42  ;;  %v13355_v5 = vld [vmem:[%s21295_s26 + $0x554] ss:$24 sps:$4 sm:$0xff]   ;;  %v6327_v42 = vadd.f32 %v6326_v57, %v6325_v6  ;;  %v6386_v6 = vpack.c.bf16 %v6354_v56, %v6354_v56  ;;  %v6514_v32 = vunpack.c.l.b16 %v6374_v62  ;;  %v13368_v56 = vld [vmem:[%s21392_s24 + $0x1f0] ss:$8 sps:$4 sm:$0xff]  }
 0x626   :  { %v6394_v54 = vpack.c.bf16 %v6362_v26, %v6362_v26 }
 0x627   :  { %6963 = vmatpush1.bf16.msra.mxu1 %v13332_v14  ;;  %v6358_v14 = vmul.f32 0.0625, %v6271_v10  ;;  %v6366_v39 = vmul.f32 0.0625, %v6327_v42  ;;  %v6526_v25 = vunpack.c.l.b16 %v6386_v6  ;;  %v13379_v6 = vld [vmem:[%s20778_s13 + $0x14] ss:$8 sps:$4 sm:$0xff]  }
 0x628   :  { %5921 = vmatpush1.bf16.msra.mxu0 %v13335_v17  ;;  %6964 = vmatprep.subr.bf16.mxu1 %v13340_v36  ;;  %v6382_v17 = vpack.c.bf16 %v6350_v19, %v6350_v19  ;;  %v13358_v36 = vld [vmem:[%s21392_s24 + $0x1d4] ss:$8 sps:$4 sm:$0xff]  }
 0x629   :  { %5922 = vmatprep.subr.bf16.mxu0 %v13343_v12  ;;  %v6370_v12 = vpack.c.bf16 %v6338_v30, %v6338_v30  ;;  %v6398_v57 = vpack.c.bf16 %v6366_v39, %v6366_v39  ;;  %v21502_v30 = vld [vmem:[#allocation130_spill] sm:$0xff]  ;;  %v21505_v39 = vld [vmem:[#allocation129_spill] sm:$0xff] }
 0x62b   :  { %5872 = vmatmul.mubr.bf16.gmra.mrb[132].mxu0 %v21498_v33  ;;  %6965 = vmatpush1.bf16.msra.mxu1 %v13338_v28  ;;  %v6390_v28 = vpack.c.bf16 %v6358_v14, %v6358_v14  ;;  %v6510_v27 = vunpack.c.l.b16 %v6370_v12  ;;  %v13362_v33 = vld [vmem:[%s21392_s24 + $0x1e0] ss:$8 sps:$4 sm:$0xff]   ;;  %v6538_v19 = vunpack.c.l.b16 %v6398_v57  ;;  %v13377_v12 = vld [vmem:[%s20778_s13 + $0x10] ss:$8 sps:$4 sm:$0xff]   ;;  %v13391_v57 = vld [vmem:[%s20778_s13 + $0x54] ss:$8 sps:$4 sm:$0xff]  }
 0x62c   :  { %5881 = vmatprep.mubr.bf16.mxu0 %v21499_v0  ;;  %5923 = vmatpush1.bf16.msra.mxu0 %v13341_v4  ;;  %v21501_v4 = vld [vmem:[#allocation127_spill] sm:$0xff]  ;;  %v6534_v0 = vunpack.c.l.b16 %v6394_v54 }
 0x62d   :  { %6966 = vmatprep.subr.bf16.mxu1 %v13346_v48  ;;  %5924 = vmatprep.subr.bf16.mxu0 %v13349_v15  ;;  %v6522_v48 = vunpack.c.l.b16 %v6382_v17  ;;  %v13367_v15 = vld [vmem:[%s21295_s26 + $0x5b4] ss:$24 sps:$4 sm:$0xff]   ;;  %v6561_v10 = vsel %vm6540_vm2, %v6514_v32, %v6510_v27  ;;  %v13371_v14 = vld [vmem:[%s21295_s26 + $0x5e0] ss:$24 sps:$4 sm:$0xff]  }
 0x62e   :  { %v13374_v17 = vld [vmem:[%s20778_s13] ss:$8 sps:$4 sm:$0xff]   ;;  %v21508_v54 = vld [vmem:[#allocation43_spill] sm:$0xff]  ;;  %v13394_v27 = vld [vmem:[%s20778_s13 + $0x64] ss:$8 sps:$4 sm:$0xff]  }
 0x62f   :  { %6967 = vmatpush1.bf16.msra.mxu1 %v13344_v61  ;;  %v6530_v61 = vunpack.c.l.b16 %v6390_v28  ;;  %v13380_v32 = vld [vmem:[%s20778_s13 + $0x20] ss:$8 sps:$4 sm:$0xff]   ;;  %v21507_v28 = vld [vmem:[#allocation99_spill] sm:$0xff] }
 0x630   :  { %5925 = vmatpush1.bf16.msra.mxu0 %v13347_v20  ;;  %6968 = vmatprep.subr.bf16.mxu1 %v13352_v52  ;;  %v6562_v20 = vsel %vm6542_vm3, %v6518_v22, %v6561_v10  ;;  %v13370_v52 = vld [vmem:[%s21392_s24 + $0x1f4] ss:$8 sps:$4 sm:$0xff]   ;;  %v13383_v22 = vld [vmem:[%s20778_s13 + $0x30] ss:$8 sps:$4 sm:$0xff]  }
 0x631   :  { %5926 = vmatprep.subr.bf16.mxu0 %v13355_v5  ;;  %v6563_v5 = vsel %vm6544_vm4, %v6522_v48, %v6562_v20  ;;  %v21509_v48 = vld [vmem:[#allocation37_spill] sm:$0xff]  ;;  %v13395_v10 = vld [vmem:[%s20778_s13 + $0x70] ss:$8 sps:$4 sm:$0xff]  }
 0x632   :  { %v6564_v42 = vsel %vm6546_vm5, %v6526_v25, %v6563_v5  ;;  %v13392_v25 = vld [vmem:[%s20778_s13 + $0x60] ss:$8 sps:$4 sm:$0xff]   ;;  %v21512_v20 = vld [vmem:[#allocation131_spill] sm:$0xff] }
 0x633   :  { %5882 = vmatmul.mubr.bf16.gmra.mrb[136].mxu0 %v21500_v35  ;;  %6969 = vmatpush1.bf16.msra.mxu1 %v13350_v38  ;;  %v6565_v62 = vsel %vm6548_vm6, %v6530_v61, %v6564_v42  ;;  %v21503_v38 = vld [vmem:[#allocation113_spill] sm:$0xff]  ;;  %v21511_v61 = vld [vmem:[#allocation66_spill] sm:$0xff] }
 0x634   :  { %5891 = vmatprep.mubr.bf16.mxu0 %v21501_v4  ;;  %5927 = vmatpush1.bf16.msra.mxu0 %v13353_v45  ;;  %v6566_v58 = vsel %vm6550_vm7, %v6534_v0, %v6565_v62  ;;  %v13382_v35 = vld [vmem:[%s20778_s13 + $0x24] ss:$8 sps:$4 sm:$0xff]   ;;  %v13385_v4 = vld [vmem:[%s20778_s13 + $0x34] ss:$8 sps:$4 sm:$0xff]   ;;  %v13401_v5 = vld [vmem:[%s20778_s13 + $0x90] ss:$8 sps:$4 sm:$0xff]  }
 0x635   :  { %6970 = vmatprep.subr.bf16.mxu1 %v13358_v36  ;;  %5928 = vmatprep.subr.bf16.mxu0 %v13361_v29  ;;  %v6567_v45 = vsel %vm6552_vm8, %v6538_v19, %v6566_v58  ;;  %v13376_v36 = vld [vmem:[%s20778_s13 + $0x4] ss:$8 sps:$4 sm:$0xff]   ;;  %v13403_v19 = vld [vmem:[%s20778_s13 + $0x94] ss:$8 sps:$4 sm:$0xff]   ;;  %v13407_v62 = vld [vmem:[%s20778_s13 + $0xb0] ss:$8 sps:$4 sm:$0xff]  }
 0x636   :  { %v6577_v26 = vpack.c.b16 %v6567_v45, %v6567_v45  ;;  %v21504_v29 = vld [vmem:[#allocation121_spill] sm:$0xff]  ;;  %v13421_v58 = vld [vmem:[%s20778_s13 + $0xf4] ss:$8 sps:$4 sm:$0xff]   ;;  %v13419_v45 = vld [vmem:[%s20778_s13 + $0xf0] ss:$8 sps:$4 sm:$0xff]  }
 0x637   :  { %6971 = vmatpush1.bf16.msra.mxu1 %v13356_v49  ;;  %v21506_v49 = vld [vmem:[#allocation68_spill] sm:$0xff]  ;;  %v13400_v0 = vld [vmem:[%s20778_s13 + $0x84] ss:$8 sps:$4 sm:$0xff]  }
 0x638   :  { %5929 = vmatpush1.bf16.msra.mxu0 %v13359_v16  ;;  %6972 = vmatprep.subr.bf16.mxu1 %v13364_v41  ;;  %v13386_v16 = vld [vmem:[%s20778_s13 + $0x40] ss:$8 sps:$4 sm:$0xff]   ;;  %v13388_v41 = vld [vmem:[%s20778_s13 + $0x44] ss:$8 sps:$4 sm:$0xff]  }
 0x639   :  { %5930 = vmatprep.subr.bf16.mxu0 %v13367_v15  ;;  %v13389_v15 = vld [vmem:[%s20778_s13 + $0x50] ss:$8 sps:$4 sm:$0xff]   ;;  %v13406_v42 = vld [vmem:[%s20778_s13 + $0xa4] ss:$8 sps:$4 sm:$0xff]  }
 0x63b   :  { %5892 = vmatmul.mubr.bf16.gmra.mrb[140].mxu0 %v21502_v30  ;;  %6973 = vmatpush1.bf16.msra.mxu1 %v13362_v33  ;;  %v21510_v33 = vld [vmem:[#allocation65_spill] sm:$0xff] }
 0x63c   :  { %5931 = vmatpush1.bf16.msra.mxu0 %v13365_v43  ;;  %5934 = vmatprep.mubr.bf16.mxu0 %v21503_v38  ;;  %v13397_v43 = vld [vmem:[%s20778_s13 + $0x74] ss:$8 sps:$4 sm:$0xff]   ;;  %v13404_v30 = vld [vmem:[%s20778_s13 + $0xa0] ss:$8 sps:$4 sm:$0xff]  }
 0x63d   :  { %6974 = vmatprep.subr.bf16.mxu1 %v13370_v52  ;;  %5932 = vmatprep.subr.bf16.mxu0 %v13373_v3  ;;  %v21513_v52 = vld [vmem:[#allocation132_spill] sm:$0xff] }
 0x63e   :  { %v13398_v3 = vld [vmem:[%s20778_s13 + $0x80] ss:$8 sps:$4 sm:$0xff]   ;;  %v13415_v38 = vld [vmem:[%s20778_s13 + $0xd4] ss:$8 sps:$4 sm:$0xff]  }
 0x63f   :  { %6975 = vmatpush1.bf16.msra.mxu1 %v13368_v56  ;;  %v13409_v56 = vld [vmem:[%s20778_s13 + $0xb4] ss:$8 sps:$4 sm:$0xff]  }
 0x640   :  { %5933 = vmatpush1.bf16.msra.mxu0 %v13371_v14  ;;  %v13413_v14 = vld [vmem:[%s20778_s13 + $0xd0] ss:$8 sps:$4 sm:$0xff]  }
 0x641   :  { %8565 = vmatprep.subr.bf16.mxu0 %v13376_v36  ;;  %v21515_v36 = vld [vmem:[#allocation9_spill] sm:$0xff] }
 0x642   :  { %6977 = vmatmul.mubr.bf16.vlgmr.msra.gmra.mrb[188].mxu1 %v6577_v26  ;;  %v21514_v26 = vld [vmem:[#allocation8_spill] sm:$0xff] }
 0x643   :  { %5935 = vmatmul.mubr.bf16.vlgmr.msra.gmra.mrb[112].mxu0 %v21504_v29 }
 0x644   :  { %5944 = vmatprep.mubr.bf16.mxu0 %v21505_v39  ;;  %8566 = vmatpush1.bf16.msra.mxu0 %v13374_v17 }
 0x645   :  { %8567 = vmatprep.subr.bf16.mxu0 %v13379_v6 }
 0x648   :  { %8568 = vmatpush1.bf16.msra.mxu0 %v13377_v12 }
 0x649   :  { %8569 = vmatprep.subr.bf16.mxu0 %v13382_v35 }
 0x64b   :  { %5945 = vmatmul.mubr.bf16.gmra.mrb[116].mxu0 %v21506_v49 }
 0x64c   :  { %5954 = vmatprep.mubr.bf16.mxu0 %v21507_v28  ;;  %8570 = vmatpush1.bf16.msra.mxu0 %v13380_v32 }
 0x64d   :  { %8571 = vmatprep.subr.bf16.mxu0 %v13385_v4 }
 0x650   :  { %8572 = vmatpush1.bf16.msra.mxu0 %v13383_v22 }
 0x651   :  { %8573 = vmatprep.subr.bf16.mxu0 %v13388_v41 }
 0x653   :  { %5955 = vmatmul.mubr.bf16.gmra.mrb[120].mxu0 %v21508_v54 }
 0x654   :  { %5964 = vmatprep.mubr.bf16.mxu0 %v21509_v48  ;;  %8574 = vmatpush1.bf16.msra.mxu0 %v13386_v16 }
 0x655   :  { %8575 = vmatprep.subr.bf16.mxu0 %v13391_v57 }
 0x658   :  { %8576 = vmatpush1.bf16.msra.mxu0 %v13389_v15 }
 0x659   :  { %8577 = vmatprep.subr.bf16.mxu0 %v13394_v27 }
 0x65b   :  { %5965 = vmatmul.mubr.bf16.gmra.mrb[124].mxu0 %v21510_v33 }
 0x65c   :  { %5974 = vmatprep.mubr.bf16.mxu0 %v21511_v61  ;;  %8578 = vmatpush1.bf16.msra.mxu0 %v13392_v25 }
 0x65d   :  { %8579 = vmatprep.subr.bf16.mxu0 %v13397_v43 }
 0x660   :  { %8580 = vmatpush1.bf16.msra.mxu0 %v13395_v10 }
 0x661   :  { %8581 = vmatprep.subr.bf16.mxu0 %v13400_v0 }
 0x663   :  { %5975 = vmatmul.mubr.bf16.gmra.mrb[128].mxu0 %v21512_v20 }
 0x664   :  { %5984 = vmatprep.mubr.bf16.mxu0 %v21513_v52  ;;  %8582 = vmatpush1.bf16.msra.mxu0 %v13398_v3 }
 0x665   :  { %8583 = vmatprep.subr.bf16.mxu0 %v13403_v19 }
 0x668   :  { %8584 = vmatpush1.bf16.msra.mxu0 %v13401_v5 }
 0x669   :  { %8585 = vmatprep.subr.bf16.mxu0 %v13406_v42 }
 0x66b   :  { %5985 = vmatmul.mubr.bf16.gmra.mrb[132].mxu0 %v17888_v37  ;;  %v13412_v37 = vld [vmem:[%s20778_s13 + $0xc4] ss:$8 sps:$4 sm:$0xff]  }
 0x66c   :  { %5994 = vmatprep.mubr.bf16.mxu0 %v17898_v9  ;;  %8586 = vmatpush1.bf16.msra.mxu0 %v13404_v30  ;;  %v13410_v9 = vld [vmem:[%s20778_s13 + $0xc0] ss:$8 sps:$4 sm:$0xff]  }
 0x66d   :  { %8587 = vmatprep.subr.bf16.mxu0 %v13409_v56 }
 0x670   :  { %8588 = vmatpush1.bf16.msra.mxu0 %v13407_v62 }
 0x671   :  { %8589 = vmatprep.subr.bf16.mxu0 %v13412_v37 }
 0x673   :  { %5995 = vmatmul.mubr.bf16.gmra.mrb[136].mxu0 %v17934_v21  ;;  %v13418_v21 = vld [vmem:[%s20778_s13 + $0xe4] ss:$8 sps:$4 sm:$0xff]  }
 0x674   :  { %6004 = vmatprep.mubr.bf16.mxu0 %v17941_v2  ;;  %8590 = vmatpush1.bf16.msra.mxu0 %v13410_v9  ;;  %v13416_v2 = vld [vmem:[%s20778_s13 + $0xe0] ss:$8 sps:$4 sm:$0xff]  }
 0x675   :  { %8591 = vmatprep.subr.bf16.mxu0 %v13415_v38 }
 0x678   :  { %8592 = vmatpush1.bf16.msra.mxu0 %v13413_v14 }
 0x679   :  { %8593 = vmatprep.subr.bf16.mxu0 %v13418_v21 }
 0x67b   :  { %6005 = vmatmul.mubr.bf16.gmra.mrb[140].mxu0 %v17991_v31  ;;  %v18374_v31 = vld [vmem:[%s20779_s10] sm:$0x3f] }
 0x67c   :  { %8594 = vmatpush1.bf16.msra.mxu0 %v13416_v2  ;;  %v18378_v17 = vrot.slane %v18374_v31, %v21514_v26  ;;  %v18382_v29 = vrot.slane %v18374_v31, %v21515_v36 }
 0x67d   :  { %8595 = vmatprep.subr.bf16.mxu0 %v13421_v58 }
 0x680   :  { %8596 = vmatpush1.bf16.msra.mxu0 %v13419_v45 }
 0x693   :  { %v18384_v39 = vpop.f32.mrb[80].mxu0  ;;  %v5710_v12 = vpop.f32.mrb[156].mxu1 }
 0x694   :  { %v12376_v6 = vadd.f32 %v5710_v12, %v18378_v17  ;;  %v18387_v32 = vpop.f32.mrb[81].mxu0  ;;  %v5712_v35 = vpop.f32.mrb[157].mxu1 }
 0x695   :  { %v12377_v49 = vadd.f32 %v5712_v35, %v18382_v29  ;;  %v18390_v28 = vpop.f32.mrb[82].mxu0  ;;  %v5714_v22 = vpop.f32.mrb[158].mxu1 }
 0x696   :  { %v12378_v4 = vadd.f32 %v5714_v22, %v18378_v17  ;;  %v18393_v16 = vpop.f32.mrb[83].mxu0  ;;  %v5716_v41 = vpop.f32.mrb[159].mxu1  ;;  %v6047_v48 = vmax.f32 %v12376_v6, 0.0 }
 0x697   :  { %v12379_v54 = vadd.f32 %v5716_v41, %v18382_v29  ;;  %v6048_v57 = vmax.f32 %v12377_v49, 0.0 }
 0x698   :  { %v6051_v15 = vmax.f32 %v12378_v4, 0.0 }
 0x699   :  { %v6052_v27 = vmax.f32 %v12379_v54, 0.0 }
 0x69a   :  { %v7841_v25 = vadd.f32 %v6051_v15, %v6047_v48 }
 0x69b   :  { %v7848_v33 = vadd.f32 %v6052_v27, %v6048_v57  ;;  %v18396_v61 = vpop.f32.mrb[84].mxu0  ;;  %v5720_v10 = vpop.f32.mrb[160].mxu1 }
 0x69c   :  { %v7842_v43 = vrot.slane %v7841_v25, 4  ;;  %v18398_v0 = vpop.f32.mrb[85].mxu0  ;;  %v5722_v20 = vpop.f32.mrb[161].mxu1  ;;  %v12380_v3 = vadd.f32 %v5720_v10, %v18378_v17 }
 0x69d   :  { %v7849_v52 = vrot.slane %v7848_v33, 4  ;;  %v18401_v19 = vpop.f32.mrb[86].mxu0  ;;  %v5724_v5 = vpop.f32.mrb[162].mxu1  ;;  %v12381_v30 = vadd.f32 %v5722_v20, %v18382_v29 }
 0x69e   :  { %v7843_v42 = vadd.f32 %v7842_v43, %v7841_v25  ;;  %v18404_v56 = vpop.f32.mrb[87].mxu0  ;;  %v5726_v62 = vpop.f32.mrb[163].mxu1  ;;  %v12382_v9 = vadd.f32 %v5724_v5, %v18378_v17  ;;  %v6055_v2 = vmax.f32 %v12380_v3, 0.0 }
 0x69f   :  { %v7850_v37 = vadd.f32 %v7849_v52, %v7848_v33  ;;  %v12383_v14 = vadd.f32 %v5726_v62, %v18382_v29  ;;  %v6056_v45 = vmax.f32 %v12381_v30, 0.0 }
 0x6a0   :  { %v7844_v38 = vrot.slane %v7843_v42, 2  ;;  %v6059_v58 = vmax.f32 %v12382_v9, 0.0 }
 0x6a1   :  { %v7851_v21 = vrot.slane %v7850_v37, 2  ;;  %v6060_v12 = vmax.f32 %v12383_v14, 0.0 }
 0x6a2   :  { %v7869_v6 = vadd.f32 %v6059_v58, %v6055_v2  ;;  %v7845_v22 = vadd.f32 %v7844_v38, %v7843_v42 }
 0x6a3   :  { %v18408_v35 = vpop.f32.mrb[88].mxu0  ;;  %v5730_v49 = vpop.f32.mrb[164].mxu1  ;;  %v7876_v4 = vadd.f32 %v6060_v12, %v6056_v45  ;;  %v7852_v48 = vadd.f32 %v7851_v21, %v7850_v37 }
 0x6a4   :  { %v18410_v41 = vpop.f32.mrb[89].mxu0  ;;  %v5732_v54 = vpop.f32.mrb[165].mxu1  ;;  %v7870_v15 = vrot.slane %v7869_v6, 4  ;;  %v12384_v33 = vadd.f32 %v5730_v49, %v18378_v17  ;;  %v7846_v3 = vrot.slane %v7845_v22, 1 }
 0x6a5   :  { %v18412_v57 = vpop.f32.mrb[90].mxu0  ;;  %v5734_v27 = vpop.f32.mrb[166].mxu1  ;;  %v7877_v25 = vrot.slane %v7876_v4, 4  ;;  %v12385_v52 = vadd.f32 %v5732_v54, %v18382_v29  ;;  %v7853_v30 = vrot.slane %v7852_v48, 1 }
 0x6a6   :  { %v18415_v10 = vpop.f32.mrb[91].mxu0  ;;  %v5736_v43 = vpop.f32.mrb[167].mxu1  ;;  %v7871_v20 = vadd.f32 %v7870_v15, %v7869_v6  ;;  %v12386_v42 = vadd.f32 %v5734_v27, %v18378_v17  ;;  %v6063_v38 = vmax.f32 %v12384_v33, 0.0  ;;  %v7847_v6 = vadd.f32 %v7846_v3, %v7845_v22 }
 0x6a7   :  { %v7878_v5 = vadd.f32 %v7877_v25, %v7876_v4  ;;  %v12387_v37 = vadd.f32 %v5736_v43, %v18382_v29  ;;  %v6064_v2 = vmax.f32 %v12385_v52, 0.0  ;;  %v7854_v27 = vadd.f32 %v7853_v30, %v7852_v48 }
 0x6a8   :  { %v7872_v62 = vrot.slane %v7871_v20, 2  ;;  %v6067_v14 = vmax.f32 %v12386_v42, 0.0 }
 0x6a9   :  { %v7879_v9 = vrot.slane %v7878_v5, 2  ;;  %v6068_v58 = vmax.f32 %v12387_v37, 0.0  ;;  %v8066_v30 = vmul.f32 0.0625, %v7854_v27 }
 0x6aa   :  { %v7873_v21 = vadd.f32 %v7872_v62, %v7871_v20  ;;  %v7897_v54 = vadd.f32 %v6067_v14, %v6063_v38 }
 0x6ab   :  { %v7880_v49 = vadd.f32 %v7879_v9, %v7878_v5  ;;  %v7904_v8 = vadd.f32 %v6068_v58, %v6064_v2  ;;  %v8065_v5 = vmul.f32 0.0625, %v7847_v6 }
 0x6ac   :  { %v18420_v45 = vpop.f32.mrb[92].mxu0  ;;  %v5740_v12 = vpop.f32.mrb[168].mxu1  ;;  %v7874_v25 = vrot.slane %v7873_v21, 1  ;;  %v7898_v42 = vrot.slane %v7897_v54, 4 }
 0x6ad   :  { %v18422_v15 = vpop.f32.mrb[93].mxu0  ;;  %v5742_v4 = vpop.f32.mrb[169].mxu1  ;;  %v7881_v33 = vrot.slane %v7880_v49, 1  ;;  %v12388_v20 = vadd.f32 %v5740_v12, %v18378_v17  ;;  %v7905_v22 = vrot.slane %v7904_v8, 4 }
 0x6ae   :  { %v18424_v60 = vpop.f32.mrb[94].mxu0  ;;  %v5744_v43 = vpop.f32.mrb[170].mxu1  ;;  %v7875_v37 = vadd.f32 %v7874_v25, %v7873_v21  ;;  %v12389_v3 = vadd.f32 %v5742_v4, %v18382_v29  ;;  %v7899_v38 = vadd.f32 %v7898_v42, %v7897_v54 }
 0x6af   :  { %v18427_v52 = vpop.f32.mrb[95].mxu0  ;;  %v5746_v62 = vpop.f32.mrb[171].mxu1  ;;  %v7882_v9 = vadd.f32 %v7881_v33, %v7880_v49  ;;  %v12390_v48 = vadd.f32 %v5744_v43, %v18378_v17  ;;  %v7906_v2 = vadd.f32 %v7905_v22, %v7904_v8  ;;  %v6071_v12 = vmax.f32 %v12388_v20, 0.0 }
 0x6b0   :  { %v8069_v14 = vmul.f32 0.0625, %v7875_v37  ;;  %v12391_v58 = vadd.f32 %v5746_v62, %v18382_v29  ;;  %v7900_v13 = vrot.slane %v7899_v38, 2  ;;  %v6072_v25 = vmax.f32 %v12389_v3, 0.0 }
 0x6b1   :  { %v8070_v51 = vmul.f32 0.0625, %v7882_v9  ;;  %v6075_v11 = vmax.f32 %v12390_v48, 0.0  ;;  %v7907_v21 = vrot.slane %v7906_v2, 2 }
 0x6b2   :  { %v8129_v47 = vsel %vm6540_vm2, %v8069_v14, %v8065_v5  ;;  %v6076_v46 = vmax.f32 %v12391_v58, 0.0  ;;  %v7901_v54 = vadd.f32 %v7900_v13, %v7899_v38 }
 0x6b3   :  { %v8136_v49 = vsel %vm6540_vm2, %v8070_v51, %v8066_v30  ;;  %v7925_v27 = vadd.f32 %v6075_v11, %v6071_v12  ;;  %v7908_v33 = vadd.f32 %v7907_v21, %v7906_v2 }
 0x6b4   :  { %v18433_v4 = vpop.f32.mrb[96].mxu0  ;;  %v7932_v42 = vadd.f32 %v6076_v46, %v6072_v25  ;;  %v7902_v37 = vrot.slane %v7901_v54, 1 }
 0x6b5   :  { %v5750_v6 = vpop.f32.mrb[172].mxu1  ;;  %v18436_v43 = vpop.f32.mrb[97].mxu0  ;;  %v7926_v22 = vrot.slane %v7925_v27, 4  ;;  %v7909_v9 = vrot.slane %v7908_v33, 1 }
 0x6b6   :  { %v5752_v8 = vpop.f32.mrb[173].mxu1  ;;  %v18438_v62 = vpop.f32.mrb[98].mxu0  ;;  %v7933_v48 = vrot.slane %v7932_v42, 4  ;;  %v12392_v14 = vadd.f32 %v5750_v6, %v18378_v17  ;;  %v7903_v51 = vadd.f32 %v7902_v37, %v7901_v54 }
 0x6b7   :  { %v5754_v20 = vpop.f32.mrb[174].mxu1  ;;  %v18440_v5 = vpop.f32.mrb[99].mxu0  ;;  %v7927_v13 = vadd.f32 %v7926_v22, %v7925_v27  ;;  %v12393_v11 = vadd.f32 %v5752_v8, %v18382_v29  ;;  %v7910_v38 = vadd.f32 %v7909_v9, %v7908_v33 }
 0x6b8   :  { %v5756_v3 = vpop.f32.mrb[175].mxu1  ;;  %v7934_v30 = vadd.f32 %v7933_v48, %v7932_v42  ;;  %v12394_v46 = vadd.f32 %v5754_v20, %v18378_v17  ;;  %v8073_v2 = vmul.f32 0.0625, %v7903_v51  ;;  %v6079_v7 = vmax.f32 %v12392_v14, 0.0  ;;  %v13424_v48 = vld [vmem:[%s20778_s13 + $0x104] ss:$8 sps:$4 sm:$0xff]  }
 0x6b9   :  { %v7928_v58 = vrot.slane %v7927_v13, 2  ;;  %v12395_v12 = vadd.f32 %v5756_v3, %v18382_v29  ;;  %v8074_v21 = vmul.f32 0.0625, %v7910_v38  ;;  %v6080_v27 = vmax.f32 %v12393_v11, 0.0  ;;  %8606 = vmatprep.subr.bf16.mxu0 %v13424_v48 }
 0x6ba   :  { %v7935_v25 = vrot.slane %v7934_v30, 2  ;;  %v6083_v18 = vmax.f32 %v12394_v46, 0.0  ;;  %v8130_v6 = vsel %vm6542_vm3, %v8073_v2, %v8129_v47 }
 0x6bb   :  { %v7929_v54 = vadd.f32 %v7928_v58, %v7927_v13  ;;  %v6084_v8 = vmax.f32 %v12395_v12, 0.0  ;;  %v8137_v20 = vsel %vm6542_vm3, %v8074_v21, %v8136_v49 }
 0x6bc   :  { %v18446_v24 = vpop.f32.mrb[100].mxu0  ;;  %v7936_v37 = vadd.f32 %v7935_v25, %v7934_v30  ;;  %v7953_v22 = vadd.f32 %v6083_v18, %v6079_v7 }
 0x6bd   :  { %v5760_v55 = vpop.f32.mrb[176].mxu1  ;;  %v18449_v33 = vpop.f32.mrb[101].mxu0  ;;  %v7930_v14 = vrot.slane %v7929_v54, 1  ;;  %v7960_v51 = vadd.f32 %v6084_v8, %v6080_v27 }
 0x6be   :  { %v5762_v42 = vpop.f32.mrb[177].mxu1  ;;  %v18452_v3 = vpop.f32.mrb[102].mxu0  ;;  %v12396_v47 = vadd.f32 %v5760_v55, %v18378_v17  ;;  %v7937_v38 = vrot.slane %v7936_v37, 1  ;;  %v7954_v46 = vrot.slane %v7953_v22, 4 }
 0x6bf   :  { %v5764_v9 = vpop.f32.mrb[178].mxu1  ;;  %v18458_v13 = vpop.f32.mrb[103].mxu0  ;;  %v7931_v49 = vadd.f32 %v7930_v14, %v7929_v54  ;;  %v7961_v30 = vrot.slane %v7960_v51, 4  ;;  %v12397_v7 = vadd.f32 %v5762_v42, %v18382_v29 }
 0x6c0   :  { %v5766_v11 = vpop.f32.mrb[179].mxu1  ;;  %v7938_v18 = vadd.f32 %v7937_v38, %v7936_v37  ;;  %v7955_v2 = vadd.f32 %v7954_v46, %v7953_v22  ;;  %v12398_v58 = vadd.f32 %v5764_v9, %v18378_v17  ;;  %v6087_v25 = vmax.f32 %v12396_v47, 0.0 }
 0x6c1   :  { %v8077_v12 = vmul.f32 0.0625, %v7931_v49  ;;  %v7962_v21 = vadd.f32 %v7961_v30, %v7960_v51  ;;  %v12399_v53 = vadd.f32 %v5766_v11, %v18382_v29  ;;  %v6088_v14 = vmax.f32 %v12397_v7, 0.0 }
 0x6c2   :  { %v8078_v27 = vmul.f32 0.0625, %v7938_v18  ;;  %v7956_v8 = vrot.slane %v7955_v2, 2  ;;  %v6091_v55 = vmax.f32 %v12398_v58, 0.0 }
 0x6c3   :  { %v8131_v54 = vsel %vm6544_vm4, %v8077_v12, %v8130_v6  ;;  %v7963_v48 = vrot.slane %v7962_v21, 2  ;;  %v6092_v47 = vmax.f32 %v12399_v53, 0.0 }
 0x6c4   :  { %v18463_v59 = vpop.f32.mrb[104].mxu0  ;;  %v8138_v22 = vsel %vm6544_vm4, %v8078_v27, %v8137_v20  ;;  %v7957_v9 = vadd.f32 %v7956_v8, %v7955_v2  ;;  %v7981_v51 = vadd.f32 %v6091_v55, %v6087_v25 }
 0x6c5   :  { %v5770_v23 = vpop.f32.mrb[180].mxu1  ;;  %v18466_v42 = vpop.f32.mrb[105].mxu0  ;;  %v7964_v49 = vadd.f32 %v7963_v48, %v7962_v21  ;;  %v7988_v6 = vadd.f32 %v6092_v47, %v6088_v14 }
 0x6c6   :  { %v5772_v37 = vpop.f32.mrb[181].mxu1  ;;  %v18469_v38 = vpop.f32.mrb[106].mxu0  ;;  %v7958_v18 = vrot.slane %v7957_v9, 1  ;;  %v7982_v58 = vrot.slane %v7981_v51, 4  ;;  %v12400_v7 = vadd.f32 %v5770_v23, %v18378_v17 }
 0x6c7   :  { %v5774_v46 = vpop.f32.mrb[182].mxu1  ;;  %v18471_v11 = vpop.f32.mrb[107].mxu0  ;;  %v7965_v12 = vrot.slane %v7964_v49, 1  ;;  %v12401_v34 = vadd.f32 %v5772_v37, %v18382_v29  ;;  %v7989_v2 = vrot.slane %v7988_v6, 4 }
 0x6c8   :  { %v5776_v30 = vpop.f32.mrb[183].mxu1  ;;  %v7959_v50 = vadd.f32 %v7958_v18, %v7957_v9  ;;  %v7983_v20 = vadd.f32 %v7982_v58, %v7981_v51  ;;  %v12402_v53 = vadd.f32 %v5774_v46, %v18378_v17  ;;  %v6095_v14 = vmax.f32 %v12400_v7, 0.0 }
 0x6c9   :  { %v7990_v8 = vadd.f32 %v7989_v2, %v7988_v6  ;;  %v12403_v21 = vadd.f32 %v5776_v30, %v18382_v29  ;;  %v7966_v44 = vadd.f32 %v7965_v12, %v7964_v49  ;;  %v6096_v47 = vmax.f32 %v12401_v34, 0.0 }
 0x6ca   :  { %v8081_v25 = vmul.f32 0.0625, %v7959_v50  ;;  %v7984_v27 = vrot.slane %v7983_v20, 2  ;;  %v6099_v40 = vmax.f32 %v12402_v53, 0.0 }
 0x6cb   :  { %v7991_v18 = vrot.slane %v7990_v8, 2  ;;  %v6100_v46 = vmax.f32 %v12403_v21, 0.0  ;;  %v8082_v53 = vmul.f32 0.0625, %v7966_v44 }
 0x6cc   :  { %v18477_v55 = vpop.f32.mrb[108].mxu0  ;;  %v8132_v9 = vsel %vm6546_vm5, %v8081_v25, %v8131_v54  ;;  %v7985_v51 = vadd.f32 %v7984_v27, %v7983_v20  ;;  %v8009_v6 = vadd.f32 %v6099_v40, %v6095_v14 }
 0x6cd   :  { %v5780_v48 = vpop.f32.mrb[184].mxu1  ;;  %v18479_v23 = vpop.f32.mrb[109].mxu0  ;;  %v7992_v34 = vadd.f32 %v7991_v18, %v7990_v8  ;;  %v8016_v7 = vadd.f32 %v6100_v46, %v6096_v47  ;;  %v8139_v44 = vsel %vm6546_vm5, %v8082_v53, %v8138_v22 }
 0x6ce   :  { %v5782_v37 = vpop.f32.mrb[185].mxu1  ;;  %v18482_v50 = vpop.f32.mrb[110].mxu0  ;;  %v12404_v30 = vadd.f32 %v5780_v48, %v18378_v17  ;;  %v7986_v12 = vrot.slane %v7985_v51, 1  ;;  %v8010_v63 = vrot.slane %v8009_v6, 4 }
 0x6cf   :  { %21516 = vst [vmem:[#allocation74_spill] sm:$0xff] %v18482_v50  ;;  %v5784_v58 = vpop.f32.mrb[186].mxu1  ;;  %v18485_v2 = vpop.f32.mrb[111].mxu0  ;;  %v12405_v1 = vadd.f32 %v5782_v37, %v18382_v29  ;;  %v7993_v20 = vrot.slane %v7992_v34, 1  ;;  %v8017_v25 = vrot.slane %v8016_v7, 4 }
 0x6d0   :  { %21517 = vst [vmem:[#allocation75_spill] sm:$0xff] %v18485_v2  ;;  %v5786_v49 = vpop.f32.mrb[187].mxu1  ;;  %v7987_v54 = vadd.f32 %v7986_v12, %v7985_v51  ;;  %v8011_v27 = vadd.f32 %v8010_v63, %v8009_v6  ;;  %v6103_v21 = vmax.f32 %v12404_v30, 0.0  ;;  %v12406_v36 = vadd.f32 %v5784_v58, %v18378_v17 }
 0x6d1   :  { %v7994_v14 = vadd.f32 %v7993_v20, %v7992_v34  ;;  %v8018_v48 = vadd.f32 %v8017_v25, %v8016_v7  ;;  %v12407_v26 = vadd.f32 %v5786_v49, %v18382_v29  ;;  %v6104_v50 = vmax.f32 %v12405_v1, 0.0 }
 0x6d2   :  { %v8085_v40 = vmul.f32 0.0625, %v7987_v54  ;;  %v8012_v2 = vrot.slane %v8011_v27, 2  ;;  %v6107_v8 = vmax.f32 %v12406_v36, 0.0 }
 0x6d3   :  { %v8086_v37 = vmul.f32 0.0625, %v7994_v14  ;;  %v8019_v51 = vrot.slane %v8018_v48, 2  ;;  %v6108_v18 = vmax.f32 %v12407_v26, 0.0 }
 0x6d4   :  { %v8133_v47 = vsel %vm6548_vm6, %v8085_v40, %v8132_v9  ;;  %v8013_v46 = vadd.f32 %v8012_v2, %v8011_v27  ;;  %v8037_v63 = vadd.f32 %v6107_v8, %v6103_v21 }
 0x6d5   :  { %v8020_v6 = vadd.f32 %v8019_v51, %v8018_v48  ;;  %v8044_v30 = vadd.f32 %v6108_v18, %v6104_v50  ;;  %v8140_v17 = vsel %vm6548_vm6, %v8086_v37, %v8139_v44  ;;  %v7837_v48 = vld [vmem:[%s20780_s1] sm:$0xff]  ;;  %v7838_v44 = vld [vmem:[%s20780_s1 + $0x8] sm:$0xff] }
 0x6d6   :  { %v8014_v58 = vrot.slane %v8013_v46, 1  ;;  %v8038_v12 = vrot.slane %v8037_v63, 4 }
 0x6d7   :  { %v8021_v34 = vrot.slane %v8020_v6, 1  ;;  %v8045_v29 = vrot.slane %v8044_v30, 4 }
 0x6d8   :  { %v8015_v49 = vadd.f32 %v8014_v58, %v8013_v46  ;;  %v8039_v1 = vadd.f32 %v8038_v12, %v8037_v63  ;;  %v13422_v63 = vld [vmem:[%s20778_s13 + $0x100] ss:$8 sps:$4 sm:$0xff]   ;;  %v13430_v58 = vld [vmem:[%s20778_s13 + $0x124] ss:$8 sps:$4 sm:$0xff]   ;;  %v27_v12 = vstv %s20781_s12 }
 0x6d9   :  { %v8022_v36 = vadd.f32 %v8021_v34, %v8020_v6  ;;  %v8046_v7 = vadd.f32 %v8045_v29, %v8044_v30  ;;  %v13427_v30 = vld [vmem:[%s20778_s13 + $0x114] ss:$8 sps:$4 sm:$0xff]   ;;  %28 = vst [vmem:[#allocation2] sm:$0x1] %v27_v12  ;;  %v13428_v34 = vld [vmem:[%s20778_s13 + $0x120] ss:$8 sps:$4 sm:$0xff]  }
 0x6da   :  { %v8089_v22 = vmul.f32 0.0625, %v8015_v49  ;;  %v8040_v53 = vrot.slane %v8039_v1, 2  ;;  %v13433_v29 = vld [vmem:[%s20778_s13 + $0x134] ss:$8 sps:$4 sm:$0xff]   ;;  %v13431_v49 = vld [vmem:[%s20778_s13 + $0x130] ss:$8 sps:$4 sm:$0xff]  }
 0x6db   :  { %v8090_v9 = vmul.f32 0.0625, %v8022_v36  ;;  %v8047_v54 = vrot.slane %v8046_v7, 2  ;;  %v13434_v36 = vld [vmem:[%s20778_s13 + $0x140] ss:$8 sps:$4 sm:$0xff]  }
 0x6dc   :  { %v8134_v26 = vsel %vm6550_vm7, %v8089_v22, %v8133_v47  ;;  %v8041_v2 = vadd.f32 %v8040_v53, %v8039_v1  ;;  %v13436_v1 = vld [vmem:[%s20778_s13 + $0x144] ss:$8 sps:$4 sm:$0xff]   ;;  %v13437_v22 = vld [vmem:[%s20778_s13 + $0x150] ss:$8 sps:$4 sm:$0xff]  }
 0x6dd   :  { %v8048_v20 = vadd.f32 %v8047_v54, %v8046_v7  ;;  %v8141_v50 = vsel %vm6550_vm7, %v8090_v9, %v8140_v17  ;;  %v13425_v17 = vld [vmem:[%s20778_s13 + $0x110] ss:$8 sps:$4 sm:$0xff]   ;;  %v13439_v7 = vld [vmem:[%s20778_s13 + $0x154] ss:$8 sps:$4 sm:$0xff]   ;;  %v13442_v53 = vld [vmem:[%s20778_s13 + $0x164] ss:$8 sps:$4 sm:$0xff]  }
 0x6de   :  { %v8042_v25 = vrot.slane %v8041_v2, 1  ;;  %v21518_v9 = vld [vmem:[#allocation6_spill] sm:$0xff] }
 0x6df   :  { %v8049_v27 = vrot.slane %v8048_v20, 1  ;;  %v18544_v54 = vrot.slane %v18374_v31, %v21518_v9 }
 0x6e0   :  { %v8043_v21 = vadd.f32 %v8042_v25, %v8041_v2 }
 0x6e1   :  { %v8050_v40 = vadd.f32 %v8049_v27, %v8048_v20  ;;  %v13440_v20 = vld [vmem:[%s20778_s13 + $0x160] ss:$8 sps:$4 sm:$0xff]   ;;  %v18558_v25 = vadd.f32 %v18384_v39, %v18544_v54  ;;  %v13443_v39 = vld [vmem:[%s20778_s13 + $0x170] ss:$8 sps:$4 sm:$0xff]  }
 0x6e2   :  { %v8093_v14 = vmul.f32 0.0625, %v8043_v21  ;;  %v18566_v21 = vadd.f32 %v18390_v28, %v18544_v54 }
 0x6e3   :  { %v8094_v8 = vmul.f32 0.0625, %v8050_v40  ;;  %v18571_v40 = vld [vmem:[%s20782_s8] sm:$0x3] }
 0x6e4   :  { %v8135_v47 = vsel %vm6552_vm8, %v8093_v14, %v8134_v26  ;;  %v21519_v26 = vld [vmem:[#allocation7_spill] sm:$0xff] }
 0x6e5   :  { %v8142_v37 = vsel %vm6552_vm8, %v8094_v8, %v8141_v50  ;;  %v8161_v51 = vmul.f32 %v8135_v47, %v7837_v48  ;;  %v18548_v2 = vrot.slane %v18374_v31, %v21519_v26  ;;  %v13445_v50 = vld [vmem:[%s20778_s13 + $0x174] ss:$8 sps:$4 sm:$0xff]   ;;  %v18591_v48 = vld [vmem:[%s20783_s11] sm:$0x3]  ;;  %v18598_v8 = vadd.f32 %v18401_v19, %v18544_v54 }
 0x6e6   :  { %v8162_v18 = vmul.f32 %v8142_v37, %v7838_v44  ;;  %v14097_v44 = vmov 1966171168   ;;  %v18614_v19 = vadd.f32 %v18408_v35, %v18544_v54 }
 0x6e7   :  { %v8165_v6 = vpack.c.bf16 %v8161_v51, %v8161_v51  ;;  %v18562_v27 = vadd.f32 %v18387_v32, %v18548_v2  ;;  %v18575_v14 = vadd.f32 %v18393_v16, %v18548_v2  ;;  %v18582_v32 = vadd.f32 %v18396_v61, %v18544_v54  ;;  %v13448_v16 = vld [vmem:[%s20778_s13 + $0x184] ss:$8 sps:$4 sm:$0xff]  }
 0x6e8   :  { %v8166_v46 = vpack.c.bf16 %v8162_v18, %v8162_v18  ;;  %v18586_v28 = vadd.f32 %v18398_v0, %v18548_v2  ;;  %v6469_v61 = vrot.slane %v18571_v40, %v21518_v9  ;;  %v18602_v0 = vunpack.c.l.s4 %v14097_v44 }
 0x6e9   :  { %v6017_v51 = vmax.f32 %v18566_v21, 0.0  ;;  %v18609_v18 = vadd.f32 %v18404_v56, %v18548_v2  ;;  %v13446_v56 = vld [vmem:[%s20778_s13 + $0x180] ss:$8 sps:$4 sm:$0xff]   ;;  %v18630_v35 = vadd.f32 %v18410_v41, %v18548_v2 }
 0x6ea   :  { %8597 = vmatprep.mubr.bf16.mxu0 %v8166_v46  ;;  %v6018_v46 = vmax.f32 %v18575_v14, 0.0 }
 0x6eb   :  { %8598 = vmatmul.mubr.bf16.vlgmr.msra.gmra.mrb[144].mxu0 %v8165_v6  ;;  %v21520_v6 = vld [vmem:[#allocation5_spill] sm:$0xff] }
 0x6ec   :  { %8607 = vmatpush1.bf16.msra.mxu0 %v13422_v63  ;;  %v6992_v63 = vrot.slane %v18591_v48, %v21518_v9 }
 0x6ed   :  { %8608 = vmatprep.subr.bf16.mxu0 %v13427_v30  ;;  %v21521_v30 = vsub.s32 4, %v21520_v6 }
 0x6f0   :  { %8609 = vmatpush1.bf16.msra.mxu0 %v13425_v17  ;;  %v18621_v17 = vrot.slane %v18374_v31, %v21521_v30  ;;  %v13452_v30 = vld [vmem:[%s20778_s13 + $0x1a0] ss:$8 sps:$4 sm:$0xff]  }
 0x6f1   :  { %8610 = vmatprep.subr.bf16.mxu0 %v13430_v58 }
 0x6f4   :  { %8611 = vmatpush1.bf16.msra.mxu0 %v13428_v34  ;;  %v6473_v34 = vrot.slane %v18571_v40, %v21519_v26 }
 0x6f5   :  { %8612 = vmatprep.subr.bf16.mxu0 %v13433_v29  ;;  %v13451_v29 = vld [vmem:[%s20778_s13 + $0x194] ss:$8 sps:$4 sm:$0xff]  }
 0x6f8   :  { %8613 = vmatpush1.bf16.msra.mxu0 %v13431_v49 }
 0x6f9   :  { %8614 = vmatprep.subr.bf16.mxu0 %v13436_v1  ;;  %v18640_v1 = vadd.f32 %v18412_v57, %v18544_v54  ;;  %v18659_v57 = vadd.f32 %v18422_v15, %v18548_v2 }
 0x6fb   :  { %21524 = vst [vmem:[#allocation82_spill] sm:$0xff] %v18659_v57 }
 0x6fc   :  { %8615 = vmatpush1.bf16.msra.mxu0 %v13434_v36  ;;  %v7007_v36 = vunpack.c.0.s8 %v18602_v0  ;;  %v18696_v0 = vadd.f32 %v18446_v24, %v18544_v54 }
 0x6fd   :  { %8616 = vmatprep.subr.bf16.mxu0 %v13439_v7  ;;  %v21522_v7 = vsub.s32 5, %v21520_v6 }
 0x6fe   :  { %v18745_v15 = vsub.s32 %v7007_v36, %v21520_v6 }
 0x6ff   :  { %v18646_v41 = vrot.slane %v18374_v31, %v21522_v7  ;;  %v18664_v31 = vadd.f32 %v18424_v60, %v18544_v54  ;;  %v18684_v60 = vadd.f32 %v18438_v62, %v18544_v54  ;;  %v18704_v62 = vadd.f32 %v18452_v3, %v18544_v54 }
 0x700   :  { %8617 = vmatpush1.bf16.msra.mxu0 %v13437_v22  ;;  %v18718_v3 = vadd.f32 %v18463_v59, %v18544_v54  ;;  %v6996_v7 = vrot.slane %v18591_v48, %v21519_v26  ;;  %v13457_v59 = vld [vmem:[%s20778_s13 + $0x1b4] ss:$8 sps:$4 sm:$0xff]   ;;  %v13458_v48 = vld [vmem:[%s20778_s13 + $0x1c0] ss:$8 sps:$4 sm:$0xff]  }
 0x701   :  { %8618 = vmatprep.subr.bf16.mxu0 %v13442_v53  ;;  %v18651_v53 = vadd.f32 %v18415_v10, %v18548_v2  ;;  %v18672_v10 = vadd.f32 %v18433_v4, %v18544_v54  ;;  %v13454_v4 = vld [vmem:[%s20778_s13 + $0x1a4] ss:$8 sps:$4 sm:$0xff]  }
 0x704   :  { %8619 = vmatpush1.bf16.msra.mxu0 %v13440_v20  ;;  %v18655_v20 = vadd.f32 %v18420_v45, %v18544_v54  ;;  %v13449_v45 = vld [vmem:[%s20778_s13 + $0x190] ss:$8 sps:$4 sm:$0xff]  }
 0x705   :  { %8620 = vmatprep.subr.bf16.mxu0 %v13445_v50 }
 0x706   :  { %21523 = vst [vmem:[#allocation81_spill] sm:$0xff] %v18655_v20 }
 0x708   :  { %8621 = vmatpush1.bf16.msra.mxu0 %v13443_v39  ;;  %v18668_v39 = vadd.f32 %v18427_v52, %v18548_v2  ;;  %v18688_v52 = vadd.f32 %v18440_v5, %v18548_v2 }
 0x709   :  { %8622 = vmatprep.subr.bf16.mxu0 %v13448_v16  ;;  %v18680_v16 = vadd.f32 %v18436_v43, %v18548_v2  ;;  %v18700_v43 = vadd.f32 %v18449_v33, %v18548_v2 }
 0x70a   :  { %21525 = vst [vmem:[#allocation91_spill] sm:$0xff] %v18668_v39 }
 0x70c   :  { %8623 = vmatpush1.bf16.msra.mxu0 %v13446_v56 }
 0x70d   :  { %8624 = vmatprep.subr.bf16.mxu0 %v13451_v29  ;;  %v18711_v29 = vadd.f32 %v18458_v13, %v18548_v2 }
 0x710   :  { %8625 = vmatpush1.bf16.msra.mxu0 %v13449_v45 }
 0x711   :  { %8626 = vmatprep.subr.bf16.mxu0 %v13454_v4  ;;  %v18740_v4 = vadd.f32 %v18466_v42, %v18548_v2  ;;  %v13455_v42 = vld [vmem:[%s20778_s13 + $0x1b0] ss:$8 sps:$4 sm:$0xff]  }
 0x714   :  { %8627 = vmatpush1.bf16.msra.mxu0 %v13452_v30  ;;  %v18765_v30 = vadd.f32 %v18477_v55, %v18544_v54  ;;  %v21530_v55 = vld [vmem:[#allocation75_spill] sm:$0xff] }
 0x715   :  { %v6978_v24 = vpop.f32.mrb[188].mxu1  ;;  %8628 = vmatprep.subr.bf16.mxu0 %v13457_v59  ;;  %v18782_v22 = vadd.f32 %v21530_v55, %v18548_v2 }
 0x716   :  { %v12440_v44 = vadd.f32 %v6978_v24, %v6469_v61  ;;  %v5936_v12 = vpop.f32.mrb[112].mxu0  ;;  %v6980_v58 = vpop.f32.mrb[189].mxu1  ;;  %21526 = vst [vmem:[#allocation92_spill] sm:$0xff] %v18765_v30  ;;  %v21532_v30 = vmax.f32 %v18558_v25, 0.0  ;;  %v13467_v25 = vld [vmem:[%s20778_s13 + $0x1f0] ss:$8 sps:$4 sm:$0xff]  }
 0x717   :  { %v12408_v49 = vadd.f32 %v5936_v12, %v18621_v17  ;;  %v12441_v56 = vadd.f32 %v6980_v58, %v6473_v34  ;;  %v5938_v45 = vpop.f32.mrb[113].mxu0  ;;  %v6982_v33 = vpop.f32.mrb[190].mxu1  ;;  %v18753_v58 = vadd.f32 %v18469_v38, %v18544_v54  ;;  %v18757_v12 = vadd.f32 %v18471_v11, %v18548_v2  ;;  %21531 = vst [vmem:[#allocation105_spill] sm:$0xff] %v18782_v22 }
 0x718   :  { %v6985_v5 = vmax.f32 %v12440_v44, 0.0  ;;  %v12409_v40 = vadd.f32 %v5938_v45, %v18646_v41  ;;  %v5940_v61 = vpop.f32.mrb[114].mxu0  ;;  %v6983_v24 = vpop.f32.mrb[191].mxu1  ;;  %v13460_v44 = vld [vmem:[%s20778_s13 + $0x1c4] ss:$8 sps:$4 sm:$0xff]   ;;  %v18769_v38 = vadd.f32 %v18479_v23, %v18548_v2  ;;  %8629 = vmatpush1.bf16.msra.mxu0 %v13455_v42 }
 0x719   :  { %v6986_v34 = vmax.f32 %v12441_v56, 0.0  ;;  %v12410_v6 = vadd.f32 %v5940_v61, %v18621_v17  ;;  %v5942_v36 = vpop.f32.mrb[115].mxu0  ;;  %v6049_v59 = vmax.f32 %v12408_v49, 0.0  ;;  %v21528_v24 = vld [vmem:[#allocation74_spill] sm:$0xff]  ;;  %8630 = vmatprep.subr.bf16.mxu0 %v13460_v44 }
 0x71a   :  { %21527 = vst [vmem:[#allocation98_spill] sm:$0xff] %v18769_v38  ;;  %v6999_v11 = vmul.f32 %v6992_v63, %v6985_v5  ;;  %v12411_v56 = vadd.f32 %v5942_v36, %v18646_v41  ;;  %v18778_v50 = vadd.f32 %v21528_v24, %v18544_v54  ;;  %v6050_v23 = vmax.f32 %v12409_v40, 0.0  ;;  %v13463_v54 = vld [vmem:[%s20778_s13 + $0x1d4] ss:$8 sps:$4 sm:$0xff]  }
 0x71b   :  { %v7000_v45 = vmul.f32 %v6996_v7, %v6986_v34  ;;  %v6053_v61 = vmax.f32 %v12410_v6, 0.0 }
 0x71c   :  { %21529 = vst [vmem:[#allocation100_spill] sm:$0xff] %v18778_v50  ;;  %v6054_v13 = vmax.f32 %v12411_v56, 0.0  ;;  %8631 = vmatpush1.bf16.msra.mxu0 %v13458_v48  ;;  %v13466_v48 = vld [vmem:[%s20778_s13 + $0x1e4] ss:$8 sps:$4 sm:$0xff]  }
 0x71d   :  { %v7003_v49 = vcombine.low %v6999_v11, %v7000_v45  ;;  %v7004_v5 = vcombine.high %v6999_v11, %v7000_v45  ;;  %v7855_v7 = vadd.f32 %v6053_v61, %v6049_v59  ;;  %8632 = vmatprep.subr.bf16.mxu0 %v13463_v54 }
 0x71e   :  { %v7862_v34 = vadd.f32 %v6054_v13, %v6050_v23  ;;  %v5946_v6 = vpop.f32.mrb[116].mxu0  ;;  %v13461_v13 = vld [vmem:[%s20778_s13 + $0x1d0] ss:$8 sps:$4 sm:$0xff]  }
 0x71f   :  { %v18795_v36 = vrot.slane %v7003_v49, %v18745_v15  ;;  %v18798_v56 = vrot.slane %v7004_v5, %v18745_v15  ;;  %v7856_v11 = vrot.slane %v7855_v7, 4  ;;  %v12412_v44 = vadd.f32 %v5946_v6, %v18621_v17  ;;  %v5948_v59 = vpop.f32.mrb[117].mxu0 }
 0x720   :  { %v7863_v24 = vrot.slane %v7862_v34, 4  ;;  %v12413_v55 = vadd.f32 %v5948_v59, %v18646_v41  ;;  %v5950_v42 = vpop.f32.mrb[118].mxu0  ;;  %8633 = vmatpush1.bf16.msra.mxu0 %v13461_v13 }
 0x721   :  { %v18813_v5 = vrot.slane %v18795_v36, %v18745_v15  ;;  %v18817_v6 = vrot.slane %v18798_v56, %v18745_v15  ;;  %v5952_v59 = vpop.f32.mrb[119].mxu0  ;;  %v7857_v40 = vadd.f32 %v7856_v11, %v7855_v7  ;;  %v6057_v45 = vmax.f32 %v12412_v44, 0.0  ;;  %8634 = vmatprep.subr.bf16.mxu0 %v13466_v48 }
 0x722   :  { %v7864_v61 = vadd.f32 %v7863_v24, %v7862_v34  ;;  %v6058_v33 = vmax.f32 %v12413_v55, 0.0  ;;  %v12414_v2 = vadd.f32 %v5950_v42, %v18621_v17  ;;  %v12415_v63 = vadd.f32 %v5952_v59, %v18646_v41  ;;  %v13464_v42 = vld [vmem:[%s20778_s13 + $0x1e0] ss:$8 sps:$4 sm:$0xff]   ;;  %v13469_v55 = vld [vmem:[%s20778_s13 + $0x1f4] ss:$8 sps:$4 sm:$0xff]  }
 0x723   :  { %v7056_v49 = vrot.slane %v18813_v5, %v21518_v9  ;;  %v7060_v23 = vrot.slane %v18813_v5, %v21519_v26  ;;  %v7858_v37 = vrot.slane %v7857_v40, 2  ;;  %v7088_v47 = vrot.slane %v18817_v6, %v21518_v9 }
 0x724   :  { %v7865_v54 = vrot.slane %v7864_v61, 2  ;;  %v7092_v7 = vrot.slane %v18817_v6, %v21519_v26  ;;  %v6061_v34 = vmax.f32 %v12414_v2, 0.0  ;;  %v6062_v11 = vmax.f32 %v12415_v63, 0.0  ;;  %8635 = vmatpush1.bf16.msra.mxu0 %v13464_v42 }
 0x725   :  { %v7135_v44 = vmul.f32 %v7056_v49, %v6017_v51  ;;  %v7136_v24 = vmul.f32 %v7060_v23, %v6018_v46  ;;  %v7859_v59 = vadd.f32 %v7858_v37, %v7857_v40  ;;  %v7133_v22 = vmul.f32 %v7056_v49, %v21532_v30  ;;  %8636 = vmatprep.subr.bf16.mxu0 %v13469_v55 }
 0x726   :  { %v7866_v38 = vadd.f32 %v7865_v54, %v7864_v61  ;;  %v5956_v13 = vpop.f32.mrb[120].mxu0  ;;  %v21533_v2 = vmax.f32 %v18562_v27, 0.0  ;;  %v7883_v50 = vadd.f32 %v6061_v34, %v6057_v45  ;;  %v7890_v21 = vadd.f32 %v6062_v11, %v6058_v33 }
 0x727   :  { %v12416_v51 = vadd.f32 %v5956_v13, %v18621_v17  ;;  %v5958_v14 = vpop.f32.mrb[121].mxu0  ;;  %v7168_v46 = vadd.f32 %v7136_v24, %v7135_v44  ;;  %v7860_v48 = vrot.slane %v7859_v59, 1  ;;  %v21534_v11 = vmax.f32 %v18684_v60, 0.0 }
 0x728   :  { %v7134_v63 = vmul.f32 %v7060_v23, %v21533_v2  ;;  %v7867_v57 = vrot.slane %v7866_v38, 1  ;;  %v12417_v20 = vadd.f32 %v5958_v14, %v18646_v41  ;;  %v5960_v39 = vpop.f32.mrb[122].mxu0  ;;  %v7884_v30 = vrot.slane %v7883_v50, 4  ;;  %8637 = vmatpush1.bf16.msra.mxu0 %v13467_v25 }
 0x729   :  { %v7891_v27 = vrot.slane %v7890_v21, 4  ;;  %v6065_v40 = vmax.f32 %v12416_v51, 0.0  ;;  %v12418_v33 = vadd.f32 %v5960_v39, %v18621_v17  ;;  %v5962_v45 = vpop.f32.mrb[123].mxu0  ;;  %7169 = vadd.xlane.f32.xlu1 %v7168_v46  ;;  %v7861_v61 = vadd.f32 %v7860_v48, %v7859_v59 }
 0x72a   :  { %v7165_v37 = vadd.f32 %v7134_v63, %v7133_v22  ;;  %v7868_v23 = vadd.f32 %v7867_v57, %v7866_v38  ;;  %v6066_v49 = vmax.f32 %v12417_v20, 0.0  ;;  %v12419_v54 = vadd.f32 %v5962_v45, %v18646_v41 }
 0x72b   :  { %v7885_v22 = vadd.f32 %v7884_v30, %v7883_v50  ;;  %v7892_v42 = vadd.f32 %v7891_v27, %v7890_v21  ;;  %v6069_v34 = vmax.f32 %v12418_v33, 0.0  ;;  %v7151_v44 = vmul.f32 %v7088_v47, %v21534_v11 }
 0x72c   :  { %7166 = vadd.xlane.f32.xlu0 %v7165_v37  ;;  %v8067_v24 = vmul.f32 0.0625, %v7861_v61  ;;  %v8068_v13 = vmul.f32 0.0625, %v7868_v23  ;;  %v6070_v2 = vmax.f32 %v12419_v54, 0.0  ;;  %v21535_v39 = vmax.f32 %v18688_v52, 0.0 }
 0x72d   :  { %v7886_v55 = vrot.slane %v7885_v22, 2  ;;  %v7893_v59 = vrot.slane %v7892_v42, 2  ;;  %v7911_v57 = vadd.f32 %v6069_v34, %v6065_v40  ;;  %v21536_v20 = vmax.f32 %v18672_v10, 0.0 }
 0x72e   :  { %v7152_v63 = vmul.f32 %v7092_v7, %v21535_v39  ;;  %v7918_v51 = vadd.f32 %v6070_v2, %v6066_v49  ;;  %v21537_v21 = vmax.f32 %v18680_v16, 0.0  ;;  %v5966_v60 = vpop.f32.mrb[124].mxu0  ;;  %v21538_v46 = vcombine.high %v18795_v36, %v18795_v36 }
 0x72f   :  { %v7149_v38 = vmul.f32 %v7088_v47, %v21536_v20  ;;  %v7887_v52 = vadd.f32 %v7886_v55, %v7885_v22  ;;  %v7894_v37 = vadd.f32 %v7893_v59, %v7892_v42  ;;  %v7912_v25 = vrot.slane %v7911_v57, 4  ;;  %v5968_v27 = vpop.f32.mrb[125].mxu0 }
 0x730   :  { %v7192_v50 = vadd.f32 %v7152_v63, %v7151_v44  ;;  %v7150_v14 = vmul.f32 %v7092_v7, %v21537_v21  ;;  %v18865_v48 = vrot.slane %v21538_v46, %v18745_v15  ;;  %v12420_v30 = vadd.f32 %v5966_v60, %v18621_v17  ;;  %v5970_v16 = vpop.f32.mrb[126].mxu0 }
 0x731   :  { %v7919_v10 = vrot.slane %v7918_v51, 4  ;;  %v12421_v40 = vadd.f32 %v5968_v27, %v18646_v41  ;;  %v7888_v33 = vrot.slane %v7887_v52, 1  ;;  %v7895_v45 = vrot.slane %v7894_v37, 1  ;;  %v5972_v23 = vpop.f32.mrb[127].mxu0 }
 0x732   :  { %7193 = vadd.xlane.f32.xlu1 %v7192_v50  ;;  %v7189_v47 = vadd.f32 %v7150_v14, %v7149_v38  ;;  %v7064_v7 = vrot.slane %v18865_v48, %v21518_v9  ;;  %v7913_v36 = vadd.f32 %v7912_v25, %v7911_v57  ;;  %v6073_v61 = vmax.f32 %v12420_v30, 0.0 }
 0x733   :  { %v7920_v49 = vadd.f32 %v7919_v10, %v7918_v51  ;;  %v6074_v54 = vmax.f32 %v12421_v40, 0.0  ;;  %v12422_v22 = vadd.f32 %v5970_v16, %v18621_v17  ;;  %v12423_v42 = vadd.f32 %v5972_v23, %v18646_v41 }
 0x734   :  { %7190 = vadd.xlane.f32.xlu0 %v7189_v47  ;;  %v7889_v34 = vadd.f32 %v7888_v33, %v7887_v52  ;;  %v7896_v11 = vadd.f32 %v7895_v45, %v7894_v37  ;;  %v7914_v44 = vrot.slane %v7913_v36, 2  ;;  %v7068_v2 = vrot.slane %v18865_v48, %v21519_v26 }
 0x735   :  { %v7921_v39 = vrot.slane %v7920_v49, 2  ;;  %v6077_v63 = vmax.f32 %v12422_v22, 0.0  ;;  %v6078_v55 = vmax.f32 %v12423_v42, 0.0  ;;  %v21539_v59 = vmax.f32 %v18598_v8, 0.0 }
 0x736   :  { %v8071_v20 = vmul.f32 0.0625, %v7889_v34  ;;  %v8072_v38 = vmul.f32 0.0625, %v7896_v11  ;;  %v7915_v51 = vadd.f32 %v7914_v44, %v7913_v36  ;;  %v21540_v50 = vmax.f32 %v18609_v18, 0.0  ;;  %v5976_v25 = vpop.f32.mrb[128].mxu0 }
 0x737   :  { %v7139_v57 = vmul.f32 %v7064_v7, %v21539_v59  ;;  %v7922_v14 = vadd.f32 %v7921_v39, %v7920_v49  ;;  %v7939_v60 = vadd.f32 %v6077_v63, %v6073_v61  ;;  %v7946_v46 = vadd.f32 %v6078_v55, %v6074_v54  ;;  %v5978_v47 = vpop.f32.mrb[129].mxu0 }
 0x738   :  { %v7140_v21 = vmul.f32 %v7068_v2, %v21540_v50  ;;  %v21541_v52 = vmax.f32 %v18582_v32, 0.0  ;;  %v8143_v30 = vsel %vm6540_vm2, %v8071_v20, %v8067_v24  ;;  %v8150_v27 = vsel %vm6540_vm2, %v8072_v38, %v8068_v13  ;;  %v5980_v36 = vpop.f32.mrb[130].mxu0 }
 0x739   :  { %v7916_v10 = vrot.slane %v7915_v51, 1  ;;  %v7923_v40 = vrot.slane %v7922_v14, 1  ;;  %v7940_v16 = vrot.slane %v7939_v60, 4  ;;  %v7947_v33 = vrot.slane %v7946_v46, 4  ;;  %v5982_v13 = vpop.f32.mrb[131].mxu0 }
 0x73a   :  { %v7137_v37 = vmul.f32 %v7064_v7, %v21541_v52  ;;  %v7174_v8 = vadd.f32 %v7140_v21, %v7139_v57  ;;  %v21542_v18 = vmax.f32 %v18586_v28, 0.0  ;;  %v7049_v32 = vcombine.high %v18813_v5, %v18813_v5 }
 0x73b   :  { %v7917_v61 = vadd.f32 %v7916_v10, %v7915_v51  ;;  %v12424_v7 = vadd.f32 %v5976_v25, %v18621_v17  ;;  %v12425_v24 = vadd.f32 %v5978_v47, %v18646_v41  ;;  %v7924_v23 = vadd.f32 %v7923_v40, %v7922_v14 }
 0x73c   :  { %v7138_v45 = vmul.f32 %v7068_v2, %v21542_v18  ;;  %7175 = vadd.xlane.f32.xlu1 %v7174_v8  ;;  %v7941_v49 = vadd.f32 %v7940_v16, %v7939_v60  ;;  %v7948_v54 = vadd.f32 %v7947_v33, %v7946_v46  ;;  %v7072_v34 = vrot.slane %v7049_v32, %v21518_v9 }
 0x73d   :  { %v8075_v42 = vmul.f32 0.0625, %v7917_v61  ;;  %v7076_v28 = vrot.slane %v7049_v32, %v21519_v26  ;;  %v6081_v11 = vmax.f32 %v12424_v7, 0.0  ;;  %v8076_v44 = vmul.f32 0.0625, %v7924_v23 }
 0x73e   :  { %v7171_v22 = vadd.f32 %v7138_v45, %v7137_v37  ;;  %v7942_v2 = vrot.slane %v7941_v49, 2  ;;  %v7949_v39 = vrot.slane %v7948_v54, 2  ;;  %v6082_v5 = vmax.f32 %v12425_v24, 0.0  ;;  %v5986_v52 = vpop.f32.mrb[132].mxu0 }
 0x73f   :  { %v8144_v63 = vsel %vm6542_vm3, %v8075_v42, %v8143_v30  ;;  %v21543_v55 = vmax.f32 %v18640_v1, 0.0  ;;  %v21544_v57 = vmax.f32 %v18651_v53, 0.0  ;;  %v21545_v38 = vmax.f32 %v18614_v19, 0.0  ;;  %v5988_v19 = vpop.f32.mrb[133].mxu0 }
 0x740   :  { %7172 = vadd.xlane.f32.xlu0 %v7171_v22  ;;  %v8151_v50 = vsel %vm6542_vm3, %v8076_v44, %v8150_v27  ;;  %v7943_v21 = vadd.f32 %v7942_v2, %v7941_v49  ;;  %v7950_v14 = vadd.f32 %v7949_v39, %v7948_v54  ;;  %v21546_v60 = vmax.f32 %v18630_v35, 0.0  ;;  %v5990_v35 = vpop.f32.mrb[134].mxu0 }
 0x741   :  { %v7143_v59 = vmul.f32 %v7072_v34, %v21543_v55  ;;  %v7144_v20 = vmul.f32 %v7076_v28, %v21544_v57  ;;  %v7141_v51 = vmul.f32 %v7072_v34, %v21545_v38  ;;  %v12426_v25 = vadd.f32 %v5980_v36, %v18621_v17  ;;  %v5992_v45 = vpop.f32.mrb[135].mxu0 }
 0x742   :  { %v7142_v46 = vmul.f32 %v7076_v28, %v21546_v60  ;;  %v12427_v1 = vadd.f32 %v5982_v13, %v18646_v41  ;;  %v21547_v53 = vcombine.high %v18798_v56, %v18798_v56  ;;  %v7944_v10 = vrot.slane %v7943_v21, 1 }
 0x743   :  { %v7180_v37 = vadd.f32 %v7144_v20, %v7143_v59  ;;  %v7951_v8 = vrot.slane %v7950_v14, 1  ;;  %v7050_v47 = vcombine.high %v18817_v6, %v18817_v6  ;;  %v6085_v40 = vmax.f32 %v12426_v25, 0.0 }
 0x744   :  { %v7048_v30 = vrot.slane %v21547_v53, %v18745_v15  ;;  %v7177_v27 = vadd.f32 %v7142_v46, %v7141_v51  ;;  %v6086_v16 = vmax.f32 %v12427_v1, 0.0  ;;  %v7945_v36 = vadd.f32 %v7944_v10, %v7943_v21 }
 0x745   :  { %7181 = vadd.xlane.f32.xlu1 %v7180_v37  ;;  %v7952_v61 = vadd.f32 %v7951_v8, %v7950_v14  ;;  %v7104_v56 = vrot.slane %v7050_v47, %v21518_v9  ;;  %v7108_v32 = vrot.slane %v7050_v47, %v21519_v26  ;;  %v7967_v7 = vadd.f32 %v6085_v40, %v6081_v11 }
 0x746   :  { %v7096_v33 = vrot.slane %v7048_v30, %v21518_v9  ;;  %v7100_v18 = vrot.slane %v7048_v30, %v21519_v26  ;;  %7178 = vadd.xlane.f32.xlu0 %v7177_v27  ;;  %v7974_v24 = vadd.f32 %v6086_v16, %v6082_v5  ;;  %v21548_v6 = vmax.f32 %v18704_v62, 0.0  ;;  %v5996_v20 = vpop.f32.mrb[136].mxu0 }
 0x747   :  { %v21549_v23 = vmax.f32 %v18711_v29, 0.0  ;;  %v8079_v54 = vmul.f32 0.0625, %v7945_v36  ;;  %v8080_v22 = vmul.f32 0.0625, %v7952_v61  ;;  %v21550_v42 = vmax.f32 %v18696_v0, 0.0  ;;  %v5998_v60 = vpop.f32.mrb[137].mxu0 }
 0x748   :  { %v7155_v13 = vmul.f32 %v7096_v33, %v21548_v6  ;;  %v21551_v28 = vmax.f32 %v18700_v43, 0.0  ;;  %v7968_v2 = vrot.slane %v7967_v7, 4  ;;  %v7975_v39 = vrot.slane %v7974_v24, 4  ;;  %v6000_v37 = vpop.f32.mrb[138].mxu0  ;;  %v21557_v6 = vld [vmem:[#allocation91_spill] sm:$0xff] }
 0x749   :  { %v7156_v49 = vmul.f32 %v7100_v18, %v21549_v23  ;;  %v7153_v34 = vmul.f32 %v7096_v33, %v21550_v42  ;;  %v21552_v11 = vmax.f32 %v18753_v58, 0.0  ;;  %v18924_v62 = vsel %vm6544_vm4, %v8079_v54, %v8144_v63  ;;  %v21559_v23 = vld [vmem:[#allocation81_spill] sm:$0xff] }
 0x74a   :  { %v7154_v44 = vmul.f32 %v7100_v18, %v21551_v28  ;;  %v18927_v29 = vsel %vm6544_vm4, %v8080_v22, %v8151_v50  ;;  %v21553_v57 = vmax.f32 %v18757_v12, 0.0  ;;  %v7969_v38 = vadd.f32 %v7968_v2, %v7967_v7 }
 0x74b   :  { %v7198_v55 = vadd.f32 %v7156_v49, %v7155_v13  ;;  %v7159_v5 = vmul.f32 %v7104_v56, %v21552_v11  ;;  %v7976_v43 = vadd.f32 %v7975_v39, %v7974_v24  ;;  %v21554_v51 = vmax.f32 %v18718_v3, 0.0  ;;  %v6002_v3 = vpop.f32.mrb[139].mxu0 }
 0x74c   :  { %v7195_v59 = vadd.f32 %v7154_v44, %v7153_v34  ;;  %v7160_v0 = vmul.f32 %v7108_v32, %v21553_v57  ;;  %v21555_v58 = vmax.f32 %v18740_v4, 0.0  ;;  %v12428_v50 = vadd.f32 %v5986_v52, %v18621_v17  ;;  %v21561_v44 = vld [vmem:[#allocation82_spill] sm:$0xff] }
 0x74d   :  { %7199 = vadd.xlane.f32.xlu1 %v7198_v55  ;;  %v7157_v21 = vmul.f32 %v7104_v56, %v21554_v51  ;;  %v12429_v46 = vadd.f32 %v5988_v19, %v18646_v41  ;;  %v12430_v12 = vadd.f32 %v5990_v35, %v18621_v17  ;;  %v7970_v25 = vrot.slane %v7969_v38, 2 }
 0x74e   :  { %v7158_v14 = vmul.f32 %v7108_v32, %v21555_v58  ;;  %7196 = vadd.xlane.f32.xlu0 %v7195_v59  ;;  %v7204_v63 = vadd.f32 %v7160_v0, %v7159_v5  ;;  %v7977_v1 = vrot.slane %v7976_v43, 2  ;;  %v12431_v10 = vadd.f32 %v5992_v45, %v18646_v41  ;;  %v6006_v22 = vpop.f32.mrb[140].mxu0 }
 0x74f   :  { %v6089_v8 = vmax.f32 %v12428_v50, 0.0  ;;  %v6090_v27 = vmax.f32 %v12429_v46, 0.0  ;;  %v6093_v4 = vmax.f32 %v12430_v12, 0.0  ;;  %v7051_v47 = vcombine.high %v18865_v48, %v18865_v48  ;;  %v6008_v55 = vpop.f32.mrb[141].mxu0  ;;  %v21567_v12 = vld [vmem:[#allocation92_spill] sm:$0xff] }
 0x750   :  { %v7201_v53 = vadd.f32 %v7158_v14, %v7157_v21  ;;  %v7971_v40 = vadd.f32 %v7970_v25, %v7969_v38  ;;  %v7978_v16 = vadd.f32 %v7977_v1, %v7976_v43  ;;  %v6094_v52 = vmax.f32 %v12431_v10, 0.0 }
 0x751   :  { %7205 = vadd.xlane.f32.xlu1 %v7204_v63  ;;  %v7052_v19 = vcombine.high %v7048_v30, %v7048_v30  ;;  %v7995_v35 = vadd.f32 %v6093_v4, %v6089_v8  ;;  %v7080_v33 = vrot.slane %v7051_v47, %v21518_v9  ;;  %v7084_v18 = vrot.slane %v7051_v47, %v21519_v26  ;;  %v21565_v63 = vld [vmem:[#allocation105_spill] sm:$0xff] }
 0x752   :  { %7202 = vadd.xlane.f32.xlu0 %v7201_v53  ;;  %v12432_v45 = vadd.f32 %v5996_v20, %v18621_v17  ;;  %v7972_v36 = vrot.slane %v7971_v40, 1  ;;  %v7979_v61 = vrot.slane %v7978_v16, 1  ;;  %v8002_v56 = vadd.f32 %v6094_v52, %v6090_v27  ;;  %v6010_v20 = vpop.f32.mrb[142].mxu0  ;;  %v21569_v53 = vld [vmem:[#allocation98_spill] sm:$0xff] }
 0x753   :  { %v7112_v32 = vrot.slane %v7052_v19, %v21518_v9  ;;  %v7996_v7 = vrot.slane %v7995_v35, 4  ;;  %v21556_v48 = vmax.f32 %v18664_v31, 0.0  ;;  %v21558_v13 = vmax.f32 %v21557_v6, 0.0  ;;  %v21563_v31 = vld [vmem:[#allocation100_spill] sm:$0xff]  ;;  %v6012_v58 = vpop.f32.mrb[143].mxu0 }
 0x754   :  { %v21560_v49 = vmax.f32 %v21559_v23, 0.0  ;;  %v7973_v42 = vadd.f32 %v7972_v36, %v7971_v40  ;;  %v7980_v34 = vadd.f32 %v7979_v61, %v7978_v16  ;;  %v8003_v28 = vrot.slane %v8002_v56, 4 }
 0x755   :  { %v7147_v24 = vmul.f32 %v7080_v33, %v21556_v48  ;;  %v7148_v30 = vmul.f32 %v7084_v18, %v21558_v13  ;;  %v21562_v2 = vmax.f32 %v21561_v44, 0.0  ;;  %v7997_v11 = vadd.f32 %v7996_v7, %v7995_v35 }
 0x756   :  { %v7145_v54 = vmul.f32 %v7080_v33, %v21560_v49  ;;  %v7116_v59 = vrot.slane %v7052_v19, %v21519_v26  ;;  %v21564_v57 = vmax.f32 %v21563_v31, 0.0  ;;  %v8083_v38 = vmul.f32 0.0625, %v7973_v42 }
 0x757   :  { %v7146_v39 = vmul.f32 %v7084_v18, %v21562_v2  ;;  %v7186_v5 = vadd.f32 %v7148_v30, %v7147_v24  ;;  %v8084_v43 = vmul.f32 0.0625, %v7980_v34  ;;  %v8004_v51 = vadd.f32 %v8003_v28, %v8002_v56 }
 0x758   :  { %v7163_v0 = vmul.f32 %v7112_v32, %v21564_v57  ;;  %v7998_v14 = vrot.slane %v7997_v11, 2  ;;  %v21566_v50 = vmax.f32 %v21565_v63, 0.0  ;;  %v21568_v25 = vmax.f32 %v21567_v12, 0.0 }
 0x759   :  { %v7183_v21 = vadd.f32 %v7146_v39, %v7145_v54  ;;  %7187 = vadd.xlane.f32.xlu1 %v7186_v5  ;;  %v21570_v10 = vmax.f32 %v21569_v53, 0.0  ;;  %v8146_v27 = vsel %vm6546_vm5, %v8083_v38, %v18924_v62  ;;  %v8005_v4 = vrot.slane %v8004_v51, 2 }
 0x75a   :  { %v7164_v46 = vmul.f32 %v7116_v59, %v21566_v50  ;;  %v7161_v1 = vmul.f32 %v7112_v32, %v21568_v25  ;;  %v6097_v47 = vmax.f32 %v12432_v45, 0.0  ;;  %v12433_v40 = vadd.f32 %v5998_v60, %v18646_v41 }
 0x75b   :  { %v7162_v8 = vmul.f32 %v7116_v59, %v21570_v10  ;;  %7184 = vadd.xlane.f32.xlu0 %v7183_v21  ;;  %v7999_v16 = vadd.f32 %v7998_v14, %v7997_v11  ;;  %v12434_v35 = vadd.f32 %v6000_v37, %v18621_v17  ;;  %v8006_v33 = vadd.f32 %v8005_v4, %v8004_v51 }
 0x75c   :  { %v7210_v52 = vadd.f32 %v7164_v46, %v7163_v0  ;;  %v6098_v18 = vmax.f32 %v12433_v40, 0.0  ;;  %v12435_v36 = vadd.f32 %v6002_v3, %v18646_v41  ;;  %v12436_v61 = vadd.f32 %v6006_v22, %v18621_v17  ;;  %v7840_v40 = vld [vmem:[%s20780_s1 + $0x18] sm:$0xff] }
 0x75d   :  { %v7207_v19 = vadd.f32 %v7162_v8, %v7161_v1  ;;  %v8000_v56 = vrot.slane %v7999_v16, 1  ;;  %v6101_v32 = vmax.f32 %v12434_v35, 0.0  ;;  %v12437_v62 = vadd.f32 %v6008_v55, %v18646_v41 }
 0x75e   :  { %7211 = vadd.xlane.f32.xlu1 %v7210_v52  ;;  %v12438_v45 = vadd.f32 %v6010_v20, %v18621_v17  ;;  %v8007_v7 = vrot.slane %v8006_v33, 1  ;;  %v6102_v60 = vmax.f32 %v12435_v36, 0.0  ;;  %v6105_v48 = vmax.f32 %v12436_v61, 0.0  ;;  %v13470_v61 = vld [vmem:[%s20784_s15] ss:$16 sps:$4 sm:$0xff]  }
 0x75f   :  { %7208 = vadd.xlane.f32.xlu0 %v7207_v19  ;;  %v12439_v24 = vadd.f32 %v6012_v58, %v18646_v41  ;;  %v8001_v37 = vadd.f32 %v8000_v56, %v7999_v16  ;;  %v8023_v6 = vadd.f32 %v6101_v32, %v6097_v47  ;;  %v6106_v13 = vmax.f32 %v12437_v62, 0.0  ;;  %v13472_v56 = vld [vmem:[%s20784_s15 + $0x4] ss:$16 sps:$4 sm:$0xff]   ;;  %v13473_v62 = vld [vmem:[%s20784_s15 + $0x20] ss:$16 sps:$4 sm:$0xff]  }
 0x760   :  { %v6109_v30 = vmax.f32 %v12438_v45, 0.0  ;;  %v8008_v3 = vadd.f32 %v8007_v7, %v8006_v33  ;;  %v8030_v23 = vadd.f32 %v6102_v60, %v6098_v18  ;;  %v8153_v54 = vsel %vm6546_vm5, %v8084_v43, %v18927_v29  ;;  %v13475_v32 = vld [vmem:[%s20784_s15 + $0x24] ss:$16 sps:$4 sm:$0xff]   ;;  %9057 = vmatprep.subr.bf16.mxu1 %v13472_v56  ;;  %v13476_v7 = vld [vmem:[%s20784_s15 + $0x40] ss:$16 sps:$4 sm:$0xff]  }
 0x761   :  { %v6110_v49 = vmax.f32 %v12439_v24, 0.0  ;;  %v8087_v22 = vmul.f32 0.0625, %v8001_v37  ;;  %v8024_v42 = vrot.slane %v8023_v6, 4  ;;  %9058 = vmatpush1.bf16.msra.mxu1 %v13470_v61  ;;  %v13478_v45 = vld [vmem:[%s20784_s15 + $0x44] ss:$16 sps:$4 sm:$0xff]  }
 0x762   :  { %v8051_v34 = vadd.f32 %v6109_v30, %v6105_v48  ;;  %v8088_v17 = vmul.f32 0.0625, %v8008_v3  ;;  %v8031_v28 = vrot.slane %v8030_v23, 4  ;;  %9059 = vmatprep.subr.bf16.mxu1 %v13475_v32  ;;  %v13481_v60 = vld [vmem:[%s20784_s15 + $0x64] ss:$16 sps:$4 sm:$0xff]   ;;  %v13479_v48 = vld [vmem:[%s20784_s15 + $0x60] ss:$16 sps:$4 sm:$0xff]  }
 0x763   :  { %v8058_v44 = vadd.f32 %v6110_v49, %v6106_v13  ;;  %v8025_v2 = vadd.f32 %v8024_v42, %v8023_v6  ;;  %v8147_v41 = vsel %vm6548_vm6, %v8087_v22, %v8146_v27  ;;  %v7839_v27 = vld [vmem:[%s20780_s1 + $0x10] sm:$0xff]  ;;  %v13544_v61 = vld [vmem:[%s20784_s15 + $0x10c] ss:$16 sps:$4 sm:$0xff]   ;;  %v13542_v56 = vld [vmem:[%s20784_s15 + $0x108] ss:$16 sps:$4 sm:$0xff]  }
 0x764   :  { %v8052_v39 = vrot.slane %v8051_v34, 4  ;;  %v8032_v55 = vadd.f32 %v8031_v28, %v8030_v23  ;;  %v8154_v5 = vsel %vm6548_vm6, %v8088_v17, %v8153_v54  ;;  %v13484_v24 = vld [vmem:[%s20784_s15 + $0x84] ss:$16 sps:$4 sm:$0xff]   ;;  %v13482_v37 = vld [vmem:[%s20784_s15 + $0x80] ss:$16 sps:$4 sm:$0xff]  }
 0x765   :  { %v8059_v11 = vrot.slane %v8058_v44, 4  ;;  %v8026_v59 = vrot.slane %v8025_v2, 2  ;;  %9060 = vmatpush1.bf16.msra.mxu1 %v13473_v62  ;;  %v13487_v6 = vld [vmem:[%s20784_s15 + $0xa4] ss:$16 sps:$4 sm:$0xff]   ;;  %v13485_v13 = vld [vmem:[%s20784_s15 + $0xa0] ss:$16 sps:$4 sm:$0xff]  }
 0x766   :  { %v8053_v31 = vadd.f32 %v8052_v39, %v8051_v34  ;;  %v8033_v57 = vrot.slane %v8032_v55, 2  ;;  %9061 = vmatprep.subr.bf16.mxu1 %v13478_v45  ;;  %v13490_v30 = vld [vmem:[%s20784_s15 + $0xc4] ss:$16 sps:$4 sm:$0xff]   ;;  %v13488_v3 = vld [vmem:[%s20784_s15 + $0xc0] ss:$16 sps:$4 sm:$0xff]  }
 0x767   :  { %v8060_v0 = vadd.f32 %v8059_v11, %v8058_v44  ;;  %v8027_v20 = vadd.f32 %v8026_v59, %v8025_v2  ;;  %v13493_v23 = vld [vmem:[%s20784_s15 + $0xe4] ss:$16 sps:$4 sm:$0xff]   ;;  %v13491_v49 = vld [vmem:[%s20784_s15 + $0xe0] ss:$16 sps:$4 sm:$0xff]   ;;  %v13547_v32 = vld [vmem:[%s20784_s15 + $0x12c] ss:$16 sps:$4 sm:$0xff]  }
 0x768   :  { %v8054_v29 = vrot.slane %v8053_v31, 2  ;;  %v8034_v38 = vadd.f32 %v8033_v57, %v8032_v55  ;;  %v13496_v54 = vld [vmem:[%s20784_s15 + $0x104] ss:$16 sps:$4 sm:$0xff]   ;;  %v13494_v22 = vld [vmem:[%s20784_s15 + $0x100] ss:$16 sps:$4 sm:$0xff]  }
 0x769   :  { %v8061_v43 = vrot.slane %v8060_v0, 2  ;;  %v8028_v51 = vrot.slane %v8027_v20, 1  ;;  %9062 = vmatpush1.bf16.msra.mxu1 %v13476_v7  ;;  %v13499_v42 = vld [vmem:[%s20784_s15 + $0x124] ss:$16 sps:$4 sm:$0xff]   ;;  %v13497_v34 = vld [vmem:[%s20784_s15 + $0x120] ss:$16 sps:$4 sm:$0xff]  }
 0x76a   :  { %v8055_v21 = vadd.f32 %v8054_v29, %v8053_v31  ;;  %v8035_v58 = vrot.slane %v8034_v38, 1  ;;  %9063 = vmatprep.subr.bf16.mxu1 %v13481_v60  ;;  %v13502_v17 = vld [vmem:[%s20784_s15 + $0x144] ss:$16 sps:$4 sm:$0xff]   ;;  %v13500_v28 = vld [vmem:[%s20784_s15 + $0x140] ss:$16 sps:$4 sm:$0xff]  }
 0x76b   :  { %v8062_v14 = vadd.f32 %v8061_v43, %v8060_v0  ;;  %v8029_v63 = vadd.f32 %v8028_v51, %v8027_v20  ;;  %v13505_v44 = vld [vmem:[%s20784_s15 + $0x164] ss:$16 sps:$4 sm:$0xff]   ;;  %v13503_v2 = vld [vmem:[%s20784_s15 + $0x160] ss:$16 sps:$4 sm:$0xff]   ;;  %v13520_v0 = vld [vmem:[%s20784_s15 + $0xc] ss:$16 sps:$4 sm:$0xff]  }
 0x76c   :  { %v8056_v50 = vrot.slane %v8055_v21, 1  ;;  %v8036_v46 = vadd.f32 %v8035_v58, %v8034_v38  ;;  %v13508_v39 = vld [vmem:[%s20784_s15 + $0x184] ss:$16 sps:$4 sm:$0xff]   ;;  %v13509_v11 = vld [vmem:[%s20784_s15 + $0x1a0] ss:$16 sps:$4 sm:$0xff]  }
 0x76d   :  { %v8063_v12 = vrot.slane %v8062_v14, 1  ;;  %v8091_v25 = vmul.f32 0.0625, %v8029_v63  ;;  %9064 = vmatpush1.bf16.msra.mxu1 %v13479_v48  ;;  %v13511_v55 = vld [vmem:[%s20784_s15 + $0x1a4] ss:$16 sps:$4 sm:$0xff]   ;;  %v13512_v59 = vld [vmem:[%s20784_s15 + $0x1c0] ss:$16 sps:$4 sm:$0xff]  }
 0x76e   :  { %v8057_v1 = vadd.f32 %v8056_v50, %v8055_v21  ;;  %v8092_v53 = vmul.f32 0.0625, %v8036_v46  ;;  %9065 = vmatprep.subr.bf16.mxu1 %v13484_v24  ;;  %v13517_v31 = vld [vmem:[%s20784_s15 + $0x1e4] ss:$16 sps:$4 sm:$0xff]   ;;  %v13515_v57 = vld [vmem:[%s20784_s15 + $0x1e0] ss:$16 sps:$4 sm:$0xff]  }
 0x76f   :  { %v8064_v10 = vadd.f32 %v8063_v12, %v8062_v14  ;;  %v8148_v4 = vsel %vm6550_vm7, %v8091_v25, %v8147_v41  ;;  %v13506_v41 = vld [vmem:[%s20784_s15 + $0x180] ss:$16 sps:$4 sm:$0xff]   ;;  %v13518_v25 = vld [vmem:[%s20784_s15 + $0x8] ss:$16 sps:$4 sm:$0xff]   ;;  %v13550_v45 = vld [vmem:[%s20784_s15 + $0x14c] ss:$16 sps:$4 sm:$0xff]  }
 0x770   :  { %v8095_v8 = vmul.f32 0.0625, %v8057_v1  ;;  %v8155_v16 = vsel %vm6550_vm7, %v8092_v53, %v8154_v5  ;;  %v13514_v5 = vld [vmem:[%s20784_s15 + $0x1c4] ss:$16 sps:$4 sm:$0xff]   ;;  %v8233_v20 = vld [vmem:[%s20785_s14] sm:$0x3] }
 0x771   :  { %v8096_v47 = vmul.f32 0.0625, %v8064_v10  ;;  %9066 = vmatpush1.bf16.msra.mxu1 %v13482_v37  ;;  %v8238_v29 = vrot.slane %v8233_v20, %v21518_v9  ;;  %v8242_v38 = vrot.slane %v8233_v20, %v21519_v26  ;;  %v13523_v53 = vld [vmem:[%s20784_s15 + $0x2c] ss:$16 sps:$4 sm:$0xff]   ;;  %v13521_v10 = vld [vmem:[%s20784_s15 + $0x28] ss:$16 sps:$4 sm:$0xff]  }
 0x772   :  { %v8149_v52 = vsel %vm6552_vm8, %v8095_v8, %v8148_v4  ;;  %9067 = vmatprep.subr.bf16.mxu1 %v13487_v6  ;;  %v13526_v8 = vld [vmem:[%s20784_s15 + $0x4c] ss:$16 sps:$4 sm:$0xff]   ;;  %v13545_v62 = vld [vmem:[%s20784_s15 + $0x128] ss:$16 sps:$4 sm:$0xff]  }
 0x773   :  { %v8156_v19 = vsel %vm6552_vm8, %v8096_v47, %v8155_v16  ;;  %v8163_v35 = vmul.f32 %v8149_v52, %v7839_v27  ;;  %v13524_v27 = vld [vmem:[%s20784_s15 + $0x48] ss:$16 sps:$4 sm:$0xff]   ;;  %v13529_v4 = vld [vmem:[%s20784_s15 + $0x6c] ss:$16 sps:$4 sm:$0xff]  }
 0x774   :  { %v8164_v33 = vmul.f32 %v8156_v19, %v7840_v40  ;;  %v13527_v47 = vld [vmem:[%s20784_s15 + $0x68] ss:$16 sps:$4 sm:$0xff]   ;;  %v13532_v40 = vld [vmem:[%s20784_s15 + $0x8c] ss:$16 sps:$4 sm:$0xff]  }
 0x775   :  { %v8167_v36 = vpack.c.bf16 %v8163_v35, %v8163_v35  ;;  %9068 = vmatpush1.bf16.msra.mxu1 %v13485_v13  ;;  %v13530_v16 = vld [vmem:[%s20784_s15 + $0x88] ss:$16 sps:$4 sm:$0xff]   ;;  %v13535_v52 = vld [vmem:[%s20784_s15 + $0xac] ss:$16 sps:$4 sm:$0xff]  }
 0x776   :  { %v8168_v18 = vpack.c.bf16 %v8164_v33, %v8164_v33  ;;  %9069 = vmatprep.subr.bf16.mxu1 %v13490_v30  ;;  %v13533_v19 = vld [vmem:[%s20784_s15 + $0xa8] ss:$16 sps:$4 sm:$0xff]   ;;  %v13538_v35 = vld [vmem:[%s20784_s15 + $0xcc] ss:$16 sps:$4 sm:$0xff]  }
 0x777   :  { %v13536_v33 = vld [vmem:[%s20784_s15 + $0xc8] ss:$16 sps:$4 sm:$0xff]   ;;  %v13553_v60 = vld [vmem:[%s20784_s15 + $0x16c] ss:$16 sps:$4 sm:$0xff]  }
 0x778   :  { %8638 = vmatprep.mubr.bf16.mxu0 %v8168_v18  ;;  %v13541_v18 = vld [vmem:[%s20784_s15 + $0xec] ss:$16 sps:$4 sm:$0xff]   ;;  %v13548_v7 = vld [vmem:[%s20784_s15 + $0x148] ss:$16 sps:$4 sm:$0xff]  }
 0x779   :  { %8639 = vmatmul.mubr.bf16.vlgmr.msra.gmra.mrb[144].mxu0 %v8167_v36  ;;  %9070 = vmatpush1.bf16.msra.mxu1 %v13488_v3  ;;  %v13539_v36 = vld [vmem:[%s20784_s15 + $0xe8] ss:$16 sps:$4 sm:$0xff]   ;;  %v13556_v24 = vld [vmem:[%s20784_s15 + $0x18c] ss:$16 sps:$4 sm:$0xff]  }
 0x77a   :  { %9071 = vmatprep.subr.bf16.mxu1 %v13493_v23  ;;  %v13551_v48 = vld [vmem:[%s20784_s15 + $0x168] ss:$16 sps:$4 sm:$0xff]   ;;  %v13559_v6 = vld [vmem:[%s20784_s15 + $0x1ac] ss:$16 sps:$4 sm:$0xff]  }
 0x77b   :  { %v13554_v37 = vld [vmem:[%s20784_s15 + $0x188] ss:$16 sps:$4 sm:$0xff]   ;;  %v13562_v30 = vld [vmem:[%s20784_s15 + $0x1cc] ss:$16 sps:$4 sm:$0xff]  }
 0x77c   :  { %v13557_v13 = vld [vmem:[%s20784_s15 + $0x1a8] ss:$16 sps:$4 sm:$0xff]   ;;  %v13565_v23 = vld [vmem:[%s20784_s15 + $0x1ec] ss:$16 sps:$4 sm:$0xff]  }
 0x77d   :  { %9072 = vmatpush1.bf16.msra.mxu1 %v13491_v49  ;;  %v13560_v3 = vld [vmem:[%s20784_s15 + $0x1c8] ss:$16 sps:$4 sm:$0xff]  }
 0x77e   :  { %9073 = vmatprep.subr.bf16.mxu1 %v13496_v54  ;;  %v13563_v49 = vld [vmem:[%s20784_s15 + $0x1e8] ss:$16 sps:$4 sm:$0xff]  }
 0x77f   :  { %v13566_v54 = vld [vmem:[%s20786_s17] ss:$8 sps:$4 sm:$0xff]  }
 0x780   :  { %v13590_v20 = vld [vmem:[%s20786_s17 + $0x80] ss:$8 sps:$4 sm:$0xff]  }
 0x781   :  { %9074 = vmatpush1.bf16.msra.mxu1 %v13494_v22  ;;  %v13568_v22 = vld [vmem:[%s20786_s17 + $0x4] ss:$8 sps:$4 sm:$0xff]  }
 0x782   :  { %9075 = vmatprep.subr.bf16.mxu1 %v13499_v42  ;;  %v13571_v42 = vld [vmem:[%s20786_s17 + $0x14] ss:$8 sps:$4 sm:$0xff]   ;;  %9911 = vmatprep.subr.bf16.mxu0 %v13568_v22 }
 0x783   :  { %9912 = vmatpush1.bf16.msra.mxu0 %v13566_v54 }
 0x784   :  { %9913 = vmatprep.subr.bf16.mxu0 %v13571_v42 }
 0x785   :  { %9076 = vmatpush1.bf16.msra.mxu1 %v13497_v34  ;;  %v13569_v34 = vld [vmem:[%s20786_s17 + $0x10] ss:$8 sps:$4 sm:$0xff]  }
 0x786   :  { %9077 = vmatprep.subr.bf16.mxu1 %v13502_v17  ;;  %v13574_v17 = vld [vmem:[%s20786_s17 + $0x24] ss:$8 sps:$4 sm:$0xff]  }
 0x787   :  { %9914 = vmatpush1.bf16.msra.mxu0 %v13569_v34 }
 0x788   :  { %9915 = vmatprep.subr.bf16.mxu0 %v13574_v17 }
 0x789   :  { %9078 = vmatpush1.bf16.msra.mxu1 %v13500_v28  ;;  %v13572_v28 = vld [vmem:[%s20786_s17 + $0x20] ss:$8 sps:$4 sm:$0xff]  }
 0x78a   :  { %9079 = vmatprep.subr.bf16.mxu1 %v13505_v44  ;;  %v13577_v44 = vld [vmem:[%s20786_s17 + $0x34] ss:$8 sps:$4 sm:$0xff]  }
 0x78b   :  { %9916 = vmatpush1.bf16.msra.mxu0 %v13572_v28 }
 0x78c   :  { %9917 = vmatprep.subr.bf16.mxu0 %v13577_v44 }
 0x78d   :  { %9080 = vmatpush1.bf16.msra.mxu1 %v13503_v2  ;;  %v13575_v2 = vld [vmem:[%s20786_s17 + $0x30] ss:$8 sps:$4 sm:$0xff]  }
 0x78e   :  { %9081 = vmatprep.subr.bf16.mxu1 %v13508_v39  ;;  %v13580_v39 = vld [vmem:[%s20786_s17 + $0x44] ss:$8 sps:$4 sm:$0xff]  }
 0x78f   :  { %9918 = vmatpush1.bf16.msra.mxu0 %v13575_v2 }
 0x790   :  { %9919 = vmatprep.subr.bf16.mxu0 %v13580_v39 }
 0x791   :  { %9082 = vmatpush1.bf16.msra.mxu1 %v13506_v41  ;;  %v13578_v41 = vld [vmem:[%s20786_s17 + $0x40] ss:$8 sps:$4 sm:$0xff]  }
 0x792   :  { %9083 = vmatprep.subr.bf16.mxu1 %v13511_v55  ;;  %v13581_v55 = vld [vmem:[%s20786_s17 + $0x50] ss:$8 sps:$4 sm:$0xff]  }
 0x793   :  { %9920 = vmatpush1.bf16.msra.mxu0 %v13578_v41 }
 0x795   :  { %9084 = vmatpush1.bf16.msra.mxu1 %v13509_v11  ;;  %v13583_v11 = vld [vmem:[%s20786_s17 + $0x54] ss:$8 sps:$4 sm:$0xff]  }
 0x796   :  { %9085 = vmatprep.subr.bf16.mxu1 %v13514_v5  ;;  %v13586_v5 = vld [vmem:[%s20786_s17 + $0x64] ss:$8 sps:$4 sm:$0xff]   ;;  %9921 = vmatprep.subr.bf16.mxu0 %v13583_v11 }
 0x797   :  { %9922 = vmatpush1.bf16.msra.mxu0 %v13581_v55 }
 0x798   :  { %9923 = vmatprep.subr.bf16.mxu0 %v13586_v5 }
 0x799   :  { %9086 = vmatpush1.bf16.msra.mxu1 %v13512_v59  ;;  %v13584_v59 = vld [vmem:[%s20786_s17 + $0x60] ss:$8 sps:$4 sm:$0xff]  }
 0x79a   :  { %9087 = vmatprep.subr.bf16.mxu1 %v13517_v31  ;;  %v13589_v31 = vld [vmem:[%s20786_s17 + $0x74] ss:$8 sps:$4 sm:$0xff]  }
 0x79b   :  { %9924 = vmatpush1.bf16.msra.mxu0 %v13584_v59 }
 0x79c   :  { %9925 = vmatprep.subr.bf16.mxu0 %v13589_v31 }
 0x79d   :  { %9088 = vmatpush1.bf16.msra.mxu1 %v13515_v57  ;;  %v13587_v57 = vld [vmem:[%s20786_s17 + $0x70] ss:$8 sps:$4 sm:$0xff]  }
 0x79e   :  { %9098 = vmatprep.subr.bf16.mxu1 %v13520_v0  ;;  %v13592_v0 = vld [vmem:[%s20786_s17 + $0x84] ss:$8 sps:$4 sm:$0xff]  }
 0x79f   :  { %9926 = vmatpush1.bf16.msra.mxu0 %v13587_v57 }
 0x7a0   :  { %9927 = vmatprep.subr.bf16.mxu0 %v13592_v0 }
 0x7a3   :  { %9928 = vmatpush1.bf16.msra.mxu0 %v13590_v20 }
 0x84c   :  { %v8640_v43 = vpop.f32.mrb[144].mxu0 }
 0x84d   :  { %v12442_v51 = vadd.f32 %v8640_v43, %v8238_v29  ;;  %v8642_v21 = vpop.f32.mrb[145].mxu0  ;;  %v13595_v29 = vld [vmem:[%s20786_s17 + $0x94] ss:$8 sps:$4 sm:$0xff]   ;;  %v13598_v43 = vld [vmem:[%s20786_s17 + $0xa4] ss:$8 sps:$4 sm:$0xff]  }
 0x84e   :  { %v12443_v58 = vadd.f32 %v8642_v21, %v8242_v38  ;;  %v8644_v14 = vpop.f32.mrb[146].mxu0  ;;  %v13593_v38 = vld [vmem:[%s20786_s17 + $0x90] ss:$8 sps:$4 sm:$0xff]   ;;  %9929 = vmatprep.subr.bf16.mxu0 %v13595_v29  ;;  %v13601_v21 = vld [vmem:[%s20786_s17 + $0xb4] ss:$8 sps:$4 sm:$0xff]  }
 0x84f   :  { %v8647_v63 = vmax.f32 %v12442_v51, 0.0  ;;  %v8645_v50 = vpop.f32.mrb[147].mxu0  ;;  %9930 = vmatpush1.bf16.msra.mxu0 %v13593_v38  ;;  %v13596_v51 = vld [vmem:[%s20786_s17 + $0xa0] ss:$8 sps:$4 sm:$0xff]  }
 0x850   :  { %v8648_v46 = vmax.f32 %v12443_v58, 0.0  ;;  %9931 = vmatprep.subr.bf16.mxu0 %v13598_v43  ;;  %v13599_v58 = vld [vmem:[%s20786_s17 + $0xb0] ss:$8 sps:$4 sm:$0xff]   ;;  %v8715_v14 = vld [vmem:[%s20787_s16] sm:$0xf] }
 0x851   :  { %v19092_v1 = vpack.c.bf16 %v8647_v63, %v8647_v63  ;;  %v13604_v63 = vld [vmem:[%s20786_s17 + $0xc4] ss:$8 sps:$4 sm:$0xff]   ;;  %v8720_v50 = vrot.slane %v8715_v14, %v21518_v9 }
 0x852   :  { %v8650_v12 = vpack.c.bf16 %v8648_v46, %v8648_v46  ;;  %v13602_v46 = vld [vmem:[%s20786_s17 + $0xc0] ss:$8 sps:$4 sm:$0xff]  }
 0x853   :  { %9932 = vmatpush1.bf16.msra.mxu0 %v13596_v51 }
 0x854   :  { %9089 = vmatprep.mubr.bf16.mxu1 %v8650_v12  ;;  %9933 = vmatprep.subr.bf16.mxu0 %v13601_v21 }
 0x855   :  { %9090 = vmatmul.mubr.bf16.vlgmr.msra.gmra.mrb[192].mxu1 %v19092_v1 }
 0x856   :  { %9099 = vmatpush1.bf16.msra.mxu1 %v13518_v25  ;;  %9130 = vmatprep.mubr.bf16.mxu1 %v8650_v12  ;;  %v8724_v12 = vrot.slane %v8715_v14, %v21519_v26  ;;  %v13607_v25 = vld [vmem:[%s20786_s17 + $0xd4] ss:$8 sps:$4 sm:$0xff]  }
 0x857   :  { %9100 = vmatprep.subr.bf16.mxu1 %v13523_v53  ;;  %9934 = vmatpush1.bf16.msra.mxu0 %v13599_v58 }
 0x858   :  { %9935 = vmatprep.subr.bf16.mxu0 %v13604_v63 }
 0x85a   :  { %9101 = vmatpush1.bf16.msra.mxu1 %v13521_v10 }
 0x85b   :  { %9102 = vmatprep.subr.bf16.mxu1 %v13526_v8  ;;  %9936 = vmatpush1.bf16.msra.mxu0 %v13602_v46  ;;  %v13605_v8 = vld [vmem:[%s20786_s17 + $0xd0] ss:$8 sps:$4 sm:$0xff]  }
 0x85c   :  { %9937 = vmatprep.subr.bf16.mxu0 %v13607_v25 }
 0x85e   :  { %9103 = vmatpush1.bf16.msra.mxu1 %v13524_v27 }
 0x85f   :  { %9104 = vmatprep.subr.bf16.mxu1 %v13529_v4  ;;  %9938 = vmatpush1.bf16.msra.mxu0 %v13605_v8 }
 0x862   :  { %9105 = vmatpush1.bf16.msra.mxu1 %v13527_v47  ;;  %v13610_v47 = vld [vmem:[%s20786_s17 + $0xe4] ss:$8 sps:$4 sm:$0xff]  }
 0x863   :  { %9106 = vmatprep.subr.bf16.mxu1 %v13532_v40  ;;  %9939 = vmatprep.subr.bf16.mxu0 %v13610_v47 }
 0x866   :  { %9107 = vmatpush1.bf16.msra.mxu1 %v13530_v16 }
 0x867   :  { %9108 = vmatprep.subr.bf16.mxu1 %v13535_v52 }
 0x86a   :  { %9109 = vmatpush1.bf16.msra.mxu1 %v13533_v19  ;;  %v13608_v19 = vld [vmem:[%s20786_s17 + $0xe0] ss:$8 sps:$4 sm:$0xff]  }
 0x86b   :  { %9110 = vmatprep.subr.bf16.mxu1 %v13538_v35  ;;  %v13613_v35 = vld [vmem:[%s20786_s17 + $0xf4] ss:$8 sps:$4 sm:$0xff]   ;;  %9940 = vmatpush1.bf16.msra.mxu0 %v13608_v19 }
 0x86c   :  { %9941 = vmatprep.subr.bf16.mxu0 %v13613_v35  ;;  %v21584_v35 = vld [vmem:[#allocation26_spill] sm:$0xff] }
 0x86e   :  { %9111 = vmatpush1.bf16.msra.mxu1 %v13536_v33  ;;  %v13611_v33 = vld [vmem:[%s20786_s17 + $0xf0] ss:$8 sps:$4 sm:$0xff]  }
 0x86f   :  { %9112 = vmatprep.subr.bf16.mxu1 %v13541_v18  ;;  %v13616_v18 = vld [vmem:[%s20786_s17 + $0x104] ss:$8 sps:$4 sm:$0xff]   ;;  %9942 = vmatpush1.bf16.msra.mxu0 %v13611_v33  ;;  %v21585_v33 = vunpack.c.h.bf16 %v21584_v35 }
 0x870   :  { %10024 = vmatprep.subr.bf16.mxu0 %v13616_v18 }
 0x872   :  { %9113 = vmatpush1.bf16.msra.mxu1 %v13539_v36 }
 0x873   :  { %9114 = vmatprep.subr.bf16.mxu1 %v13544_v61 }
 0x876   :  { %9115 = vmatpush1.bf16.msra.mxu1 %v13542_v56 }
 0x877   :  { %9116 = vmatprep.subr.bf16.mxu1 %v13547_v32 }
 0x87a   :  { %9117 = vmatpush1.bf16.msra.mxu1 %v13545_v62 }
 0x87b   :  { %9118 = vmatprep.subr.bf16.mxu1 %v13550_v45 }
 0x87e   :  { %9119 = vmatpush1.bf16.msra.mxu1 %v13548_v7 }
 0x87f   :  { %9120 = vmatprep.subr.bf16.mxu1 %v13553_v60 }
 0x882   :  { %9121 = vmatpush1.bf16.msra.mxu1 %v13551_v48  ;;  %v21571_v48 = vld [vmem:[#allocation8_spill] sm:$0xff] }
 0x883   :  { %9122 = vmatprep.subr.bf16.mxu1 %v13556_v24  ;;  %v8728_v24 = vrot.slane %v8715_v14, %v21571_v48 }
 0x886   :  { %9123 = vmatpush1.bf16.msra.mxu1 %v13554_v37  ;;  %v21572_v37 = vld [vmem:[#allocation9_spill] sm:$0xff] }
 0x887   :  { %9124 = vmatprep.subr.bf16.mxu1 %v13559_v6  ;;  %v8732_v6 = vrot.slane %v8715_v14, %v21572_v37 }
 0x88a   :  { %9125 = vmatpush1.bf16.msra.mxu1 %v13557_v13 }
 0x88b   :  { %9126 = vmatprep.subr.bf16.mxu1 %v13562_v30 }
 0x88e   :  { %9127 = vmatpush1.bf16.msra.mxu1 %v13560_v3 }
 0x88f   :  { %9128 = vmatprep.subr.bf16.mxu1 %v13565_v23 }
 0x892   :  { %9129 = vmatpush1.bf16.msra.mxu1 %v13563_v49 }
 0x895   :  { %9131 = vmatmul.mubr.bf16.vlgmr.msra.gmra.mrb[196].mxu1 %v19092_v1 }
 0x928   :  { %v9091_v1 = vpop.f32.mrb[192].mxu1 }
 0x929   :  { %v9092_v53 = vadd.f32 %v9091_v1, %v8720_v50  ;;  %v9093_v10 = vpop.f32.mrb[193].mxu1 }
 0x92a   :  { %v9094_v27 = vadd.f32 %v9093_v10, %v8724_v12  ;;  %v9095_v4 = vpop.f32.mrb[194].mxu1  ;;  %v21573_v12 = vld [vmem:[#allocation11_spill] sm:$0xff] }
 0x92b   :  { %v12007_v40 = vmul.f32 -1.442695, %v9092_v53  ;;  %v9096_v16 = vpop.f32.mrb[195].mxu1  ;;  %v21574_v25 = vunpack.c.h.bf16 %v21573_v12  ;;  %v21575_v53 = vld [vmem:[#allocation10_spill] sm:$0xff] }
 0x92c   :  { %v12008_v52 = vmul.f32 -1.442695, %v9094_v27  ;;  %v21576_v10 = vunpack.c.h.bf16 %v21575_v53  ;;  %v21578_v27 = vunpack.c.l.bf16 %v21573_v12  ;;  %v21579_v47 = vunpack.c.l.bf16 %v21575_v53  ;;  %v21581_v16 = vld [vmem:[#allocation27_spill] sm:$0xff]  ;;  %v21604_v12 = vld [vmem:[#allocation16_spill] sm:$0xff] }
 0x92d   :  { %13758 = vpow2.f32 %v12007_v40 }
 0x92e   :  { %13760 = vpow2.f32 %v12008_v52  ;;  %v21582_v52 = vunpack.c.h.bf16 %v21581_v16 }
 0x937   :  { %v13759_v36 = vpop.eup %13758 }
 0x938   :  { %v13761_v61 = vpop.eup %13760  ;;  %v9151_v56 = vadd.f32 1.0, %v13759_v36 }
 0x939   :  { %v9152_v32 = vadd.f32 1.0, %v13761_v61 }
 0x93a   :  { %13762 = vrcp.f32 %v9151_v56  ;;  %v13614_v56 = vld [vmem:[%s20786_s17 + $0x100] ss:$8 sps:$4 sm:$0xff]  }
 0x93b   :  { %13764 = vrcp.f32 %v9152_v32  ;;  %v13619_v32 = vld [vmem:[%s20786_s17 + $0x114] ss:$8 sps:$4 sm:$0xff]  }
 0x944   :  { %v13763_v62 = vpop.eup %13762 }
 0x945   :  { %v13765_v45 = vpop.eup %13764 }
 0x946   :  { %v9167_v7 = vcombine.low %v13763_v62, %v13765_v45  ;;  %v9168_v60 = vcombine.high %v13763_v62, %v13765_v45 }
 0x948   :  { %v9177_v11 = vrot.slane %v9167_v7, %v18745_v15  ;;  %v19294_v5 = vrot.slane %v9168_v60, %v18745_v15 }
 0x968   :  { %v9132_v13 = vpop.f32.mrb[196].mxu1 }
 0x969   :  { %v9133_v30 = vadd.f32 %v9132_v13, %v8728_v24  ;;  %v9134_v3 = vpop.f32.mrb[197].mxu1  ;;  %v13617_v24 = vld [vmem:[%s20786_s17 + $0x110] ss:$8 sps:$4 sm:$0xff]  }
 0x96a   :  { %v9135_v23 = vadd.f32 %v9134_v3, %v8732_v6  ;;  %v9136_v49 = vpop.f32.mrb[198].mxu1  ;;  %v21587_v6 = vunpack.c.l.bf16 %v21581_v16  ;;  %v13631_v16 = vld [vmem:[%s20786_s17 + $0x154] ss:$8 sps:$4 sm:$0xff]  }
 0x96b   :  { %v12009_v54 = vmul.f32 -1.442695, %v9133_v30  ;;  %v9137_v22 = vpop.f32.mrb[199].mxu1  ;;  %v21589_v30 = vunpack.c.l.bf16 %v21584_v35  ;;  %v21591_v49 = vld [vmem:[#allocation14_spill] sm:$0xff] }
 0x96c   :  { %v12010_v42 = vmul.f32 -1.442695, %v9135_v23  ;;  %v13622_v23 = vld [vmem:[%s20786_s17 + $0x124] ss:$8 sps:$4 sm:$0xff]  }
 0x96d   :  { %13766 = vpow2.f32 %v12009_v54  ;;  %v21592_v54 = vunpack.c.h.bf16 %v21591_v49 }
 0x96e   :  { %13768 = vpow2.f32 %v12010_v42  ;;  %v21594_v42 = vld [vmem:[#allocation12_spill] sm:$0xff] }
 0x977   :  { %v13767_v34 = vpop.eup %13766 }
 0x978   :  { %v13769_v17 = vpop.eup %13768  ;;  %v9153_v28 = vadd.f32 1.0, %v13767_v34  ;;  %v21595_v34 = vunpack.c.h.bf16 %v21594_v42 }
 0x979   :  { %v9154_v44 = vadd.f32 1.0, %v13769_v17 }
 0x97a   :  { %13770 = vrcp.f32 %v9153_v28 }
 0x97b   :  { %13772 = vrcp.f32 %v9154_v44  ;;  %v13620_v44 = vld [vmem:[%s20786_s17 + $0x120] ss:$8 sps:$4 sm:$0xff]  }
 0x984   :  { %v13771_v2 = vpop.eup %13770 }
 0x985   :  { %v13773_v39 = vpop.eup %13772 }
 0x986   :  { %v9169_v41 = vcombine.low %v13771_v2, %v13773_v39  ;;  %v9170_v55 = vcombine.high %v13771_v2, %v13773_v39  ;;  %v13625_v39 = vld [vmem:[%s20786_s17 + $0x134] ss:$8 sps:$4 sm:$0xff]  }
 0x988   :  { %v9191_v59 = vrot.slane %v9169_v41, %v18745_v15  ;;  %v19298_v31 = vrot.slane %v9170_v55, %v18745_v15 }
 0x98a   :  { %v9199_v57 = vcombine.low %v9177_v11, %v9191_v59  ;;  %v9200_v0 = vcombine.high %v9177_v11, %v9191_v59  ;;  %v9201_v20 = vcombine.low %v19294_v5, %v19298_v31  ;;  %v9202_v29 = vcombine.high %v19294_v5, %v19298_v31  ;;  %v13634_v5 = vld [vmem:[%s20786_s17 + $0x164] ss:$8 sps:$4 sm:$0xff]  }
 0x98b   :  { %v21611_v31 = vld [vmem:[#allocation22_spill] sm:$0xff] }
 0x98c   :  { %v9209_v38 = vrot.slane %v9199_v57, %v18745_v15  ;;  %v9223_v43 = vrot.slane %v9200_v0, %v18745_v15  ;;  %v9216_v59 = vrot.slane %v9201_v20, %v18745_v15  ;;  %v13623_v57 = vld [vmem:[%s20786_s17 + $0x130] ss:$8 sps:$4 sm:$0xff]   ;;  %v21597_v0 = vunpack.c.l.bf16 %v21591_v49  ;;  %v13628_v20 = vld [vmem:[%s20786_s17 + $0x144] ss:$8 sps:$4 sm:$0xff]  }
 0x98e   :  { %v19306_v51 = vadd.f32 1.0, %v9209_v38  ;;  %v19308_v21 = vadd.f32 1.0, %v9223_v43  ;;  %v9231_v58 = vcombine.high %v9209_v38, %v9209_v38  ;;  %v9233_v60 = vcombine.high %v9223_v43, %v9223_v43 }
 0x98f   :  { %v21599_v43 = vunpack.c.l.bf16 %v21594_v42 }
 0x990   :  { %v9266_v14 = vrot.slane %v19306_v51, %v21519_v26  ;;  %v9262_v63 = vrot.slane %v19306_v51, %v21518_v9  ;;  %v9282_v50 = vrot.slane %v19308_v21, %v21519_v26  ;;  %v19316_v46 = vadd.f32 1.0, %v9231_v58 }
 0x991   :  { %v9278_v62 = vrot.slane %v19308_v21, %v21518_v9  ;;  %v19380_v28 = vadd.f32 1.0, %v9233_v60  ;;  %v21614_v60 = vld [vmem:[#allocation20_spill] sm:$0xff] }
 0x992   :  { %v19320_v1 = vmul.f32 %v9266_v14, %v21574_v25  ;;  %v19324_v8 = vmul.f32 %v9266_v14, %v21576_v10  ;;  %v19328_v4 = vmul.f32 %v9262_v63, %v21578_v27  ;;  %v19332_v40 = vmul.f32 %v9262_v63, %v21579_v47  ;;  %v21601_v14 = vld [vmem:[#allocation18_spill] sm:$0xff] }
 0x993   :  { %v19336_v19 = vmul.f32 %v9282_v50, %v21582_v52  ;;  %v19340_v18 = vmul.f32 %v9282_v50, %v21585_v33  ;;  %v9298_v7 = vrot.slane %v19316_v46, %v21519_v26  ;;  %v19363_v13 = vmul.f32 %v9278_v62, %v21587_v6  ;;  %v13626_v27 = vld [vmem:[%s20786_s17 + $0x140] ss:$8 sps:$4 sm:$0xff]  }
 0x994   :  { %21577 = vst [vmem:[#allocation106_spill] sm:$0xff] %v19324_v8  ;;  %21580 = vst [vmem:[#allocation110_spill] sm:$0xff] %v19332_v40  ;;  %v9484_v36 = vpack.c.bf16 %v19324_v8, %v19320_v1  ;;  %v9483_v61 = vpack.c.bf16 %v19332_v40, %v19328_v4  ;;  %v19367_v3 = vmul.f32 %v9278_v62, %v21589_v30  ;;  %v21602_v63 = vunpack.c.h.bf16 %v21601_v14 }
 0x995   :  { %21583 = vst [vmem:[#allocation114_spill] sm:$0xff] %v19336_v19  ;;  %21586 = vst [vmem:[#allocation119_spill] sm:$0xff] %v19340_v18  ;;  %v9488_v45 = vpack.c.bf16 %v19340_v18, %v19336_v19  ;;  %v19374_v22 = vmul.f32 %v9298_v7, %v21592_v54  ;;  %v19378_v17 = vmul.f32 %v9298_v7, %v21595_v34  ;;  %v21605_v25 = vunpack.c.h.bf16 %v21604_v12  ;;  %v13637_v54 = vld [vmem:[%s20786_s17 + $0x174] ss:$8 sps:$4 sm:$0xff]  }
 0x996   :  { %9943 = vmatprep.mubr.bf16.mxu0 %v9484_v36  ;;  %21588 = vst [vmem:[#allocation122_spill] sm:$0xff] %v19363_v13  ;;  %21590 = vst [vmem:[#allocation127_spill] sm:$0xff] %v19367_v3  ;;  %v9487_v2 = vpack.c.bf16 %v19367_v3, %v19363_v13  ;;  %v9294_v41 = vrot.slane %v19316_v46, %v21518_v9  ;;  %v9314_v11 = vrot.slane %v19380_v28, %v21519_v26 }
 0x997   :  { %9944 = vmatmul.mubr.bf16.vlgmr.msra.gmra.mrb[148].mxu0 %v9483_v61  ;;  %21593 = vst [vmem:[#allocation130_spill] sm:$0xff] %v19374_v22  ;;  %21596 = vst [vmem:[#allocation113_spill] sm:$0xff] %v19378_v17  ;;  %v9492_v55 = vpack.c.bf16 %v19378_v17, %v19374_v22  ;;  %v19419_v10 = vadd.f32 1.0, %v9216_v59  ;;  %v9310_v52 = vrot.slane %v19380_v28, %v21518_v9  ;;  %v13629_v61 = vld [vmem:[%s20786_s17 + $0x150] ss:$8 sps:$4 sm:$0xff]   ;;  %v21609_v62 = vunpack.c.l.bf16 %v21604_v12 }
 0x998   :  { %9953 = vmatprep.mubr.bf16.mxu0 %v9488_v45  ;;  %10025 = vmatpush1.bf16.msra.mxu0 %v13614_v56  ;;  %v19402_v38 = vmul.f32 %v9294_v41, %v21597_v0  ;;  %v19406_v58 = vmul.f32 %v9294_v41, %v21599_v43  ;;  %v19413_v50 = vmul.f32 %v9314_v11, %v21602_v63  ;;  %v21607_v56 = vunpack.c.l.bf16 %v21601_v14  ;;  %v21621_v0 = vld [vmem:[#allocation33_spill] sm:$0xff]  ;;  %v21624_v14 = vld [vmem:[#allocation34_spill] sm:$0xff] }
 0x999   :  { %10026 = vmatprep.subr.bf16.mxu0 %v13619_v32  ;;  %v19417_v53 = vmul.f32 %v9314_v11, %v21605_v25  ;;  %v9330_v33 = vrot.slane %v19419_v10, %v21519_v26  ;;  %v9230_v36 = vrot.slane %v9202_v29, %v18745_v15  ;;  %v19448_v45 = vmul.f32 %v9310_v52, %v21609_v62 }
 0x99a   :  { %21598 = vst [vmem:[#allocation121_spill] sm:$0xff] %v19402_v38  ;;  %21600 = vst [vmem:[#allocation129_spill] sm:$0xff] %v19406_v58  ;;  %v9491_v47 = vpack.c.bf16 %v19406_v58, %v19402_v38  ;;  %v19444_v32 = vmul.f32 %v9310_v52, %v21607_v56  ;;  %v21612_v29 = vunpack.c.h.bf16 %v21611_v31  ;;  %v9326_v42 = vrot.slane %v19419_v10, %v21518_v9  ;;  %v13641_v56 = vld [vmem:[%s20786_s17 + $0x190] ss:$8 sps:$4 sm:$0xff]  }
 0x99b   :  { %21603 = vst [vmem:[#allocation68_spill] sm:$0xff] %v19413_v50  ;;  %21606 = vst [vmem:[#allocation99_spill] sm:$0xff] %v19417_v53  ;;  %v9496_v35 = vpack.c.bf16 %v19417_v53, %v19413_v50  ;;  %v19461_v30 = vadd.f32 1.0, %v9230_v36  ;;  %v21617_v41 = vunpack.c.l.bf16 %v21611_v31  ;;  %v21619_v11 = vunpack.c.l.bf16 %v21614_v60 }
 0x99c   :  { %10027 = vmatpush1.bf16.msra.mxu0 %v13617_v24  ;;  %21608 = vst [vmem:[#allocation43_spill] sm:$0xff] %v19444_v32  ;;  %21610 = vst [vmem:[#allocation37_spill] sm:$0xff] %v19448_v45  ;;  %v19455_v7 = vmul.f32 %v9330_v33, %v21612_v29  ;;  %v21615_v24 = vunpack.c.h.bf16 %v21614_v60  ;;  %v9495_v49 = vpack.c.bf16 %v19448_v45, %v19444_v32  ;;  %v21622_v43 = vunpack.c.h.bf16 %v21621_v0  ;;  %v21631_v60 = vld [vmem:[#allocation41_spill] sm:$0xff] }
 0x99d   :  { %10028 = vmatprep.subr.bf16.mxu0 %v13622_v23  ;;  %v13632_v23 = vld [vmem:[%s20786_s17 + $0x160] ss:$8 sps:$4 sm:$0xff]   ;;  %v21625_v63 = vunpack.c.h.bf16 %v21624_v14  ;;  %v9342_v52 = vrot.slane %v19461_v30, %v21518_v9  ;;  %v21627_v62 = vunpack.c.l.bf16 %v21621_v0  ;;  %v21629_v31 = vunpack.c.l.bf16 %v21624_v14  ;;  %v13647_v0 = vld [vmem:[%s20786_s17 + $0x1b0] ss:$8 sps:$4 sm:$0xff]  }
 0x99e   :  { %21613 = vst [vmem:[#allocation65_spill] sm:$0xff] %v19455_v7  ;;  %v19459_v6 = vmul.f32 %v9330_v33, %v21615_v24  ;;  %v21632_v24 = vunpack.c.h.bf16 %v21631_v60 }
 0x99f   :  { %9954 = vmatmul.mubr.bf16.gmra.mrb[152].mxu0 %v9487_v2  ;;  %v9232_v2 = vcombine.high %v9216_v59, %v9216_v59  ;;  %v13640_v59 = vld [vmem:[%s20786_s17 + $0x184] ss:$8 sps:$4 sm:$0xff]   ;;  %v19524_v29 = vmul.f32 %v9342_v52, %v21629_v31 }
 0x9a0   :  { %9963 = vmatprep.mubr.bf16.mxu0 %v9492_v55  ;;  %10029 = vmatpush1.bf16.msra.mxu0 %v13620_v44  ;;  %21616 = vst [vmem:[#allocation66_spill] sm:$0xff] %v19459_v6  ;;  %v9500_v34 = vpack.c.bf16 %v19459_v6, %v19455_v7  ;;  %v9346_v44 = vrot.slane %v19461_v30, %v21519_v26 }
 0x9a1   :  { %10030 = vmatprep.subr.bf16.mxu0 %v13625_v39  ;;  %v13635_v39 = vld [vmem:[%s20786_s17 + $0x170] ss:$8 sps:$4 sm:$0xff]   ;;  %v19482_v55 = vmul.f32 %v9326_v42, %v21617_v41  ;;  %v19499_v25 = vadd.f32 1.0, %v9232_v2  ;;  %21630 = vst [vmem:[#allocation74_spill] sm:$0xff] %v19524_v29 }
 0x9a2   :  { %v19497_v12 = vmul.f32 %v9346_v44, %v21625_v63 }
 0x9a3   :  { %21618 = vst [vmem:[#allocation131_spill] sm:$0xff] %v19482_v55  ;;  %v9362_v33 = vrot.slane %v19499_v25, %v21519_v26  ;;  %v9358_v41 = vrot.slane %v19499_v25, %v21518_v9 }
 0x9a4   :  { %10031 = vmatpush1.bf16.msra.mxu0 %v13623_v57  ;;  %v19486_v57 = vmul.f32 %v9326_v42, %v21619_v11  ;;  %21626 = vst [vmem:[#allocation7_spill] sm:$0xff] %v19497_v12 }
 0x9a5   :  { %10032 = vmatprep.subr.bf16.mxu0 %v13628_v20  ;;  %v19493_v20 = vmul.f32 %v9346_v44, %v21622_v43  ;;  %v13644_v44 = vld [vmem:[%s20786_s17 + $0x1a0] ss:$8 sps:$4 sm:$0xff]   ;;  %v21637_v43 = vunpack.c.l.bf16 %v21631_v60 }
 0x9a6   :  { %21620 = vst [vmem:[#allocation132_spill] sm:$0xff] %v19486_v57 }
 0x9a7   :  { %9964 = vmatmul.mubr.bf16.gmra.mrb[156].mxu0 %v9491_v47  ;;  %21623 = vst [vmem:[#allocation6_spill] sm:$0xff] %v19493_v20  ;;  %v9499_v47 = vpack.c.bf16 %v19486_v57, %v19482_v55  ;;  %v19558_v14 = vmul.f32 %v9358_v41, %v21637_v43 }
 0x9a8   :  { %9973 = vmatprep.mubr.bf16.mxu0 %v9496_v35  ;;  %10033 = vmatpush1.bf16.msra.mxu0 %v13626_v27  ;;  %v13638_v27 = vld [vmem:[%s20786_s17 + $0x180] ss:$8 sps:$4 sm:$0xff]   ;;  %v9504_v35 = vpack.c.bf16 %v19497_v12, %v19493_v20 }
 0x9a9   :  { %10034 = vmatprep.subr.bf16.mxu0 %v13631_v16  ;;  %v13643_v16 = vld [vmem:[%s20786_s17 + $0x194] ss:$8 sps:$4 sm:$0xff]   ;;  %21638 = vst [vmem:[#allocation81_spill] sm:$0xff] %v19558_v14 }
 0x9ac   :  { %10035 = vmatpush1.bf16.msra.mxu0 %v13629_v61  ;;  %v9234_v61 = vcombine.high %v9230_v36, %v9230_v36  ;;  %v13646_v36 = vld [vmem:[%s20786_s17 + $0x1a4] ss:$8 sps:$4 sm:$0xff]  }
 0x9ad   :  { %10036 = vmatprep.subr.bf16.mxu0 %v13634_v5  ;;  %v19520_v5 = vmul.f32 %v9342_v52, %v21627_v62  ;;  %v13650_v62 = vld [vmem:[%s20786_s17 + $0x1c0] ss:$8 sps:$4 sm:$0xff]  }
 0x9af   :  { %9974 = vmatmul.mubr.bf16.gmra.mrb[160].mxu0 %v9495_v49  ;;  %21628 = vst [vmem:[#allocation5_spill] sm:$0xff] %v19520_v5  ;;  %v21634_v49 = vld [vmem:[#allocation42_spill] sm:$0xff]  ;;  %v9503_v2 = vpack.c.bf16 %v19524_v29, %v19520_v5 }
 0x9b0   :  { %9983 = vmatprep.mubr.bf16.mxu0 %v9500_v34  ;;  %10037 = vmatpush1.bf16.msra.mxu0 %v13632_v23  ;;  %v19531_v23 = vmul.f32 %v9362_v33, %v21632_v24  ;;  %v19537_v34 = vadd.f32 1.0, %v9234_v61  ;;  %v21639_v63 = vunpack.c.l.bf16 %v21634_v49 }
 0x9b1   :  { %10038 = vmatprep.subr.bf16.mxu0 %v13637_v54  ;;  %v21635_v54 = vunpack.c.h.bf16 %v21634_v49  ;;  %v9274_v49 = vrot.slane %v19306_v51, %v21572_v37 }
 0x9b2   :  { %21633 = vst [vmem:[#allocation75_spill] sm:$0xff] %v19531_v23  ;;  %v9374_v60 = vrot.slane %v19537_v34, %v21518_v9 }
 0x9b3   :  { %v19535_v42 = vmul.f32 %v9362_v33, %v21635_v54  ;;  %v21644_v33 = vld [vmem:[#allocation50_spill] sm:$0xff] }
 0x9b4   :  { %10039 = vmatpush1.bf16.msra.mxu0 %v13635_v39  ;;  %v13649_v39 = vld [vmem:[%s20786_s17 + $0x1b4] ss:$8 sps:$4 sm:$0xff]   ;;  %v21645_v61 = vunpack.c.h.bf16 %v21644_v33  ;;  %v13653_v54 = vld [vmem:[%s20786_s17 + $0x1d0] ss:$8 sps:$4 sm:$0xff]  }
 0x9b5   :  { %10040 = vmatprep.subr.bf16.mxu0 %v13640_v59  ;;  %21636 = vst [vmem:[#allocation91_spill] sm:$0xff] %v19535_v42  ;;  %v9508_v11 = vpack.c.bf16 %v19535_v42, %v19531_v23  ;;  %v9378_v59 = vrot.slane %v19537_v34, %v21519_v26 }
 0x9b7   :  { %9984 = vmatmul.mubr.bf16.gmra.mrb[164].mxu0 %v9499_v47  ;;  %v13652_v47 = vld [vmem:[%s20786_s17 + $0x1c4] ss:$8 sps:$4 sm:$0xff]  }
 0x9b8   :  { %9993 = vmatprep.mubr.bf16.mxu0 %v9504_v35  ;;  %10041 = vmatpush1.bf16.msra.mxu0 %v13638_v27  ;;  %v19562_v27 = vmul.f32 %v9358_v41, %v21639_v63  ;;  %v21653_v63 = vld [vmem:[#allocation24_spill] sm:$0xff] }
 0x9b9   :  { %10042 = vmatprep.subr.bf16.mxu0 %v13643_v16  ;;  %v21641_v16 = vld [vmem:[#allocation49_spill] sm:$0xff] }
 0x9ba   :  { %21640 = vst [vmem:[#allocation82_spill] sm:$0xff] %v19562_v27  ;;  %v21642_v52 = vunpack.c.h.bf16 %v21641_v16  ;;  %v9507_v31 = vpack.c.bf16 %v19562_v27, %v19558_v14 }
 0x9bc   :  { %10043 = vmatpush1.bf16.msra.mxu0 %v13641_v56  ;;  %v19569_v35 = vmul.f32 %v9378_v59, %v21642_v52  ;;  %v19573_v56 = vmul.f32 %v9378_v59, %v21645_v61  ;;  %v21651_v59 = vld [vmem:[#allocation25_spill] sm:$0xff]  ;;  %v13661_v61 = vld [vmem:[%s20786_s17 + $0x1f4] ss:$8 sps:$4 sm:$0xff]  }
 0x9bd   :  { %10044 = vmatprep.subr.bf16.mxu0 %v13646_v36  ;;  %v13655_v36 = vld [vmem:[%s20786_s17 + $0x1d4] ss:$8 sps:$4 sm:$0xff]  }
 0x9be   :  { %21643 = vst [vmem:[#allocation100_spill] sm:$0xff] %v19569_v35  ;;  %21646 = vst [vmem:[#allocation105_spill] sm:$0xff] %v19573_v56  ;;  %v9512_v24 = vpack.c.bf16 %v19573_v56, %v19569_v35 }
 0x9bf   :  { %9994 = vmatmul.mubr.bf16.gmra.mrb[168].mxu0 %v9503_v2 }
 0x9c0   :  { %10003 = vmatprep.mubr.bf16.mxu0 %v9508_v11  ;;  %10045 = vmatpush1.bf16.msra.mxu0 %v13644_v44  ;;  %v21647_v44 = vunpack.c.l.bf16 %v21641_v16  ;;  %v13658_v11 = vld [vmem:[%s20786_s17 + $0x1e4] ss:$8 sps:$4 sm:$0xff]   ;;  %v13656_v16 = vld [vmem:[%s20786_s17 + $0x1e0] ss:$8 sps:$4 sm:$0xff]  }
 0x9c1   :  { %10046 = vmatprep.subr.bf16.mxu0 %v13649_v39  ;;  %v21649_v39 = vunpack.c.l.bf16 %v21644_v33 }
 0x9c2   :  { %v19594_v2 = vmul.f32 %v9374_v60, %v21647_v44  ;;  %v21659_v44 = vld [vmem:[#allocation15_spill] sm:$0xff] }
 0x9c3   :  { %v19598_v41 = vmul.f32 %v9374_v60, %v21649_v39  ;;  %v13659_v60 = vld [vmem:[%s20786_s17 + $0x1f0] ss:$8 sps:$4 sm:$0xff]   ;;  %v21660_v39 = vunpack.c.h.bf16 %v21659_v44 }
 0x9c4   :  { %10047 = vmatpush1.bf16.msra.mxu0 %v13647_v0  ;;  %21648 = vst [vmem:[#allocation92_spill] sm:$0xff] %v19594_v2  ;;  %v21652_v0 = vunpack.c.h.bf16 %v21651_v59 }
 0x9c5   :  { %10048 = vmatprep.subr.bf16.mxu0 %v13652_v47  ;;  %21650 = vst [vmem:[#allocation98_spill] sm:$0xff] %v19598_v41  ;;  %v21654_v47 = vunpack.c.h.bf16 %v21653_v63  ;;  %v9511_v33 = vpack.c.bf16 %v19598_v41, %v19594_v2 }
 0x9c6   :  { %v19605_v43 = vmul.f32 %v9274_v49, %v21652_v0  ;;  %v21662_v0 = vld [vmem:[#allocation13_spill] sm:$0xff] }
 0x9c7   :  { %10004 = vmatmul.mubr.bf16.gmra.mrb[172].mxu0 %v9507_v31  ;;  %v19609_v52 = vmul.f32 %v9274_v49, %v21654_v47  ;;  %v21663_v47 = vunpack.c.h.bf16 %v21662_v0 }
 0x9c8   :  { %10013 = vmatprep.mubr.bf16.mxu0 %v9512_v24  ;;  %10049 = vmatpush1.bf16.msra.mxu0 %v13650_v62  ;;  %v9270_v62 = vrot.slane %v19306_v51, %v21571_v48  ;;  %v21656_v24 = vunpack.c.l.bf16 %v21651_v59  ;;  %v21657_v51 = vunpack.c.l.bf16 %v21653_v63  ;;  %v9286_v59 = vrot.slane %v19308_v21, %v21571_v48 }
 0x9c9   :  { %10050 = vmatprep.subr.bf16.mxu0 %v13655_v36  ;;  %21655 = vst [vmem:[#allocation8_spill] sm:$0xff] %v19609_v52  ;;  %v9486_v31 = vpack.c.bf16 %v19609_v52, %v19605_v43  ;;  %v9290_v36 = vrot.slane %v19308_v21, %v21572_v37  ;;  %v21672_v21 = vld [vmem:[#allocation17_spill] sm:$0xff] }
 0x9ca   :  { %v19630_v49 = vmul.f32 %v9270_v62, %v21656_v24  ;;  %v21669_v24 = vld [vmem:[#allocation19_spill] sm:$0xff] }
 0x9cc   :  { %10051 = vmatpush1.bf16.msra.mxu0 %v13653_v54  ;;  %v19634_v54 = vmul.f32 %v9270_v62, %v21657_v51  ;;  %v21665_v62 = vunpack.c.l.bf16 %v21659_v44  ;;  %v21670_v51 = vunpack.c.h.bf16 %v21669_v24  ;;  %v9302_v44 = vrot.slane %v19316_v46, %v21571_v48 }
 0x9cd   :  { %10052 = vmatprep.subr.bf16.mxu0 %v13658_v11  ;;  %v19638_v11 = vmul.f32 %v9290_v36, %v21660_v39 }
 0x9ce   :  { %21658 = vst [vmem:[#allocation9_spill] sm:$0xff] %v19634_v54 }
 0x9cf   :  { %10014 = vmatmul.mubr.bf16.gmra.mrb[176].mxu0 %v9511_v33  ;;  %21661 = vst [vmem:[#allocation11_spill] sm:$0xff] %v19638_v11  ;;  %v9485_v33 = vpack.c.bf16 %v19634_v54, %v19630_v49  ;;  %v21759_v54 = vld [vmem:[#allocation107_spill] sm:$0xff] }
 0x9d0   :  { %10053 = vmatpush1.bf16.msra.mxu0 %v13656_v16  ;;  %10056 = vmatprep.mubr.bf16.mxu0 %v9486_v31  ;;  %v19642_v16 = vmul.f32 %v9290_v36, %v21663_v47  ;;  %v19654_v31 = vmul.f32 %v9286_v59, %v21665_v62  ;;  %v21667_v36 = vunpack.c.l.bf16 %v21662_v0  ;;  %v21673_v47 = vunpack.c.h.bf16 %v21672_v21 }
 0x9d1   :  { %10054 = vmatprep.subr.bf16.mxu0 %v13661_v61  ;;  %v9306_v61 = vrot.slane %v19316_v46, %v21572_v37  ;;  %v9322_v0 = vrot.slane %v19380_v28, %v21572_v37  ;;  %v21682_v46 = vld [vmem:[#allocation21_spill] sm:$0xff] }
 0x9d2   :  { %21664 = vst [vmem:[#allocation10_spill] sm:$0xff] %v19642_v16  ;;  %v9490_v63 = vpack.c.bf16 %v19642_v16, %v19638_v11  ;;  %21666 = vst [vmem:[#allocation27_spill] sm:$0xff] %v19654_v31  ;;  %v21683_v35 = vunpack.c.h.bf16 %v21682_v46 }
 0x9d3   :  { %v19662_v39 = vmul.f32 %v9306_v61, %v21670_v51  ;;  %v19666_v56 = vmul.f32 %v9306_v61, %v21673_v47  ;;  %v21677_v61 = vunpack.c.l.bf16 %v21672_v21  ;;  %v21679_v51 = vld [vmem:[#allocation23_spill] sm:$0xff]  ;;  %v9338_v21 = vrot.slane %v19419_v10, %v21572_v37 }
 0x9d4   :  { %10055 = vmatpush1.bf16.msra.mxu0 %v13659_v60  ;;  %v19658_v60 = vmul.f32 %v9286_v59, %v21667_v36  ;;  %v21675_v59 = vunpack.c.l.bf16 %v21669_v24  ;;  %v21680_v47 = vunpack.c.h.bf16 %v21679_v51  ;;  %v19690_v2 = vmul.f32 %v9322_v0, %v21683_v35 }
 0x9d5   :  { %21671 = vst [vmem:[#allocation14_spill] sm:$0xff] %v19662_v39  ;;  %21674 = vst [vmem:[#allocation12_spill] sm:$0xff] %v19666_v56  ;;  %v19682_v36 = vmul.f32 %v9302_v44, %v21677_v61  ;;  %v9318_v24 = vrot.slane %v19380_v28, %v21571_v48  ;;  %v21687_v35 = vunpack.c.l.bf16 %v21682_v46  ;;  %v21689_v61 = vld [vmem:[#allocation28_spill] sm:$0xff]  ;;  %v9354_v46 = vrot.slane %v19461_v30, %v21572_v37 }
 0x9d6   :  { %21668 = vst [vmem:[#allocation26_spill] sm:$0xff] %v19658_v60  ;;  %v19678_v62 = vmul.f32 %v9302_v44, %v21675_v59  ;;  %v19686_v41 = vmul.f32 %v9322_v0, %v21680_v47  ;;  %21684 = vst [vmem:[#allocation20_spill] sm:$0xff] %v19690_v2  ;;  %v21685_v44 = vunpack.c.l.bf16 %v21679_v51  ;;  %v21690_v47 = vunpack.c.h.bf16 %v21689_v61  ;;  %v21692_v28 = vld [vmem:[#allocation32_spill] sm:$0xff] }
 0x9d7   :  { %10057 = vmatmul.mubr.bf16.vlgmr.msra.gmra.mrb[148].mxu0 %v9485_v33  ;;  %v9489_v33 = vpack.c.bf16 %v19658_v60, %v19654_v31  ;;  %21678 = vst [vmem:[#allocation16_spill] sm:$0xff] %v19682_v36  ;;  %v19706_v0 = vmul.f32 %v9318_v24, %v21687_v35  ;;  %v21693_v27 = vunpack.c.h.bf16 %v21692_v28  ;;  %v9334_v51 = vrot.slane %v19419_v10, %v21571_v48  ;;  %v21699_v35 = vld [vmem:[#allocation36_spill] sm:$0xff] }
 0x9d8   :  { %10066 = vmatprep.mubr.bf16.mxu0 %v9490_v63  ;;  %v9494_v63 = vpack.c.bf16 %v19666_v56, %v19662_v39  ;;  %21676 = vst [vmem:[#allocation18_spill] sm:$0xff] %v19678_v62  ;;  %21681 = vst [vmem:[#allocation22_spill] sm:$0xff] %v19686_v41  ;;  %v19702_v59 = vmul.f32 %v9318_v24, %v21685_v44  ;;  %v19710_v42 = vmul.f32 %v9338_v21, %v21690_v47  ;;  %v21702_v10 = vld [vmem:[#allocation40_spill] sm:$0xff] }
 0x9d9   :  { %21688 = vst [vmem:[#allocation34_spill] sm:$0xff] %v19706_v0  ;;  %v19714_v23 = vmul.f32 %v9338_v21, %v21693_v27  ;;  %v21695_v24 = vunpack.c.l.bf16 %v21689_v61  ;;  %v21697_v27 = vunpack.c.l.bf16 %v21692_v28  ;;  %v21700_v47 = vunpack.c.h.bf16 %v21699_v35 }
 0x9da   :  { %21686 = vst [vmem:[#allocation33_spill] sm:$0xff] %v19702_v59  ;;  %21691 = vst [vmem:[#allocation41_spill] sm:$0xff] %v19710_v42  ;;  %v21703_v12 = vunpack.c.h.bf16 %v21702_v10  ;;  %v9350_v61 = vrot.slane %v19461_v30, %v21571_v48  ;;  %v9370_v28 = vrot.slane %v19499_v25, %v21572_v37  ;;  %v21712_v30 = vld [vmem:[#allocation48_spill] sm:$0xff] }
 0x9db   :  { %21694 = vst [vmem:[#allocation42_spill] sm:$0xff] %v19714_v23  ;;  %v19726_v44 = vmul.f32 %v9334_v51, %v21695_v24  ;;  %v19730_v21 = vmul.f32 %v9334_v51, %v21697_v27  ;;  %v19734_v14 = vmul.f32 %v9354_v46, %v21700_v47  ;;  %v21705_v51 = vunpack.c.l.bf16 %v21699_v35  ;;  %v21709_v27 = vld [vmem:[#allocation44_spill] sm:$0xff] }
 0x9dc   :  { %v19738_v29 = vmul.f32 %v9354_v46, %v21703_v12  ;;  %v21707_v12 = vunpack.c.l.bf16 %v21702_v10  ;;  %v21710_v47 = vunpack.c.h.bf16 %v21709_v27  ;;  %v21713_v5 = vunpack.c.h.bf16 %v21712_v30 }
 0x9dd   :  { %21696 = vst [vmem:[#allocation49_spill] sm:$0xff] %v19726_v44  ;;  %21698 = vst [vmem:[#allocation50_spill] sm:$0xff] %v19730_v21  ;;  %v19750_v24 = vmul.f32 %v9350_v61, %v21705_v51  ;;  %v9366_v35 = vrot.slane %v19499_v25, %v21571_v48  ;;  %v9386_v10 = vrot.slane %v19537_v34, %v21572_v37  ;;  %v21722_v25 = vld [vmem:[#allocation53_spill] sm:$0xff] }
 0x9de   :  { %21701 = vst [vmem:[#allocation25_spill] sm:$0xff] %v19734_v14  ;;  %21704 = vst [vmem:[#allocation24_spill] sm:$0xff] %v19738_v29  ;;  %v19754_v46 = vmul.f32 %v9350_v61, %v21707_v12  ;;  %v19758_v20 = vmul.f32 %v9370_v28, %v21710_v47  ;;  %v21715_v61 = vunpack.c.l.bf16 %v21709_v27  ;;  %v21719_v12 = vld [vmem:[#allocation51_spill] sm:$0xff]  ;;  %v9382_v27 = vrot.slane %v19537_v34, %v21571_v48  ;;  %v7170_v48 = vpop.xlane.xlu1 %7169  ;;  %v7167_v34 = vpop.xlane.xlu0 %7166 }
 0x9df   :  { %10067 = vmatmul.mubr.bf16.gmra.mrb[152].mxu0 %v9489_v33  ;;  %v9493_v33 = vpack.c.bf16 %v19682_v36, %v19678_v62  ;;  %21706 = vst [vmem:[#allocation15_spill] sm:$0xff] %v19750_v24  ;;  %v21720_v47 = vunpack.c.h.bf16 %v21719_v12 }
 0x9e0   :  { %10076 = vmatprep.mubr.bf16.mxu0 %v9494_v63  ;;  %v9498_v63 = vpack.c.bf16 %v19690_v2, %v19686_v41  ;;  %21708 = vst [vmem:[#allocation13_spill] sm:$0xff] %v19754_v46  ;;  %21711 = vst [vmem:[#allocation19_spill] sm:$0xff] %v19758_v20  ;;  %v19774_v51 = vmul.f32 %v9366_v35, %v21715_v61 }
 0x9e2   :  { %21716 = vst [vmem:[#allocation23_spill] sm:$0xff] %v19774_v51 }
 0x9e7   :  { %10077 = vmatmul.mubr.bf16.gmra.mrb[156].mxu0 %v9493_v33  ;;  %v9497_v33 = vpack.c.bf16 %v19706_v0, %v19702_v59 }
 0x9e8   :  { %10086 = vmatprep.mubr.bf16.mxu0 %v9498_v63  ;;  %v9502_v63 = vpack.c.bf16 %v19714_v23, %v19710_v42 }
 0x9ef   :  { %10087 = vmatmul.mubr.bf16.gmra.mrb[160].mxu0 %v9497_v33  ;;  %v9501_v33 = vpack.c.bf16 %v19730_v21, %v19726_v44 }
 0x9f0   :  { %10096 = vmatprep.mubr.bf16.mxu0 %v9502_v63  ;;  %v9506_v63 = vpack.c.bf16 %v19738_v29, %v19734_v14  ;;  %v19762_v29 = vmul.f32 %v9370_v28, %v21713_v5  ;;  %v21717_v5 = vunpack.c.l.bf16 %v21712_v30  ;;  %v21723_v14 = vunpack.c.h.bf16 %v21722_v25 }
 0x9f1   :  { %v21725_v30 = vunpack.c.l.bf16 %v21719_v12  ;;  %v7194_v12 = vpop.xlane.xlu1 %7193 }
 0x9f2   :  { %21714 = vst [vmem:[#allocation17_spill] sm:$0xff] %v19762_v29  ;;  %v19778_v28 = vmul.f32 %v9366_v35, %v21717_v5 }
 0x9f3   :  { %v19796_v35 = vmul.f32 %v9382_v27, %v21725_v30 }
 0x9f4   :  { %21718 = vst [vmem:[#allocation21_spill] sm:$0xff] %v19778_v28  ;;  %v9509_v37 = vpack.c.bf16 %v19778_v28, %v19774_v51 }
 0x9f5   :  { %21726 = vst [vmem:[#allocation36_spill] sm:$0xff] %v19796_v35 }
 0x9f7   :  { %10097 = vmatmul.mubr.bf16.gmra.mrb[164].mxu0 %v9501_v33  ;;  %v9505_v33 = vpack.c.bf16 %v19754_v46, %v19750_v24  ;;  %v19782_v46 = vmul.f32 %v9386_v10, %v21720_v47 }
 0x9f8   :  { %10106 = vmatprep.mubr.bf16.mxu0 %v9506_v63  ;;  %v9510_v63 = vpack.c.bf16 %v19762_v29, %v19758_v20  ;;  %v19786_v29 = vmul.f32 %v9386_v10, %v21723_v14  ;;  %v19804_v10 = vld [vmem:[#allocation2] ss:$0 sm:$0xff] }
 0x9f9   :  { %21721 = vst [vmem:[#allocation28_spill] sm:$0xff] %v19782_v46  ;;  %v7221_v5 = vadd.f32 %v19804_v10, %v7170_v48  ;;  %v7220_v47 = vadd.f32 %v19804_v10, %v7167_v34 }
 0x9fa   :  { %21724 = vst [vmem:[#allocation32_spill] sm:$0xff] %v19786_v29 }
 0x9fb   :  { %13774 = vtanh.f32 %v7221_v5  ;;  %v7176_v5 = vpop.xlane.xlu1 %7175 }
 0x9fc   :  { %13776 = vtanh.f32 %v7220_v47 }
 0x9ff   :  { %10107 = vmatmul.mubr.bf16.gmra.mrb[168].mxu0 %v9505_v33  ;;  %v9514_v33 = vpack.c.bf16 %v19786_v29, %v19782_v46  ;;  %v7223_v46 = vadd.f32 %v19804_v10, %v7176_v5 }
 0xa00   :  { %10116 = vmatprep.mubr.bf16.mxu0 %v9510_v63  ;;  %v21727_v63 = vunpack.c.l.bf16 %v21722_v25 }
 0xa02   :  { %v19800_v61 = vmul.f32 %v9382_v27, %v21727_v63  ;;  %v7229_v27 = vadd.f32 %v19804_v10, %v7194_v12 }
 0xa04   :  { %21728 = vst [vmem:[#allocation40_spill] sm:$0xff] %v19800_v61  ;;  %v9513_v14 = vpack.c.bf16 %v19800_v61, %v19796_v35  ;;  %13778 = vtanh.f32 %v7229_v27 }
 0xa07   :  { %10117 = vmatmul.mubr.bf16.gmra.mrb[172].mxu0 %v9509_v37  ;;  %v7191_v37 = vpop.xlane.xlu0 %7190 }
 0xa08   :  { %10126 = vmatprep.mubr.bf16.mxu0 %v9514_v33  ;;  %v19808_v33 = vpop.eup %13774  ;;  %v7228_v30 = vadd.f32 %v19804_v10, %v7191_v37 }
 0xa09   :  { %v13777_v25 = vpop.eup %13776  ;;  %v7254_v63 = vsel %vm7252_vm9, %v19808_v33, -inf }
 0xa0a   :  { %13780 = vtanh.f32 %v7228_v30  ;;  %v7182_v30 = vpop.xlane.xlu1 %7181 }
 0xa0b   :  { %v7173_v47 = vpop.xlane.xlu0 %7172  ;;  %13782 = vtanh.f32 %v7223_v46 }
 0xa0c   :  { %v7222_v12 = vadd.f32 %v19804_v10, %v7173_v47 }
 0xa0e   :  { %v19815_v29 = vpop.eup %13778  ;;  %13784 = vtanh.f32 %v7222_v12  ;;  %v7200_v5 = vpop.xlane.xlu1 %7199 }
 0xa0f   :  { %10127 = vmatmul.mubr.bf16.gmra.mrb[176].mxu0 %v9513_v14  ;;  %v7253_v14 = vsel %vm7252_vm9, %v13777_v25, -inf  ;;  %v7290_v28 = vsel %vm7252_vm9, %v19815_v29, -inf }
 0xa10   :  { %v7255_v48 = vmax.f32 %v7253_v14, %v7254_v63  ;;  %v7179_v63 = vpop.xlane.xlu0 %7178 }
 0xa12   :  { %v7256_v34 = vrot.slane %v7255_v48, 4  ;;  %v7206_v12 = vpop.xlane.xlu1 %7205 }
 0xa14   :  { %v7257_v61 = vmax.f32 %v7255_v48, %v7256_v34  ;;  %v19818_v35 = vpop.eup %13780  ;;  %v7225_v48 = vadd.f32 %v19804_v10, %v7182_v30  ;;  %v7224_v34 = vadd.f32 %v19804_v10, %v7179_v63  ;;  %v7197_v47 = vpop.xlane.xlu0 %7196 }
 0xa15   :  { %v7289_v27 = vsel %vm7252_vm9, %v19818_v35, -inf  ;;  %v19827_v23 = vpop.eup %13782  ;;  %v7230_v30 = vadd.f32 %v19804_v10, %v7197_v47 }
 0xa16   :  { %v7258_v37 = vrot.slane %v7257_v61, 2  ;;  %v7291_v14 = vmax.f32 %v7289_v27, %v7290_v28  ;;  %13786 = vtanh.f32 %v7225_v48  ;;  %v7231_v28 = vadd.f32 %v19804_v10, %v7200_v5 }
 0xa17   :  { %13788 = vtanh.f32 %v7224_v34  ;;  %v7188_v34 = vpop.xlane.xlu1 %7187 }
 0xa18   :  { %v7259_v20 = vmax.f32 %v7257_v61, %v7258_v37  ;;  %v7292_v51 = vrot.slane %v7291_v14, 4  ;;  %v19829_v21 = vpop.eup %13784  ;;  %v7203_v61 = vpop.xlane.xlu0 %7202  ;;  %v7263_v37 = vsel %vm7252_vm9, %v19827_v23, -inf  ;;  %13790 = vtanh.f32 %v7231_v28 }
 0xa19   :  { %v7262_v27 = vsel %vm7252_vm9, %v19829_v21, -inf  ;;  %13792 = vtanh.f32 %v7230_v30  ;;  %v7233_v28 = vadd.f32 %v19804_v10, %v7206_v12  ;;  %v7227_v55 = vadd.f32 %v19804_v10, %v7188_v34 }
 0xa1a   :  { %v7260_v24 = vrot.slane %v7259_v20, 1  ;;  %v7293_v46 = vmax.f32 %v7291_v14, %v7292_v51  ;;  %v7264_v57 = vmax.f32 %v7262_v27, %v7263_v37  ;;  %v10169_v37 = vld [vmem:[%s20789_s2] sm:$0xff]  ;;  %v10170_v27 = vld [vmem:[%s20789_s2 + $0x8] sm:$0xff] }
 0xa1c   :  { %v7261_v6 = vmax.f32 %v7259_v20, %v7260_v24  ;;  %v7294_v63 = vrot.slane %v7293_v46, 2  ;;  %v10171_v20 = vld [vmem:[%s20788_s19] sm:$0x3]  ;;  %v7185_v14 = vpop.xlane.xlu0 %7184  ;;  %v7265_v44 = vrot.slane %v7264_v57, 4 }
 0xa1d   :  { %v10176_v47 = vrot.slane %v10171_v20, %v21518_v9  ;;  %v7226_v41 = vadd.f32 %v19804_v10, %v7185_v14 }
 0xa1e   :  { %v7325_v48 = vsub.f32 %v13777_v25, %v7261_v6  ;;  %v7295_v51 = vmax.f32 %v7293_v46, %v7294_v63  ;;  %v10180_v25 = vrot.slane %v10171_v20, %v21519_v26  ;;  %v7212_v20 = vpop.xlane.xlu1 %7211  ;;  %v7326_v12 = vsub.f32 %v19808_v33, %v7261_v6 }
 0xa1f   :  { %v7266_v7 = vmax.f32 %v7264_v57, %v7265_v44  ;;  %v19860_v0 = vmul.f32 %v10176_v47, %v10169_v37 }
 0xa20   :  { %v19840_v24 = vpop.eup %13786  ;;  %v7341_v42 = vmul.f32 1.442695, %v7325_v48  ;;  %v7296_v46 = vrot.slane %v7295_v51, 1  ;;  %v7232_v48 = vadd.f32 %v19804_v10, %v7203_v61  ;;  %v7209_v2 = vpop.xlane.xlu0 %7208  ;;  %v19862_v53 = vmul.f32 %v10180_v25, %v10170_v27 }
 0xa21   :  { %v19842_v5 = vpop.eup %13788  ;;  %v7272_v30 = vsel %vm7252_vm9, %v19840_v24, -inf  ;;  %v7234_v6 = vadd.f32 %v19804_v10, %v7209_v2  ;;  %v7267_v57 = vrot.slane %v7266_v7, 2  ;;  %v7343_v33 = vmul.f32 1.442695, %v7326_v12 }
 0xa22   :  { %v7271_v63 = vsel %vm7252_vm9, %v19842_v5, -inf  ;;  %13794 = vpow2.f32 %v7341_v42  ;;  %v19865_v59 = vpop.eup %13790  ;;  %v7297_v50 = vmax.f32 %v7295_v51, %v7296_v46  ;;  %v7235_v42 = vadd.f32 %v19804_v10, %v7212_v20 }
 0xa23   :  { %v7273_v45 = vmax.f32 %v7271_v63, %v7272_v30  ;;  %13796 = vtanh.f32 %v7233_v28  ;;  %v19868_v61 = vpop.eup %13792  ;;  %v10187_v44 = vcombine.low %v19860_v0, %v19862_v53  ;;  %v7299_v51 = vsel %vm7252_vm9, %v19865_v59, -inf }
 0xa24   :  { %13798 = vtanh.f32 %v7232_v48  ;;  %v7333_v14 = vsub.f32 %v19818_v35, %v7297_v50  ;;  %v7298_v47 = vsel %vm7252_vm9, %v19868_v61, -inf  ;;  %v7334_v25 = vsub.f32 %v19815_v29, %v7297_v50  ;;  %v9579_v35 = vld [vmem:[%s20790_s18] sm:$0x3] }
 0xa25   :  { %13800 = vtanh.f32 %v7227_v55  ;;  %v7274_v34 = vrot.slane %v7273_v45, 4  ;;  %v7268_v2 = vmax.f32 %v7266_v7, %v7267_v57  ;;  %v10195_v55 = vrot.slane %v10187_v44, %v18745_v15 }
 0xa26   :  { %13802 = vtanh.f32 %v7226_v41  ;;  %v7300_v41 = vmax.f32 %v7298_v47, %v7299_v51  ;;  %v7357_v37 = vmul.f32 1.442695, %v7333_v14  ;;  %v7359_v46 = vmul.f32 1.442695, %v7334_v25 }
 0xa27   :  { %13804 = vtanh.f32 %v7235_v42  ;;  %v7275_v28 = vmax.f32 %v7273_v45, %v7274_v34  ;;  %v7269_v50 = vrot.slane %v7268_v2, 1  ;;  %v19890_v7 = vrot.slane %v9579_v35, %v21518_v9 }
 0xa28   :  { %13806 = vtanh.f32 %v7234_v6  ;;  %v19893_v29 = vrot.slane %v10195_v55, %v18745_v15  ;;  %v7301_v45 = vrot.slane %v7300_v41, 4  ;;  %v19896_v48 = vrot.slane %v9579_v35, %v21519_v26 }
 0xa29   :  { %13808 = vpow2.f32 %v7343_v33  ;;  %v7276_v63 = vrot.slane %v7275_v28, 2  ;;  %v29_v20 = vstv %s20791_s20  ;;  %v19913_v14 = vmax.f32 %v7268_v2, %v7269_v50 }
 0xa2a   :  { %13810 = vpow2.f32 %v7357_v37  ;;  %30 = vst [vmem:[#allocation3] sm:$0x1] %v29_v20  ;;  %v10240_v47 = vrot.slane %v19893_v29, %v21518_v9  ;;  %v10203_v35 = vcombine.high %v10195_v55, %v10195_v55  ;;  %v7302_v20 = vmax.f32 %v7300_v41, %v7301_v45 }
 0xa2b   :  { %13812 = vpow2.f32 %v7359_v46  ;;  %v7277_v46 = vmax.f32 %v7275_v28, %v7276_v63  ;;  %v10244_v56 = vrot.slane %v19893_v29, %v21519_v26  ;;  %v10233_v13 = vcombine.high %v19893_v29, %v19893_v29 }
 0xa2c   :  { %v19880_v10 = vpop.eup %13794  ;;  %v19936_v39 = vrot.slane %v10203_v35, %v18745_v15  ;;  %v7303_v60 = vrot.slane %v7302_v20, 2 }
 0xa2d   :  { %v19885_v27 = vpop.eup %13796  ;;  %v7373_v33 = vsel %vm7252_vm9, %v19880_v10, 0.0  ;;  %v7278_v11 = vrot.slane %v7277_v46, 1 }
 0xa2e   :  { %v19887_v30 = vpop.eup %13798  ;;  %v7308_v6 = vsel %vm7252_vm9, %v19885_v27, -inf }
 0xa2f   :  { %v19901_v12 = vpop.eup %13800  ;;  %v7307_v57 = vsel %vm7252_vm9, %v19887_v30, -inf }
 0xa30   :  { %v19903_v42 = vpop.eup %13802  ;;  %v7309_v2 = vmax.f32 %v7307_v57, %v7308_v6  ;;  %v7281_v50 = vsel %vm7252_vm9, %v19901_v12, -inf }
 0xa31   :  { %v19911_v34 = vpop.eup %13804  ;;  %v7280_v28 = vsel %vm7252_vm9, %v19903_v42, -inf }
 0xa32   :  { %v19918_v37 = vpop.eup %13806  ;;  %v7317_v41 = vsel %vm7252_vm9, %v19911_v34, -inf  ;;  %v7282_v38 = vmax.f32 %v7280_v28, %v7281_v50 }
 0xa33   :  { %v19923_v17 = vpop.eup %13808 }
 0xa34   :  { %v7374_v22 = vsel %vm7252_vm9, %v19923_v17, 0.0  ;;  %v19944_v3 = vpop.eup %13810 }
 0xa35   :  { %v19949_v31 = vadd.f32 %v7374_v22, %v7373_v33 }
 0xaaa   :  { %v10058_v44 = vpop.f32.mrb[148].mxu0 }
 0xaab   :  { %v12444_v51 = vadd.f32 %v10058_v44, %v19890_v7  ;;  %v10060_v25 = vpop.f32.mrb[149].mxu0 }
 0xaac   :  { %v12445_v32 = vadd.f32 %v10060_v25, %v19896_v48  ;;  %v10062_v36 = vpop.f32.mrb[150].mxu0  ;;  %v7316_v25 = vsel %vm7252_vm9, %v19918_v37, -inf }
 0xaad   :  { %v10137_v44 = vmax.f32 %v12444_v51, 0.0  ;;  %v12446_v58 = vadd.f32 %v10062_v36, %v19890_v7  ;;  %v10064_v55 = vpop.f32.mrb[151].mxu0  ;;  %v7327_v36 = vsub.f32 %v19829_v21, %v19913_v14 }
 0xaae   :  { %v10138_v63 = vmax.f32 %v12445_v32, 0.0  ;;  %v12447_v45 = vadd.f32 %v10064_v55, %v19896_v48  ;;  %v7328_v32 = vsub.f32 %v19827_v23, %v19913_v14  ;;  %v7310_v55 = vrot.slane %v7309_v2, 4  ;;  %v19951_v23 = vpop.eup %13812 }
 0xaaf   :  { %v10317_v6 = vmul.f32 %v10240_v47, %v10137_v44  ;;  %v10139_v57 = vmax.f32 %v12446_v58, 0.0  ;;  %v7318_v44 = vmax.f32 %v7316_v25, %v7317_v41  ;;  %v7345_v14 = vmul.f32 1.442695, %v7327_v36 }
 0xab0   :  { %v10318_v51 = vmul.f32 %v10244_v56, %v10138_v63  ;;  %v10140_v62 = vmax.f32 %v12447_v45, 0.0  ;;  %v10248_v63 = vrot.slane %v19936_v39, %v21518_v9  ;;  %v7311_v28 = vmax.f32 %v7309_v2, %v7310_v55 }
 0xab1   :  { %v10319_v16 = vmul.f32 %v10240_v47, %v10139_v57  ;;  %v7283_v41 = vrot.slane %v7282_v38, 4  ;;  %v7304_v57 = vmax.f32 %v7302_v20, %v7303_v60  ;;  %v7319_v22 = vrot.slane %v7318_v44, 4 }
 0xab2   :  { %v10320_v58 = vmul.f32 %v10244_v56, %v10140_v62  ;;  %v10068_v18 = vpop.f32.mrb[152].mxu0  ;;  %v10349_v35 = vadd.f32 %v10318_v51, %v10317_v6  ;;  %v10252_v56 = vrot.slane %v19936_v39, %v21519_v26  ;;  %v7279_v36 = vmax.f32 %v7277_v46, %v7278_v11 }
 0xab3   :  { %v12448_v21 = vadd.f32 %v10068_v18, %v19890_v7  ;;  %v10070_v45 = vpop.f32.mrb[153].mxu0  ;;  %v7376_v55 = vrot.slane %v19949_v31, 4  ;;  %13814 = vpow2.f32 %v7345_v14  ;;  %v7305_v20 = vrot.slane %v7304_v57, 1 }
 0xab4   :  { %v12449_v47 = vadd.f32 %v10070_v45, %v19896_v48  ;;  %v10072_v62 = vpop.f32.mrb[154].mxu0  ;;  %10350 = vadd.xlane.f32.xlu0 %v10349_v35  ;;  %v10352_v50 = vadd.f32 %v10320_v58, %v10319_v16  ;;  %v7347_v35 = vmul.f32 1.442695, %v7328_v32  ;;  %v7312_v58 = vrot.slane %v7311_v28, 2 }
 0xab5   :  { %v10141_v18 = vmax.f32 %v12448_v21, 0.0  ;;  %v12450_v25 = vadd.f32 %v10072_v62, %v19890_v7  ;;  %v10074_v6 = vpop.f32.mrb[155].mxu0  ;;  %v7284_v21 = vmax.f32 %v7282_v38, %v7283_v41  ;;  %v19963_v11 = vsel %vm7252_vm9, %v19944_v3, 0.0 }
 0xab6   :  { %v10142_v33 = vmax.f32 %v12449_v47, 0.0  ;;  %v12451_v51 = vadd.f32 %v10074_v6, %v19896_v48  ;;  %10353 = vadd.xlane.f32.xlu1 %v10352_v50  ;;  %v7320_v47 = vmax.f32 %v7318_v44, %v7319_v22  ;;  %v7329_v29 = vsub.f32 %v19842_v5, %v7279_v36 }
 0xab7   :  { %v10321_v45 = vmul.f32 %v10248_v63, %v10141_v18  ;;  %v10143_v19 = vmax.f32 %v12450_v25, 0.0  ;;  %v10256_v32 = vrot.slane %v10233_v13, %v21518_v9  ;;  %v7330_v14 = vsub.f32 %v19840_v24, %v7279_v36 }
 0xab8   :  { %v10322_v16 = vmul.f32 %v10252_v56, %v10142_v33  ;;  %v10144_v2 = vmax.f32 %v12451_v51, 0.0  ;;  %v10260_v38 = vrot.slane %v10233_v13, %v21519_v26  ;;  %v7285_v41 = vrot.slane %v7284_v21, 2 }
 0xab9   :  { %v10323_v60 = vmul.f32 %v10248_v63, %v10143_v19  ;;  %v7306_v33 = vmax.f32 %v7304_v57, %v7305_v20  ;;  %v7321_v51 = vrot.slane %v7320_v47, 2  ;;  %v10235_v13 = vcombine.high %v19936_v39, %v19936_v39 }
 0xaba   :  { %v10324_v62 = vmul.f32 %v10252_v56, %v10144_v2  ;;  %v10078_v6 = vpop.f32.mrb[156].mxu0  ;;  %v10355_v50 = vadd.f32 %v10322_v16, %v10321_v45  ;;  %v7313_v56 = vmax.f32 %v7311_v28, %v7312_v58  ;;  %v10188_v2 = vcombine.high %v19860_v0, %v19862_v53 }
 0xabb   :  { %v12452_v46 = vadd.f32 %v10078_v6, %v19890_v7  ;;  %v10080_v18 = vpop.f32.mrb[157].mxu0  ;;  %13816 = vpow2.f32 %v7347_v35  ;;  %v7349_v57 = vmul.f32 1.442695, %v7329_v29  ;;  %v7335_v39 = vsub.f32 %v19868_v61, %v7306_v33 }
 0xabc   :  { %v12453_v19 = vadd.f32 %v10080_v18, %v19896_v48  ;;  %v10082_v44 = vpop.f32.mrb[158].mxu0  ;;  %10356 = vadd.xlane.f32.xlu0 %v10355_v50  ;;  %v10358_v63 = vadd.f32 %v10324_v62, %v10323_v60  ;;  %v19978_v60 = vadd.f32 %v7376_v55, %v19949_v31  ;;  %v7314_v20 = vrot.slane %v7313_v56, 1 }
 0xabd   :  { %v10145_v25 = vmax.f32 %v12452_v46, 0.0  ;;  %v12454_v22 = vadd.f32 %v10082_v44, %v19890_v7  ;;  %v10084_v5 = vpop.f32.mrb[159].mxu0  ;;  %v7286_v62 = vmax.f32 %v7284_v21, %v7285_v41  ;;  %v7351_v50 = vmul.f32 1.442695, %v7330_v14 }
 0xabe   :  { %v10146_v45 = vmax.f32 %v12453_v19, 0.0  ;;  %v12455_v16 = vadd.f32 %v10084_v5, %v19896_v48  ;;  %10359 = vadd.xlane.f32.xlu1 %v10358_v63  ;;  %v7322_v46 = vmax.f32 %v7320_v47, %v7321_v51  ;;  %v19980_v63 = vpop.eup %13814  ;;  %v10264_v0 = vrot.slane %v10235_v13, %v21518_v9 }
 0xabf   :  { %v10325_v24 = vmul.f32 %v10256_v32, %v10145_v25  ;;  %v10147_v36 = vmax.f32 %v12454_v22, 0.0  ;;  %v10202_v31 = vrot.slane %v10188_v2, %v18745_v15  ;;  %v7336_v55 = vsub.f32 %v19865_v59, %v7306_v33 }
 0xac0   :  { %v10326_v28 = vmul.f32 %v10260_v38, %v10146_v45  ;;  %v10148_v58 = vmax.f32 %v12455_v16, 0.0  ;;  %v10268_v47 = vrot.slane %v10235_v13, %v21519_v26  ;;  %v7315_v14 = vmax.f32 %v7313_v56, %v7314_v20 }
 0xac1   :  { %v10327_v6 = vmul.f32 %v10256_v32, %v10147_v36  ;;  %v7323_v22 = vrot.slane %v7322_v46, 1  ;;  %v7410_v59 = vsel %vm7252_vm9, %v19951_v23, 0.0  ;;  %v7361_v33 = vmul.f32 1.442695, %v7335_v39 }
 0xac2   :  { %v10328_v18 = vmul.f32 %v10260_v38, %v10148_v58  ;;  %v10088_v19 = vpop.f32.mrb[160].mxu0  ;;  %v10361_v44 = vadd.f32 %v10326_v28, %v10325_v24  ;;  %v7287_v38 = vrot.slane %v7286_v62, 1  ;;  %v19994_v24 = vrot.slane %v10202_v31, %v18745_v15 }
 0xac3   :  { %v12456_v53 = vadd.f32 %v10088_v19, %v19890_v7  ;;  %v10090_v35 = vpop.f32.mrb[161].mxu0  ;;  %13818 = vpow2.f32 %v7349_v57  ;;  %v7363_v56 = vmul.f32 1.442695, %v7336_v55  ;;  %v7337_v2 = vsub.f32 %v19887_v30, %v7315_v14 }
 0xac4   :  { %v12457_v21 = vadd.f32 %v10090_v35, %v19896_v48  ;;  %v10092_v29 = vpop.f32.mrb[162].mxu0  ;;  %10362 = vadd.xlane.f32.xlu0 %v10361_v44  ;;  %v10364_v32 = vadd.f32 %v10328_v18, %v10327_v6  ;;  %13820 = vpow2.f32 %v7351_v50  ;;  %v7288_v28 = vmax.f32 %v7286_v62, %v7287_v38 }
 0xac5   :  { %v10149_v41 = vmax.f32 %v12456_v53, 0.0  ;;  %v12458_v61 = vadd.f32 %v10092_v29, %v19890_v7  ;;  %v10094_v25 = vpop.f32.mrb[163].mxu0  ;;  %v19997_v20 = vpop.eup %13816  ;;  %v7338_v6 = vsub.f32 %v19885_v27, %v7315_v14  ;;  %v7324_v18 = vmax.f32 %v7322_v46, %v7323_v22 }
 0xac6   :  { %v10150_v5 = vmax.f32 %v12457_v21, 0.0  ;;  %v12459_v51 = vadd.f32 %v10094_v25, %v19896_v48  ;;  %10365 = vadd.xlane.f32.xlu1 %v10364_v32  ;;  %13822 = vpow2.f32 %v7361_v33  ;;  %v10272_v57 = vrot.slane %v19994_v24, %v21518_v9 }
 0xac7   :  { %v10329_v45 = vmul.f32 %v10264_v0, %v10149_v41  ;;  %v10151_v16 = vmax.f32 %v12458_v61, 0.0  ;;  %v10204_v50 = vcombine.high %v10202_v31, %v10202_v31  ;;  %13824 = vpow2.f32 %v7363_v56 }
 0xac8   :  { %v10330_v36 = vmul.f32 %v10268_v47, %v10150_v5  ;;  %v10152_v13 = vmax.f32 %v12459_v51, 0.0  ;;  %v10276_v62 = vrot.slane %v19994_v24, %v21519_v26  ;;  %v7365_v46 = vmul.f32 1.442695, %v7337_v2 }
 0xac9   :  { %v10331_v58 = vmul.f32 %v10264_v0, %v10151_v16  ;;  %v7331_v55 = vsub.f32 %v19903_v42, %v7288_v28  ;;  %v7367_v32 = vmul.f32 1.442695, %v7338_v6  ;;  %v7339_v14 = vsub.f32 %v19918_v37, %v7324_v18 }
 0xaca   :  { %v10332_v19 = vmul.f32 %v10268_v47, %v10152_v13  ;;  %v10098_v44 = vpop.f32.mrb[164].mxu0  ;;  %v10367_v39 = vadd.f32 %v10330_v36, %v10329_v45  ;;  %v7340_v41 = vsub.f32 %v19911_v34, %v7324_v18  ;;  %v20012_v22 = vrot.slane %v10204_v50, %v18745_v15 }
 0xacb   :  { %v12460_v53 = vadd.f32 %v10098_v44, %v19890_v7  ;;  %v10100_v35 = vpop.f32.mrb[165].mxu0  ;;  %v7332_v42 = vsub.f32 %v19901_v12, %v7288_v28  ;;  %v20016_v33 = vadd.f32 %v7410_v59, %v19963_v11  ;;  %v7382_v37 = vsel %vm7252_vm9, %v19980_v63, 0.0 }
 0xacc   :  { %v12461_v30 = vadd.f32 %v10100_v35, %v19896_v48  ;;  %v10102_v0 = vpop.f32.mrb[166].mxu0  ;;  %10368 = vadd.xlane.f32.xlu0 %v10367_v39  ;;  %v10370_v27 = vadd.f32 %v10332_v19, %v10331_v58  ;;  %v7353_v45 = vmul.f32 1.442695, %v7331_v55  ;;  %v7383_v34 = vsel %vm7252_vm9, %v19997_v20, 0.0 }
 0xacd   :  { %v10153_v21 = vmax.f32 %v12460_v53, 0.0  ;;  %v12462_v47 = vadd.f32 %v10102_v0, %v19890_v7  ;;  %v10104_v29 = vpop.f32.mrb[167].mxu0  ;;  %v20022_v56 = vpop.eup %13818  ;;  %13826 = vpow2.f32 %v7365_v46  ;;  %v7369_v15 = vmul.f32 1.442695, %v7339_v14 }
 0xace   :  { %v10154_v31 = vmax.f32 %v12461_v30, 0.0  ;;  %v12463_v38 = vadd.f32 %v10104_v29, %v19896_v48  ;;  %10371 = vadd.xlane.f32.xlu1 %v10370_v27  ;;  %v20024_v2 = vpop.eup %13820  ;;  %13828 = vpow2.f32 %v7367_v32  ;;  %v7371_v11 = vmul.f32 1.442695, %v7340_v41 }
 0xacf   :  { %v10333_v61 = vmul.f32 %v10272_v57, %v10153_v21  ;;  %v10155_v25 = vmax.f32 %v12462_v47, 0.0  ;;  %v10280_v28 = vrot.slane %v20012_v22, %v21518_v9  ;;  %v7355_v6 = vmul.f32 1.442695, %v7332_v42 }
 0xad0   :  { %v10334_v5 = vmul.f32 %v10276_v62, %v10154_v31  ;;  %v10156_v51 = vmax.f32 %v12463_v38, 0.0  ;;  %v10284_v19 = vrot.slane %v20012_v22, %v21519_v26  ;;  %v20032_v53 = vpop.eup %13822  ;;  %13830 = vpow2.f32 %v7353_v45 }
 0xad1   :  { %v10335_v16 = vmul.f32 %v10272_v57, %v10155_v25  ;;  %v7384_v30 = vadd.f32 %v7383_v34, %v7382_v37  ;;  %13832 = vpow2.f32 %v7369_v15  ;;  %v10234_v21 = vcombine.high %v19994_v24, %v19994_v24 }
 0xad2   :  { %v10336_v36 = vmul.f32 %v10276_v62, %v10156_v51  ;;  %v10108_v13 = vpop.f32.mrb[168].mxu0  ;;  %v10373_v12 = vadd.f32 %v10334_v5, %v10333_v61  ;;  %v20035_v62 = vpop.eup %13824  ;;  %13834 = vpow2.f32 %v7371_v11  ;;  %v7378_v32 = vrot.slane %v19978_v60, 2 }
 0xad3   :  { %v12464_v59 = vadd.f32 %v10108_v13, %v19890_v7  ;;  %v10110_v58 = vpop.f32.mrb[169].mxu0  ;;  %13836 = vpow2.f32 %v7355_v6  ;;  %v7385_v31 = vrot.slane %v7384_v30, 4  ;;  %v7412_v38 = vrot.slane %v20016_v33, 4 }
 0xad4   :  { %v12465_v18 = vadd.f32 %v10110_v58, %v19896_v48  ;;  %v10112_v44 = vpop.f32.mrb[170].mxu0  ;;  %10374 = vadd.xlane.f32.xlu0 %v10373_v12  ;;  %v10376_v39 = vadd.f32 %v10336_v36, %v10335_v16  ;;  %v7391_v41 = vsel %vm7252_vm9, %v20022_v56, 0.0  ;;  %v7392_v5 = vsel %vm7252_vm9, %v20024_v2, 0.0 }
 0xad5   :  { %v10157_v57 = vmax.f32 %v12464_v59, 0.0  ;;  %v12466_v35 = vadd.f32 %v10112_v44, %v19890_v7  ;;  %v10114_v50 = vpop.f32.mrb[171].mxu0  ;;  %v7418_v24 = vsel %vm7252_vm9, %v20032_v53, 0.0  ;;  %v10288_v37 = vrot.slane %v10234_v21, %v21518_v9 }
 0xad6   :  { %v10158_v0 = vmax.f32 %v12465_v18, 0.0  ;;  %v12467_v27 = vadd.f32 %v10114_v50, %v19896_v48  ;;  %10377 = vadd.xlane.f32.xlu1 %v10376_v39  ;;  %v7419_v16 = vsel %vm7252_vm9, %v20035_v62, 0.0  ;;  %v10292_v36 = vrot.slane %v10234_v21, %v21519_v26 }
 0xad7   :  { %v10337_v46 = vmul.f32 %v10280_v28, %v10157_v57  ;;  %v10159_v55 = vmax.f32 %v12466_v35, 0.0  ;;  %v20052_v34 = vpop.eup %13826  ;;  %v20057_v11 = vadd.f32 %v7378_v32, %v19978_v60  ;;  %v7386_v18 = vadd.f32 %v7385_v31, %v7384_v30 }
 0xad8   :  { %v10338_v47 = vmul.f32 %v10284_v19, %v10158_v0  ;;  %v10160_v29 = vmax.f32 %v12467_v27, 0.0  ;;  %v20059_v59 = vpop.eup %13828  ;;  %v7420_v57 = vadd.f32 %v7419_v16, %v7418_v24  ;;  %v7393_v35 = vadd.f32 %v7392_v5, %v7391_v41 }
 0xad9   :  { %v10339_v14 = vmul.f32 %v10280_v28, %v10159_v55  ;;  %v10236_v27 = vcombine.high %v20012_v22, %v20012_v22  ;;  %v7427_v30 = vsel %vm7252_vm9, %v20052_v34, 0.0  ;;  %v7428_v21 = vsel %vm7252_vm9, %v20059_v59, 0.0 }
 0xada   :  { %v10340_v61 = vmul.f32 %v10284_v19, %v10160_v29  ;;  %v10118_v25 = vpop.f32.mrb[172].mxu0  ;;  %v10379_v42 = vadd.f32 %v10338_v47, %v10337_v46  ;;  %v7413_v19 = vadd.f32 %v7412_v38, %v20016_v33  ;;  %v20064_v50 = vpop.eup %13830  ;;  %v7380_v32 = vrot.slane %v20057_v11, 1 }
 0xadb   :  { %v12468_v51 = vadd.f32 %v10118_v25, %v19890_v7  ;;  %v10120_v45 = vpop.f32.mrb[173].mxu0  ;;  %v20068_v46 = vpop.eup %13832  ;;  %v7421_v25 = vrot.slane %v7420_v57, 4 }
 0xadc   :  { %v12469_v15 = vadd.f32 %v10120_v45, %v19896_v48  ;;  %v10122_v13 = vpop.f32.mrb[174].mxu0  ;;  %10380 = vadd.xlane.f32.xlu0 %v10379_v42  ;;  %v10382_v12 = vadd.f32 %v10340_v61, %v10339_v14  ;;  %v20074_v47 = vpop.eup %13834  ;;  %v7387_v14 = vrot.slane %v7386_v18, 2  ;;  %v7414_v31 = vrot.slane %v7413_v19, 2 }
 0xadd   :  { %v10161_v28 = vmax.f32 %v12468_v51, 0.0  ;;  %v12470_v58 = vadd.f32 %v10122_v13, %v19890_v7  ;;  %v10124_v6 = vpop.f32.mrb[175].mxu0  ;;  %v20077_v38 = vpop.eup %13836  ;;  %v7394_v42 = vrot.slane %v7393_v35, 4  ;;  %v7436_v5 = vsel %vm7252_vm9, %v20068_v46, 0.0 }
 0xade   :  { %v10162_v44 = vmax.f32 %v12469_v15, 0.0  ;;  %v12471_v39 = vadd.f32 %v10124_v6, %v19896_v48  ;;  %10383 = vadd.xlane.f32.xlu1 %v10382_v12  ;;  %v10296_v51 = vrot.slane %v10236_v27, %v21518_v9  ;;  %v10300_v15 = vrot.slane %v10236_v27, %v21519_v26 }
 0xadf   :  { %v10341_v0 = vmul.f32 %v10288_v37, %v10161_v28  ;;  %v10163_v60 = vmax.f32 %v12470_v58, 0.0  ;;  %v7437_v12 = vsel %vm7252_vm9, %v20074_v47, 0.0  ;;  %v7400_v28 = vsel %vm7252_vm9, %v20064_v50, 0.0 }
 0xae0   :  { %v10342_v55 = vmul.f32 %v10292_v36, %v10162_v44  ;;  %v10164_v33 = vmax.f32 %v12471_v39, 0.0  ;;  %v7401_v9 = vsel %vm7252_vm9, %v20077_v38, 0.0  ;;  %v7388_v26 = vadd.f32 %v7387_v14, %v7386_v18 }
 0xae1   :  { %v10343_v29 = vmul.f32 %v10288_v37, %v10163_v60  ;;  %v7429_v37 = vadd.f32 %v7428_v21, %v7427_v30  ;;  %v7422_v60 = vadd.f32 %v7421_v25, %v7420_v57 }
 0xae2   :  { %v10344_v22 = vmul.f32 %v10292_v36, %v10164_v33  ;;  %v10128_v41 = vpop.f32.mrb[176].mxu0  ;;  %v10385_v61 = vadd.f32 %v10342_v55, %v10341_v0  ;;  %v7438_v33 = vadd.f32 %v7437_v12, %v7436_v5  ;;  %v7389_v57 = vrot.slane %v7388_v26, 1 }
 0xae3   :  { %v12472_v24 = vadd.f32 %v10128_v41, %v19890_v7  ;;  %v10130_v45 = vpop.f32.mrb[177].mxu0  ;;  %v7430_v55 = vrot.slane %v7429_v37, 4  ;;  %v7402_v41 = vadd.f32 %v7401_v9, %v7400_v28 }
 0xae4   :  { %v12473_v16 = vadd.f32 %v10130_v45, %v19896_v48  ;;  %v10132_v13 = vpop.f32.mrb[178].mxu0  ;;  %10386 = vadd.xlane.f32.xlu0 %v10385_v61  ;;  %v10388_v36 = vadd.f32 %v10344_v22, %v10343_v29  ;;  %v7395_v22 = vadd.f32 %v7394_v42, %v7393_v35  ;;  %v7381_v45 = vadd.f32 %v7380_v32, %v20057_v11 }
 0xae5   :  { %v10165_v58 = vmax.f32 %v12472_v24, 0.0  ;;  %v12474_v6 = vadd.f32 %v10132_v13, %v19890_v7  ;;  %v10134_v44 = vpop.f32.mrb[179].mxu0  ;;  %v7415_v13 = vadd.f32 %v7414_v31, %v7413_v19  ;;  %v7431_v52 = vadd.f32 %v7430_v55, %v7429_v37 }
 0xae6   :  { %v10166_v39 = vmax.f32 %v12473_v16, 0.0  ;;  %v12475_v0 = vadd.f32 %v10134_v44, %v19896_v48  ;;  %10389 = vadd.xlane.f32.xlu1 %v10388_v36  ;;  %v7423_v16 = vrot.slane %v7422_v60, 2  ;;  %v7439_v48 = vrot.slane %v7438_v33, 4 }
 0xae7   :  { %v10345_v27 = vmul.f32 %v10296_v51, %v10165_v58  ;;  %v10167_v30 = vmax.f32 %v12474_v6, 0.0  ;;  %v7396_v14 = vrot.slane %v7395_v22, 2  ;;  %v7403_v25 = vrot.slane %v7402_v41, 4 }
 0xae8   :  { %v10346_v21 = vmul.f32 %v10300_v15, %v10166_v39  ;;  %v10168_v29 = vmax.f32 %v12475_v0, 0.0  ;;  %v7416_v5 = vrot.slane %v7415_v13, 1  ;;  %v7424_v36 = vadd.f32 %v7423_v16, %v7422_v60 }
 0xae9   :  { %v10347_v61 = vmul.f32 %v10296_v51, %v10167_v30  ;;  %v7432_v12 = vrot.slane %v7431_v52, 2  ;;  %v7440_v35 = vadd.f32 %v7439_v48, %v7438_v33  ;;  %13838 = vrcp.f32 %v7381_v45 }
 0xaea   :  { %v10348_v7 = vmul.f32 %v10300_v15, %v10168_v29  ;;  %v10391_v24 = vadd.f32 %v10346_v21, %v10345_v27  ;;  %v7390_v42 = vadd.f32 %v7389_v57, %v7388_v26  ;;  %v7397_v51 = vadd.f32 %v7396_v14, %v7395_v22 }
 0xaeb   :  { %v7404_v15 = vadd.f32 %v7403_v25, %v7402_v41  ;;  %v7417_v28 = vadd.f32 %v7416_v5, %v7415_v13  ;;  %v7425_v11 = vrot.slane %v7424_v36, 1  ;;  %v7433_v19 = vadd.f32 %v7432_v12, %v7431_v52 }
 0xaec   :  { %10392 = vadd.xlane.f32.xlu0 %v10391_v24  ;;  %v10394_v18 = vadd.f32 %v10348_v7, %v10347_v61  ;;  %v7441_v32 = vrot.slane %v7440_v35, 2  ;;  %13840 = vrcp.f32 %v7390_v42  ;;  %v7398_v31 = vrot.slane %v7397_v51, 1 }
 0xaed   :  { %v7405_v37 = vrot.slane %v7404_v15, 2  ;;  %13842 = vrcp.f32 %v7417_v28  ;;  %v7426_v58 = vadd.f32 %v7425_v11, %v7424_v36  ;;  %v7434_v6 = vrot.slane %v7433_v19, 1 }
 0xaee   :  { %10395 = vadd.xlane.f32.xlu1 %v10394_v18  ;;  %v7442_v44 = vadd.f32 %v7441_v32, %v7440_v35  ;;  %v7399_v9 = vadd.f32 %v7398_v31, %v7397_v51 }
 0xaef   :  { %v7406_v39 = vadd.f32 %v7405_v37, %v7404_v15  ;;  %13844 = vrcp.f32 %v7426_v58  ;;  %v7435_v60 = vadd.f32 %v7434_v6, %v7433_v19 }
 0xaf0   :  { %v7443_v27 = vrot.slane %v7442_v44, 1  ;;  %13846 = vrcp.f32 %v7399_v9 }
 0xaf1   :  { %v7407_v26 = vrot.slane %v7406_v39, 1  ;;  %13848 = vrcp.f32 %v7435_v60 }
 0xaf2   :  { %v7444_v52 = vadd.f32 %v7443_v27, %v7442_v44 }
 0xaf3   :  { %v13839_v0 = vpop.eup %13838  ;;  %v7408_v21 = vadd.f32 %v7407_v26, %v7406_v39 }
 0xaf4   :  { %v7447_v30 = vmul.f32 %v13839_v0, %v19923_v17  ;;  %v7446_v33 = vmul.f32 %v13839_v0, %v19880_v10  ;;  %13850 = vrcp.f32 %v7444_v52 }
 0xaf5   :  { %13852 = vrcp.f32 %v7408_v21 }
 0xaf6   :  { %v13841_v55 = vpop.eup %13840 }
 0xaf7   :  { %v13843_v29 = vpop.eup %13842  ;;  %v7449_v22 = vmul.f32 %v13841_v55, %v19980_v63  ;;  %v7450_v7 = vmul.f32 %v13841_v55, %v19997_v20 }
 0xaf8   :  { %v7459_v41 = vmul.f32 %v13843_v29, %v19951_v23 }
 0xaf9   :  { %v13845_v61 = vpop.eup %13844 }
 0xafa   :  { %v13847_v17 = vpop.eup %13846  ;;  %v7462_v24 = vmul.f32 %v13845_v61, %v20035_v62 }
 0xafb   :  { %v13849_v45 = vpop.eup %13848  ;;  %v7452_v10 = vmul.f32 %v13847_v17, %v20022_v56  ;;  %v7453_v16 = vmul.f32 %v13847_v17, %v20024_v2  ;;  %v7458_v56 = vmul.f32 %v13843_v29, %v19944_v3 }
 0xafc   :  { %v7465_v63 = vmul.f32 %v13849_v45, %v20059_v59  ;;  %v7461_v59 = vmul.f32 %v13845_v61, %v20032_v53  ;;  %v7464_v2 = vmul.f32 %v13849_v45, %v20052_v34 }
 0xafe   :  { %v13851_v13 = vpop.eup %13850 }
 0xaff   :  { %7476 = vperm.xlu1 %12669, %v7447_v30   ;;  %v13853_v23 = vpop.eup %13852  ;;  %v7468_v20 = vmul.f32 %v13851_v13, %v20074_v47  ;;  %v7467_v18 = vmul.f32 %v13851_v13, %v20068_v46  ;;  %v20110_v47 = vld [vmem:[#allocation3] ss:$0 sm:$0xff] }
 0xb00   :  { %v7455_v48 = vmul.f32 %v13853_v23, %v20064_v50  ;;  %v7456_v62 = vmul.f32 %v13853_v23, %v20077_v38 }
 0xb02   :  { %7471 = vperm.xlu0 %12668, %v7446_v33  }
 0xb03   :  { %7481 = vperm.xlu1 %12669, %v7449_v22  }
 0xb06   :  { %7516 = vperm.xlu0 %12668, %v7459_v41  }
 0xb07   :  { %7486 = vperm.xlu1 %12669, %v7450_v7  }
 0xb0a   :  { %7526 = vperm.xlu0 %12668, %v7462_v24  }
 0xb0b   :  { %7491 = vperm.xlu1 %12669, %v7452_v10  }
 0xb0e   :  { %7536 = vperm.xlu0 %12668, %v7465_v63  }
 0xb0f   :  { %7496 = vperm.xlu1 %12669, %v7453_v16  }
 0xb12   :  { %7546 = vperm.xlu0 %12668, %v7468_v20  }
 0xb13   :  { %7501 = vperm.xlu1 %12669, %v7455_v48  }
 0xb17   :  { %7506 = vperm.xlu1 %12669, %v7456_v62  }
 0xb1b   :  { %7511 = vperm.xlu1 %12669, %v7458_v56  }
 0xb1f   :  { %7521 = vperm.xlu1 %12669, %v7461_v59  }
 0xb23   :  { %7531 = vperm.xlu1 %12669, %v7464_v2  }
 0xb27   :  { %7541 = vperm.xlu1 %12669, %v7467_v18  }
 0xb41   :  { %v10351_v50 = vpop.xlane.xlu0 %10350 }
 0xb42   :  { %v10404_v57 = vadd.f32 %v20110_v47, %v10351_v50 }
 0xb43   :  { %v10354_v14 = vpop.xlane.xlu1 %10353 }
 0xb44   :  { %13854 = vtanh.f32 %v10404_v57  ;;  %v10405_v38 = vadd.f32 %v20110_v47, %v10354_v14 }
 0xb46   :  { %13856 = vtanh.f32 %v10405_v38 }
 0xb49   :  { %v10357_v35 = vpop.xlane.xlu0 %10356 }
 0xb4a   :  { %v10406_v51 = vadd.f32 %v20110_v47, %v10357_v35 }
 0xb4b   :  { %v10360_v46 = vpop.xlane.xlu1 %10359 }
 0xb4c   :  { %v10407_v42 = vadd.f32 %v20110_v47, %v10360_v46 }
 0xb4e   :  { %v13855_v3 = vpop.eup %13854  ;;  %13858 = vtanh.f32 %v10407_v42 }
 0xb4f   :  { %v10436_v53 = vsel %vm7252_vm9, %v13855_v3, -inf  ;;  %13860 = vtanh.f32 %v10406_v51 }
 0xb50   :  { %v13857_v25 = vpop.eup %13856 }
 0xb51   :  { %v10437_v34 = vsel %vm7252_vm9, %v13857_v25, -inf  ;;  %v10363_v33 = vpop.xlane.xlu0 %10362 }
 0xb52   :  { %v10438_v5 = vmax.f32 %v10436_v53, %v10437_v34  ;;  %v10408_v41 = vadd.f32 %v20110_v47, %v10363_v33 }
 0xb53   :  { %v10366_v30 = vpop.xlane.xlu1 %10365 }
 0xb54   :  { %v10439_v36 = vrot.slane %v10438_v5, 4  ;;  %v10409_v29 = vadd.f32 %v20110_v47, %v10366_v30 }
 0xb56   :  { %v10440_v12 = vmax.f32 %v10438_v5, %v10439_v36 }
 0xb58   :  { %v10441_v15 = vrot.slane %v10440_v12, 2  ;;  %v13859_v19 = vpop.eup %13858 }
 0xb59   :  { %v13861_v31 = vpop.eup %13860  ;;  %v10446_v37 = vsel %vm7252_vm9, %v13859_v19, -inf  ;;  %v10369_v14 = vpop.xlane.xlu0 %10368 }
 0xb5a   :  { %v10442_v28 = vmax.f32 %v10440_v12, %v10441_v15  ;;  %v10445_v6 = vsel %vm7252_vm9, %v13861_v31, -inf  ;;  %v10410_v34 = vadd.f32 %v20110_v47, %v10369_v14 }
 0xb5b   :  { %v10447_v9 = vmax.f32 %v10445_v6, %v10446_v37  ;;  %v10372_v50 = vpop.xlane.xlu1 %10371 }
 0xb5c   :  { %v10443_v11 = vrot.slane %v10442_v28, 1  ;;  %v10411_v38 = vadd.f32 %v20110_v47, %v10372_v50 }
 0xb5d   :  { %v10448_v60 = vrot.slane %v10447_v9, 4 }
 0xb5e   :  { %v10444_v32 = vmax.f32 %v10442_v28, %v10443_v11 }
 0xb5f   :  { %v10449_v27 = vmax.f32 %v10447_v9, %v10448_v60 }
 0xb60   :  { %v10508_v58 = vsub.f32 %v13855_v3, %v10444_v32  ;;  %v10509_v44 = vsub.f32 %v13857_v25, %v10444_v32 }
 0xb61   :  { %v10450_v26 = vrot.slane %v10449_v27, 2  ;;  %v10375_v51 = vpop.xlane.xlu0 %10374 }
 0xb62   :  { %v10524_v39 = vmul.f32 1.442695, %v10508_v58  ;;  %v10526_v0 = vmul.f32 1.442695, %v10509_v44  ;;  %v10412_v32 = vadd.f32 %v20110_v47, %v10375_v51 }
 0xb63   :  { %v10451_v55 = vmax.f32 %v10449_v27, %v10450_v26  ;;  %v10378_v42 = vpop.xlane.xlu1 %10377 }
 0xb64   :  { %13862 = vpow2.f32 %v10524_v39  ;;  %v10413_v11 = vadd.f32 %v20110_v47, %v10378_v42 }
 0xb65   :  { %13864 = vpow2.f32 %v10526_v0  ;;  %v10452_v22 = vrot.slane %v10451_v55, 1 }
 0xb66   :  { %13866 = vtanh.f32 %v10409_v29 }
 0xb67   :  { %v10453_v17 = vmax.f32 %v10451_v55, %v10452_v22  ;;  %13868 = vtanh.f32 %v10408_v41 }
 0xb69   :  { %v10510_v45 = vsub.f32 %v13861_v31, %v10453_v17  ;;  %v10511_v63 = vsub.f32 %v13859_v19, %v10453_v17  ;;  %v10381_v31 = vpop.xlane.xlu0 %10380 }
 0xb6a   :  { %v10414_v60 = vadd.f32 %v20110_v47, %v10381_v31 }
 0xb6b   :  { %v10528_v16 = vmul.f32 1.442695, %v10510_v45  ;;  %v10530_v20 = vmul.f32 1.442695, %v10511_v63  ;;  %v10384_v19 = vpop.xlane.xlu1 %10383 }
 0xb6c   :  { %v10415_v44 = vadd.f32 %v20110_v47, %v10384_v19 }
 0xb6d   :  { %13870 = vpow2.f32 %v10528_v16 }
 0xb6e   :  { %v20120_v52 = vpop.eup %13862  ;;  %13872 = vpow2.f32 %v10530_v20 }
 0xb6f   :  { %v20122_v21 = vpop.eup %13864  ;;  %v10556_v7 = vsel %vm7252_vm9, %v20120_v52, 0.0  ;;  %13874 = vtanh.f32 %v10411_v38 }
 0xb70   :  { %v10557_v61 = vsel %vm7252_vm9, %v20122_v21, 0.0  ;;  %v20130_v13 = vpop.eup %13866  ;;  %13876 = vtanh.f32 %v10410_v34 }
 0xb71   :  { %v10558_v24 = vadd.f32 %v10557_v61, %v10556_v7  ;;  %v20132_v48 = vpop.eup %13868  ;;  %v10455_v62 = vsel %vm7252_vm9, %v20130_v13, -inf  ;;  %v10387_v27 = vpop.xlane.xlu0 %10386 }
 0xb72   :  { %v10454_v59 = vsel %vm7252_vm9, %v20132_v48, -inf  ;;  %v10416_v17 = vadd.f32 %v20110_v47, %v10387_v27 }
 0xb73   :  { %v10559_v10 = vrot.slane %v10558_v24, 4  ;;  %v10456_v2 = vmax.f32 %v10454_v59, %v10455_v62  ;;  %v10390_v9 = vpop.xlane.xlu1 %10389 }
 0xb74   :  { %v10417_v33 = vadd.f32 %v20110_v47, %v10390_v9 }
 0xb75   :  { %v10560_v23 = vadd.f32 %v10559_v10, %v10558_v24  ;;  %v10457_v57 = vrot.slane %v10456_v2, 4 }
 0xb77   :  { %v10561_v56 = vrot.slane %v10560_v23, 2  ;;  %v20139_v25 = vpop.eup %13870  ;;  %v10458_v53 = vmax.f32 %v10456_v2, %v10457_v57 }
 0xb78   :  { %v20142_v5 = vpop.eup %13872  ;;  %v10565_v35 = vsel %vm7252_vm9, %v20139_v25, 0.0 }
 0xb79   :  { %v10562_v18 = vadd.f32 %v10561_v56, %v10560_v23  ;;  %v10566_v46 = vsel %vm7252_vm9, %v20142_v5, 0.0  ;;  %v10459_v12 = vrot.slane %v10458_v53, 2  ;;  %v20150_v58 = vpop.eup %13874  ;;  %v10393_v24 = vpop.xlane.xlu0 %10392 }
 0xb7a   :  { %v10567_v15 = vadd.f32 %v10566_v46, %v10565_v35  ;;  %v20153_v39 = vpop.eup %13876  ;;  %v10464_v0 = vsel %vm7252_vm9, %v20150_v58, -inf }
 0xb7b   :  { %v10563_v3 = vrot.slane %v10562_v18, 1  ;;  %v10460_v28 = vmax.f32 %v10458_v53, %v10459_v12  ;;  %v10463_v29 = vsel %vm7252_vm9, %v20153_v39, -inf  ;;  %v10396_v22 = vpop.xlane.xlu1 %10395 }
 0xb7c   :  { %v10568_v37 = vrot.slane %v10567_v15, 4  ;;  %v10465_v7 = vmax.f32 %v10463_v29, %v10464_v0  ;;  %v10419_v63 = vadd.f32 %v20110_v47, %v10396_v22 }
 0xb7d   :  { %v10564_v36 = vadd.f32 %v10563_v3, %v10562_v18  ;;  %v10461_v6 = vrot.slane %v10460_v28, 1 }
 0xb7e   :  { %v10569_v26 = vadd.f32 %v10568_v37, %v10567_v15  ;;  %v10466_v20 = vrot.slane %v10465_v7, 4 }
 0xb7f   :  { %13878 = vrcp.f32 %v10564_v36  ;;  %v10462_v55 = vmax.f32 %v10460_v28, %v10461_v6  ;;  %v7477_v22 = vpop.permute.xlu1 %7476 }
 0xb80   :  { %13880 = vtanh.f32 %v10413_v11  ;;  %v10570_v45 = vrot.slane %v10569_v26, 2  ;;  %v10467_v18 = vmax.f32 %v10465_v7, %v10466_v20 }
 0xb81   :  { %13882 = vtanh.f32 %v10412_v32  ;;  %v10512_v10 = vsub.f32 %v20132_v48, %v10462_v55  ;;  %v10513_v16 = vsub.f32 %v20130_v13, %v10462_v55  ;;  %v7472_v27 = vpop.permute.xlu0 %7471 }
 0xb82   :  { %13884 = vtanh.f32 %v10415_v44  ;;  %v10571_v23 = vadd.f32 %v10570_v45, %v10569_v26  ;;  %v10468_v3 = vrot.slane %v10467_v18, 2 }
 0xb83   :  { %13886 = vtanh.f32 %v10414_v60  ;;  %v10532_v62 = vmul.f32 1.442695, %v10512_v10  ;;  %v10534_v2 = vmul.f32 1.442695, %v10513_v16 }
 0xb84   :  { %13888 = vtanh.f32 %v10417_v33  ;;  %v10572_v56 = vrot.slane %v10571_v23, 1  ;;  %v10469_v51 = vmax.f32 %v10467_v18, %v10468_v3  ;;  %v21733_v3 = vld [vmem:[#allocation69_spill] sm:$0xff] }
 0xb85   :  { %13890 = vtanh.f32 %v10416_v17 }
 0xb86   :  { %13892 = vtanh.f32 %v10419_v63  ;;  %v10470_v6 = vrot.slane %v10469_v51, 1 }
 0xb88   :  { %v10471_v29 = vmax.f32 %v10469_v51, %v10470_v6 }
 0xb89   :  { %v13879_v30 = vpop.eup %13878 }
 0xb8a   :  { %v10630_v41 = vmul.f32 %v13879_v30, %v20122_v21  ;;  %v10629_v61 = vmul.f32 %v13879_v30, %v20120_v52  ;;  %v10418_v52 = vadd.f32 %v20110_v47, %v10393_v24  ;;  %v20168_v21 = vpop.eup %13880  ;;  %v10573_v47 = vadd.f32 %v10572_v56, %v10571_v23  ;;  %v21730_v23 = vld [vmem:[#allocation72_spill] sm:$0xff]  ;;  %v21731_v56 = vld [vmem:[#allocation57_spill] sm:$0xff] }
 0xb8b   :  { %v20170_v59 = vpop.eup %13882  ;;  %v10473_v48 = vsel %vm7252_vm9, %v20168_v21, -inf  ;;  %v7553_v20 = vmul.f32 %v7477_v22, %v21730_v23  ;;  %v10514_v18 = vsub.f32 %v20153_v39, %v10471_v29 }
 0xb8c   :  { %10659 = vperm.xlu0 %12668, %v10630_v41   ;;  %10654 = vperm.xlu1 %12669, %v10629_v61   ;;  %13894 = vtanh.f32 %v10418_v52  ;;  %v20174_v50 = vpop.eup %13884  ;;  %v10472_v13 = vsel %vm7252_vm9, %v20170_v59, -inf  ;;  %v21729_v61 = vld [vmem:[#allocation71_spill] sm:$0xff] }
 0xb8d   :  { %13896 = vpow2.f32 %v10532_v62  ;;  %v20178_v57 = vpop.eup %13886  ;;  %v10474_v14 = vmax.f32 %v10472_v13, %v10473_v48  ;;  %v10482_v53 = vsel %vm7252_vm9, %v20174_v50, -inf  ;;  %v7549_v7 = vmul.f32 %v7472_v27, %v21729_v61 }
 0xb8e   :  { %13898 = vpow2.f32 %v10534_v2  ;;  %v20180_v38 = vpop.eup %13888  ;;  %v10481_v36 = vsel %vm7252_vm9, %v20178_v57, -inf  ;;  %v10515_v62 = vsub.f32 %v20150_v58, %v10471_v29  ;;  %v7550_v2 = vmul.f32 %v7472_v27, %v21731_v56 }
 0xb8f   :  { %v20184_v34 = vpop.eup %13890  ;;  %13900 = vrcp.f32 %v10573_v47  ;;  %v10475_v46 = vrot.slane %v10474_v14, 4  ;;  %v10483_v12 = vmax.f32 %v10481_v36, %v10482_v53  ;;  %v10491_v35 = vsel %vm7252_vm9, %v20180_v38, -inf }
 0xb90   :  { %v20190_v42 = vpop.eup %13892  ;;  %v10490_v15 = vsel %vm7252_vm9, %v20184_v34, -inf  ;;  %v7613_v48 = vadd.f32 %v7553_v20, %v7549_v7  ;;  %v7551_v53 = vmul.f32 %v7472_v27, %v21733_v3 }
 0xb91   :  { %v10492_v11 = vmax.f32 %v10490_v15, %v10491_v35  ;;  %v10476_v19 = vmax.f32 %v10474_v14, %v10475_v46  ;;  %v10484_v32 = vrot.slane %v10483_v12, 4  ;;  %v10500_v31 = vsel %vm7252_vm9, %v20190_v42, -inf }
 0xb92   :  { %v10538_v15 = vmul.f32 1.442695, %v10515_v62  ;;  %v7614_v6 = vrot.slane %v7613_v48, 4 }
 0xb93   :  { %v10493_v0 = vrot.slane %v10492_v11, 4  ;;  %v10477_v26 = vrot.slane %v10476_v19, 2  ;;  %v10485_v30 = vmax.f32 %v10483_v12, %v10484_v32  ;;  %v21734_v12 = vld [vmem:[#allocation58_spill] sm:$0xff]  ;;  %v10536_v32 = vmul.f32 1.442695, %v10514_v18 }
 0xb94   :  { %v7552_v35 = vmul.f32 %v7472_v27, %v21734_v12  ;;  %13902 = vpow2.f32 %v10538_v15  ;;  %v7615_v27 = vadd.f32 %v7614_v6, %v7613_v48 }
 0xb95   :  { %v10494_v45 = vmax.f32 %v10492_v11, %v10493_v0  ;;  %v10478_v63 = vmax.f32 %v10476_v19, %v10477_v26  ;;  %v10486_v16 = vrot.slane %v10485_v30, 2  ;;  %v21735_v11 = vld [vmem:[#allocation76_spill] sm:$0xff]  ;;  %13904 = vpow2.f32 %v10536_v32 }
 0xb96   :  { %v20194_v28 = vpop.eup %13894  ;;  %v7555_v58 = vmul.f32 %v7477_v22, %v21735_v11 }
 0xb97   :  { %v20198_v37 = vpop.eup %13896  ;;  %v10499_v9 = vsel %vm7252_vm9, %v20194_v28, -inf  ;;  %v10479_v36 = vrot.slane %v10478_v63, 1  ;;  %v10487_v46 = vmax.f32 %v10485_v30, %v10486_v16 }
 0xb98   :  { %v20200_v44 = vpop.eup %13898  ;;  %v10501_v60 = vmax.f32 %v10499_v9, %v10500_v31  ;;  %v10574_v41 = vsel %vm7252_vm9, %v20198_v37, 0.0  ;;  %v21736_v31 = vld [vmem:[#allocation73_spill] sm:$0xff]  ;;  %v7627_v26 = vadd.f32 %v7555_v58, %v7551_v53 }
 0xb99   :  { %v13901_v55 = vpop.eup %13900  ;;  %v10575_v33 = vsel %vm7252_vm9, %v20200_v44, 0.0  ;;  %v7556_v39 = vmul.f32 %v7477_v22, %v21736_v31 }
 0xb9a   :  { %v10633_v17 = vmul.f32 %v13901_v55, %v20142_v5  ;;  %v10632_v24 = vmul.f32 %v13901_v55, %v20139_v25  ;;  %v10502_v10 = vrot.slane %v10501_v60, 4  ;;  %v10576_v52 = vadd.f32 %v10575_v33, %v10574_v41  ;;  %v21732_v25 = vld [vmem:[#allocation70_spill] sm:$0xff] }
 0xb9b   :  { %v10495_v5 = vrot.slane %v10494_v45, 2  ;;  %v7554_v14 = vmul.f32 %v7477_v22, %v21732_v25  ;;  %v10480_v55 = vmax.f32 %v10478_v63, %v10479_v36  ;;  %v10488_v33 = vrot.slane %v10487_v46, 1 }
 0xb9c   :  { %10669 = vperm.xlu0 %12668, %v10633_v17   ;;  %10664 = vperm.xlu1 %12669, %v10632_v24   ;;  %v10577_v13 = vrot.slane %v10576_v52, 4  ;;  %v10503_v47 = vmax.f32 %v10501_v60, %v10502_v10  ;;  %v7634_v29 = vadd.f32 %v7556_v39, %v7552_v35  ;;  %v7628_v24 = vrot.slane %v7627_v26, 4 }
 0xb9d   :  { %v7620_v19 = vadd.f32 %v7554_v14, %v7550_v2  ;;  %v10496_v0 = vmax.f32 %v10494_v45, %v10495_v5  ;;  %v10516_v10 = vsub.f32 %v20170_v59, %v10480_v55  ;;  %v10489_v22 = vmax.f32 %v10487_v46, %v10488_v33  ;;  %v21740_v33 = vld [vmem:[#allocation80_spill] sm:$0xff] }
 0xb9e   :  { %v10578_v51 = vadd.f32 %v10577_v13, %v10576_v52  ;;  %v10504_v60 = vrot.slane %v10503_v47, 2  ;;  %v7635_v16 = vrot.slane %v7634_v29, 4  ;;  %v10517_v45 = vsub.f32 %v20168_v21, %v10480_v55  ;;  %v20223_v13 = vpop.permute.xlu1 %7481  ;;  %v20226_v14 = vpop.eup %13902 }
 0xb9f   :  { %v7621_v30 = vrot.slane %v7620_v19, 4  ;;  %v10497_v7 = vrot.slane %v10496_v0, 1  ;;  %v7616_v63 = vrot.slane %v7615_v27, 2  ;;  %v7629_v56 = vadd.f32 %v7628_v24, %v7627_v26  ;;  %v20229_v36 = vpop.eup %13904  ;;  %v21739_v26 = vld [vmem:[#allocation85_spill] sm:$0xff] }
 0xba0   :  { %v10579_v9 = vrot.slane %v10578_v51, 2  ;;  %v10505_v17 = vmax.f32 %v10503_v47, %v10504_v60  ;;  %v10540_v2 = vmul.f32 1.442695, %v10516_v10  ;;  %v10518_v18 = vsub.f32 %v20178_v57, %v10489_v22 }
 0xba1   :  { %v7622_v23 = vadd.f32 %v7621_v30, %v7620_v19  ;;  %v10498_v52 = vmax.f32 %v10496_v0, %v10497_v7  ;;  %v7636_v48 = vadd.f32 %v7635_v16, %v7634_v29  ;;  %v10542_v5 = vmul.f32 1.442695, %v10517_v45  ;;  %v21742_v7 = vld [vmem:[#allocation90_spill] sm:$0xff] }
 0xba2   :  { %v10580_v41 = vadd.f32 %v10579_v9, %v10578_v51  ;;  %v10506_v62 = vrot.slane %v10505_v17, 1  ;;  %v10519_v47 = vsub.f32 %v20174_v50, %v10489_v22  ;;  %v7617_v25 = vadd.f32 %v7616_v63, %v7615_v27  ;;  %v21737_v51 = vld [vmem:[#allocation79_spill] sm:$0xff]  ;;  %v7487_v32 = vpop.permute.xlu1 %7486 }
 0xba3   :  { %v7623_v59 = vrot.slane %v7622_v23, 2  ;;  %v10521_v21 = vsub.f32 %v20180_v38, %v10498_v52  ;;  %v7630_v53 = vrot.slane %v7629_v56, 2  ;;  %v10544_v46 = vmul.f32 1.442695, %v10518_v18  ;;  %v21738_v38 = vld [vmem:[#allocation77_spill] sm:$0xff] }
 0xba4   :  { %v10581_v61 = vrot.slane %v10580_v41, 1  ;;  %v10507_v3 = vmax.f32 %v10505_v17, %v10506_v62  ;;  %v7637_v57 = vrot.slane %v7636_v48, 2  ;;  %v10546_v12 = vmul.f32 1.442695, %v10519_v47  ;;  %v7517_v47 = vpop.permute.xlu0 %7516 }
 0xba5   :  { %v7624_v35 = vadd.f32 %v7623_v59, %v7622_v23  ;;  %v7557_v50 = vmul.f32 %v20223_v13, %v21737_v51  ;;  %v10584_v15 = vsel %vm7252_vm9, %v20226_v14, 0.0  ;;  %v10520_v11 = vsub.f32 %v20184_v34, %v10498_v52  ;;  %v21743_v59 = vld [vmem:[#allocation84_spill] sm:$0xff] }
 0xba6   :  { %v10582_v20 = vadd.f32 %v10581_v61, %v10580_v41  ;;  %v7618_v58 = vrot.slane %v7617_v25, 1  ;;  %v7558_v19 = vmul.f32 %v20223_v13, %v21738_v38  ;;  %v10550_v31 = vmul.f32 1.442695, %v10521_v21  ;;  %v21741_v61 = vld [vmem:[#allocation78_spill] sm:$0xff] }
 0xba7   :  { %v10522_v39 = vsub.f32 %v20194_v28, %v10507_v3  ;;  %v7631_v6 = vadd.f32 %v7630_v53, %v7629_v56  ;;  %v10583_v9 = vsel %vm7252_vm9, %v20229_v36, 0.0  ;;  %v10523_v0 = vsub.f32 %v20190_v42, %v10507_v3  ;;  %v21744_v53 = vld [vmem:[#allocation83_spill] sm:$0xff] }
 0xba8   :  { %13906 = vrcp.f32 %v10582_v20  ;;  %v7638_v60 = vadd.f32 %v7637_v57, %v7636_v48  ;;  %v7559_v55 = vmul.f32 %v20223_v13, %v21739_v26  ;;  %v7625_v34 = vrot.slane %v7624_v35, 1  ;;  %v20272_v26 = vpop.permute.xlu0 %7526 }
 0xba9   :  { %13908 = vpow2.f32 %v10540_v2  ;;  %v7561_v29 = vmul.f32 %v7487_v32, %v21740_v33  ;;  %v10585_v41 = vadd.f32 %v10584_v15, %v10583_v9  ;;  %v10548_v30 = vmul.f32 1.442695, %v10520_v11  ;;  %v21746_v9 = vld [vmem:[#allocation102_spill] sm:$0xff] }
 0xbaa   :  { %13910 = vpow2.f32 %v10542_v5  ;;  %v7619_v27 = vadd.f32 %v7618_v58, %v7617_v25  ;;  %v7562_v28 = vmul.f32 %v7487_v32, %v21741_v61  ;;  %v7563_v17 = vmul.f32 %v7487_v32, %v21742_v7  ;;  %v21747_v7 = vld [vmem:[#allocation35_spill] sm:$0xff] }
 0xbab   :  { %13912 = vpow2.f32 %v10544_v46  ;;  %v10552_v10 = vmul.f32 1.442695, %v10522_v39  ;;  %v7632_v22 = vrot.slane %v7631_v6, 1  ;;  %v10586_v42 = vrot.slane %v10585_v41, 4 }
 0xbac   :  { %13914 = vpow2.f32 %v10546_v12  ;;  %v10554_v16 = vmul.f32 1.442695, %v10523_v0  ;;  %v7639_v45 = vrot.slane %v7638_v60, 1  ;;  %v7626_v63 = vadd.f32 %v7625_v34, %v7624_v35  ;;  %v20256_v12 = vpop.permute.xlu1 %7491 }
 0xbad   :  { %13916 = vpow2.f32 %v10550_v31  ;;  %v7641_v52 = vadd.f32 %v7561_v29, %v7557_v50  ;;  %v10587_v62 = vadd.f32 %v10586_v42, %v10585_v41  ;;  %v7648_v2 = vadd.f32 %v7562_v28, %v7558_v19  ;;  %v21745_v31 = vld [vmem:[#allocation104_spill] sm:$0xff] }
 0xbae   :  { %13918 = vpow2.f32 %v10548_v30  ;;  %v7655_v18 = vadd.f32 %v7563_v17, %v7559_v55  ;;  %v7633_v5 = vadd.f32 %v7632_v22, %v7631_v6  ;;  %v7564_v25 = vmul.f32 %v7487_v32, %v21743_v59  ;;  %v21749_v22 = vld [vmem:[#allocation112_spill] sm:$0xff] }
 0xbaf   :  { %13920 = vpow2.f32 %v10552_v10  ;;  %v12076_v21 = vmul.f32 -1.442695, %v7619_v27  ;;  %v12077_v3 = vmul.f32 -1.442695, %v7626_v63  ;;  %v7560_v46 = vmul.f32 %v20223_v13, %v21744_v53 }
 0xbb0   :  { %13922 = vpow2.f32 %v10554_v16  ;;  %v7642_v57 = vrot.slane %v7641_v52, 4  ;;  %v7649_v50 = vrot.slane %v7648_v2, 4  ;;  %v7656_v15 = vrot.slane %v7655_v18, 4  ;;  %v7497_v30 = vpop.permute.xlu1 %7496 }
 0xbb1   :  { %v12078_v58 = vmul.f32 -1.442695, %v7633_v5  ;;  %v7662_v38 = vadd.f32 %v7564_v25, %v7560_v46  ;;  %13924 = vpow2.f32 %v12076_v21  ;;  %v20263_v39 = vmul.f32 %v7517_v47, %v21745_v31  ;;  %v21753_v46 = vld [vmem:[#allocation60_spill] sm:$0xff]  ;;  %v21754_v31 = vld [vmem:[#allocation86_spill] sm:$0xff] }
 0xbb2   :  { %v13907_v24 = vpop.eup %13906  ;;  %13926 = vpow2.f32 %v12077_v3  ;;  %v20270_v0 = vmul.f32 %v7517_v47, %v21746_v9  ;;  %v7650_v34 = vadd.f32 %v7649_v50, %v7648_v2  ;;  %v7657_v33 = vadd.f32 %v7656_v15, %v7655_v18  ;;  %v21750_v18 = vld [vmem:[#allocation89_spill] sm:$0xff]  ;;  %v21752_v3 = vld [vmem:[#allocation87_spill] sm:$0xff] }
 0xbb3   :  { %v10636_v23 = vmul.f32 %v13907_v24, %v20200_v44  ;;  %v10635_v20 = vmul.f32 %v13907_v24, %v20198_v37  ;;  %v20249_v56 = vpop.eup %13908  ;;  %v10588_v44 = vrot.slane %v10587_v62, 2  ;;  %v7640_v37 = vadd.f32 %v7639_v45, %v7638_v60  ;;  %v21748_v24 = vld [vmem:[#allocation30_spill] sm:$0xff]  ;;  %v21755_v9 = vld [vmem:[#allocation59_spill] sm:$0xff] }
 0xbb4   :  { %v20251_v48 = vpop.eup %13910  ;;  %v7643_v60 = vadd.f32 %v7642_v57, %v7641_v52  ;;  %13928 = vpow2.f32 %v12078_v58  ;;  %v7663_v41 = vrot.slane %v7662_v38, 4  ;;  %v10592_v27 = vsel %vm7252_vm9, %v20249_v56, 0.0 }
 0xbb5   :  { %10679 = vperm.xlu0 %12668, %v10636_v23   ;;  %10674 = vperm.xlu1 %12669, %v10635_v20   ;;  %v10589_v35 = vadd.f32 %v10588_v44, %v10587_v62  ;;  %v20258_v51 = vpop.eup %13912  ;;  %v12079_v32 = vmul.f32 -1.442695, %v7640_v37  ;;  %v10593_v13 = vsel %vm7252_vm9, %v20251_v48, 0.0  ;;  %v20283_v17 = vmul.f32 %v7517_v47, %v21747_v7  ;;  %v21751_v37 = vld [vmem:[#allocation88_spill] sm:$0xff] }
 0xbb6   :  { %v20260_v11 = vpop.eup %13914  ;;  %v10601_v61 = vsel %vm7252_vm9, %v20258_v51, 0.0  ;;  %v20286_v10 = vmul.f32 %v7517_v47, %v21748_v24  ;;  %v20290_v42 = vmul.f32 %v20272_v26, %v21749_v22  ;;  %v7644_v23 = vrot.slane %v7643_v60, 2 }
 0xbb7   :  { %v10590_v19 = vrot.slane %v10589_v35, 1  ;;  %v20265_v6 = vpop.eup %13916  ;;  %v10602_v55 = vsel %vm7252_vm9, %v20260_v11, 0.0  ;;  %13930 = vpow2.f32 %v12079_v32  ;;  %v10594_v20 = vadd.f32 %v10593_v13, %v10592_v27 }
 0xbb8   :  { %v20280_v28 = vpop.eup %13918  ;;  %v10611_v45 = vsel %vm7252_vm9, %v20265_v6, 0.0  ;;  %v10603_v63 = vadd.f32 %v10602_v55, %v10601_v61  ;;  %v7651_v62 = vrot.slane %v7650_v34, 2  ;;  %v7658_v2 = vrot.slane %v7657_v33, 2  ;;  %v21756_v61 = vld [vmem:[#allocation109_spill] sm:$0xff] }
 0xbb9   :  { %v10591_v29 = vadd.f32 %v10590_v19, %v10589_v35  ;;  %v20292_v16 = vpop.eup %13920  ;;  %v7569_v5 = vmul.f32 %v7497_v30, %v21750_v18  ;;  %v7664_v47 = vadd.f32 %v7663_v41, %v7662_v38  ;;  %v10595_v59 = vrot.slane %v10594_v20, 4 }
 0xbba   :  { %v20296_v52 = vpop.eup %13922  ;;  %v10604_v25 = vrot.slane %v10603_v63, 4  ;;  %v10610_v44 = vsel %vm7252_vm9, %v20280_v28, 0.0  ;;  %v7565_v21 = vmul.f32 %v20256_v12, %v21751_v37  ;;  %v7570_v53 = vmul.f32 %v7497_v30, %v21752_v3 }
 0xbbb   :  { %13932 = vrcp.f32 %v10591_v29  ;;  %v7571_v57 = vmul.f32 %v7497_v30, %v21753_v46  ;;  %v10612_v35 = vadd.f32 %v10611_v45, %v10610_v44  ;;  %v10620_v50 = vsel %vm7252_vm9, %v20296_v52, 0.0  ;;  %v13925_v19 = vpop.eup %13924  ;;  %v21757_v46 = vld [vmem:[#allocation126_spill] sm:$0xff] }
 0xbbc   :  { %v10596_v15 = vadd.f32 %v10595_v59, %v10594_v20  ;;  %v10605_v58 = vadd.f32 %v10604_v25, %v10603_v63  ;;  %v10619_v38 = vsel %vm7252_vm9, %v20292_v16, 0.0  ;;  %v7645_v32 = vadd.f32 %v7644_v23, %v7643_v60  ;;  %v13927_v41 = vpop.eup %13926 }
 0xbbd   :  { %v7566_v13 = vmul.f32 %v20256_v12, %v21754_v31  ;;  %v7567_v55 = vmul.f32 %v20256_v12, %v21755_v9  ;;  %v7669_v29 = vadd.f32 %v7569_v5, %v7565_v21  ;;  %v7652_v27 = vadd.f32 %v7651_v62, %v7650_v34 }
 0xbbe   :  { %v20315_v7 = vmul.f32 %v20272_v26, %v21756_v61  ;;  %v10597_v24 = vrot.slane %v10596_v15, 2  ;;  %v10606_v22 = vrot.slane %v10605_v58, 2  ;;  %v10613_v63 = vrot.slane %v10612_v35, 4  ;;  %v13929_v60 = vpop.eup %13928 }
 0xbbf   :  { %v7676_v45 = vadd.f32 %v7570_v53, %v7566_v13  ;;  %v7683_v20 = vadd.f32 %v7571_v57, %v7567_v55  ;;  %v10621_v18 = vadd.f32 %v10620_v50, %v10619_v38  ;;  %v7659_v23 = vadd.f32 %v7658_v2, %v7657_v33  ;;  %v20320_v50 = vpop.permute.xlu1 %7501 }
 0xbc0   :  { %v7665_v59 = vrot.slane %v7664_v47, 2  ;;  %v10598_v25 = vadd.f32 %v10597_v24, %v10596_v15  ;;  %v10607_v44 = vadd.f32 %v10606_v22, %v10605_v58  ;;  %v7646_v5 = vrot.slane %v7645_v32, 1  ;;  %v21758_v58 = vld [vmem:[#allocation125_spill] sm:$0xff] }
 0xbc1   :  { %v20317_v37 = vpop.eup %13930  ;;  %v7670_v21 = vrot.slane %v7669_v29, 4  ;;  %v10614_v34 = vadd.f32 %v10613_v63, %v10612_v35  ;;  %v10622_v62 = vrot.slane %v10621_v18, 4  ;;  %v7653_v3 = vrot.slane %v7652_v27, 1 }
 0xbc2   :  { %v7572_v31 = vmul.f32 %v7497_v30, %v21757_v46  ;;  %v10599_v9 = vrot.slane %v10598_v25, 1  ;;  %v10608_v61 = vrot.slane %v10607_v44, 1  ;;  %v7677_v57 = vrot.slane %v7676_v45, 4 }
 0xbc3   :  { %v7684_v13 = vrot.slane %v7683_v20, 4  ;;  %v10615_v33 = vrot.slane %v10614_v34, 2  ;;  %v10623_v2 = vadd.f32 %v10622_v62, %v10621_v18  ;;  %v7666_v15 = vadd.f32 %v7665_v59, %v7664_v47 }
 0xbc4   :  { %v7568_v38 = vmul.f32 %v20256_v12, %v21758_v58  ;;  %v7671_v24 = vadd.f32 %v7670_v21, %v7669_v29  ;;  %v10600_v22 = vadd.f32 %v10599_v9, %v10598_v25  ;;  %v10609_v30 = vadd.f32 %v10608_v61, %v10607_v44  ;;  %v7507_v21 = vpop.permute.xlu1 %7506  ;;  %v21762_v58 = vld [vmem:[#allocation96_spill] sm:$0xff] }
 0xbc5   :  { %v13933_v53 = vpop.eup %13932  ;;  %v10616_v63 = vadd.f32 %v10615_v33, %v10614_v34  ;;  %v7660_v46 = vrot.slane %v7659_v23, 1  ;;  %v20328_v8 = vmul.f32 %v20272_v26, %v21759_v54  ;;  %v10624_v47 = vrot.slane %v10623_v2, 2  ;;  %v21760_v54 = vld [vmem:[#allocation31_spill] sm:$0xff] }
 0xbc6   :  { %v10639_v55 = vmul.f32 %v13933_v53, %v20226_v14  ;;  %v10638_v35 = vmul.f32 %v13933_v53, %v20229_v36  ;;  %v7690_v40 = vadd.f32 %v7572_v31, %v7568_v38  ;;  %v7678_v18 = vadd.f32 %v7677_v57, %v7676_v45  ;;  %v21763_v38 = vld [vmem:[#allocation95_spill] sm:$0xff] }
 0xbc7   :  { %v7685_v59 = vadd.f32 %v7684_v13, %v7683_v20  ;;  %13934 = vrcp.f32 %v10600_v22  ;;  %v10617_v12 = vrot.slane %v10616_v63, 1  ;;  %v11117_v14 = vadd.f32 1.0, %v13925_v19 }
 0xbc8   :  { %10689 = vperm.xlu0 %12668, %v10639_v55   ;;  %10684 = vperm.xlu1 %12669, %v10638_v35   ;;  %v7647_v62 = vadd.f32 %v7646_v5, %v7645_v32  ;;  %13936 = vrcp.f32 %v10609_v30  ;;  %v10625_v36 = vadd.f32 %v10624_v47, %v10623_v2  ;;  %v7654_v29 = vadd.f32 %v7653_v3, %v7652_v27  ;;  %v21761_v32 = vld [vmem:[#allocation97_spill] sm:$0xff]  ;;  %v21764_v30 = vld [vmem:[#allocation94_spill] sm:$0xff] }
 0xbc9   :  { %v7667_v25 = vrot.slane %v7666_v15, 1  ;;  %v7672_v44 = vrot.slane %v7671_v24, 2  ;;  %v10618_v34 = vadd.f32 %v10617_v12, %v10616_v63  ;;  %v11118_v9 = vadd.f32 1.0, %v13927_v41  ;;  %v21766_v12 = vld [vmem:[#allocation56_spill] sm:$0xff] }
 0xbca   :  { %v20332_v31 = vmul.f32 %v20272_v26, %v21760_v54  ;;  %v7691_v61 = vrot.slane %v7690_v40, 4  ;;  %v10626_v53 = vrot.slane %v10625_v36, 1  ;;  %v7661_v45 = vadd.f32 %v7660_v46, %v7659_v23  ;;  %v21765_v46 = vld [vmem:[#allocation61_spill] sm:$0xff] }
 0xbcb   :  { %v7679_v20 = vrot.slane %v7678_v18, 2  ;;  %v7686_v57 = vrot.slane %v7685_v59, 2  ;;  %13938 = vrcp.f32 %v10618_v34  ;;  %v12080_v19 = vmul.f32 -1.442695, %v7647_v62 }
 0xbcc   :  { %13940 = vrcp.f32 %v11117_v14  ;;  %v7577_v5 = vmul.f32 %v7507_v21, %v21761_v32  ;;  %v10627_v27 = vadd.f32 %v10626_v53, %v10625_v36  ;;  %v11119_v3 = vadd.f32 1.0, %v13929_v60  ;;  %v7537_v36 = vpop.permute.xlu0 %7536  ;;  %v21768_v32 = vld [vmem:[#allocation118_spill] sm:$0xff] }
 0xbcd   :  { %v7668_v13 = vadd.f32 %v7667_v25, %v7666_v15  ;;  %v12081_v33 = vmul.f32 -1.442695, %v7654_v29  ;;  %v7673_v2 = vadd.f32 %v7672_v44, %v7671_v24  ;;  %13942 = vrcp.f32 %v11118_v9  ;;  %v21767_v9 = vld [vmem:[#allocation64_spill] sm:$0xff] }
 0xbce   :  { %v7692_v41 = vadd.f32 %v7691_v61, %v7690_v40  ;;  %v7573_v26 = vmul.f32 %v20320_v50, %v21762_v58  ;;  %v7578_v55 = vmul.f32 %v7507_v21, %v21763_v38  ;;  %v12082_v23 = vmul.f32 -1.442695, %v7661_v45  ;;  %v7512_v45 = vpop.permute.xlu1 %7511 }
 0xbcf   :  { %v7680_v35 = vadd.f32 %v7679_v20, %v7678_v18  ;;  %v7687_v22 = vadd.f32 %v7686_v57, %v7685_v59  ;;  %13944 = vrcp.f32 %v10627_v27  ;;  %v7574_v63 = vmul.f32 %v20320_v50, %v21764_v30 }
 0xbd0   :  { %13946 = vpow2.f32 %v12080_v19  ;;  %v7579_v60 = vmul.f32 %v7507_v21, %v21765_v46  ;;  %v7697_v15 = vadd.f32 %v7577_v5, %v7573_v26  ;;  %v12083_v24 = vmul.f32 -1.442695, %v7668_v13  ;;  %v21769_v5 = vld [vmem:[#allocation62_spill] sm:$0xff] }
 0xbd1   :  { %v13935_v47 = vpop.eup %13934  ;;  %13948 = vpow2.f32 %v12081_v33  ;;  %v7674_v40 = vrot.slane %v7673_v2, 1  ;;  %v7575_v14 = vmul.f32 %v20320_v50, %v21766_v12  ;;  %v7693_v29 = vrot.slane %v7692_v41, 2 }
 0xbd2   :  { %v13937_v62 = vpop.eup %13936  ;;  %v7704_v18 = vadd.f32 %v7578_v55, %v7574_v63  ;;  %v10642_v59 = vmul.f32 %v13935_v47, %v20251_v48  ;;  %v10641_v25 = vmul.f32 %v13935_v47, %v20249_v56  ;;  %13950 = vrcp.f32 %v11119_v3 }
 0xbd3   :  { %v7681_v44 = vrot.slane %v7680_v35, 1  ;;  %v7688_v34 = vrot.slane %v7687_v22, 1  ;;  %v7580_v54 = vmul.f32 %v7507_v21, %v21767_v9  ;;  %v7698_v61 = vrot.slane %v7697_v15, 4 }
 0xbd4   :  { %v7711_v53 = vadd.f32 %v7579_v60, %v7575_v14  ;;  %10699 = vperm.xlu0 %12668, %v10642_v59   ;;  %10694 = vperm.xlu1 %12669, %v10641_v25   ;;  %v10645_v20 = vmul.f32 %v13937_v62, %v20260_v11  ;;  %v10644_v57 = vmul.f32 %v13937_v62, %v20258_v51  ;;  %13952 = vpow2.f32 %v12082_v23  ;;  %v21770_v51 = vld [vmem:[#allocation103_spill] sm:$0xff]  ;;  %v21773_v60 = vld [vmem:[#allocation101_spill] sm:$0xff] }
 0xbd5   :  { %v13939_v19 = vpop.eup %13938  ;;  %v20349_v48 = vmul.f32 %v7537_v36, %v21768_v32  ;;  %v7675_v56 = vadd.f32 %v7674_v40, %v7673_v2  ;;  %v7576_v27 = vmul.f32 %v20320_v50, %v21769_v5  ;;  %v11120_v21 = vadd.f32 1.0, %v20317_v37  ;;  %v21771_v37 = vld [vmem:[#allocation117_spill] sm:$0xff] }
 0xbd6   :  { %v20353_v3 = vpop.eup %13940  ;;  %13954 = vpow2.f32 %v12083_v24  ;;  %v7694_v13 = vadd.f32 %v7693_v29, %v7692_v41  ;;  %v7705_v33 = vrot.slane %v7704_v18, 4  ;;  %v7682_v58 = vadd.f32 %v7681_v44, %v7680_v35  ;;  %v21772_v41 = vld [vmem:[#allocation47_spill] sm:$0xff]  ;;  %v20371_v29 = vpop.permute.xlu0 %7546 }
 0xbd7   :  { %v7689_v11 = vadd.f32 %v7688_v34, %v7687_v22  ;;  %v7718_v26 = vadd.f32 %v7580_v54, %v7576_v27  ;;  %v7581_v38 = vmul.f32 %v7512_v45, %v21770_v51  ;;  %v20357_v55 = vpop.eup %13942  ;;  %v7699_v23 = vadd.f32 %v7698_v61, %v7697_v15  ;;  %v21774_v15 = vld [vmem:[#allocation46_spill] sm:$0xff] }
 0xbd8   :  { %v7712_v30 = vrot.slane %v7711_v53, 4  ;;  %10709 = vperm.xlu0 %12668, %v10645_v20   ;;  %10704 = vperm.xlu1 %12669, %v10644_v57   ;;  %v10648_v50 = vmul.f32 %v13939_v19, %v20265_v6  ;;  %v10647_v2 = vmul.f32 %v13939_v19, %v20280_v28  ;;  %v20362_v46 = vmul.f32 %v7537_v36, %v21771_v37  ;;  %v21776_v20 = vld [vmem:[#allocation63_spill] sm:$0xff] }
 0xbd9   :  { %v13945_v63 = vpop.eup %13944  ;;  %v20365_v35 = vmul.f32 %v7537_v36, %v21772_v41  ;;  %v12084_v22 = vmul.f32 -1.442695, %v7675_v56  ;;  %v7582_v47 = vmul.f32 %v7512_v45, %v21773_v60  ;;  %13956 = vrcp.f32 %v11120_v21  ;;  %v21777_v56 = vld [vmem:[#allocation124_spill] sm:$0xff] }
 0xbda   :  { %v13947_v24 = vpop.eup %13946  ;;  %v20369_v40 = vmul.f32 %v7537_v36, %v21774_v15  ;;  %v7695_v12 = vrot.slane %v7694_v13, 1  ;;  %v7706_v14 = vadd.f32 %v7705_v33, %v7704_v18  ;;  %v12085_v62 = vmul.f32 -1.442695, %v7682_v58  ;;  %v21775_v18 = vld [vmem:[#allocation93_spill] sm:$0xff] }
 0xbdb   :  { %v13949_v6 = vpop.eup %13948  ;;  %v12086_v28 = vmul.f32 -1.442695, %v7689_v11  ;;  %v7719_v59 = vrot.slane %v7718_v26, 4  ;;  %v7725_v25 = vadd.f32 %v20263_v39, %v7581_v38  ;;  %v7700_v44 = vrot.slane %v7699_v23, 2 }
 0xbdc   :  { %v7713_v34 = vadd.f32 %v7712_v30, %v7711_v53  ;;  %10719 = vperm.xlu0 %12668, %v10648_v50   ;;  %10714 = vperm.xlu1 %12669, %v10647_v2   ;;  %v10651_v9 = vmul.f32 %v13945_v63, %v20296_v52  ;;  %v10650_v54 = vmul.f32 %v13945_v63, %v20292_v16  ;;  %v20376_v36 = vpop.eup %13950  ;;  %13958 = vpow2.f32 %v12084_v22  ;;  %v21778_v53 = vld [vmem:[#allocation123_spill] sm:$0xff]  ;;  %v7522_v16 = vpop.permute.xlu1 %7521  ;;  %v21780_v22 = vld [vmem:[#allocation108_spill] sm:$0xff] }
 0xbdd   :  { %v7583_v61 = vmul.f32 %v7512_v45, %v21775_v18  ;;  %v7584_v57 = vmul.f32 %v7512_v45, %v21776_v20  ;;  %v7732_v19 = vadd.f32 %v20270_v0, %v7582_v47  ;;  %v11121_v32 = vadd.f32 1.0, %v13947_v24  ;;  %v21779_v2 = vld [vmem:[#allocation111_spill] sm:$0xff] }
 0xbde   :  { %v20383_v39 = vmul.f32 %v20371_v29, %v21777_v56  ;;  %v20387_v5 = vmul.f32 %v20371_v29, %v21778_v53  ;;  %v7707_v52 = vrot.slane %v7706_v14, 2  ;;  %v13953_v27 = vpop.eup %13952  ;;  %v11122_v21 = vadd.f32 1.0, %v13949_v6  ;;  %v21781_v6 = vld [vmem:[#allocation38_spill] sm:$0xff] }
 0xbdf   :  { %13960 = vpow2.f32 %v12085_v62  ;;  %v7720_v33 = vadd.f32 %v7719_v59, %v7718_v26  ;;  %v7726_v58 = vrot.slane %v7725_v25, 4  ;;  %v7696_v45 = vadd.f32 %v7695_v12, %v7694_v13 }
 0xbe0   :  { %v13955_v11 = vpop.eup %13954  ;;  %13962 = vpow2.f32 %v12086_v28  ;;  %v7701_v0 = vadd.f32 %v7700_v44, %v7699_v23  ;;  %v7714_v51 = vrot.slane %v7713_v34, 2  ;;  %10729 = vperm.xlu0 %12668, %v10651_v9   ;;  %10724 = vperm.xlu1 %12669, %v10650_v54   ;;  %v7733_v38 = vrot.slane %v7732_v19, 4  ;;  %v7532_v62 = vpop.permute.xlu1 %7531  ;;  %v21782_v9 = vld [vmem:[#allocation29_spill] sm:$0xff] }
 0xbe1   :  { %v7739_v30 = vadd.f32 %v20283_v17, %v7583_v61  ;;  %v7746_v50 = vadd.f32 %v20286_v10, %v7584_v57  ;;  %v7589_v63 = vmul.f32 %v7522_v16, %v21779_v2  ;;  %v11123_v37 = vadd.f32 1.0, %v13953_v27  ;;  %v21783_v57 = vld [vmem:[#allocation120_spill] sm:$0xff] }
 0xbe2   :  { %13964 = vrcp.f32 %v11121_v32  ;;  %v7708_v41 = vadd.f32 %v7707_v52, %v7706_v14  ;;  %v7590_v26 = vmul.f32 %v7522_v16, %v21780_v22  ;;  %v11124_v60 = vadd.f32 1.0, %v13955_v11 }
 0xbe3   :  { %13966 = vrcp.f32 %v11122_v21  ;;  %v7721_v13 = vrot.slane %v7720_v33, 2  ;;  %v7727_v47 = vadd.f32 %v7726_v58, %v7725_v25  ;;  %v20393_v23 = vpop.eup %13956  ;;  %v12087_v24 = vmul.f32 -1.442695, %v7696_v45 }
 0xbe4   :  { %v7702_v15 = vrot.slane %v7701_v0, 1  ;;  %v7715_v12 = vadd.f32 %v7714_v51, %v7713_v34  ;;  %v7591_v17 = vmul.f32 %v7522_v16, %v21781_v6  ;;  %v7734_v10 = vadd.f32 %v7733_v38, %v7732_v19  ;;  %v21784_v38 = vld [vmem:[#allocation116_spill] sm:$0xff] }
 0xbe5   :  { %v7740_v28 = vrot.slane %v7739_v30, 4  ;;  %v7747_v59 = vrot.slane %v7746_v50, 4  ;;  %v7753_v44 = vadd.f32 %v20290_v42, %v7589_v63  ;;  %13968 = vrcp.f32 %v11123_v37 }
 0xbe6   :  { %v7709_v14 = vrot.slane %v7708_v41, 1  ;;  %v7592_v54 = vmul.f32 %v7522_v16, %v21782_v9  ;;  %v7760_v18 = vadd.f32 %v20315_v7, %v7590_v26  ;;  %v13959_v25 = vpop.eup %13958  ;;  %13970 = vrcp.f32 %v11124_v60 }
 0xbe7   :  { %v7722_v61 = vadd.f32 %v7721_v13, %v7720_v33  ;;  %v7728_v20 = vrot.slane %v7727_v47, 2  ;;  %v7597_v34 = vmul.f32 %v7532_v62, %v21783_v57  ;;  %13972 = vpow2.f32 %v12087_v24 }
 0xbe8   :  { %v7703_v32 = vadd.f32 %v7702_v15, %v7701_v0  ;;  %v7716_v56 = vrot.slane %v7715_v12, 1  ;;  %v7767_v19 = vadd.f32 %v20328_v8, %v7591_v17  ;;  %v7735_v52 = vrot.slane %v7734_v10, 2 }
 0xbe9   :  { %v13961_v53 = vpop.eup %13960  ;;  %v7741_v42 = vadd.f32 %v7740_v28, %v7739_v30  ;;  %v7748_v27 = vadd.f32 %v7747_v59, %v7746_v50  ;;  %v7754_v21 = vrot.slane %v7753_v44, 4  ;;  %v11125_v16 = vadd.f32 1.0, %v13959_v25 }
 0xbea   :  { %v13963_v58 = vpop.eup %13962  ;;  %v7710_v11 = vadd.f32 %v7709_v14, %v7708_v41  ;;  %v7761_v7 = vrot.slane %v7760_v18, 4  ;;  %v7774_v45 = vadd.f32 %v20332_v31, %v7592_v54  ;;  %v7723_v33 = vrot.slane %v7722_v61, 1  ;;  %v21786_v54 = vld [vmem:[#allocation39_spill] sm:$0xff] }
 0xbeb   :  { %v7729_v51 = vadd.f32 %v7728_v20, %v7727_v47  ;;  %v7598_v2 = vmul.f32 %v7532_v62, %v21784_v38  ;;  %v7781_v0 = vadd.f32 %v20349_v48, %v7597_v34  ;;  %v11126_v8 = vadd.f32 1.0, %v13961_v53  ;;  %v21785_v47 = vld [vmem:[#allocation45_spill] sm:$0xff] }
 0xbec   :  { %v20404_v63 = vpop.eup %13964  ;;  %v7717_v37 = vadd.f32 %v7716_v56, %v7715_v12  ;;  %v12088_v22 = vmul.f32 -1.442695, %v7703_v32  ;;  %v7768_v30 = vrot.slane %v7767_v19, 4  ;;  %v11127_v26 = vadd.f32 1.0, %v13963_v58 }
 0xbed   :  { %v20406_v50 = vpop.eup %13966  ;;  %v7736_v60 = vadd.f32 %v7735_v52, %v7734_v10  ;;  %v7742_v41 = vrot.slane %v7741_v42, 2  ;;  %v7755_v13 = vadd.f32 %v7754_v21, %v7753_v44  ;;  %13974 = vrcp.f32 %v11125_v16 }
 0xbee   :  { %v7762_v31 = vadd.f32 %v7761_v7, %v7760_v18  ;;  %v7775_v24 = vrot.slane %v7774_v45, 4  ;;  %v7599_v15 = vmul.f32 %v7532_v62, %v21785_v47  ;;  %v7724_v6 = vadd.f32 %v7723_v33, %v7722_v61 }
 0xbef   :  { %v7730_v17 = vrot.slane %v7729_v51, 1  ;;  %v7782_v48 = vrot.slane %v7781_v0, 4  ;;  %v7788_v28 = vadd.f32 %v20362_v46, %v7598_v2  ;;  %v20410_v59 = vpop.eup %13968  ;;  %v12089_v12 = vmul.f32 -1.442695, %v7710_v11 }
 0xbf0   :  { %v7749_v14 = vrot.slane %v7748_v27, 2  ;;  %v7769_v9 = vadd.f32 %v7768_v30, %v7767_v19  ;;  %v7600_v25 = vmul.f32 %v7532_v62, %v21786_v54  ;;  %v20413_v10 = vpop.eup %13970  ;;  %13976 = vrcp.f32 %v11126_v8  ;;  %v7542_v19 = vpop.permute.xlu1 %7541 }
 0xbf1   :  { %v7737_v44 = vrot.slane %v7736_v60, 1  ;;  %v7743_v18 = vadd.f32 %v7742_v41, %v7741_v42  ;;  %v7756_v20 = vrot.slane %v7755_v13, 2  ;;  %v20415_v57 = vpop.eup %13972  ;;  %v12090_v61 = vmul.f32 -1.442695, %v7717_v37 }
 0xbf2   :  { %v7763_v34 = vrot.slane %v7762_v31, 2  ;;  %v7776_v32 = vadd.f32 %v7775_v24, %v7774_v45  ;;  %v7795_v46 = vadd.f32 %v20365_v35, %v7599_v15  ;;  %13978 = vrcp.f32 %v11127_v26  ;;  %v21787_v45 = vld [vmem:[#allocation128_spill] sm:$0xff] }
 0xbf3   :  { %v7731_v56 = vadd.f32 %v7730_v17, %v7729_v51  ;;  %v7783_v53 = vadd.f32 %v7782_v48, %v7781_v0  ;;  %v7789_v52 = vrot.slane %v7788_v28, 4  ;;  %v12091_v21 = vmul.f32 -1.442695, %v7724_v6  ;;  %v21788_v17 = vld [vmem:[#allocation67_spill] sm:$0xff] }
 0xbf4   :  { %v7750_v62 = vadd.f32 %v7749_v14, %v7748_v27  ;;  %v7770_v58 = vrot.slane %v7769_v9, 2  ;;  %v7802_v16 = vadd.f32 %v20369_v40, %v7600_v25  ;;  %13980 = vpow2.f32 %v12088_v22 }
 0xbf5   :  { %v7738_v42 = vadd.f32 %v7737_v44, %v7736_v60  ;;  %v7744_v11 = vrot.slane %v7743_v18, 1  ;;  %v7757_v7 = vadd.f32 %v7756_v20, %v7755_v13  ;;  %v7764_v33 = vadd.f32 %v7763_v34, %v7762_v31  ;;  %v21790_v44 = vld [vmem:[#allocation54_spill] sm:$0xff] }
 0xbf6   :  { %v7777_v38 = vrot.slane %v7776_v32, 2  ;;  %v7796_v2 = vrot.slane %v7795_v46, 4  ;;  %v7605_v8 = vmul.f32 %v7542_v19, %v21787_v45  ;;  %13982 = vpow2.f32 %v12089_v12  ;;  %v21792_v45 = vld [vmem:[#allocation55_spill] sm:$0xff] }
 0xbf7   :  { %v12092_v35 = vmul.f32 -1.442695, %v7731_v56  ;;  %v7784_v51 = vrot.slane %v7783_v53, 2  ;;  %v7790_v0 = vadd.f32 %v7789_v52, %v7788_v28  ;;  %v20420_v37 = vpop.eup %13974  ;;  %13984 = vpow2.f32 %v12090_v61 }
 0xbf8   :  { %v7751_v27 = vrot.slane %v7750_v62, 1  ;;  %v7771_v30 = vadd.f32 %v7770_v58, %v7769_v9  ;;  %v7803_v26 = vrot.slane %v7802_v16, 4  ;;  %13986 = vpow2.f32 %v12091_v21  ;;  %v21789_v9 = vld [vmem:[#allocation52_spill] sm:$0xff]  ;;  %v21791_v21 = vld [vmem:[#allocation115_spill] sm:$0xff] }
 0xbf9   :  { %v7745_v40 = vadd.f32 %v7744_v11, %v7743_v18  ;;  %v12093_v22 = vmul.f32 -1.442695, %v7738_v42  ;;  %v7758_v60 = vrot.slane %v7757_v7, 1  ;;  %v7765_v41 = vrot.slane %v7764_v33, 1 }
 0xbfa   :  { %v7778_v13 = vadd.f32 %v7777_v38, %v7776_v32  ;;  %v7797_v31 = vadd.f32 %v7796_v2, %v7795_v46  ;;  %v7809_v24 = vadd.f32 %v20383_v39, %v7605_v8  ;;  %v20423_v47 = vpop.eup %13976  ;;  %13988 = vpow2.f32 %v12092_v35 }
 0xbfb   :  { %v7785_v15 = vadd.f32 %v7784_v51, %v7783_v53  ;;  %v7791_v6 = vrot.slane %v7790_v0, 2  ;;  %v7606_v48 = vmul.f32 %v7542_v19, %v21788_v17  ;;  %v7752_v28 = vadd.f32 %v7751_v27, %v7750_v62 }
 0xbfc   :  { %v7772_v12 = vrot.slane %v7771_v30, 1  ;;  %v7804_v14 = vadd.f32 %v7803_v26, %v7802_v16  ;;  %v7607_v54 = vmul.f32 %v7542_v19, %v21789_v9  ;;  %v20427_v25 = vpop.eup %13978  ;;  %v7611_v18 = vmul.f32 %v20371_v29, %v21790_v44 }
 0xbfd   :  { %13990 = vpow2.f32 %v12093_v22  ;;  %v12094_v20 = vmul.f32 -1.442695, %v7745_v40  ;;  %v7759_v39 = vadd.f32 %v7758_v60, %v7757_v7  ;;  %v7766_v61 = vadd.f32 %v7765_v41, %v7764_v33 }
 0xbfe   :  { %v7779_v34 = vrot.slane %v7778_v13, 1  ;;  %v7798_v32 = vrot.slane %v7797_v31, 2  ;;  %v7810_v46 = vrot.slane %v7809_v24, 4  ;;  %v13981_v56 = vpop.eup %13980  ;;  %v7786_v53 = vrot.slane %v7785_v15, 1 }
 0xbff   :  { %v7792_v52 = vadd.f32 %v7791_v6, %v7790_v0  ;;  %v7608_v62 = vmul.f32 %v7542_v19, %v21791_v21  ;;  %v7816_v58 = vadd.f32 %v20387_v5, %v7606_v48  ;;  %v12095_v16 = vmul.f32 -1.442695, %v7752_v28 }
 0xc00   :  { %v7773_v42 = vadd.f32 %v7772_v12, %v7771_v30  ;;  %v7805_v11 = vrot.slane %v7804_v14, 2  ;;  %v7823_v38 = vadd.f32 %v7611_v18, %v7607_v54  ;;  %v13983_v2 = vpop.eup %13982  ;;  %v7612_v8 = vmul.f32 %v20371_v29, %v21792_v45 }
 0xc01   :  { %13992 = vpow2.f32 %v12094_v20  ;;  %v12096_v7 = vmul.f32 -1.442695, %v7759_v39  ;;  %v13985_v33 = vpop.eup %13984  ;;  %v7780_v35 = vadd.f32 %v7779_v34, %v7778_v13  ;;  %v12097_v51 = vmul.f32 -1.442695, %v7766_v61 }
 0xc02   :  { %v7799_v27 = vadd.f32 %v7798_v32, %v7797_v31  ;;  %v7811_v26 = vadd.f32 %v7810_v46, %v7809_v24  ;;  %v13987_v0 = vpop.eup %13986  ;;  %v7787_v40 = vadd.f32 %v7786_v53, %v7785_v15  ;;  %v7793_v19 = vrot.slane %v7792_v52, 1 }
 0xc03   :  { %v7817_v22 = vrot.slane %v7816_v58, 4  ;;  %v7830_v5 = vadd.f32 %v7612_v8, %v7608_v62  ;;  %13994 = vpow2.f32 %v12095_v16  ;;  %v12098_v30 = vmul.f32 -1.442695, %v7773_v42 }
 0xc04   :  { %v7806_v60 = vadd.f32 %v7805_v11, %v7804_v14  ;;  %v7824_v41 = vrot.slane %v7823_v38, 4  ;;  %v13989_v6 = vpop.eup %13988  ;;  %v11128_v17 = vadd.f32 1.0, %v20415_v57  ;;  %13996 = vpow2.f32 %v12096_v7 }
 0xc05   :  { %13998 = vpow2.f32 %v12097_v51  ;;  %v12099_v29 = vmul.f32 -1.442695, %v7780_v35  ;;  %v7800_v48 = vrot.slane %v7799_v27, 1  ;;  %v7812_v13 = vrot.slane %v7811_v26, 2 }
 0xc06   :  { %v7794_v31 = vadd.f32 %v7793_v19, %v7792_v52  ;;  %v12100_v24 = vmul.f32 -1.442695, %v7787_v40  ;;  %v7818_v12 = vadd.f32 %v7817_v22, %v7816_v58  ;;  %v7831_v15 = vrot.slane %v7830_v5, 4 }
 0xc07   :  { %v13991_v28 = vpop.eup %13990  ;;  %v11129_v9 = vadd.f32 1.0, %v13981_v56  ;;  %14000 = vpow2.f32 %v12098_v30  ;;  %v7807_v54 = vrot.slane %v7806_v60, 1  ;;  %v7825_v44 = vadd.f32 %v7824_v41, %v7823_v38 }
 0xc08   :  { %14002 = vrcp.f32 %v11128_v17  ;;  %v11130_v14 = vadd.f32 1.0, %v13983_v2  ;;  %v11131_v18 = vadd.f32 1.0, %v13985_v33  ;;  %v7801_v20 = vadd.f32 %v7800_v48, %v7799_v27 }
 0xc09   :  { %14004 = vpow2.f32 %v12099_v29  ;;  %v7813_v57 = vadd.f32 %v7812_v13, %v7811_v26  ;;  %v12101_v61 = vmul.f32 -1.442695, %v7794_v31  ;;  %v7819_v34 = vrot.slane %v7818_v12, 2 }
 0xc0a   :  { %14006 = vpow2.f32 %v12100_v24  ;;  %v7832_v32 = vadd.f32 %v7831_v15, %v7830_v5  ;;  %v11132_v46 = vadd.f32 1.0, %v13987_v0  ;;  %v7808_v53 = vadd.f32 %v7807_v54, %v7806_v60 }
 0xc0b   :  { %v13993_v39 = vpop.eup %13992  ;;  %14008 = vrcp.f32 %v11129_v9  ;;  %v7826_v52 = vrot.slane %v7825_v44, 2  ;;  %v11133_v56 = vadd.f32 1.0, %v13989_v6  ;;  %v11134_v62 = vadd.f32 1.0, %v13991_v28  ;;  %v10655_v9 = vpop.permute.xlu1 %10654 }
 0xc0c   :  { %14010 = vrcp.f32 %v11130_v14  ;;  %v7814_v58 = vrot.slane %v7813_v57, 1  ;;  %v12102_v42 = vmul.f32 -1.442695, %v7801_v20  ;;  %v7820_v11 = vadd.f32 %v7819_v34, %v7818_v12 }
 0xc0d   :  { %v13995_v21 = vpop.eup %13994  ;;  %14012 = vrcp.f32 %v11131_v18  ;;  %v7833_v38 = vrot.slane %v7832_v32, 2  ;;  %v12103_v45 = vmul.f32 -1.442695, %v7808_v53  ;;  %v7827_v8 = vadd.f32 %v7826_v52, %v7825_v44  ;;  %v10660_v18 = vpop.permute.xlu0 %10659 }
 0xc0e   :  { %v13997_v16 = vpop.eup %13996  ;;  %14014 = vpow2.f32 %v12101_v61  ;;  %v11135_v7 = vadd.f32 1.0, %v13993_v39  ;;  %v11136_v35 = vadd.f32 1.0, %v13995_v21  ;;  %v7815_v51 = vadd.f32 %v7814_v58, %v7813_v57 }
 0xc0f   :  { %v13999_v2 = vpop.eup %13998  ;;  %14016 = vrcp.f32 %v11132_v46  ;;  %v11137_v26 = vadd.f32 1.0, %v13997_v16  ;;  %v7821_v0 = vrot.slane %v7820_v11, 1  ;;  %v7834_v40 = vadd.f32 %v7833_v38, %v7832_v32  ;;  %v21795_v16 = vld [vmem:[#allocation9_spill] sm:$0xff] }
 0xc10   :  { %14018 = vrcp.f32 %v11133_v56  ;;  %v11138_v22 = vadd.f32 1.0, %v13999_v2  ;;  %v7828_v5 = vrot.slane %v7827_v8, 1  ;;  %v12104_v6 = vmul.f32 -1.442695, %v7815_v51  ;;  %v21793_v56 = vld [vmem:[#allocation110_spill] sm:$0xff] }
 0xc11   :  { %v14001_v33 = vpop.eup %14000  ;;  %14020 = vrcp.f32 %v11134_v62  ;;  %v7822_v48 = vadd.f32 %v7821_v0, %v7820_v11  ;;  %v7835_v13 = vrot.slane %v7834_v40, 1  ;;  %v10732_v34 = vmul.f32 %v10655_v9, %v19328_v4  ;;  %v21794_v62 = vld [vmem:[#allocation106_spill] sm:$0xff]  ;;  %v21796_v11 = vld [vmem:[#allocation8_spill] sm:$0xff] }
 0xc12   :  { %v20436_v27 = vpop.eup %14002  ;;  %14022 = vpow2.f32 %v12102_v42  ;;  %v11139_v60 = vadd.f32 1.0, %v14001_v33  ;;  %v7829_v24 = vadd.f32 %v7828_v5, %v7827_v8  ;;  %v10733_v32 = vmul.f32 %v10655_v9, %v19320_v1 }
 0xc13   :  { %v14005_v19 = vpop.eup %14004  ;;  %14024 = vpow2.f32 %v12103_v45  ;;  %v7836_v44 = vadd.f32 %v7835_v13, %v7834_v40  ;;  %v12105_v14 = vmul.f32 -1.442695, %v7822_v48  ;;  %v10734_v46 = vmul.f32 %v10655_v9, %v19630_v49 }
 0xc14   :  { %v14007_v30 = vpop.eup %14006  ;;  %14026 = vrcp.f32 %v11135_v7  ;;  %v11140_v29 = vadd.f32 1.0, %v14005_v19  ;;  %v12106_v39 = vmul.f32 -1.442695, %v7829_v24  ;;  %v10735_v53 = vmul.f32 %v10655_v9, %v19605_v43  ;;  %v21797_v9 = vld [vmem:[#allocation122_spill] sm:$0xff] }
 0xc15   :  { %v20438_v41 = vpop.eup %14008  ;;  %14028 = vrcp.f32 %v11136_v35  ;;  %v11141_v31 = vadd.f32 1.0, %v14007_v30  ;;  %v10736_v21 = vmul.f32 %v10660_v18, %v21793_v56  ;;  %v10737_v58 = vmul.f32 %v10660_v18, %v21794_v62  ;;  %v21803_v56 = vld [vmem:[#allocation26_spill] sm:$0xff] }
 0xc16   :  { %v20440_v17 = vpop.eup %14010  ;;  %14030 = vrcp.f32 %v11137_v26  ;;  %v10738_v42 = vmul.f32 %v10660_v18, %v21795_v16  ;;  %v10739_v38 = vmul.f32 %v10660_v18, %v21796_v11  ;;  %v12107_v45 = vmul.f32 -1.442695, %v7836_v44 }
 0xc17   :  { %v20442_v28 = vpop.eup %14012  ;;  %14032 = vrcp.f32 %v11138_v22  ;;  %v10796_v7 = vadd.f32 %v10736_v21, %v10732_v34  ;;  %v10803_v33 = vadd.f32 %v10737_v58, %v10733_v32  ;;  %v20471_v40 = vstv %s20792_s21  ;;  %v21804_v21 = vld [vmem:[#allocation10_spill] sm:$0xff] }
 0xc18   :  { %v14015_v12 = vpop.eup %14014  ;;  %14034 = vrcp.f32 %v11139_v60  ;;  %v10810_v35 = vadd.f32 %v10738_v42, %v10734_v46  ;;  %v10817_v51 = vadd.f32 %v10739_v38, %v10735_v53  ;;  %v20483_v24 = vmul.f32 %v20357_v55, %v20471_v40  ;;  %v21801_v46 = vld [vmem:[#allocation127_spill] sm:$0xff] }
 0xc19   :  { %v20444_v15 = vpop.eup %14016  ;;  %14036 = vpow2.f32 %v12104_v6  ;;  %v11142_v57 = vadd.f32 1.0, %v14015_v12  ;;  %v10797_v30 = vrot.slane %v10796_v7, 4  ;;  %v10804_v60 = vrot.slane %v10803_v33, 4  ;;  %v21802_v53 = vld [vmem:[#allocation119_spill] sm:$0xff] }
 0xc1a   :  { %v20446_v54 = vpop.eup %14018  ;;  %14038 = vrcp.f32 %v11140_v29  ;;  %v10811_v6 = vrot.slane %v10810_v35, 4  ;;  %v10818_v29 = vrot.slane %v10817_v51, 4  ;;  %v20487_v12 = vmul.f32 %v20376_v36, %v20471_v40 }
 0xc1b   :  { %v20448_v20 = vpop.eup %14020  ;;  %14040 = vrcp.f32 %v11141_v31  ;;  %v10665_v22 = vpop.permute.xlu1 %10664  ;;  %v20479_v31 = vmul.f32 %v20353_v3, %v20471_v40  ;;  %v10798_v36 = vadd.f32 %v10797_v30, %v10796_v7  ;;  %v10805_v16 = vadd.f32 %v10804_v60, %v10803_v33 }
 0xc1c   :  { %v14023_v61 = vpop.eup %14022  ;;  %14042 = vpow2.f32 %v12105_v14  ;;  %v10670_v48 = vpop.permute.xlu0 %10669  ;;  %v10740_v44 = vmul.f32 %v10665_v22, %v21797_v9  ;;  %v21798_v14 = vld [vmem:[#allocation114_spill] sm:$0xff]  ;;  %v10812_v42 = vadd.f32 %v10811_v6, %v10810_v35  ;;  %v10819_v11 = vadd.f32 %v10818_v29, %v10817_v51 }
 0xc1d   :  { %v14025_v52 = vpop.eup %14024  ;;  %v11143_v1 = vadd.f32 1.0, %v14023_v61  ;;  %14044 = vrcp.f32 %v11142_v57  ;;  %v10741_v18 = vmul.f32 %v10665_v22, %v21798_v14  ;;  %v21799_v57 = vld [vmem:[#allocation27_spill] sm:$0xff]  ;;  %v10744_v3 = vmul.f32 %v10670_v48, %v21801_v46 }
 0xc1e   :  { %v20458_v2 = vpop.eup %14026  ;;  %v11144_v43 = vadd.f32 1.0, %v14025_v52  ;;  %14046 = vpow2.f32 %v12106_v39  ;;  %v10742_v39 = vmul.f32 %v10665_v22, %v21799_v57  ;;  %v21800_v61 = vld [vmem:[#allocation11_spill] sm:$0xff]  ;;  %v10745_v52 = vmul.f32 %v10670_v48, %v21802_v53 }
 0xc1f   :  { %v20460_v4 = vpop.eup %14028  ;;  %14048 = vpow2.f32 %v12107_v45  ;;  %v10743_v34 = vmul.f32 %v10665_v22, %v21800_v61  ;;  %v10746_v55 = vmul.f32 %v10670_v48, %v21803_v56  ;;  %v10747_v62 = vmul.f32 %v10670_v48, %v21804_v21 }
 0xc20   :  { %v20462_v49 = vpop.eup %14030  ;;  %14050 = vrcp.f32 %v11143_v1  ;;  %v20501_v45 = vmul.f32 %v20393_v23, %v20471_v40  ;;  %v20505_v1 = vmul.f32 %v20404_v63, %v20471_v40  ;;  %v20513_v7 = vmul.f32 %v20410_v59, %v20471_v40 }
 0xc21   :  { %v20464_v8 = vpop.eup %14032  ;;  %14052 = vrcp.f32 %v11144_v43  ;;  %v20509_v43 = vmul.f32 %v20406_v50, %v20471_v40  ;;  %v20517_v33 = vmul.f32 %v20413_v10, %v20471_v40  ;;  %v20521_v23 = vmul.f32 %v20420_v37, %v20471_v40 }
 0xc22   :  { %v20466_v26 = vpop.eup %14034  ;;  %v10824_v63 = vadd.f32 %v10744_v3, %v10740_v44  ;;  %v10831_v51 = vadd.f32 %v10745_v52, %v10741_v18  ;;  %v10838_v22 = vadd.f32 %v10746_v55, %v10742_v39  ;;  %v10845_v30 = vadd.f32 %v10747_v62, %v10743_v34 }
 0xc23   :  { %v14037_v0 = vpop.eup %14036  ;;  %v10799_v60 = vrot.slane %v10798_v36, 2  ;;  %v10806_v6 = vrot.slane %v10805_v16, 2  ;;  %v10813_v29 = vrot.slane %v10812_v42, 2  ;;  %v10820_v59 = vrot.slane %v10819_v11, 2 }
 0xc24   :  { %v20473_v19 = vpop.eup %14038  ;;  %v11145_v13 = vadd.f32 1.0, %v14037_v0  ;;  %v20529_v10 = vmul.f32 %v20423_v47, %v20471_v40  ;;  %v20533_v37 = vmul.f32 %v20427_v25, %v20471_v40  ;;  %v20537_v9 = vmul.f32 %v20436_v27, %v20471_v40 }
 0xc25   :  { %v20475_v5 = vpop.eup %14040  ;;  %v20541_v14 = vmul.f32 %v20438_v41, %v20471_v40  ;;  %v20545_v18 = vmul.f32 %v20440_v17, %v20471_v40  ;;  %v10825_v47 = vrot.slane %v10824_v63, 4  ;;  %v10832_v57 = vrot.slane %v10831_v51, 4 }
 0xc26   :  { %v14043_v32 = vpop.eup %14042  ;;  %14054 = vrcp.f32 %v11145_v13  ;;  %v10839_v39 = vrot.slane %v10838_v22, 4  ;;  %v10846_v61 = vrot.slane %v10845_v30, 4  ;;  %v10800_v25 = vadd.f32 %v10799_v60, %v10798_v36 }
 0xc27   :  { %v20497_v58 = vpop.eup %14044  ;;  %v11146_v0 = vadd.f32 1.0, %v14043_v32  ;;  %v10807_v34 = vadd.f32 %v10806_v6, %v10805_v16  ;;  %v10814_v32 = vadd.f32 %v10813_v29, %v10812_v42  ;;  %v10821_v46 = vadd.f32 %v10820_v59, %v10819_v11  ;;  %v21813_v6 = vld [vmem:[#allocation14_spill] sm:$0xff] }
 0xc28   :  { %v14047_v38 = vpop.eup %14046  ;;  %v20549_v27 = vmul.f32 %v20442_v28, %v20471_v40  ;;  %v20553_v41 = vmul.f32 %v20444_v15, %v20471_v40  ;;  %v20557_v17 = vmul.f32 %v20446_v54, %v20471_v40  ;;  %v20561_v53 = vmul.f32 %v20448_v20, %v20471_v40  ;;  %v21810_v20 = vld [vmem:[#allocation121_spill] sm:$0xff] }
 0xc29   :  { %v14049_v35 = vpop.eup %14048  ;;  %v11147_v13 = vadd.f32 1.0, %v14047_v38  ;;  %14056 = vrcp.f32 %v11146_v0  ;;  %v20565_v52 = vmul.f32 %v20458_v2, %v20471_v40  ;;  %v20569_v28 = vmul.f32 %v20460_v4, %v20471_v40  ;;  %v21811_v0 = vld [vmem:[#allocation130_spill] sm:$0xff]  ;;  %v21814_v4 = vld [vmem:[#allocation129_spill] sm:$0xff] }
 0xc2a   :  { %v20523_v50 = vpop.eup %14050  ;;  %v11148_v44 = vadd.f32 1.0, %v14049_v35  ;;  %21805 = vst [vmem:[#allocation44_spill] sm:$0xff] %v20553_v41  ;;  %21806 = vst [vmem:[#allocation48_spill] sm:$0xff] %v20557_v17  ;;  %v10826_v56 = vadd.f32 %v10825_v47, %v10824_v63  ;;  %v10833_v55 = vadd.f32 %v10832_v57, %v10831_v51  ;;  %v10840_v21 = vadd.f32 %v10839_v39, %v10838_v22  ;;  %v21812_v2 = vld [vmem:[#allocation18_spill] sm:$0xff]  ;;  %v21816_v51 = vld [vmem:[#allocation16_spill] sm:$0xff] }
 0xc2b   :  { %v20525_v48 = vpop.eup %14052  ;;  %14058 = vrcp.f32 %v11147_v13  ;;  %21807 = vst [vmem:[#allocation51_spill] sm:$0xff] %v20561_v53  ;;  %21808 = vst [vmem:[#allocation53_spill] sm:$0xff] %v20565_v52  ;;  %v10847_v54 = vadd.f32 %v10846_v61, %v10845_v30  ;;  %v10801_v36 = vrot.slane %v10800_v25, 1  ;;  %v10808_v16 = vrot.slane %v10807_v34, 1  ;;  %v21815_v13 = vld [vmem:[#allocation113_spill] sm:$0xff]  ;;  %v21817_v30 = vld [vmem:[#allocation12_spill] sm:$0xff] }
 0xc2c   :  { %14060 = vrcp.f32 %v11148_v44  ;;  %21809 = vst [vmem:[#allocation71_spill] sm:$0xff] %v20569_v28  ;;  %v10815_v42 = vrot.slane %v10814_v32, 1  ;;  %v10822_v11 = vrot.slane %v10821_v46, 1  ;;  %v10827_v47 = vrot.slane %v10826_v56, 2 }
 0xc2d   :  { %v10834_v57 = vrot.slane %v10833_v55, 2  ;;  %v10841_v39 = vrot.slane %v10840_v21, 2  ;;  %v10848_v61 = vrot.slane %v10847_v54, 2 }
 0xc2e   :  { %v10828_v53 = vadd.f32 %v10827_v47, %v10826_v56 }
 0xc2f   :  { %v10849_v17 = vadd.f32 %v10848_v61, %v10847_v54  ;;  %v21825_v61 = vld [vmem:[#allocation33_spill] sm:$0xff] }
 0xc30   :  { %v14055_v15 = vpop.eup %14054 }
 0xc33   :  { %v14057_v28 = vpop.eup %14056 }
 0xc34   :  { %v10675_v3 = vpop.permute.xlu1 %10674  ;;  %v10680_v62 = vpop.permute.xlu0 %10679 }
 0xc35   :  { %v10748_v38 = vmul.f32 %v10675_v3, %v21810_v20  ;;  %v10749_v35 = vmul.f32 %v10675_v3, %v21811_v0  ;;  %v10750_v60 = vmul.f32 %v10675_v3, %v21812_v2  ;;  %v10751_v29 = vmul.f32 %v10675_v3, %v21813_v6  ;;  %v14059_v52 = vpop.eup %14058 }
 0xc36   :  { %v10752_v59 = vmul.f32 %v10680_v62, %v21814_v4  ;;  %v10753_v63 = vmul.f32 %v10680_v62, %v21815_v13  ;;  %v10754_v22 = vmul.f32 %v10680_v62, %v21816_v51  ;;  %v10755_v44 = vmul.f32 %v10680_v62, %v21817_v30  ;;  %v14061_v41 = vpop.eup %14060 }
 0xc37   :  { %v20581_v20 = vmul.f32 %v20462_v49, %v20471_v40  ;;  %v20585_v3 = vmul.f32 %v20464_v8, %v20471_v40  ;;  %v20589_v0 = vmul.f32 %v20466_v26, %v20471_v40  ;;  %v20593_v62 = vmul.f32 %v20473_v19, %v20471_v40 }
 0xc38   :  { %v10802_v2 = vadd.f32 %v10801_v36, %v10800_v25  ;;  %v10809_v6 = vadd.f32 %v10808_v16, %v10807_v34  ;;  %v10816_v4 = vadd.f32 %v10815_v42, %v10814_v32  ;;  %v10823_v13 = vadd.f32 %v10822_v11, %v10821_v46 }
 0xc39   :  { %21818 = vst [vmem:[#allocation72_spill] sm:$0xff] %v20581_v20  ;;  %21819 = vst [vmem:[#allocation57_spill] sm:$0xff] %v20585_v3  ;;  %v10852_v51 = vadd.f32 %v10752_v59, %v10748_v38  ;;  %v10859_v30 = vadd.f32 %v10753_v63, %v10749_v35  ;;  %v10866_v49 = vadd.f32 %v10754_v22, %v10750_v60  ;;  %v10829_v36 = vrot.slane %v10828_v53, 1 }
 0xc3a   :  { %v10873_v20 = vadd.f32 %v10755_v44, %v10751_v29  ;;  %v10835_v8 = vadd.f32 %v10834_v57, %v10833_v55  ;;  %v10842_v3 = vadd.f32 %v10841_v39, %v10840_v21  ;;  %v20597_v26 = vmul.f32 %v20475_v5, %v20471_v40  ;;  %v21824_v57 = vld [vmem:[#allocation68_spill] sm:$0xff] }
 0xc3b   :  { %v20601_v19 = vmul.f32 %v20497_v58, %v20471_v40  ;;  %v20605_v25 = vmul.f32 %v20523_v50, %v20471_v40  ;;  %v20609_v34 = vmul.f32 %v20525_v48, %v20471_v40  ;;  %v11246_v32 = vmul.f32 %v20479_v31, %v10802_v2 }
 0xc3c   :  { %v11247_v46 = vmul.f32 %v20483_v24, %v10809_v6  ;;  %v11248_v56 = vmul.f32 %v20487_v12, %v10816_v4  ;;  %v11249_v5 = vmul.f32 %v20501_v45, %v10823_v13  ;;  %v10853_v55 = vrot.slane %v10852_v51, 4 }
 0xc3d   :  { %v10860_v21 = vrot.slane %v10859_v30, 4  ;;  %v10867_v58 = vrot.slane %v10866_v49, 4  ;;  %v10874_v54 = vrot.slane %v10873_v20, 4  ;;  %v10836_v16 = vrot.slane %v10835_v8, 1 }
 0xc3e   :  { %v10843_v50 = vrot.slane %v10842_v3, 1  ;;  %v10850_v42 = vrot.slane %v10849_v17, 1  ;;  %v20616_v11 = vmul.f32 %v14055_v15, %v20471_v40  ;;  %v20619_v48 = vmul.f32 %v14057_v28, %v20471_v40 }
 0xc3f   :  { %v20622_v31 = vmul.f32 %v14059_v52, %v20471_v40  ;;  %v20625_v24 = vmul.f32 %v14061_v41, %v20471_v40  ;;  %v20627_v12 = vadd.f32 %v11246_v32, %v10802_v2  ;;  %v20629_v45 = vadd.f32 %v11247_v46, %v10809_v6  ;;  %v21823_v40 = vld [vmem:[#allocation43_spill] sm:$0xff]  ;;  %v21826_v6 = vld [vmem:[#allocation22_spill] sm:$0xff] }
 0xc40   :  { %21820 = vst [vmem:[#allocation70_spill] sm:$0xff] %v20619_v48  ;;  %v20631_v38 = vadd.f32 %v11248_v56, %v10816_v4  ;;  %v20633_v35 = vadd.f32 %v11249_v5, %v10823_v13  ;;  %v10854_v60 = vadd.f32 %v10853_v55, %v10852_v51  ;;  %v10861_v15 = vadd.f32 %v10860_v21, %v10859_v30  ;;  %v21827_v13 = vld [vmem:[#allocation37_spill] sm:$0xff]  ;;  %v21828_v51 = vld [vmem:[#allocation99_spill] sm:$0xff] }
 0xc41   :  { %21821 = vst [vmem:[#allocation69_spill] sm:$0xff] %v20622_v31  ;;  %21822 = vst [vmem:[#allocation58_spill] sm:$0xff] %v20625_v24  ;;  %v10868_v29 = vadd.f32 %v10867_v58, %v10866_v49  ;;  %v10875_v59 = vadd.f32 %v10874_v54, %v10873_v20  ;;  %v10830_v28 = vadd.f32 %v10829_v36, %v10828_v53  ;;  %v21829_v49 = vld [vmem:[#allocation34_spill] sm:$0xff]  ;;  %v21830_v53 = vld [vmem:[#allocation20_spill] sm:$0xff] }
 0xc42   :  { %v10837_v63 = vadd.f32 %v10836_v16, %v10835_v8  ;;  %v10844_v22 = vadd.f32 %v10843_v50, %v10842_v3  ;;  %v10851_v52 = vadd.f32 %v10850_v42, %v10849_v17  ;;  %v10855_v3 = vrot.slane %v10854_v60, 2 }
 0xc43   :  { %v10862_v17 = vrot.slane %v10861_v15, 2  ;;  %v10869_v46 = vrot.slane %v10868_v29, 2  ;;  %v10876_v56 = vrot.slane %v10875_v59, 2  ;;  %v11250_v54 = vmul.f32 %v20505_v1, %v10830_v28 }
 0xc44   :  { %v11251_v36 = vmul.f32 %v20509_v43, %v10837_v63  ;;  %v11252_v16 = vmul.f32 %v20513_v7, %v10844_v22  ;;  %v11253_v50 = vmul.f32 %v20517_v33, %v10851_v52 }
 0xc46   :  { %v11283_v1 = vadd.f32 %v11251_v36, %v10837_v63  ;;  %v11285_v43 = vadd.f32 %v11253_v50, %v10851_v52 }
 0xc47   :  { %v10685_v44 = vpop.permute.xlu1 %10684  ;;  %v10690_v47 = vpop.permute.xlu0 %10689 }
 0xc48   :  { %v10756_v41 = vmul.f32 %v10685_v44, %v21823_v40  ;;  %v10757_v39 = vmul.f32 %v10685_v44, %v21824_v57  ;;  %v10758_v2 = vmul.f32 %v10685_v44, %v21825_v61  ;;  %v10759_v4 = vmul.f32 %v10685_v44, %v21826_v6 }
 0xc49   :  { %v10760_v32 = vmul.f32 %v10690_v47, %v21827_v13  ;;  %v10761_v30 = vmul.f32 %v10690_v47, %v21828_v51  ;;  %v10762_v20 = vmul.f32 %v10690_v47, %v21829_v49  ;;  %v10763_v8 = vmul.f32 %v10690_v47, %v21830_v53 }
 0xc4a   :  { %v10856_v57 = vadd.f32 %v10855_v3, %v10854_v60  ;;  %v10863_v61 = vadd.f32 %v10862_v17, %v10861_v15  ;;  %v10870_v6 = vadd.f32 %v10869_v46, %v10868_v29  ;;  %v10877_v13 = vadd.f32 %v10876_v56, %v10875_v59 }
 0xc4b   :  { %v10880_v5 = vadd.f32 %v10760_v32, %v10756_v41  ;;  %v10887_v55 = vadd.f32 %v10761_v30, %v10757_v39  ;;  %v10894_v21 = vadd.f32 %v10762_v20, %v10758_v2  ;;  %v10901_v58 = vadd.f32 %v10763_v8, %v10759_v4 }
 0xc4c   :  { %v11282_v32 = vadd.f32 %v11250_v54, %v10830_v28  ;;  %v11284_v51 = vadd.f32 %v11252_v16, %v10844_v22  ;;  %v10857_v20 = vrot.slane %v10856_v57, 1  ;;  %v10864_v53 = vrot.slane %v10863_v61, 1  ;;  %v21834_v16 = vld [vmem:[#allocation41_spill] sm:$0xff] }
 0xc4d   :  { %v10881_v42 = vrot.slane %v10880_v5, 4  ;;  %v10888_v44 = vrot.slane %v10887_v55, 4  ;;  %v10895_v40 = vrot.slane %v10894_v21, 4  ;;  %v10902_v47 = vrot.slane %v10901_v58, 4 }
 0xc4e   :  { %v10871_v8 = vrot.slane %v10870_v6, 1  ;;  %v10878_v24 = vrot.slane %v10877_v13, 1  ;;  %v20649_v3 = vsel %vm6540_vm2, %v11282_v32, %v20627_v12  ;;  %v20653_v28 = vsel %vm6540_vm2, %v11283_v1, %v20629_v45  ;;  %v21831_v12 = vld [vmem:[#allocation131_spill] sm:$0xff]  ;;  %v21833_v45 = vld [vmem:[#allocation49_spill] sm:$0xff]  ;;  %v21838_v32 = vld [vmem:[#allocation42_spill] sm:$0xff] }
 0xc4f   :  { %v10882_v41 = vadd.f32 %v10881_v42, %v10880_v5  ;;  %v10889_v39 = vadd.f32 %v10888_v44, %v10887_v55  ;;  %v10896_v2 = vadd.f32 %v10895_v40, %v10894_v21  ;;  %v10903_v4 = vadd.f32 %v10902_v47, %v10901_v58  ;;  %v21832_v58 = vld [vmem:[#allocation65_spill] sm:$0xff] }
 0xc50   :  { %v20657_v63 = vsel %vm6540_vm2, %v11284_v51, %v20631_v38  ;;  %v20661_v22 = vsel %vm6540_vm2, %v11285_v43, %v20633_v35  ;;  %v10858_v38 = vadd.f32 %v10857_v20, %v10856_v57  ;;  %v10865_v42 = vadd.f32 %v10864_v53, %v10863_v61  ;;  %v21835_v35 = vld [vmem:[#allocation132_spill] sm:$0xff] }
 0xc51   :  { %v10883_v30 = vrot.slane %v10882_v41, 2  ;;  %v10890_v7 = vrot.slane %v10889_v39, 2  ;;  %v10897_v49 = vrot.slane %v10896_v2, 2  ;;  %v10904_v33 = vrot.slane %v10903_v4, 2 }
 0xc52   :  { %v10872_v44 = vadd.f32 %v10871_v8, %v10870_v6  ;;  %v10879_v40 = vadd.f32 %v10878_v24, %v10877_v13  ;;  %v11254_v57 = vmul.f32 %v20521_v23, %v10858_v38  ;;  %v11255_v24 = vmul.f32 %v20529_v10, %v10865_v42 }
 0xc53   :  { %v10884_v60 = vadd.f32 %v10883_v30, %v10882_v41  ;;  %v10891_v15 = vadd.f32 %v10890_v7, %v10889_v39  ;;  %v10898_v29 = vadd.f32 %v10897_v49, %v10896_v2  ;;  %v10905_v59 = vadd.f32 %v10904_v33, %v10903_v4  ;;  %v10695_v5 = vpop.permute.xlu1 %10694  ;;  %v10700_v55 = vpop.permute.xlu0 %10699  ;;  %v21836_v41 = vld [vmem:[#allocation66_spill] sm:$0xff] }
 0xc54   :  { %v10764_v21 = vmul.f32 %v10695_v5, %v21831_v12  ;;  %v10765_v54 = vmul.f32 %v10695_v5, %v21832_v58  ;;  %v10766_v36 = vmul.f32 %v10695_v5, %v21833_v45  ;;  %v10767_v50 = vmul.f32 %v10695_v5, %v21834_v16  ;;  %v21837_v2 = vld [vmem:[#allocation50_spill] sm:$0xff] }
 0xc55   :  { %v10885_v52 = vrot.slane %v10884_v60, 1  ;;  %v10892_v17 = vrot.slane %v10891_v15, 1  ;;  %v10899_v46 = vrot.slane %v10898_v29, 1  ;;  %v10906_v56 = vrot.slane %v10905_v59, 1 }
 0xc56   :  { %v10768_v47 = vmul.f32 %v10700_v55, %v21835_v35  ;;  %v10769_v39 = vmul.f32 %v10700_v55, %v21836_v41  ;;  %v10770_v4 = vmul.f32 %v10700_v55, %v21837_v2  ;;  %v10771_v1 = vmul.f32 %v10700_v55, %v21838_v32  ;;  %v21840_v55 = vld [vmem:[#allocation5_spill] sm:$0xff]  ;;  %v21845_v41 = vld [vmem:[#allocation7_spill] sm:$0xff]  ;;  %v21847_v32 = vld [vmem:[#allocation24_spill] sm:$0xff] }
 0xc57   :  { %v10886_v51 = vadd.f32 %v10885_v52, %v10884_v60  ;;  %v10893_v43 = vadd.f32 %v10892_v17, %v10891_v15  ;;  %v10900_v30 = vadd.f32 %v10899_v46, %v10898_v29  ;;  %v10907_v7 = vadd.f32 %v10906_v56, %v10905_v59  ;;  %v10705_v60 = vpop.permute.xlu1 %10704  ;;  %v21839_v52 = vld [vmem:[#allocation44_spill] sm:$0xff]  ;;  %v21846_v2 = vld [vmem:[#allocation13_spill] sm:$0xff] }
 0xc58   :  { %v10908_v49 = vadd.f32 %v10768_v47, %v10764_v21  ;;  %v10915_v33 = vadd.f32 %v10769_v39, %v10765_v54  ;;  %v10922_v12 = vadd.f32 %v10770_v4, %v10766_v36  ;;  %v10929_v5 = vadd.f32 %v10771_v1, %v10767_v50  ;;  %v21841_v21 = vld [vmem:[#allocation6_spill] sm:$0xff]  ;;  %v21842_v54 = vld [vmem:[#allocation15_spill] sm:$0xff]  ;;  %v21843_v36 = vld [vmem:[#allocation25_spill] sm:$0xff] }
 0xc59   :  { %v11256_v61 = vmul.f32 %v20533_v37, %v10872_v44  ;;  %v11257_v6 = vmul.f32 %v20537_v9, %v10879_v40  ;;  %v11258_v15 = vmul.f32 %v20541_v14, %v10886_v51  ;;  %v11259_v29 = vmul.f32 %v20545_v18, %v10893_v43  ;;  %v10710_v37 = vpop.permute.xlu0 %10709 }
 0xc5a   :  { %v10909_v13 = vrot.slane %v10908_v49, 4  ;;  %v10916_v20 = vrot.slane %v10915_v33, 4  ;;  %v10923_v53 = vrot.slane %v10922_v12, 4  ;;  %v10930_v8 = vrot.slane %v10929_v5, 4 }
 0xc5b   :  { %v11260_v59 = vmul.f32 %v20549_v27, %v10900_v30  ;;  %v11261_v17 = vmul.f32 %v21839_v52, %v10907_v7  ;;  %v10772_v9 = vmul.f32 %v10705_v60, %v21840_v55  ;;  %v10773_v58 = vmul.f32 %v10705_v60, %v21841_v21  ;;  %v21844_v27 = vld [vmem:[#allocation74_spill] sm:$0xff] }
 0xc5c   :  { %v10910_v23 = vadd.f32 %v10909_v13, %v10908_v49  ;;  %v10917_v46 = vadd.f32 %v10916_v20, %v10915_v33  ;;  %v10924_v10 = vadd.f32 %v10923_v53, %v10922_v12  ;;  %v10931_v56 = vadd.f32 %v10930_v8, %v10929_v5 }
 0xc5d   :  { %v10774_v45 = vmul.f32 %v10705_v60, %v21842_v54  ;;  %v10775_v16 = vmul.f32 %v10705_v60, %v21843_v36  ;;  %v10776_v47 = vmul.f32 %v10710_v37, %v21844_v27  ;;  %v10777_v39 = vmul.f32 %v10710_v37, %v21845_v41 }
 0xc5e   :  { %v10911_v14 = vrot.slane %v10910_v23, 2  ;;  %v10918_v50 = vrot.slane %v10917_v46, 2  ;;  %v10925_v18 = vrot.slane %v10924_v10, 2  ;;  %v10932_v35 = vrot.slane %v10931_v56, 2 }
 0xc5f   :  { %v10778_v4 = vmul.f32 %v10710_v37, %v21846_v2  ;;  %v10779_v1 = vmul.f32 %v10710_v37, %v21847_v32  ;;  %v10936_v13 = vadd.f32 %v10776_v47, %v10772_v9  ;;  %v10943_v20 = vadd.f32 %v10777_v39, %v10773_v58 }
 0xc60   :  { %v10912_v49 = vadd.f32 %v10911_v14, %v10910_v23  ;;  %v10919_v33 = vadd.f32 %v10918_v50, %v10917_v46  ;;  %v10926_v12 = vadd.f32 %v10925_v18, %v10924_v10  ;;  %v10933_v5 = vadd.f32 %v10932_v35, %v10931_v56 }
 0xc61   :  { %v10950_v53 = vadd.f32 %v10778_v4, %v10774_v45  ;;  %v10957_v8 = vadd.f32 %v10779_v1, %v10775_v16  ;;  %v10937_v54 = vrot.slane %v10936_v13, 4  ;;  %v10944_v36 = vrot.slane %v10943_v20, 4  ;;  %v21853_v4 = vld [vmem:[#allocation75_spill] sm:$0xff] }
 0xc62   :  { %v10913_v60 = vrot.slane %v10912_v49, 1  ;;  %v10920_v52 = vrot.slane %v10919_v33, 1  ;;  %v10927_v55 = vrot.slane %v10926_v12, 1  ;;  %v10934_v21 = vrot.slane %v10933_v5, 1  ;;  %v21854_v1 = vld [vmem:[#allocation23_spill] sm:$0xff] }
 0xc63   :  { %v10951_v27 = vrot.slane %v10950_v53, 4  ;;  %v10958_v41 = vrot.slane %v10957_v8, 4  ;;  %v11286_v31 = vadd.f32 %v11254_v57, %v10858_v38  ;;  %v11287_v2 = vadd.f32 %v11255_v24, %v10865_v42  ;;  %v21851_v24 = vld [vmem:[#allocation71_spill] sm:$0xff] }
 0xc64   :  { %v11288_v48 = vadd.f32 %v11256_v61, %v10872_v44  ;;  %v11289_v37 = vadd.f32 %v11257_v6, %v10879_v40  ;;  %v10914_v23 = vadd.f32 %v10913_v60, %v10912_v49  ;;  %v10921_v46 = vadd.f32 %v10920_v52, %v10919_v33  ;;  %v21848_v40 = vld [vmem:[#allocation48_spill] sm:$0xff]  ;;  %v10715_v6 = vpop.permute.xlu1 %10714  ;;  %v21855_v33 = vld [vmem:[#allocation19_spill] sm:$0xff] }
 0xc65   :  { %v10928_v10 = vadd.f32 %v10927_v55, %v10926_v12  ;;  %v10935_v56 = vadd.f32 %v10934_v21, %v10933_v5  ;;  %v11290_v9 = vadd.f32 %v11258_v15, %v10886_v51  ;;  %v11291_v58 = vadd.f32 %v11259_v29, %v10893_v43  ;;  %v21849_v43 = vld [vmem:[#allocation51_spill] sm:$0xff]  ;;  %v21858_v21 = vld [vmem:[#allocation21_spill] sm:$0xff] }
 0xc66   :  { %v11292_v45 = vadd.f32 %v11260_v59, %v10900_v30  ;;  %v11293_v16 = vadd.f32 %v11261_v17, %v10907_v7  ;;  %v10938_v14 = vadd.f32 %v10937_v54, %v10936_v13  ;;  %v10945_v50 = vadd.f32 %v10944_v36, %v10943_v20  ;;  %v21850_v7 = vld [vmem:[#allocation53_spill] sm:$0xff]  ;;  %v10720_v59 = vpop.permute.xlu0 %10719  ;;  %v21857_v52 = vld [vmem:[#allocation91_spill] sm:$0xff] }
 0xc67   :  { %v10952_v18 = vadd.f32 %v10951_v27, %v10950_v53  ;;  %v10959_v35 = vadd.f32 %v10958_v41, %v10957_v8  ;;  %v11343_v47 = vsel %vm6542_vm3, %v11286_v31, %v20649_v3  ;;  %v11350_v38 = vsel %vm6542_vm3, %v11287_v2, %v20653_v28  ;;  %v21852_v17 = vld [vmem:[#allocation81_spill] sm:$0xff]  ;;  %v21856_v8 = vld [vmem:[#allocation82_spill] sm:$0xff] }
 0xc68   :  { %v11357_v42 = vsel %vm6542_vm3, %v11288_v48, %v20657_v63  ;;  %v11364_v44 = vsel %vm6542_vm3, %v11289_v37, %v20661_v22  ;;  %v11262_v51 = vmul.f32 %v21848_v40, %v10914_v23  ;;  %v11263_v30 = vmul.f32 %v21849_v43, %v10921_v46  ;;  %v21859_v36 = vld [vmem:[#allocation17_spill] sm:$0xff] }
 0xc69   :  { %v11264_v57 = vmul.f32 %v21850_v7, %v10928_v10  ;;  %v11265_v61 = vmul.f32 %v21851_v24, %v10935_v56  ;;  %v11344_v31 = vsel %vm6544_vm4, %v11290_v9, %v11343_v47  ;;  %v11351_v3 = vsel %vm6544_vm4, %v11291_v58, %v11350_v38  ;;  %v10725_v38 = vpop.permute.xlu1 %10724 }
 0xc6a   :  { %v11358_v28 = vsel %vm6544_vm4, %v11292_v45, %v11357_v42  ;;  %v11365_v48 = vsel %vm6544_vm4, %v11293_v16, %v11364_v44  ;;  %v10939_v63 = vrot.slane %v10938_v14, 2  ;;  %v10946_v15 = vrot.slane %v10945_v50, 2  ;;  %v10730_v24 = vpop.permute.xlu0 %10729 }
 0xc6b   :  { %v10953_v22 = vrot.slane %v10952_v18, 2  ;;  %v10960_v29 = vrot.slane %v10959_v35, 2  ;;  %v10780_v39 = vmul.f32 %v10715_v6, %v21852_v17  ;;  %v10781_v32 = vmul.f32 %v10715_v6, %v21853_v4 }
 0xc6c   :  { %v10782_v49 = vmul.f32 %v10715_v6, %v21854_v1  ;;  %v10783_v12 = vmul.f32 %v10715_v6, %v21855_v33  ;;  %v11294_v5 = vadd.f32 %v11262_v51, %v10914_v23  ;;  %v11295_v13 = vadd.f32 %v11263_v30, %v10921_v46 }
 0xc6d   :  { %v11296_v20 = vadd.f32 %v11264_v57, %v10928_v10  ;;  %v11297_v53 = vadd.f32 %v11265_v61, %v10935_v56  ;;  %v10784_v60 = vmul.f32 %v10720_v59, %v21856_v8  ;;  %v10785_v55 = vmul.f32 %v10720_v59, %v21857_v52  ;;  %v21860_v61 = vld [vmem:[#allocation92_spill] sm:$0xff] }
 0xc6e   :  { %v10786_v54 = vmul.f32 %v10720_v59, %v21858_v21  ;;  %v10787_v27 = vmul.f32 %v10720_v59, %v21859_v36  ;;  %v10940_v41 = vadd.f32 %v10939_v63, %v10938_v14  ;;  %v10947_v2 = vadd.f32 %v10946_v15, %v10945_v50  ;;  %v21863_v63 = vld [vmem:[#allocation28_spill] sm:$0xff] }
 0xc6f   :  { %v10954_v37 = vadd.f32 %v10953_v22, %v10952_v18  ;;  %v10961_v9 = vadd.f32 %v10960_v29, %v10959_v35  ;;  %v10964_v58 = vadd.f32 %v10784_v60, %v10780_v39  ;;  %v10971_v45 = vadd.f32 %v10785_v55, %v10781_v32  ;;  %v21864_v39 = vld [vmem:[#allocation98_spill] sm:$0xff]  ;;  %v21865_v32 = vld [vmem:[#allocation105_spill] sm:$0xff] }
 0xc70   :  { %v10978_v16 = vadd.f32 %v10786_v54, %v10782_v49  ;;  %v10985_v47 = vadd.f32 %v10787_v27, %v10783_v12  ;;  %v20712_v23 = vsel %vm6546_vm5, %v11294_v5, %v11344_v31  ;;  %v20715_v46 = vsel %vm6546_vm5, %v11295_v13, %v11351_v3  ;;  %v21861_v31 = vld [vmem:[#allocation100_spill] sm:$0xff] }
 0xc71   :  { %v20718_v10 = vsel %vm6546_vm5, %v11296_v20, %v11358_v28  ;;  %v20721_v56 = vsel %vm6546_vm5, %v11297_v53, %v11365_v48  ;;  %v10965_v14 = vrot.slane %v10964_v58, 4  ;;  %v10972_v50 = vrot.slane %v10971_v45, 4  ;;  %v21862_v28 = vld [vmem:[#allocation36_spill] sm:$0xff] }
 0xc72   :  { %v10979_v18 = vrot.slane %v10978_v16, 4  ;;  %v10986_v35 = vrot.slane %v10985_v47, 4  ;;  %v10941_v42 = vrot.slane %v10940_v41, 1  ;;  %v10948_v44 = vrot.slane %v10947_v2, 1  ;;  %v21866_v49 = vld [vmem:[#allocation40_spill] sm:$0xff] }
 0xc73   :  { %v10955_v40 = vrot.slane %v10954_v37, 1  ;;  %v10962_v51 = vrot.slane %v10961_v9, 1  ;;  %v10966_v43 = vadd.f32 %v10965_v14, %v10964_v58  ;;  %v10973_v30 = vadd.f32 %v10972_v50, %v10971_v45  ;;  %v21867_v12 = vld [vmem:[#allocation32_spill] sm:$0xff] }
 0xc74   :  { %v10980_v7 = vadd.f32 %v10979_v18, %v10978_v16  ;;  %v10987_v57 = vadd.f32 %v10986_v35, %v10985_v47  ;;  %v10788_v6 = vmul.f32 %v10725_v38, %v21860_v61  ;;  %v10789_v3 = vmul.f32 %v10725_v38, %v21861_v31 }
 0xc75   :  { %v10790_v48 = vmul.f32 %v10725_v38, %v21862_v28  ;;  %v10791_v15 = vmul.f32 %v10725_v38, %v21863_v63  ;;  %v10967_v22 = vrot.slane %v10966_v43, 2  ;;  %v10974_v29 = vrot.slane %v10973_v30, 2 }
 0xc76   :  { %v10981_v59 = vrot.slane %v10980_v7, 2  ;;  %v10988_v17 = vrot.slane %v10987_v57, 2  ;;  %v10792_v4 = vmul.f32 %v10730_v24, %v21864_v39  ;;  %v10793_v1 = vmul.f32 %v10730_v24, %v21865_v32 }
 0xc77   :  { %v10794_v33 = vmul.f32 %v10730_v24, %v21866_v49  ;;  %v10795_v5 = vmul.f32 %v10730_v24, %v21867_v12  ;;  %v10968_v13 = vadd.f32 %v10967_v22, %v10966_v43  ;;  %v10975_v20 = vadd.f32 %v10974_v29, %v10973_v30  ;;  %v21869_v29 = vld [vmem:[#allocation57_spill] sm:$0xff] }
 0xc78   :  { %v10982_v53 = vadd.f32 %v10981_v59, %v10980_v7  ;;  %v10989_v8 = vadd.f32 %v10988_v17, %v10987_v57  ;;  %v10992_v60 = vadd.f32 %v10792_v4, %v10788_v6  ;;  %v10999_v52 = vadd.f32 %v10793_v1, %v10789_v3 }
 0xc79   :  { %v11006_v55 = vadd.f32 %v10794_v33, %v10790_v48  ;;  %v11013_v21 = vadd.f32 %v10795_v5, %v10791_v15  ;;  %v10969_v54 = vrot.slane %v10968_v13, 1  ;;  %v10976_v36 = vrot.slane %v10975_v20, 1  ;;  %v21868_v15 = vld [vmem:[#allocation72_spill] sm:$0xff] }
 0xc7a   :  { %v10983_v27 = vrot.slane %v10982_v53, 1  ;;  %v10990_v58 = vrot.slane %v10989_v8, 1  ;;  %v10993_v45 = vrot.slane %v10992_v60, 4  ;;  %v11000_v16 = vrot.slane %v10999_v52, 4 }
 0xc7b   :  { %v11007_v47 = vrot.slane %v11006_v55, 4  ;;  %v11014_v14 = vrot.slane %v11013_v21, 4  ;;  %v10942_v50 = vadd.f32 %v10941_v42, %v10940_v41  ;;  %v10949_v18 = vadd.f32 %v10948_v44, %v10947_v2 }
 0xc7c   :  { %v10956_v35 = vadd.f32 %v10955_v40, %v10954_v37  ;;  %v10963_v38 = vadd.f32 %v10962_v51, %v10961_v9  ;;  %v10994_v43 = vadd.f32 %v10993_v45, %v10992_v60  ;;  %v11001_v30 = vadd.f32 %v11000_v16, %v10999_v52  ;;  %v21870_v52 = vld [vmem:[#allocation70_spill] sm:$0xff] }
 0xc7d   :  { %v11008_v7 = vadd.f32 %v11007_v47, %v11006_v55  ;;  %v11015_v57 = vadd.f32 %v11014_v14, %v11013_v21  ;;  %v10970_v24 = vadd.f32 %v10969_v54, %v10968_v13  ;;  %v10977_v61 = vadd.f32 %v10976_v36, %v10975_v20  ;;  %v21871_v55 = vld [vmem:[#allocation69_spill] sm:$0xff]  ;;  %v21872_v54 = vld [vmem:[#allocation58_spill] sm:$0xff] }
 0xc7e   :  { %v10984_v6 = vadd.f32 %v10983_v27, %v10982_v53  ;;  %v10991_v31 = vadd.f32 %v10990_v58, %v10989_v8  ;;  %v10995_v3 = vrot.slane %v10994_v43, 2  ;;  %v11002_v28 = vrot.slane %v11001_v30, 2 }
 0xc7f   :  { %v11009_v48 = vrot.slane %v11008_v7, 2  ;;  %v11016_v63 = vrot.slane %v11015_v57, 2  ;;  %v11266_v22 = vmul.f32 %v21868_v15, %v10942_v50  ;;  %v11267_v59 = vmul.f32 %v21869_v29, %v10949_v18 }
 0xc80   :  { %v11268_v41 = vmul.f32 %v20589_v0, %v10956_v35  ;;  %v11269_v2 = vmul.f32 %v20593_v62, %v10963_v38  ;;  %v10996_v37 = vadd.f32 %v10995_v3, %v10994_v43  ;;  %v11003_v9 = vadd.f32 %v11002_v28, %v11001_v30 }
 0xc81   :  { %v11010_v42 = vadd.f32 %v11009_v48, %v11008_v7  ;;  %v11017_v44 = vadd.f32 %v11016_v63, %v11015_v57  ;;  %v11270_v40 = vmul.f32 %v20597_v26, %v10970_v24  ;;  %v11271_v51 = vmul.f32 %v20601_v19, %v10977_v61 }
 0xc82   :  { %v11272_v17 = vmul.f32 %v20605_v25, %v10984_v6  ;;  %v11273_v39 = vmul.f32 %v20609_v34, %v10991_v31  ;;  %v10997_v4 = vrot.slane %v10996_v37, 1  ;;  %v11004_v32 = vrot.slane %v11003_v9, 1 }
 0xc83   :  { %v11011_v1 = vrot.slane %v11010_v42, 1  ;;  %v11018_v49 = vrot.slane %v11017_v44, 1  ;;  %v11298_v33 = vadd.f32 %v11266_v22, %v10942_v50  ;;  %v11299_v0 = vadd.f32 %v11267_v59, %v10949_v18 }
 0xc84   :  { %v11300_v12 = vadd.f32 %v11268_v41, %v10956_v35  ;;  %v11301_v62 = vadd.f32 %v11269_v2, %v10963_v38  ;;  %v10998_v5 = vadd.f32 %v10997_v4, %v10996_v37  ;;  %v11005_v13 = vadd.f32 %v11004_v32, %v11003_v9 }
 0xc85   :  { %v11012_v20 = vadd.f32 %v11011_v1, %v11010_v42  ;;  %v11019_v53 = vadd.f32 %v11018_v49, %v11017_v44  ;;  %v11302_v8 = vadd.f32 %v11270_v40, %v10970_v24  ;;  %v11303_v26 = vadd.f32 %v11271_v51, %v10977_v61 }
 0xc86   :  { %v11304_v60 = vadd.f32 %v11272_v17, %v10984_v6  ;;  %v11305_v19 = vadd.f32 %v11273_v39, %v10991_v31  ;;  %v11274_v25 = vmul.f32 %v20616_v11, %v10998_v5  ;;  %v11275_v34 = vmul.f32 %v21870_v52, %v11005_v13 }
 0xc87   :  { %v11276_v21 = vmul.f32 %v21871_v55, %v11012_v20  ;;  %v11277_v36 = vmul.f32 %v21872_v54, %v11019_v53  ;;  %v11346_v27 = vsel %vm6548_vm6, %v11298_v33, %v20712_v23  ;;  %v11353_v58 = vsel %vm6548_vm6, %v11299_v0, %v20715_v46 }
 0xc88   :  { %v11360_v45 = vsel %vm6548_vm6, %v11300_v12, %v20718_v10  ;;  %v11367_v16 = vsel %vm6548_vm6, %v11301_v62, %v20721_v56  ;;  %v11306_v47 = vadd.f32 %v11274_v25, %v10998_v5  ;;  %v11307_v11 = vadd.f32 %v11275_v34, %v11005_v13 }
 0xc89   :  { %v11308_v14 = vadd.f32 %v11276_v21, %v11012_v20  ;;  %v11309_v50 = vadd.f32 %v11277_v36, %v11019_v53  ;;  %v11347_v18 = vsel %vm6550_vm7, %v11302_v8, %v11346_v27  ;;  %v11354_v35 = vsel %vm6550_vm7, %v11303_v26, %v11353_v58 }
 0xc8a   :  { %v11361_v38 = vsel %vm6550_vm7, %v11304_v60, %v11360_v45  ;;  %v11368_v23 = vsel %vm6550_vm7, %v11305_v19, %v11367_v16  ;;  %v11348_v46 = vsel %vm6552_vm8, %v11306_v47, %v11347_v18  ;;  %v11355_v43 = vsel %vm6552_vm8, %v11307_v11, %v11354_v35 }
 0xc8b   :  { %v11362_v10 = vsel %vm6552_vm8, %v11308_v14, %v11361_v38  ;;  %v11369_v56 = vsel %vm6552_vm8, %v11309_v50, %v11368_v23  ;;  %11374 = vst [vmem:[%s20793_s22] sm:$0xff] %v11348_v46  ;;  %11375 = vst [vmem:[%s20793_s22 + $0x8] sm:$0xff] %v11355_v43 }
 0xc8c   :  { %11376 = vst [vmem:[%s20793_s22 + $0x10] sm:$0xff] %v11362_v10  ;;  %11377 = vst [vmem:[%s20793_s22 + $0x18] sm:$0xff] %v11369_v56 }

</bundles_post_ra>
